<compile_context>
chip_gen: v6e
topology: v6e:2x2x1
jax: 0.10.0
libtpu: 0.0.40
codegen_flags: <defaults>
</compile_context>

<pallas_src>
import math

import jax
import jax.numpy as jnp
from jax import lax
from jax.experimental import pallas as pl
from jax.experimental.pallas import tpu as pltpu

K1 = 64          # conv1 kernel size
C1 = 16          # conv1 out channels (padded to C inside the kernel)
C = 64           # conv2..4 channels
FC_H = 512       # fc1 hidden size
NSPLIT = 2       # FC_H split -> "parallel" grid axis (engages v7x's 2nd TensorCore)
OUT_PAD = 128    # lane-dense logits (sliced to num_classes outside the kernel)


def _pick_tile_l(l2):
    """Largest L2-tile <= 64 that divides L2 and still gives >= 2 grid steps."""
    for t in (64, 32, 16, 8, 4, 2):
        if l2 % t == 0 and l2 // t >= 2:
            return t
    return l2


def wdcnn_kernel(patches_ref,                       # (2*L2*B, 64) conv1 windows (even|odd)
                 w1_ref, b1_ref,                    # conv1 (out-ch padded to 64)
                 w2_ref, b2_ref,                    # conv2 (in-ch padded to 64)
                 w3_ref, b3_ref, w4_ref, b4_ref,    # conv3 / conv4
                 wfc1_ref,                          # (TILE_L, 64, FC_H/NSPLIT) bf16 tile
                 bfc1_ref, wfc2_ref, bfc2_ref,      # fc heads (bfc2 pre-divided by NSPLIT)
                 out_ref,                           # (1, B, 128) partial logits
                 act_a, act_b,                      # ((L2+2)*B, 64) padded activations
                 h_ref):                            # (B, FC_H/NSPLIT) f32 accumulator
    l = pl.program_id(1)
    n_l = pl.num_programs(1)
    B = out_ref.shape[1]
    rows = act_a.shape[0]
    L2B = rows - 2 * B                              # (L//2) * B body rows
    tile_l = wfc1_ref.shape[0]

    # ---- all conv work happens once, at the first reduction step of this split ----
    @pl.when(l == 0)
    def _convs():
        # conv1 (k=64, pad=32) + MaxPool(2) + ReLU: one GEMM over stacked even/odd windows
        z = jnp.dot(patches_ref[...], w1_ref[...], preferred_element_type=jnp.float32)
        a1 = jnp.maximum(jnp.maximum(z[:L2B], z[L2B:]) + b1_ref[...], 0.0)   # (L2B, 64)

        halo = jnp.zeros((B, C), jnp.float32)       # zero halo rows -> "same" padding
        act_a[pl.ds(0, B), :] = halo
        act_a[pl.ds(L2B + B, B), :] = halo
        act_b[pl.ds(0, B), :] = halo
        act_b[pl.ds(L2B + B, B), :] = halo
        act_a[pl.ds(B, L2B), :] = a1

        # conv k=3, pad=1: three tap-GEMMs on pl.ds-shifted views (no shifted copies)
        def conv3_relu(src, dst, w_ref, b_ref):
            y = (jnp.dot(src[pl.ds(0, L2B), :], w_ref[0],
                         preferred_element_type=jnp.float32)
                 + jnp.dot(src[pl.ds(B, L2B), :], w_ref[1],
                           preferred_element_type=jnp.float32)
                 + jnp.dot(src[pl.ds(2 * B, L2B), :], w_ref[2],
                           preferred_element_type=jnp.float32)
                 + b_ref[...])
            dst[pl.ds(B, L2B), :] = jnp.maximum(y, 0.0)

        conv3_relu(act_a, act_b, w2_ref, b2_ref)
        conv3_relu(act_b, act_a, w3_ref, b3_ref)
        conv3_relu(act_a, act_b, w4_ref, b4_ref)    # final activations live in act_b

        h_ref[...] = jnp.zeros_like(h_ref)

    # ---- streamed fc1: contract this wfc1 tile and accumulate into h_ref ----
    start = pl.multiple_of(B + l * (tile_l * B), 8)
    a_t = act_b[pl.ds(start, tile_l * B), :].reshape(tile_l, B, C).astype(jnp.bfloat16)
    t = jnp.einsum('lbc,lcj->lbj', a_t, wfc1_ref[...],
                   preferred_element_type=jnp.float32)                     # (tile_l,B,fch)
    h_ref[...] += jnp.sum(t, axis=0)

    # ---- epilogue: bias + ReLU + fc2 (lane-dense padded logits) ----
    @pl.when(l == n_l - 1)
    def _epilogue():
        hh = jnp.maximum(h_ref[...] + bfc1_ref[...], 0.0)
        out_ref[...] = (jnp.dot(hh, wfc2_ref[...], preferred_element_type=jnp.float32)
                        + bfc2_ref[...])[None]


def wdcnn_forward(x, params):
    """x: (B, L, 1) float32, exactly like the PyTorch module (batch, seq, 1)."""
    B, L, _ = x.shape
    assert L % 2 == 0 and B % 8 == 0
    L2 = L // 2
    nc = params['wfc2'].shape[0]
    assert nc <= OUT_PAD
    tile_l = _pick_tile_l(L2)
    n_l = L2 // tile_l
    fch = FC_H // NSPLIT

    # conv1 tap windows via 64 static slices (no gather); rows ordered (position, batch),
    # even output positions stacked above odd ones so conv1+pool is a single GEMM.
    xp = jnp.pad(x[..., 0], ((0, 0), (32, 32)))                       # (B, L+64)
    patches = jnp.stack([xp[:, k:k + L] for k in range(K1)], axis=-1) # (B, L, 64)
    patches = jnp.transpose(patches, (1, 0, 2))                       # (L, B, 64)
    p_all = jnp.concatenate([patches[0::2].reshape(L2 * B, K1),
                             patches[1::2].reshape(L2 * B, K1)], axis=0)

    # Weights pre-transposed so every in-kernel matmul is (rows, in) @ (in, out);
    # conv1 out-channels / conv2 in-channels zero-padded 16 -> 64.
    w1k = jnp.zeros((K1, C), jnp.float32).at[:, :C1].set(params['w1'][:, 0, :].T)
    b1k = jnp.zeros((1, C), jnp.float32).at[0, :C1].set(params['b1'])
    w2k = jnp.zeros((3, C, C), jnp.float32).at[:, :C1, :].set(
        jnp.transpose(params['w2'], (2, 1, 0)))
    w3k = jnp.transpose(params['w3'], (2, 1, 0))
    w4k = jnp.transpose(params['w4'], (2, 1, 0))
    # PyTorch flattens (C, L2) channel-major: feature index = c * L2 + l.
    wfc1k = jnp.transpose(params['wfc1'].reshape(FC_H, C, L2),
                          (2, 1, 0)).astype(jnp.bfloat16)             # (L2, 64, 512) bf16
    bfc1k = params['bfc1'].reshape(1, -1)
    wfc2k = jnp.zeros((FC_H, OUT_PAD), jnp.float32).at[:, :nc].set(params['wfc2'].T)
    bfc2k = (jnp.zeros((1, OUT_PAD), jnp.float32).at[0, :nc].set(params['bfc2'])
             / NSPLIT)                                                # added once per split

    grid = (NSPLIT, n_l)
    in_specs = [
        pl.BlockSpec(p_all.shape, lambda c, l: (0, 0)),
        pl.BlockSpec(w1k.shape, lambda c, l: (0, 0)),
        pl.BlockSpec(b1k.shape, lambda c, l: (0, 0)),
        pl.BlockSpec(w2k.shape, lambda c, l: (0, 0, 0)),
        pl.BlockSpec((1, C), lambda c, l: (0, 0)),
        pl.BlockSpec(w3k.shape, lambda c, l: (0, 0, 0)),
        pl.BlockSpec((1, C), lambda c, l: (0, 0)),
        pl.BlockSpec(w4k.shape, lambda c, l: (0, 0, 0)),
        pl.BlockSpec((1, C), lambda c, l: (0, 0)),
        pl.BlockSpec((tile_l, C, fch), lambda c, l: (l, 0, c)),       # streamed fc1 weight
        pl.BlockSpec((1, fch), lambda c, l: (0, c)),
        pl.BlockSpec((fch, OUT_PAD), lambda c, l: (c, 0)),
        pl.BlockSpec((1, OUT_PAD), lambda c, l: (0, 0)),
    ]
    out_specs = pl.BlockSpec((1, B, OUT_PAD), lambda c, l: (c, 0, 0))

    out = pl.pallas_call(
        wdcnn_kernel,
        out_shape=jax.ShapeDtypeStruct((NSPLIT, B, OUT_PAD), jnp.float32),
        grid_spec=pltpu.PrefetchScalarGridSpec(
            num_scalar_prefetch=0, grid=grid,
            in_specs=in_specs, out_specs=out_specs,
            scratch_shapes=[pltpu.VMEM(((L2 + 2) * B, C), jnp.float32),
                            pltpu.VMEM(((L2 + 2) * B, C), jnp.float32),
                            pltpu.VMEM((B, fch), jnp.float32)]),
        compiler_params=pltpu.CompilerParams(
            dimension_semantics=("parallel", "arbitrary"),
            vmem_limit_bytes=48 * 1024 * 1024),
    )(p_all, w1k, b1k,
      w2k, params['b2'].reshape(1, -1),
      w3k, params['b3'].reshape(1, -1),
      w4k, params['b4'].reshape(1, -1),
      wfc1k, bfc1k, wfc2k, bfc2k)

    # TODO(synk): partial-logit sum over the FC_H splits is a trivial (NSPLIT,B,nc) add
    # done outside the kernel so the two splits stay independent ("parallel") on v7x.
    return out.sum(axis=0)[:, :nc]


def init_params(key, seq_len, num_classes):
    """PyTorch-default uniform init U(-1/sqrt(fan_in), +1/sqrt(fan_in)), PyTorch shapes."""
    L2 = seq_len // 2
    ks = jax.random.split(key, 12)

    def u(k, shape, fan_in):
        b = 1.0 / math.sqrt(fan_in)
        return jax.random.uniform(k, shape, jnp.float32, -b, b)

    return {
        'w1': u(ks[0], (C1, 1, K1), 1 * K1),       'b1': u(ks[1], (C1,), 1 * K1),
        'w2': u(ks[2], (C, C1, 3), C1 * 3),        'b2': u(ks[3], (C,), C1 * 3),
        'w3': u(ks[4], (C, C, 3), C * 3),          'b3': u(ks[5], (C,), C * 3),
        'w4': u(ks[6], (C, C, 3), C * 3),          'b4': u(ks[7], (C,), C * 3),
        'wfc1': u(ks[8], (FC_H, C * L2), C * L2),  'bfc1': u(ks[9], (FC_H,), C * L2),
        'wfc2': u(ks[10], (num_classes, FC_H), FC_H),
        'bfc2': u(ks[11], (num_classes,), FC_H),
    }


def wdcnn_reference(x, p):
    """Pure-JAX (XLA, f32) mirror of the PyTorch forward, for correctness checking."""
    B = x.shape[0]
    dn = ('NCH', 'OIH', 'NCH')
    y = jnp.transpose(x, (0, 2, 1))                                   # (B, 1, L)
    y = lax.conv_general_dilated(y, p['w1'], (1,), [(32, 32)], dimension_numbers=dn)
    y = jnp.maximum(y + p['b1'][None, :, None], 0.0)                  # (B, 16, L+1)
    lp = y.shape[-1] // 2
    y = jnp.max(y[..., :2 * lp].reshape(B, C1, lp, 2), axis=-1)       # MaxPool1d(2)
    for w, b in (('w2', 'b2'), ('w3', 'b3'), ('w4', 'b4')):
        y = lax.conv_general_dilated(y, p[w], (1,), [(1, 1)], dimension_numbers=dn)
        y = jnp.maximum(y + p[b][None, :, None], 0.0)
    y = y.reshape(B, -1)                                              # channel-major flatten
    y = jnp.maximum(y @ p['wfc1'].T + p['bfc1'], 0.0)
    return y @ p['wfc2'].T + p['bfc2']


if __name__ == "__main__":
    # Small shapes consistent with the module: fc1 in-features = 64 * (L // 2).
    # The same code path scales to the module's hardcoded L=1024 (fc1 weight streamed).
    B, L, NUM_CLASSES = 8, 128, 10
    key = jax.random.PRNGKey(0)
    kx, kp = jax.random.split(key)
    x = jax.random.normal(kx, (B, L, 1), jnp.float32)                 # (batch, seq, 1)
    params = init_params(kp, L, NUM_CLASSES)

    fwd = jax.jit(wdcnn_forward)
    out = jax.block_until_ready(fwd(x, params))
    assert out.shape == (B, NUM_CLASSES)

    ref = jax.block_until_ready(wdcnn_reference(x, params))
    # fc1 weight/activation are bf16 in the kernel -> slightly looser tolerance than f32.
    assert jnp.allclose(out, ref, atol=5e-3, rtol=5e-3), float(jnp.max(jnp.abs(out - ref)))

    print("KERNEL_OK")
</pallas_src>

<mosaic_0001>
module attributes {stable_mosaic.version = 11 : i64} {
  func.func @wdcnn_kernel(%arg0: i32, %arg1: i32, %arg2: memref<1024x64xf32, #tpu.memory_space<vmem>>, %arg3: memref<64x64xf32, #tpu.memory_space<vmem>>, %arg4: memref<1x64xf32, #tpu.memory_space<vmem>>, %arg5: memref<3x64x64xf32, #tpu.memory_space<vmem>>, %arg6: memref<1x64xf32, #tpu.memory_space<vmem>>, %arg7: memref<3x64x64xf32, #tpu.memory_space<vmem>>, %arg8: memref<1x64xf32, #tpu.memory_space<vmem>>, %arg9: memref<3x64x64xf32, #tpu.memory_space<vmem>>, %arg10: memref<1x64xf32, #tpu.memory_space<vmem>>, %arg11: memref<32x64x256xbf16, #tpu.memory_space<vmem>>, %arg12: memref<1x256xf32, #tpu.memory_space<vmem>>, %arg13: memref<256x128xf32, #tpu.memory_space<vmem>>, %arg14: memref<1x128xf32, #tpu.memory_space<vmem>>, %arg15: memref<1x8x128xf32, #tpu.memory_space<vmem>>, %arg16: memref<528x64xf32, #tpu.memory_space<vmem>>, %arg17: memref<528x64xf32, #tpu.memory_space<vmem>>, %arg18: memref<8x256xf32, #tpu.memory_space<vmem>>) attributes {dimension_semantics = [#tpu.dimension_semantics<parallel>, #tpu.dimension_semantics<arbitrary>], iteration_bounds = array<i64: 2, 2>, scalar_prefetch = 0 : i64, scratch_operands = 3 : i64, tpu.core_type = #tpu.core_type<tc>, window_params = [{pipeline_mode = #tpu.pipeline_mode<synchronous>, transform_indices = @transform_0, window_bounds = array<i64: 1024, 64>}, {pipeline_mode = #tpu.pipeline_mode<synchronous>, transform_indices = @transform_1, window_bounds = array<i64: 64, 64>}, {pipeline_mode = #tpu.pipeline_mode<synchronous>, transform_indices = @transform_2, window_bounds = array<i64: 1, 64>}, {pipeline_mode = #tpu.pipeline_mode<synchronous>, transform_indices = @transform_3, window_bounds = array<i64: 3, 64, 64>}, {pipeline_mode = #tpu.pipeline_mode<synchronous>, transform_indices = @transform_4, window_bounds = array<i64: 1, 64>}, {pipeline_mode = #tpu.pipeline_mode<synchronous>, transform_indices = @transform_5, window_bounds = array<i64: 3, 64, 64>}, {pipeline_mode = #tpu.pipeline_mode<synchronous>, transform_indices = @transform_6, window_bounds = array<i64: 1, 64>}, {pipeline_mode = #tpu.pipeline_mode<synchronous>, transform_indices = @transform_7, window_bounds = array<i64: 3, 64, 64>}, {pipeline_mode = #tpu.pipeline_mode<synchronous>, transform_indices = @transform_8, window_bounds = array<i64: 1, 64>}, {transform_indices = @transform_9, window_bounds = array<i64: 32, 64, 256>}, {transform_indices = @transform_10, window_bounds = array<i64: 1, 256>}, {transform_indices = @transform_11, window_bounds = array<i64: 256, 128>}, {pipeline_mode = #tpu.pipeline_mode<synchronous>, transform_indices = @transform_12, window_bounds = array<i64: 1, 128>}, {transform_indices = @transform_13, window_bounds = array<i64: 1, 8, 128>}]} {
    %c0_i32 = arith.constant 0 : i32
    %0 = arith.cmpi eq, %arg1, %c0_i32 : i32
    %1 = arith.extui %0 : i1 to i32
    %c0_i32_0 = arith.constant 0 : i32
    %2 = arith.cmpi ne, %1, %c0_i32_0 : i32
    scf.if %2 {
      %c0_10 = arith.constant 0 : index
      %c0_11 = arith.constant 0 : index
      %19 = vector.load %arg2[%c0_10, %c0_11] : memref<1024x64xf32, #tpu.memory_space<vmem>>, vector<1024x64xf32>
      %c0_12 = arith.constant 0 : index
      %c0_13 = arith.constant 0 : index
      %20 = vector.load %arg3[%c0_12, %c0_13] : memref<64x64xf32, #tpu.memory_space<vmem>>, vector<64x64xf32>
      %cst_14 = arith.constant dense<0.000000e+00> : vector<1024x64xf32>
      %21 = tpu.matmul %19, %20, %cst_14 {dimension_numbers = #tpu.dot_dimension_numbers<[1], [0], [0], [1], [0, 0, 1, 1], [], []>} : vector<1024x64xf32>, vector<64x64xf32>, vector<1024x64xf32> -> vector<1024x64xf32>
      %22 = vector.extract_strided_slice %21 {offsets = [0, 0], sizes = [512, 64], strides = [1, 1]} : vector<1024x64xf32> to vector<512x64xf32>
      %23 = vector.extract_strided_slice %21 {offsets = [512, 0], sizes = [512, 64], strides = [1, 1]} : vector<1024x64xf32> to vector<512x64xf32>
      %24 = arith.maximumf %22, %23 : vector<512x64xf32>
      %c0_15 = arith.constant 0 : index
      %c0_16 = arith.constant 0 : index
      %25 = vector.load %arg4[%c0_15, %c0_16] : memref<1x64xf32, #tpu.memory_space<vmem>>, vector<1x64xf32>
      %26 = vector.broadcast %25 : vector<1x64xf32> to vector<512x64xf32>
      %27 = arith.addf %24, %26 : vector<512x64xf32>
      %cst_17 = arith.constant 0.000000e+00 : f32
      %28 = vector.broadcast %cst_17 : f32 to vector<512x64xf32>
      %29 = arith.maximumf %27, %28 : vector<512x64xf32>
      %cst_18 = arith.constant 0.000000e+00 : f32
      %30 = vector.broadcast %cst_18 : f32 to vector<8x64xf32>
      %c0_19 = arith.constant 0 : index
      %c0_20 = arith.constant 0 : index
      %31 = vector.load %arg16[%c0_19, %c0_20] : memref<528x64xf32, #tpu.memory_space<vmem>>, vector<8x64xf32>
      tpu.vector_store %arg16[%c0_19, %c0_20], %30 {strides = array<i32>} : memref<528x64xf32, #tpu.memory_space<vmem>>, vector<8x64xf32>,
      %c520 = arith.constant 520 : index
      %c0_21 = arith.constant 0 : index
      %32 = vector.load %arg16[%c520, %c0_21] : memref<528x64xf32, #tpu.memory_space<vmem>>, vector<8x64xf32>
      tpu.vector_store %arg16[%c520, %c0_21], %30 {strides = array<i32>} : memref<528x64xf32, #tpu.memory_space<vmem>>, vector<8x64xf32>,
      %c0_22 = arith.constant 0 : index
      %c0_23 = arith.constant 0 : index
      %33 = vector.load %arg17[%c0_22, %c0_23] : memref<528x64xf32, #tpu.memory_space<vmem>>, vector<8x64xf32>
      tpu.vector_store %arg17[%c0_22, %c0_23], %30 {strides = array<i32>} : memref<528x64xf32, #tpu.memory_space<vmem>>, vector<8x64xf32>,
      %c520_24 = arith.constant 520 : index
      %c0_25 = arith.constant 0 : index
      %34 = vector.load %arg17[%c520_24, %c0_25] : memref<528x64xf32, #tpu.memory_space<vmem>>, vector<8x64xf32>
      tpu.vector_store %arg17[%c520_24, %c0_25], %30 {strides = array<i32>} : memref<528x64xf32, #tpu.memory_space<vmem>>, vector<8x64xf32>,
      %c8 = arith.constant 8 : index
      %c0_26 = arith.constant 0 : index
      %35 = vector.load %arg16[%c8, %c0_26] : memref<528x64xf32, #tpu.memory_space<vmem>>, vector<512x64xf32>
      tpu.vector_store %arg16[%c8, %c0_26], %29 {strides = array<i32>} : memref<528x64xf32, #tpu.memory_space<vmem>>, vector<512x64xf32>,
      %c0_27 = arith.constant 0 : index
      %c0_28 = arith.constant 0 : index
      %36 = vector.load %arg16[%c0_27, %c0_28] : memref<528x64xf32, #tpu.memory_space<vmem>>, vector<512x64xf32>
      %c0_29 = arith.constant 0 : index
      %c0_30 = arith.constant 0 : index
      %c0_31 = arith.constant 0 : index
      %37 = vector.load %arg5[%c0_29, %c0_30, %c0_31] : memref<3x64x64xf32, #tpu.memory_space<vmem>>, vector<1x64x64xf32>
      %38 = vector.shape_cast %37 : vector<1x64x64xf32> to vector<64x64xf32>
      %cst_32 = arith.constant dense<0.000000e+00> : vector<512x64xf32>
      %39 = tpu.matmul %36, %38, %cst_32 {dimension_numbers = #tpu.dot_dimension_numbers<[1], [0], [0], [1], [0, 0, 1, 1], [], []>} : vector<512x64xf32>, vector<64x64xf32>, vector<512x64xf32> -> vector<512x64xf32>
      %c8_33 = arith.constant 8 : index
      %c0_34 = arith.constant 0 : index
      %40 = vector.load %arg16[%c8_33, %c0_34] : memref<528x64xf32, #tpu.memory_space<vmem>>, vector<512x64xf32>
      %c1 = arith.constant 1 : index
      %c0_35 = arith.constant 0 : index
      %c0_36 = arith.constant 0 : index
      %41 = vector.load %arg5[%c1, %c0_35, %c0_36] : memref<3x64x64xf32, #tpu.memory_space<vmem>>, vector<1x64x64xf32>
      %42 = vector.shape_cast %41 : vector<1x64x64xf32> to vector<64x64xf32>
      %cst_37 = arith.constant dense<0.000000e+00> : vector<512x64xf32>
      %43 = tpu.matmul %40, %42, %cst_37 {dimension_numbers = #tpu.dot_dimension_numbers<[1], [0], [0], [1], [0, 0, 1, 1], [], []>} : vector<512x64xf32>, vector<64x64xf32>, vector<512x64xf32> -> vector<512x64xf32>
      %44 = arith.addf %39, %43 : vector<512x64xf32>
      %c16 = arith.constant 16 : index
      %c0_38 = arith.constant 0 : index
      %45 = vector.load %arg16[%c16, %c0_38] : memref<528x64xf32, #tpu.memory_space<vmem>>, vector<512x64xf32>
      %c2 = arith.constant 2 : index
      %c0_39 = arith.constant 0 : index
      %c0_40 = arith.constant 0 : index
      %46 = vector.load %arg5[%c2, %c0_39, %c0_40] : memref<3x64x64xf32, #tpu.memory_space<vmem>>, vector<1x64x64xf32>
      %47 = vector.shape_cast %46 : vector<1x64x64xf32> to vector<64x64xf32>
      %cst_41 = arith.constant dense<0.000000e+00> : vector<512x64xf32>
      %48 = tpu.matmul %45, %47, %cst_41 {dimension_numbers = #tpu.dot_dimension_numbers<[1], [0], [0], [1], [0, 0, 1, 1], [], []>} : vector<512x64xf32>, vector<64x64xf32>, vector<512x64xf32> -> vector<512x64xf32>
      %49 = arith.addf %44, %48 : vector<512x64xf32>
      %c0_42 = arith.constant 0 : index
      %c0_43 = arith.constant 0 : index
      %50 = vector.load %arg6[%c0_42, %c0_43] : memref<1x64xf32, #tpu.memory_space<vmem>>, vector<1x64xf32>
      %51 = vector.broadcast %50 : vector<1x64xf32> to vector<512x64xf32>
      %52 = arith.addf %49, %51 : vector<512x64xf32>
      %cst_44 = arith.constant 0.000000e+00 : f32
      %53 = vector.broadcast %cst_44 : f32 to vector<512x64xf32>
      %54 = arith.maximumf %52, %53 : vector<512x64xf32>
      %c8_45 = arith.constant 8 : index
      %c0_46 = arith.constant 0 : index
      %55 = vector.load %arg17[%c8_45, %c0_46] : memref<528x64xf32, #tpu.memory_space<vmem>>, vector<512x64xf32>
      tpu.vector_store %arg17[%c8_45, %c0_46], %54 {strides = array<i32>} : memref<528x64xf32, #tpu.memory_space<vmem>>, vector<512x64xf32>,
      %c0_47 = arith.constant 0 : index
      %c0_48 = arith.constant 0 : index
      %56 = vector.load %arg17[%c0_47, %c0_48] : memref<528x64xf32, #tpu.memory_space<vmem>>, vector<512x64xf32>
      %c0_49 = arith.constant 0 : index
      %c0_50 = arith.constant 0 : index
      %c0_51 = arith.constant 0 : index
      %57 = vector.load %arg7[%c0_49, %c0_50, %c0_51] : memref<3x64x64xf32, #tpu.memory_space<vmem>>, vector<1x64x64xf32>
      %58 = vector.shape_cast %57 : vector<1x64x64xf32> to vector<64x64xf32>
      %cst_52 = arith.constant dense<0.000000e+00> : vector<512x64xf32>
      %59 = tpu.matmul %56, %58, %cst_52 {dimension_numbers = #tpu.dot_dimension_numbers<[1], [0], [0], [1], [0, 0, 1, 1], [], []>} : vector<512x64xf32>, vector<64x64xf32>, vector<512x64xf32> -> vector<512x64xf32>
      %c8_53 = arith.constant 8 : index
      %c0_54 = arith.constant 0 : index
      %60 = vector.load %arg17[%c8_53, %c0_54] : memref<528x64xf32, #tpu.memory_space<vmem>>, vector<512x64xf32>
      %c1_55 = arith.constant 1 : index
      %c0_56 = arith.constant 0 : index
      %c0_57 = arith.constant 0 : index
      %61 = vector.load %arg7[%c1_55, %c0_56, %c0_57] : memref<3x64x64xf32, #tpu.memory_space<vmem>>, vector<1x64x64xf32>
      %62 = vector.shape_cast %61 : vector<1x64x64xf32> to vector<64x64xf32>
      %cst_58 = arith.constant dense<0.000000e+00> : vector<512x64xf32>
      %63 = tpu.matmul %60, %62, %cst_58 {dimension_numbers = #tpu.dot_dimension_numbers<[1], [0], [0], [1], [0, 0, 1, 1], [], []>} : vector<512x64xf32>, vector<64x64xf32>, vector<512x64xf32> -> vector<512x64xf32>
      %64 = arith.addf %59, %63 : vector<512x64xf32>
      %c16_59 = arith.constant 16 : index
      %c0_60 = arith.constant 0 : index
      %65 = vector.load %arg17[%c16_59, %c0_60] : memref<528x64xf32, #tpu.memory_space<vmem>>, vector<512x64xf32>
      %c2_61 = arith.constant 2 : index
      %c0_62 = arith.constant 0 : index
      %c0_63 = arith.constant 0 : index
      %66 = vector.load %arg7[%c2_61, %c0_62, %c0_63] : memref<3x64x64xf32, #tpu.memory_space<vmem>>, vector<1x64x64xf32>
      %67 = vector.shape_cast %66 : vector<1x64x64xf32> to vector<64x64xf32>
      %cst_64 = arith.constant dense<0.000000e+00> : vector<512x64xf32>
      %68 = tpu.matmul %65, %67, %cst_64 {dimension_numbers = #tpu.dot_dimension_numbers<[1], [0], [0], [1], [0, 0, 1, 1], [], []>} : vector<512x64xf32>, vector<64x64xf32>, vector<512x64xf32> -> vector<512x64xf32>
      %69 = arith.addf %64, %68 : vector<512x64xf32>
      %c0_65 = arith.constant 0 : index
      %c0_66 = arith.constant 0 : index
      %70 = vector.load %arg8[%c0_65, %c0_66] : memref<1x64xf32, #tpu.memory_space<vmem>>, vector<1x64xf32>
      %71 = vector.broadcast %70 : vector<1x64xf32> to vector<512x64xf32>
      %72 = arith.addf %69, %71 : vector<512x64xf32>
      %cst_67 = arith.constant 0.000000e+00 : f32
      %73 = vector.broadcast %cst_67 : f32 to vector<512x64xf32>
      %74 = arith.maximumf %72, %73 : vector<512x64xf32>
      %c8_68 = arith.constant 8 : index
      %c0_69 = arith.constant 0 : index
      %75 = vector.load %arg16[%c8_68, %c0_69] : memref<528x64xf32, #tpu.memory_space<vmem>>, vector<512x64xf32>
      tpu.vector_store %arg16[%c8_68, %c0_69], %74 {strides = array<i32>} : memref<528x64xf32, #tpu.memory_space<vmem>>, vector<512x64xf32>,
      %c0_70 = arith.constant 0 : index
      %c0_71 = arith.constant 0 : index
      %76 = vector.load %arg16[%c0_70, %c0_71] : memref<528x64xf32, #tpu.memory_space<vmem>>, vector<512x64xf32>
      %c0_72 = arith.constant 0 : index
      %c0_73 = arith.constant 0 : index
      %c0_74 = arith.constant 0 : index
      %77 = vector.load %arg9[%c0_72, %c0_73, %c0_74] : memref<3x64x64xf32, #tpu.memory_space<vmem>>, vector<1x64x64xf32>
      %78 = vector.shape_cast %77 : vector<1x64x64xf32> to vector<64x64xf32>
      %cst_75 = arith.constant dense<0.000000e+00> : vector<512x64xf32>
      %79 = tpu.matmul %76, %78, %cst_75 {dimension_numbers = #tpu.dot_dimension_numbers<[1], [0], [0], [1], [0, 0, 1, 1], [], []>} : vector<512x64xf32>, vector<64x64xf32>, vector<512x64xf32> -> vector<512x64xf32>
      %c8_76 = arith.constant 8 : index
      %c0_77 = arith.constant 0 : index
      %80 = vector.load %arg16[%c8_76, %c0_77] : memref<528x64xf32, #tpu.memory_space<vmem>>, vector<512x64xf32>
      %c1_78 = arith.constant 1 : index
      %c0_79 = arith.constant 0 : index
      %c0_80 = arith.constant 0 : index
      %81 = vector.load %arg9[%c1_78, %c0_79, %c0_80] : memref<3x64x64xf32, #tpu.memory_space<vmem>>, vector<1x64x64xf32>
      %82 = vector.shape_cast %81 : vector<1x64x64xf32> to vector<64x64xf32>
      %cst_81 = arith.constant dense<0.000000e+00> : vector<512x64xf32>
      %83 = tpu.matmul %80, %82, %cst_81 {dimension_numbers = #tpu.dot_dimension_numbers<[1], [0], [0], [1], [0, 0, 1, 1], [], []>} : vector<512x64xf32>, vector<64x64xf32>, vector<512x64xf32> -> vector<512x64xf32>
      %84 = arith.addf %79, %83 : vector<512x64xf32>
      %c16_82 = arith.constant 16 : index
      %c0_83 = arith.constant 0 : index
      %85 = vector.load %arg16[%c16_82, %c0_83] : memref<528x64xf32, #tpu.memory_space<vmem>>, vector<512x64xf32>
      %c2_84 = arith.constant 2 : index
      %c0_85 = arith.constant 0 : index
      %c0_86 = arith.constant 0 : index
      %86 = vector.load %arg9[%c2_84, %c0_85, %c0_86] : memref<3x64x64xf32, #tpu.memory_space<vmem>>, vector<1x64x64xf32>
      %87 = vector.shape_cast %86 : vector<1x64x64xf32> to vector<64x64xf32>
      %cst_87 = arith.constant dense<0.000000e+00> : vector<512x64xf32>
      %88 = tpu.matmul %85, %87, %cst_87 {dimension_numbers = #tpu.dot_dimension_numbers<[1], [0], [0], [1], [0, 0, 1, 1], [], []>} : vector<512x64xf32>, vector<64x64xf32>, vector<512x64xf32> -> vector<512x64xf32>
      %89 = arith.addf %84, %88 : vector<512x64xf32>
      %c0_88 = arith.constant 0 : index
      %c0_89 = arith.constant 0 : index
      %90 = vector.load %arg10[%c0_88, %c0_89] : memref<1x64xf32, #tpu.memory_space<vmem>>, vector<1x64xf32>
      %91 = vector.broadcast %90 : vector<1x64xf32> to vector<512x64xf32>
      %92 = arith.addf %89, %91 : vector<512x64xf32>
      %cst_90 = arith.constant 0.000000e+00 : f32
      %93 = vector.broadcast %cst_90 : f32 to vector<512x64xf32>
      %94 = arith.maximumf %92, %93 : vector<512x64xf32>
      %c8_91 = arith.constant 8 : index
      %c0_92 = arith.constant 0 : index
      %95 = vector.load %arg17[%c8_91, %c0_92] : memref<528x64xf32, #tpu.memory_space<vmem>>, vector<512x64xf32>
      tpu.vector_store %arg17[%c8_91, %c0_92], %94 {strides = array<i32>} : memref<528x64xf32, #tpu.memory_space<vmem>>, vector<512x64xf32>,
      %cst_93 = arith.constant 0.000000e+00 : f32
      %96 = vector.broadcast %cst_93 : f32 to vector<8x256xf32>
      %c0_94 = arith.constant 0 : index
      %c0_95 = arith.constant 0 : index
      %97 = vector.load %arg18[%c0_94, %c0_95] : memref<8x256xf32, #tpu.memory_space<vmem>>, vector<8x256xf32>
      tpu.vector_store %arg18[%c0_94, %c0_95], %96 {strides = array<i32>} : memref<8x256xf32, #tpu.memory_space<vmem>>, vector<8x256xf32>,
    } else {
    }
    %c256_i32 = arith.constant 256 : i32
    %3 = arith.muli %arg1, %c256_i32 : i32
    %c8_i32 = arith.constant 8 : i32
    %4 = arith.addi %c8_i32, %3 : i32
    %5 = tpu.assume_multiple %4, 8 : i32
    %6 = arith.index_cast %5 : i32 to index
    %c0 = arith.constant 0 : index
    %7 = vector.load %arg17[%6, %c0] : memref<528x64xf32, #tpu.memory_space<vmem>>, vector<256x64xf32>
    %8 = vector.shape_cast %7 : vector<256x64xf32> to vector<32x8x64xf32>
    %9 = arith.truncf %8 : vector<32x8x64xf32> to vector<32x8x64xbf16>
    %c0_1 = arith.constant 0 : index
    %c0_2 = arith.constant 0 : index
    %c0_3 = arith.constant 0 : index
    %10 = vector.load %arg11[%c0_1, %c0_2, %c0_3] : memref<32x64x256xbf16, #tpu.memory_space<vmem>>, vector<32x64x256xbf16>
    "tpu.trace_start"() <{level = 10 : i32, message = "lbc,lcj->lbj"}> : () -> ()
    %cst = arith.constant dense<0.000000e+00> : vector<32x8x256xf32>
    %11 = tpu.matmul %9, %10, %cst {dimension_numbers = #tpu.dot_dimension_numbers<[2], [1], [1], [2], [0, 0, 0, 1, 1, 2], [0], [0]>} : vector<32x8x64xbf16>, vector<32x64x256xbf16>, vector<32x8x256xf32> -> vector<32x8x256xf32>
    "tpu.trace_stop"() : () -> ()
    %c0_4 = arith.constant 0 : index
    %c0_5 = arith.constant 0 : index
    %12 = vector.load %arg18[%c0_4, %c0_5] : memref<8x256xf32, #tpu.memory_space<vmem>>, vector<8x256xf32>
    %cst_6 = arith.constant dense<0.000000e+00> : vector<8x256xf32>
    %13 = vector.multi_reduction <add>, %11, %cst_6 [0] : vector<32x8x256xf32> to vector<8x256xf32>
    %14 = arith.addf %12, %13 : vector<8x256xf32>
    %c0_7 = arith.constant 0 : index
    %c0_8 = arith.constant 0 : index
    %15 = vector.load %arg18[%c0_7, %c0_8] : memref<8x256xf32, #tpu.memory_space<vmem>>, vector<8x256xf32>
    tpu.vector_store %arg18[%c0_7, %c0_8], %14 {strides = array<i32>} : memref<8x256xf32, #tpu.memory_space<vmem>>, vector<8x256xf32>,
    %c1_i32 = arith.constant 1 : i32
    %16 = arith.cmpi eq, %arg1, %c1_i32 : i32
    %17 = arith.extui %16 : i1 to i32
    %c0_i32_9 = arith.constant 0 : i32
    %18 = arith.cmpi ne, %17, %c0_i32_9 : i32
    scf.if %18 {
      %c0_10 = arith.constant 0 : index
      %c0_11 = arith.constant 0 : index
      %19 = vector.load %arg18[%c0_10, %c0_11] : memref<8x256xf32, #tpu.memory_space<vmem>>, vector<8x256xf32>
      %c0_12 = arith.constant 0 : index
      %c0_13 = arith.constant 0 : index
      %20 = vector.load %arg12[%c0_12, %c0_13] : memref<1x256xf32, #tpu.memory_space<vmem>>, vector<1x256xf32>
      %21 = vector.broadcast %20 : vector<1x256xf32> to vector<8x256xf32>
      %22 = arith.addf %19, %21 : vector<8x256xf32>
      %cst_14 = arith.constant 0.000000e+00 : f32
      %23 = vector.broadcast %cst_14 : f32 to vector<8x256xf32>
      %24 = arith.maximumf %22, %23 : vector<8x256xf32>
      %c0_15 = arith.constant 0 : index
      %c0_16 = arith.constant 0 : index
      %25 = vector.load %arg13[%c0_15, %c0_16] : memref<256x128xf32, #tpu.memory_space<vmem>>, vector<256x128xf32>
      %cst_17 = arith.constant dense<0.000000e+00> : vector<8x128xf32>
      %26 = tpu.matmul %24, %25, %cst_17 {dimension_numbers = #tpu.dot_dimension_numbers<[1], [0], [0], [1], [0, 0, 1, 1], [], []>} : vector<8x256xf32>, vector<256x128xf32>, vector<8x128xf32> -> vector<8x128xf32>
      %c0_18 = arith.constant 0 : index
      %c0_19 = arith.constant 0 : index
      %27 = vector.load %arg14[%c0_18, %c0_19] : memref<1x128xf32, #tpu.memory_space<vmem>>, vector<1x128xf32>
      %28 = vector.broadcast %27 : vector<1x128xf32> to vector<8x128xf32>
      %29 = arith.addf %26, %28 : vector<8x128xf32>
      %30 = vector.shape_cast %29 : vector<8x128xf32> to vector<1x8x128xf32>
      %c0_20 = arith.constant 0 : index
      %c0_21 = arith.constant 0 : index
      %c0_22 = arith.constant 0 : index
      %31 = vector.load %arg15[%c0_20, %c0_21, %c0_22] : memref<1x8x128xf32, #tpu.memory_space<vmem>>, vector<1x8x128xf32>
      tpu.vector_store %arg15[%c0_20, %c0_21, %c0_22], %30 {strides = array<i32>} : memref<1x8x128xf32, #tpu.memory_space<vmem>>, vector<1x8x128xf32>,
    } else {
    }
    return
  }
  func.func @transform_0(%arg0: i32, %arg1: i32) -> (i32, i32) {
    %c0_i32 = arith.constant 0 : i32
    %c0_i32_0 = arith.constant 0 : i32
    %c0_i32_1 = arith.constant 0 : i32
    return %c0_i32, %c0_i32_0 : i32, i32
  }
  func.func @transform_1(%arg0: i32, %arg1: i32) -> (i32, i32) {
    %c0_i32 = arith.constant 0 : i32
    %c0_i32_0 = arith.constant 0 : i32
    %c0_i32_1 = arith.constant 0 : i32
    return %c0_i32, %c0_i32_0 : i32, i32
  }
  func.func @transform_2(%arg0: i32, %arg1: i32) -> (i32, i32) {
    %c0_i32 = arith.constant 0 : i32
    %c0_i32_0 = arith.constant 0 : i32
    %c0_i32_1 = arith.constant 0 : i32
    return %c0_i32, %c0_i32_0 : i32, i32
  }
  func.func @transform_3(%arg0: i32, %arg1: i32) -> (i32, i32, i32) {
    %c0_i32 = arith.constant 0 : i32
    %c0_i32_0 = arith.constant 0 : i32
    %c0_i32_1 = arith.constant 0 : i32
    %c0_i32_2 = arith.constant 0 : i32
    return %c0_i32, %c0_i32_0, %c0_i32_1 : i32, i32, i32
  }
  func.func @transform_4(%arg0: i32, %arg1: i32) -> (i32, i32) {
    %c0_i32 = arith.constant 0 : i32
    %c0_i32_0 = arith.constant 0 : i32
    %c0_i32_1 = arith.constant 0 : i32
    return %c0_i32, %c0_i32_0 : i32, i32
  }
  func.func @transform_5(%arg0: i32, %arg1: i32) -> (i32, i32, i32) {
    %c0_i32 = arith.constant 0 : i32
    %c0_i32_0 = arith.constant 0 : i32
    %c0_i32_1 = arith.constant 0 : i32
    %c0_i32_2 = arith.constant 0 : i32
    return %c0_i32, %c0_i32_0, %c0_i32_1 : i32, i32, i32
  }
  func.func @transform_6(%arg0: i32, %arg1: i32) -> (i32, i32) {
    %c0_i32 = arith.constant 0 : i32
    %c0_i32_0 = arith.constant 0 : i32
    %c0_i32_1 = arith.constant 0 : i32
    return %c0_i32, %c0_i32_0 : i32, i32
  }
  func.func @transform_7(%arg0: i32, %arg1: i32) -> (i32, i32, i32) {
    %c0_i32 = arith.constant 0 : i32
    %c0_i32_0 = arith.constant 0 : i32
    %c0_i32_1 = arith.constant 0 : i32
    %c0_i32_2 = arith.constant 0 : i32
    return %c0_i32, %c0_i32_0, %c0_i32_1 : i32, i32, i32
  }
  func.func @transform_8(%arg0: i32, %arg1: i32) -> (i32, i32) {
    %c0_i32 = arith.constant 0 : i32
    %c0_i32_0 = arith.constant 0 : i32
    %c0_i32_1 = arith.constant 0 : i32
    return %c0_i32, %c0_i32_0 : i32, i32
  }
  func.func @transform_9(%arg0: i32, %arg1: i32) -> (i32, i32, i32) {
    %c0_i32 = arith.constant 0 : i32
    %c0_i32_0 = arith.constant 0 : i32
    return %arg1, %c0_i32, %arg0 : i32, i32, i32
  }
  func.func @transform_10(%arg0: i32, %arg1: i32) -> (i32, i32) {
    %c0_i32 = arith.constant 0 : i32
    %c0_i32_0 = arith.constant 0 : i32
    return %c0_i32, %arg0 : i32, i32
  }
  func.func @transform_11(%arg0: i32, %arg1: i32) -> (i32, i32) {
    %c0_i32 = arith.constant 0 : i32
    %c0_i32_0 = arith.constant 0 : i32
    return %arg0, %c0_i32 : i32, i32
  }
  func.func @transform_12(%arg0: i32, %arg1: i32) -> (i32, i32) {
    %c0_i32 = arith.constant 0 : i32
    %c0_i32_0 = arith.constant 0 : i32
    %c0_i32_1 = arith.constant 0 : i32
    return %c0_i32, %c0_i32_0 : i32, i32
  }
  func.func @transform_13(%arg0: i32, %arg1: i32) -> (i32, i32, i32) {
    %c0_i32 = arith.constant 0 : i32
    %c0_i32_0 = arith.constant 0 : i32
    %c0_i32_1 = arith.constant 0 : i32
    return %arg0, %c0_i32, %c0_i32_0 : i32, i32, i32
  }
}

</mosaic_0001>

<bundles_post_ra>
// kernel: wdcnn_forward.1
= control target key start
LH: loop header
LB: loop body
LE: loop exit
PB: predicated region body
PF: predicated region fallthrough
CT: control target
= control target key end

     0   :  { %s21005_s0 = inlined_call_operand.vmem [shape: f32[1024,64], index: 0, kind: input, shape index: {}]   ;;  %s21006_s1 = inlined_call_operand.vmem [shape: f32[64,64], index: 1, kind: input, shape index: {}]   ;;  %s21007_s2 = inlined_call_operand.vmem [shape: f32[1,64], index: 2, kind: input, shape index: {}]   ;;  %s21008_s3 = inlined_call_operand.vmem [shape: f32[3,64,64], index: 3, kind: input, shape index: {}]   ;;  %s21009_s4 = inlined_call_operand.vmem [shape: f32[1,64], index: 4, kind: input, shape index: {}]   ;;  %s21010_s5 = inlined_call_operand.vmem [shape: f32[3,64,64], index: 5, kind: input, shape index: {}]   ;;  %s21011_s6 = inlined_call_operand.vmem [shape: f32[1,64], index: 6, kind: input, shape index: {}]   ;;  %s21012_s7 = inlined_call_operand.vmem [shape: f32[3,64,64], index: 7, kind: input, shape index: {}]   ;;  %s21013_s8 = inlined_call_operand.vmem [shape: f32[1,64], index: 8, kind: input, shape index: {}]   ;;  %s21014_s9 = inlined_call_operand.vmem [shape: bf16[64,64,512], index: 9, kind: input, shape index: {}]   ;;  %s21015_s10 = inlined_call_operand.vmem [shape: f32[1,512], index: 10, kind: input, shape index: {}]   ;;  %s21016_s11 = inlined_call_operand.vmem [shape: f32[512,128], index: 11, kind: input, shape index: {}]   ;;  %s21017_s12 = inlined_call_operand.vmem [shape: f32[1,128], index: 12, kind: input, shape index: {}]   ;;  %s21018_s13 = inlined_call_operand.vmem [shape: f32[2,8,128], index: 13, kind: output, shape index: {}]  }
   0x1   :  { %21030 = sst [smem:[#allocation57_spill]] %s21011_s6 }
   0x2   :  { %21031 = sst [smem:[#allocation58_spill]] %s21013_s8 }
   0x3   :  { %21032 = sst [smem:[#allocation59_spill]] %s21014_s9 }
   0x4   :  { %21033 = sst [smem:[#allocation60_spill]] %s21017_s12 }
   0x5   :  { %s15977_s25 = smov 0   ;;  %s15979_s26 = smov 0  }
   0x6   :  { %s15981_s27 = smov 0   ;;  %s15983_s28 = smov 0  }
   0x7   :  { %s15985_s29 = smov 0   ;;  %s15987_s30 = smov 0  }
   0x8   :  { %s15989_s14 = smov 0  }
   0x9 LB: > { %21034 = sst [smem:[#allocation6_spill]] %s15899_s30  ;;  %s32_s15 = sadd.s32 1, %s15895_s29  ;;  %s15903_s14 = sphi %s15989_s14, %s23_s14   ;;  %s15899_s30 = sphi %s15987_s30, %s21342_s30   ;;  %s15895_s29 = sphi %s15985_s29, %s21346_s29   ;;  %s15891_s28 = sphi %s15983_s28, %s21340_s28   ;;  %s15887_s27 = sphi %s15981_s27, %s21345_s27   ;;  %s15883_s26 = sphi %s15979_s26, %s21344_s26   ;;  %s15879_s25 = sphi %s15977_s25, %s21343_s25  }
   0xa   : > { %p33_p0 = scmp.ge.s32.totalorder %s32_s15, 2  ;;  %s35_s16 = sadd.s32 1, %s15899_s30 }
   0xb   : > { %p240_p1 = scmp.ne.s32.totalorder %s15883_s26, %s15879_s25  ;;  %p241_p2 = scmp.eq.s32.totalorder %s15903_s14, 0 }
   0xc   : > { %s21348_s15 = smov (%p33_p0, %s32_s15), 0  ;;  %s21350_s16 = smov (!%p33_p0, %s35_s16), %s15899_s30 }
   0xd   : > { %21035 = sst [smem:[#allocation7_spill]] %s21348_s15  ;;  %p242_p3 = por %p241_p2, %p240_p1 }
   0xe   : > { %p37_p4 = scmp.ge.s32.totalorder %s21350_s16, 2  ;;  %s228_s17 = ssub.s32 %s15895_s29, %s21348_s15 }
   0xf   : > { %s233_s20 = sadd.s32 1, %s15883_s26  ;;  %p12247_p6 = scmp.ge.s32.totalorder %s15903_s14, 4 }
  0x10   : > { %s21352_s16 = smov (%p37_p4, %s21350_s16), 0 }
  0x11   : > { %21036 = sst [smem:[#allocation8_spill]] %s21352_s16  ;;  %s229_s18 = ssub.s32 %s15899_s30, %s21352_s16 }
  0x12   : > { %s230_s19 = sor.u32 %s229_s18, %s228_s17  ;;  %395 = sbr.rel (%p12247_p6) target bundleno = 161 (0xa1), region = 56 }
  0x13   : > { %p231_p5 = scmp.eq.s32.totalorder %s230_s19, 0 }
  0x15   : > { %s16028_s21 = scalar_select %p231_p5, %s15883_s26, %s233_s20  }
  0x17   : > { %398 = sbr.rel (!%p242_p3) target bundleno = 161 (0xa1), region = 60  ;;  %s400_s22 = sand.u32 (%p242_p3), 1, %s15883_s26  }
  0x18   : > { %s12250_s23 = sshll.u32 (%p242_p3), %s15899_s30, 1  ;;  %s12248_s24 = sshll.u32 (%p242_p3), %s400_s22, 11 }
  0x19   : > { %s13341_s15 = sshll.u32 (%p242_p3), %s15895_s29, 10  ;;  %s21037_s9 = sld [smem:[#allocation59_spill]] (%p242_p3) }
  0x1a   : > { %s406_s12 = sadd.s32 (%p242_p3), %s13341_s15, %s12250_s23  ;;  %s16042_s18 = scalar_lea.vmem (%p242_p3), [#allocation5], %s12248_s24 }
  0x1b   : > { %s12252_s8 = sshll.u32 (%p242_p3), %s406_s12, 2 }
  0x1f   : > { %s16037_s17 = scalar_lea.vmem %s21037_s9, %s12252_s8 }
  0x20   : > { %v947_v0 = vld [vmem:[%s16037_s17] sm:$0xff]  ;;  %v949_v1 = vld [vmem:[%s16037_s17 + $0x10] sm:$0xff] }
  0x21   : > { %v951_v2 = vld [vmem:[%s16037_s17 + $0x20] sm:$0xff]  ;;  %948 = vst [vmem:[%s16042_s18] sm:$0xff] %v947_v0  ;;  %950 = vst [vmem:[%s16042_s18 + $0x8] sm:$0xff] %v949_v1  ;;  %v953_v3 = vld [vmem:[%s16037_s17 + $0x30] sm:$0xff] }
  0x22   : > { %952 = vst [vmem:[%s16042_s18 + $0x10] sm:$0xff] %v951_v2  ;;  %v955_v4 = vld [vmem:[%s16037_s17 + $0x40] sm:$0xff]  ;;  %v957_v5 = vld [vmem:[%s16037_s17 + $0x50] sm:$0xff]  ;;  %954 = vst [vmem:[%s16042_s18 + $0x18] sm:$0xff] %v953_v3 }
  0x23   : > { %956 = vst [vmem:[%s16042_s18 + $0x20] sm:$0xff] %v955_v4  ;;  %958 = vst [vmem:[%s16042_s18 + $0x28] sm:$0xff] %v957_v5  ;;  %v959_v6 = vld [vmem:[%s16037_s17 + $0x60] sm:$0xff]  ;;  %v961_v7 = vld [vmem:[%s16037_s17 + $0x70] sm:$0xff] }
  0x24   : > { %v963_v8 = vld [vmem:[%s16037_s17 + $0x80] sm:$0xff]  ;;  %960 = vst [vmem:[%s16042_s18 + $0x30] sm:$0xff] %v959_v6  ;;  %962 = vst [vmem:[%s16042_s18 + $0x38] sm:$0xff] %v961_v7  ;;  %v965_v9 = vld [vmem:[%s16037_s17 + $0x90] sm:$0xff] }
  0x25   : > { %964 = vst [vmem:[%s16042_s18 + $0x40] sm:$0xff] %v963_v8  ;;  %v967_v10 = vld [vmem:[%s16037_s17 + $0xa0] sm:$0xff]  ;;  %v969_v11 = vld [vmem:[%s16037_s17 + $0xb0] sm:$0xff]  ;;  %966 = vst [vmem:[%s16042_s18 + $0x48] sm:$0xff] %v965_v9 }
  0x26   : > { %968 = vst [vmem:[%s16042_s18 + $0x50] sm:$0xff] %v967_v10  ;;  %970 = vst [vmem:[%s16042_s18 + $0x58] sm:$0xff] %v969_v11  ;;  %v971_v12 = vld [vmem:[%s16037_s17 + $0xc0] sm:$0xff]  ;;  %v973_v13 = vld [vmem:[%s16037_s17 + $0xd0] sm:$0xff] }
  0x27   : > { %v975_v14 = vld [vmem:[%s16037_s17 + $0xe0] sm:$0xff]  ;;  %972 = vst [vmem:[%s16042_s18 + $0x60] sm:$0xff] %v971_v12  ;;  %974 = vst [vmem:[%s16042_s18 + $0x68] sm:$0xff] %v973_v13  ;;  %v977_v15 = vld [vmem:[%s16037_s17 + $0xf0] sm:$0xff] }
  0x28   : > { %976 = vst [vmem:[%s16042_s18 + $0x70] sm:$0xff] %v975_v14  ;;  %v979_v16 = vld [vmem:[%s16037_s17 + $0x100] sm:$0xff]  ;;  %v981_v17 = vld [vmem:[%s16037_s17 + $0x110] sm:$0xff]  ;;  %978 = vst [vmem:[%s16042_s18 + $0x78] sm:$0xff] %v977_v15 }
  0x29   : > { %980 = vst [vmem:[%s16042_s18 + $0x80] sm:$0xff] %v979_v16  ;;  %982 = vst [vmem:[%s16042_s18 + $0x88] sm:$0xff] %v981_v17  ;;  %v983_v18 = vld [vmem:[%s16037_s17 + $0x120] sm:$0xff]  ;;  %v985_v19 = vld [vmem:[%s16037_s17 + $0x130] sm:$0xff] }
  0x2a   : > { %v987_v20 = vld [vmem:[%s16037_s17 + $0x140] sm:$0xff]  ;;  %984 = vst [vmem:[%s16042_s18 + $0x90] sm:$0xff] %v983_v18  ;;  %986 = vst [vmem:[%s16042_s18 + $0x98] sm:$0xff] %v985_v19  ;;  %v989_v21 = vld [vmem:[%s16037_s17 + $0x150] sm:$0xff] }
  0x2b   : > { %988 = vst [vmem:[%s16042_s18 + $0xa0] sm:$0xff] %v987_v20  ;;  %v991_v22 = vld [vmem:[%s16037_s17 + $0x160] sm:$0xff]  ;;  %v993_v23 = vld [vmem:[%s16037_s17 + $0x170] sm:$0xff]  ;;  %990 = vst [vmem:[%s16042_s18 + $0xa8] sm:$0xff] %v989_v21 }
  0x2c   : > { %992 = vst [vmem:[%s16042_s18 + $0xb0] sm:$0xff] %v991_v22  ;;  %994 = vst [vmem:[%s16042_s18 + $0xb8] sm:$0xff] %v993_v23  ;;  %v995_v24 = vld [vmem:[%s16037_s17 + $0x180] sm:$0xff]  ;;  %v997_v25 = vld [vmem:[%s16037_s17 + $0x190] sm:$0xff] }
  0x2d   : > { %v999_v26 = vld [vmem:[%s16037_s17 + $0x1a0] sm:$0xff]  ;;  %996 = vst [vmem:[%s16042_s18 + $0xc0] sm:$0xff] %v995_v24  ;;  %998 = vst [vmem:[%s16042_s18 + $0xc8] sm:$0xff] %v997_v25  ;;  %v1001_v27 = vld [vmem:[%s16037_s17 + $0x1b0] sm:$0xff] }
  0x2e   : > { %1000 = vst [vmem:[%s16042_s18 + $0xd0] sm:$0xff] %v999_v26  ;;  %v1003_v28 = vld [vmem:[%s16037_s17 + $0x1c0] sm:$0xff]  ;;  %v1005_v29 = vld [vmem:[%s16037_s17 + $0x1d0] sm:$0xff]  ;;  %1002 = vst [vmem:[%s16042_s18 + $0xd8] sm:$0xff] %v1001_v27 }
  0x2f   : > { %1004 = vst [vmem:[%s16042_s18 + $0xe0] sm:$0xff] %v1003_v28  ;;  %1006 = vst [vmem:[%s16042_s18 + $0xe8] sm:$0xff] %v1005_v29  ;;  %v1007_v30 = vld [vmem:[%s16037_s17 + $0x1e0] sm:$0xff]  ;;  %v1009_v31 = vld [vmem:[%s16037_s17 + $0x1f0] sm:$0xff] }
  0x30   : > { %v1011_v32 = vld [vmem:[%s16037_s17 + $0x200] sm:$0xff]  ;;  %1008 = vst [vmem:[%s16042_s18 + $0xf0] sm:$0xff] %v1007_v30  ;;  %1010 = vst [vmem:[%s16042_s18 + $0xf8] sm:$0xff] %v1009_v31  ;;  %v1013_v33 = vld [vmem:[%s16037_s17 + $0x210] sm:$0xff] }
  0x31   : > { %1012 = vst [vmem:[%s16042_s18 + $0x100] sm:$0xff] %v1011_v32  ;;  %v1015_v34 = vld [vmem:[%s16037_s17 + $0x220] sm:$0xff]  ;;  %v1017_v35 = vld [vmem:[%s16037_s17 + $0x230] sm:$0xff]  ;;  %1014 = vst [vmem:[%s16042_s18 + $0x108] sm:$0xff] %v1013_v33 }
  0x32   : > { %1016 = vst [vmem:[%s16042_s18 + $0x110] sm:$0xff] %v1015_v34  ;;  %1018 = vst [vmem:[%s16042_s18 + $0x118] sm:$0xff] %v1017_v35  ;;  %v1019_v36 = vld [vmem:[%s16037_s17 + $0x240] sm:$0xff]  ;;  %v1021_v37 = vld [vmem:[%s16037_s17 + $0x250] sm:$0xff] }
  0x33   : > { %v1023_v38 = vld [vmem:[%s16037_s17 + $0x260] sm:$0xff]  ;;  %1020 = vst [vmem:[%s16042_s18 + $0x120] sm:$0xff] %v1019_v36  ;;  %1022 = vst [vmem:[%s16042_s18 + $0x128] sm:$0xff] %v1021_v37  ;;  %v1025_v39 = vld [vmem:[%s16037_s17 + $0x270] sm:$0xff] }
  0x34   : > { %1024 = vst [vmem:[%s16042_s18 + $0x130] sm:$0xff] %v1023_v38  ;;  %v1027_v40 = vld [vmem:[%s16037_s17 + $0x280] sm:$0xff]  ;;  %v1029_v41 = vld [vmem:[%s16037_s17 + $0x290] sm:$0xff]  ;;  %1026 = vst [vmem:[%s16042_s18 + $0x138] sm:$0xff] %v1025_v39 }
  0x35   : > { %1028 = vst [vmem:[%s16042_s18 + $0x140] sm:$0xff] %v1027_v40  ;;  %1030 = vst [vmem:[%s16042_s18 + $0x148] sm:$0xff] %v1029_v41  ;;  %v1031_v42 = vld [vmem:[%s16037_s17 + $0x2a0] sm:$0xff]  ;;  %v1033_v43 = vld [vmem:[%s16037_s17 + $0x2b0] sm:$0xff] }
  0x36   : > { %v1035_v44 = vld [vmem:[%s16037_s17 + $0x2c0] sm:$0xff]  ;;  %1032 = vst [vmem:[%s16042_s18 + $0x150] sm:$0xff] %v1031_v42  ;;  %1034 = vst [vmem:[%s16042_s18 + $0x158] sm:$0xff] %v1033_v43  ;;  %v1037_v45 = vld [vmem:[%s16037_s17 + $0x2d0] sm:$0xff] }
  0x37   : > { %1036 = vst [vmem:[%s16042_s18 + $0x160] sm:$0xff] %v1035_v44  ;;  %v1039_v46 = vld [vmem:[%s16037_s17 + $0x2e0] sm:$0xff]  ;;  %v1041_v47 = vld [vmem:[%s16037_s17 + $0x2f0] sm:$0xff]  ;;  %1038 = vst [vmem:[%s16042_s18 + $0x168] sm:$0xff] %v1037_v45 }
  0x38   : > { %1040 = vst [vmem:[%s16042_s18 + $0x170] sm:$0xff] %v1039_v46  ;;  %1042 = vst [vmem:[%s16042_s18 + $0x178] sm:$0xff] %v1041_v47  ;;  %v1043_v48 = vld [vmem:[%s16037_s17 + $0x300] sm:$0xff]  ;;  %v1045_v49 = vld [vmem:[%s16037_s17 + $0x310] sm:$0xff] }
  0x39   : > { %v1047_v50 = vld [vmem:[%s16037_s17 + $0x320] sm:$0xff]  ;;  %1044 = vst [vmem:[%s16042_s18 + $0x180] sm:$0xff] %v1043_v48  ;;  %1046 = vst [vmem:[%s16042_s18 + $0x188] sm:$0xff] %v1045_v49  ;;  %v1049_v51 = vld [vmem:[%s16037_s17 + $0x330] sm:$0xff] }
  0x3a   : > { %1048 = vst [vmem:[%s16042_s18 + $0x190] sm:$0xff] %v1047_v50  ;;  %v1051_v52 = vld [vmem:[%s16037_s17 + $0x340] sm:$0xff]  ;;  %v1053_v53 = vld [vmem:[%s16037_s17 + $0x350] sm:$0xff]  ;;  %1050 = vst [vmem:[%s16042_s18 + $0x198] sm:$0xff] %v1049_v51 }
  0x3b   : > { %1052 = vst [vmem:[%s16042_s18 + $0x1a0] sm:$0xff] %v1051_v52  ;;  %1054 = vst [vmem:[%s16042_s18 + $0x1a8] sm:$0xff] %v1053_v53  ;;  %v1055_v54 = vld [vmem:[%s16037_s17 + $0x360] sm:$0xff]  ;;  %v1057_v55 = vld [vmem:[%s16037_s17 + $0x370] sm:$0xff] }
  0x3c   : > { %v1059_v56 = vld [vmem:[%s16037_s17 + $0x380] sm:$0xff]  ;;  %1056 = vst [vmem:[%s16042_s18 + $0x1b0] sm:$0xff] %v1055_v54  ;;  %1058 = vst [vmem:[%s16042_s18 + $0x1b8] sm:$0xff] %v1057_v55  ;;  %v1061_v57 = vld [vmem:[%s16037_s17 + $0x390] sm:$0xff] }
  0x3d   : > { %1060 = vst [vmem:[%s16042_s18 + $0x1c0] sm:$0xff] %v1059_v56  ;;  %v1063_v58 = vld [vmem:[%s16037_s17 + $0x3a0] sm:$0xff]  ;;  %v1065_v59 = vld [vmem:[%s16037_s17 + $0x3b0] sm:$0xff]  ;;  %1062 = vst [vmem:[%s16042_s18 + $0x1c8] sm:$0xff] %v1061_v57 }
  0x3e   : > { %1064 = vst [vmem:[%s16042_s18 + $0x1d0] sm:$0xff] %v1063_v58  ;;  %1066 = vst [vmem:[%s16042_s18 + $0x1d8] sm:$0xff] %v1065_v59  ;;  %v1067_v60 = vld [vmem:[%s16037_s17 + $0x3c0] sm:$0xff]  ;;  %v1069_v61 = vld [vmem:[%s16037_s17 + $0x3d0] sm:$0xff] }
  0x3f   : > { %v1071_v62 = vld [vmem:[%s16037_s17 + $0x3e0] sm:$0xff]  ;;  %1068 = vst [vmem:[%s16042_s18 + $0x1e0] sm:$0xff] %v1067_v60  ;;  %1070 = vst [vmem:[%s16042_s18 + $0x1e8] sm:$0xff] %v1069_v61  ;;  %v1073_v63 = vld [vmem:[%s16037_s17 + $0x3f0] sm:$0xff] }
  0x40   : > { %1072 = vst [vmem:[%s16042_s18 + $0x1f0] sm:$0xff] %v1071_v62  ;;  %v1075_v0 = vld [vmem:[%s16037_s17 + $0x400] sm:$0xff]  ;;  %v1077_v1 = vld [vmem:[%s16037_s17 + $0x410] sm:$0xff]  ;;  %1074 = vst [vmem:[%s16042_s18 + $0x1f8] sm:$0xff] %v1073_v63 }
  0x41   : > { %1076 = vst [vmem:[%s16042_s18 + $0x200] sm:$0xff] %v1075_v0  ;;  %1078 = vst [vmem:[%s16042_s18 + $0x208] sm:$0xff] %v1077_v1  ;;  %v1079_v2 = vld [vmem:[%s16037_s17 + $0x420] sm:$0xff]  ;;  %v1081_v3 = vld [vmem:[%s16037_s17 + $0x430] sm:$0xff] }
  0x42   : > { %v1083_v4 = vld [vmem:[%s16037_s17 + $0x440] sm:$0xff]  ;;  %1080 = vst [vmem:[%s16042_s18 + $0x210] sm:$0xff] %v1079_v2  ;;  %1082 = vst [vmem:[%s16042_s18 + $0x218] sm:$0xff] %v1081_v3  ;;  %v1085_v5 = vld [vmem:[%s16037_s17 + $0x450] sm:$0xff] }
  0x43   : > { %1084 = vst [vmem:[%s16042_s18 + $0x220] sm:$0xff] %v1083_v4  ;;  %v1087_v6 = vld [vmem:[%s16037_s17 + $0x460] sm:$0xff]  ;;  %v1089_v7 = vld [vmem:[%s16037_s17 + $0x470] sm:$0xff]  ;;  %1086 = vst [vmem:[%s16042_s18 + $0x228] sm:$0xff] %v1085_v5 }
  0x44   : > { %1088 = vst [vmem:[%s16042_s18 + $0x230] sm:$0xff] %v1087_v6  ;;  %1090 = vst [vmem:[%s16042_s18 + $0x238] sm:$0xff] %v1089_v7  ;;  %v1091_v8 = vld [vmem:[%s16037_s17 + $0x480] sm:$0xff]  ;;  %v1093_v9 = vld [vmem:[%s16037_s17 + $0x490] sm:$0xff] }
  0x45   : > { %v1095_v10 = vld [vmem:[%s16037_s17 + $0x4a0] sm:$0xff]  ;;  %1092 = vst [vmem:[%s16042_s18 + $0x240] sm:$0xff] %v1091_v8  ;;  %1094 = vst [vmem:[%s16042_s18 + $0x248] sm:$0xff] %v1093_v9  ;;  %v1097_v11 = vld [vmem:[%s16037_s17 + $0x4b0] sm:$0xff] }
  0x46   : > { %1096 = vst [vmem:[%s16042_s18 + $0x250] sm:$0xff] %v1095_v10  ;;  %v1099_v12 = vld [vmem:[%s16037_s17 + $0x4c0] sm:$0xff]  ;;  %v1101_v13 = vld [vmem:[%s16037_s17 + $0x4d0] sm:$0xff]  ;;  %1098 = vst [vmem:[%s16042_s18 + $0x258] sm:$0xff] %v1097_v11 }
  0x47   : > { %1100 = vst [vmem:[%s16042_s18 + $0x260] sm:$0xff] %v1099_v12  ;;  %1102 = vst [vmem:[%s16042_s18 + $0x268] sm:$0xff] %v1101_v13  ;;  %v1103_v14 = vld [vmem:[%s16037_s17 + $0x4e0] sm:$0xff]  ;;  %v1105_v15 = vld [vmem:[%s16037_s17 + $0x4f0] sm:$0xff] }
  0x48   : > { %v1107_v16 = vld [vmem:[%s16037_s17 + $0x500] sm:$0xff]  ;;  %1104 = vst [vmem:[%s16042_s18 + $0x270] sm:$0xff] %v1103_v14  ;;  %1106 = vst [vmem:[%s16042_s18 + $0x278] sm:$0xff] %v1105_v15  ;;  %v1109_v17 = vld [vmem:[%s16037_s17 + $0x510] sm:$0xff] }
  0x49   : > { %1108 = vst [vmem:[%s16042_s18 + $0x280] sm:$0xff] %v1107_v16  ;;  %v1111_v18 = vld [vmem:[%s16037_s17 + $0x520] sm:$0xff]  ;;  %v1113_v19 = vld [vmem:[%s16037_s17 + $0x530] sm:$0xff]  ;;  %1110 = vst [vmem:[%s16042_s18 + $0x288] sm:$0xff] %v1109_v17 }
  0x4a   : > { %1112 = vst [vmem:[%s16042_s18 + $0x290] sm:$0xff] %v1111_v18  ;;  %1114 = vst [vmem:[%s16042_s18 + $0x298] sm:$0xff] %v1113_v19  ;;  %v1115_v20 = vld [vmem:[%s16037_s17 + $0x540] sm:$0xff]  ;;  %v1117_v21 = vld [vmem:[%s16037_s17 + $0x550] sm:$0xff] }
  0x4b   : > { %v1119_v22 = vld [vmem:[%s16037_s17 + $0x560] sm:$0xff]  ;;  %1116 = vst [vmem:[%s16042_s18 + $0x2a0] sm:$0xff] %v1115_v20  ;;  %1118 = vst [vmem:[%s16042_s18 + $0x2a8] sm:$0xff] %v1117_v21  ;;  %v1121_v23 = vld [vmem:[%s16037_s17 + $0x570] sm:$0xff] }
  0x4c   : > { %1120 = vst [vmem:[%s16042_s18 + $0x2b0] sm:$0xff] %v1119_v22  ;;  %v1123_v24 = vld [vmem:[%s16037_s17 + $0x580] sm:$0xff]  ;;  %v1125_v25 = vld [vmem:[%s16037_s17 + $0x590] sm:$0xff]  ;;  %1122 = vst [vmem:[%s16042_s18 + $0x2b8] sm:$0xff] %v1121_v23 }
  0x4d   : > { %1124 = vst [vmem:[%s16042_s18 + $0x2c0] sm:$0xff] %v1123_v24  ;;  %1126 = vst [vmem:[%s16042_s18 + $0x2c8] sm:$0xff] %v1125_v25  ;;  %v1127_v26 = vld [vmem:[%s16037_s17 + $0x5a0] sm:$0xff]  ;;  %v1129_v27 = vld [vmem:[%s16037_s17 + $0x5b0] sm:$0xff] }
  0x4e   : > { %v1131_v28 = vld [vmem:[%s16037_s17 + $0x5c0] sm:$0xff]  ;;  %1128 = vst [vmem:[%s16042_s18 + $0x2d0] sm:$0xff] %v1127_v26  ;;  %1130 = vst [vmem:[%s16042_s18 + $0x2d8] sm:$0xff] %v1129_v27  ;;  %v1133_v29 = vld [vmem:[%s16037_s17 + $0x5d0] sm:$0xff] }
  0x4f   : > { %1132 = vst [vmem:[%s16042_s18 + $0x2e0] sm:$0xff] %v1131_v28  ;;  %v1135_v30 = vld [vmem:[%s16037_s17 + $0x5e0] sm:$0xff]  ;;  %v1137_v31 = vld [vmem:[%s16037_s17 + $0x5f0] sm:$0xff]  ;;  %1134 = vst [vmem:[%s16042_s18 + $0x2e8] sm:$0xff] %v1133_v29 }
  0x50   : > { %1136 = vst [vmem:[%s16042_s18 + $0x2f0] sm:$0xff] %v1135_v30  ;;  %1138 = vst [vmem:[%s16042_s18 + $0x2f8] sm:$0xff] %v1137_v31  ;;  %v1139_v32 = vld [vmem:[%s16037_s17 + $0x600] sm:$0xff]  ;;  %v1141_v33 = vld [vmem:[%s16037_s17 + $0x610] sm:$0xff] }
  0x51   : > { %v1143_v34 = vld [vmem:[%s16037_s17 + $0x620] sm:$0xff]  ;;  %1140 = vst [vmem:[%s16042_s18 + $0x300] sm:$0xff] %v1139_v32  ;;  %1142 = vst [vmem:[%s16042_s18 + $0x308] sm:$0xff] %v1141_v33  ;;  %v1145_v35 = vld [vmem:[%s16037_s17 + $0x630] sm:$0xff] }
  0x52   : > { %1144 = vst [vmem:[%s16042_s18 + $0x310] sm:$0xff] %v1143_v34  ;;  %v1147_v36 = vld [vmem:[%s16037_s17 + $0x640] sm:$0xff]  ;;  %v1149_v37 = vld [vmem:[%s16037_s17 + $0x650] sm:$0xff]  ;;  %1146 = vst [vmem:[%s16042_s18 + $0x318] sm:$0xff] %v1145_v35 }
  0x53   : > { %1148 = vst [vmem:[%s16042_s18 + $0x320] sm:$0xff] %v1147_v36  ;;  %1150 = vst [vmem:[%s16042_s18 + $0x328] sm:$0xff] %v1149_v37  ;;  %v1151_v38 = vld [vmem:[%s16037_s17 + $0x660] sm:$0xff]  ;;  %v1153_v39 = vld [vmem:[%s16037_s17 + $0x670] sm:$0xff] }
  0x54   : > { %v1155_v40 = vld [vmem:[%s16037_s17 + $0x680] sm:$0xff]  ;;  %1152 = vst [vmem:[%s16042_s18 + $0x330] sm:$0xff] %v1151_v38  ;;  %1154 = vst [vmem:[%s16042_s18 + $0x338] sm:$0xff] %v1153_v39  ;;  %v1157_v41 = vld [vmem:[%s16037_s17 + $0x690] sm:$0xff] }
  0x55   : > { %1156 = vst [vmem:[%s16042_s18 + $0x340] sm:$0xff] %v1155_v40  ;;  %v1159_v42 = vld [vmem:[%s16037_s17 + $0x6a0] sm:$0xff]  ;;  %v1161_v43 = vld [vmem:[%s16037_s17 + $0x6b0] sm:$0xff]  ;;  %1158 = vst [vmem:[%s16042_s18 + $0x348] sm:$0xff] %v1157_v41 }
  0x56   : > { %1160 = vst [vmem:[%s16042_s18 + $0x350] sm:$0xff] %v1159_v42  ;;  %1162 = vst [vmem:[%s16042_s18 + $0x358] sm:$0xff] %v1161_v43  ;;  %v1163_v44 = vld [vmem:[%s16037_s17 + $0x6c0] sm:$0xff]  ;;  %v1165_v45 = vld [vmem:[%s16037_s17 + $0x6d0] sm:$0xff] }
  0x57   : > { %v1167_v46 = vld [vmem:[%s16037_s17 + $0x6e0] sm:$0xff]  ;;  %1164 = vst [vmem:[%s16042_s18 + $0x360] sm:$0xff] %v1163_v44  ;;  %1166 = vst [vmem:[%s16042_s18 + $0x368] sm:$0xff] %v1165_v45  ;;  %v1169_v47 = vld [vmem:[%s16037_s17 + $0x6f0] sm:$0xff] }
  0x58   : > { %1168 = vst [vmem:[%s16042_s18 + $0x370] sm:$0xff] %v1167_v46  ;;  %v1171_v48 = vld [vmem:[%s16037_s17 + $0x700] sm:$0xff]  ;;  %v1173_v49 = vld [vmem:[%s16037_s17 + $0x710] sm:$0xff]  ;;  %1170 = vst [vmem:[%s16042_s18 + $0x378] sm:$0xff] %v1169_v47 }
  0x59   : > { %1172 = vst [vmem:[%s16042_s18 + $0x380] sm:$0xff] %v1171_v48  ;;  %1174 = vst [vmem:[%s16042_s18 + $0x388] sm:$0xff] %v1173_v49  ;;  %v1175_v50 = vld [vmem:[%s16037_s17 + $0x720] sm:$0xff]  ;;  %v1177_v51 = vld [vmem:[%s16037_s17 + $0x730] sm:$0xff] }
  0x5a   : > { %v1179_v52 = vld [vmem:[%s16037_s17 + $0x740] sm:$0xff]  ;;  %1176 = vst [vmem:[%s16042_s18 + $0x390] sm:$0xff] %v1175_v50  ;;  %1178 = vst [vmem:[%s16042_s18 + $0x398] sm:$0xff] %v1177_v51  ;;  %v1181_v53 = vld [vmem:[%s16037_s17 + $0x750] sm:$0xff] }
  0x5b   : > { %1180 = vst [vmem:[%s16042_s18 + $0x3a0] sm:$0xff] %v1179_v52  ;;  %v1183_v54 = vld [vmem:[%s16037_s17 + $0x760] sm:$0xff]  ;;  %v1185_v55 = vld [vmem:[%s16037_s17 + $0x770] sm:$0xff]  ;;  %1182 = vst [vmem:[%s16042_s18 + $0x3a8] sm:$0xff] %v1181_v53 }
  0x5c   : > { %1184 = vst [vmem:[%s16042_s18 + $0x3b0] sm:$0xff] %v1183_v54  ;;  %1186 = vst [vmem:[%s16042_s18 + $0x3b8] sm:$0xff] %v1185_v55  ;;  %v1187_v56 = vld [vmem:[%s16037_s17 + $0x780] sm:$0xff]  ;;  %v1189_v57 = vld [vmem:[%s16037_s17 + $0x790] sm:$0xff] }
  0x5d   : > { %v1191_v58 = vld [vmem:[%s16037_s17 + $0x7a0] sm:$0xff]  ;;  %1188 = vst [vmem:[%s16042_s18 + $0x3c0] sm:$0xff] %v1187_v56  ;;  %1190 = vst [vmem:[%s16042_s18 + $0x3c8] sm:$0xff] %v1189_v57  ;;  %v1193_v59 = vld [vmem:[%s16037_s17 + $0x7b0] sm:$0xff] }
  0x5e   : > { %1192 = vst [vmem:[%s16042_s18 + $0x3d0] sm:$0xff] %v1191_v58  ;;  %v1195_v60 = vld [vmem:[%s16037_s17 + $0x7c0] sm:$0xff]  ;;  %v1197_v61 = vld [vmem:[%s16037_s17 + $0x7d0] sm:$0xff]  ;;  %1194 = vst [vmem:[%s16042_s18 + $0x3d8] sm:$0xff] %v1193_v59 }
  0x5f   : > { %1196 = vst [vmem:[%s16042_s18 + $0x3e0] sm:$0xff] %v1195_v60  ;;  %1198 = vst [vmem:[%s16042_s18 + $0x3e8] sm:$0xff] %v1197_v61  ;;  %v1199_v62 = vld [vmem:[%s16037_s17 + $0x7e0] sm:$0xff]  ;;  %v1201_v63 = vld [vmem:[%s16037_s17 + $0x7f0] sm:$0xff] }
  0x60   : > { %v1203_v0 = vld [vmem:[%s16037_s17 + $0x800] sm:$0xff]  ;;  %1200 = vst [vmem:[%s16042_s18 + $0x3f0] sm:$0xff] %v1199_v62  ;;  %1202 = vst [vmem:[%s16042_s18 + $0x3f8] sm:$0xff] %v1201_v63  ;;  %v1205_v1 = vld [vmem:[%s16037_s17 + $0x810] sm:$0xff] }
  0x61   : > { %1204 = vst [vmem:[%s16042_s18 + $0x400] sm:$0xff] %v1203_v0  ;;  %v1207_v2 = vld [vmem:[%s16037_s17 + $0x820] sm:$0xff]  ;;  %v1209_v3 = vld [vmem:[%s16037_s17 + $0x830] sm:$0xff]  ;;  %1206 = vst [vmem:[%s16042_s18 + $0x408] sm:$0xff] %v1205_v1 }
  0x62   : > { %1208 = vst [vmem:[%s16042_s18 + $0x410] sm:$0xff] %v1207_v2  ;;  %1210 = vst [vmem:[%s16042_s18 + $0x418] sm:$0xff] %v1209_v3  ;;  %v1211_v4 = vld [vmem:[%s16037_s17 + $0x840] sm:$0xff]  ;;  %v1213_v5 = vld [vmem:[%s16037_s17 + $0x850] sm:$0xff] }
  0x63   : > { %v1215_v6 = vld [vmem:[%s16037_s17 + $0x860] sm:$0xff]  ;;  %1212 = vst [vmem:[%s16042_s18 + $0x420] sm:$0xff] %v1211_v4  ;;  %1214 = vst [vmem:[%s16042_s18 + $0x428] sm:$0xff] %v1213_v5  ;;  %v1217_v7 = vld [vmem:[%s16037_s17 + $0x870] sm:$0xff] }
  0x64   : > { %1216 = vst [vmem:[%s16042_s18 + $0x430] sm:$0xff] %v1215_v6  ;;  %v1219_v8 = vld [vmem:[%s16037_s17 + $0x880] sm:$0xff]  ;;  %v1221_v9 = vld [vmem:[%s16037_s17 + $0x890] sm:$0xff]  ;;  %1218 = vst [vmem:[%s16042_s18 + $0x438] sm:$0xff] %v1217_v7 }
  0x65   : > { %1220 = vst [vmem:[%s16042_s18 + $0x440] sm:$0xff] %v1219_v8  ;;  %1222 = vst [vmem:[%s16042_s18 + $0x448] sm:$0xff] %v1221_v9  ;;  %v1223_v10 = vld [vmem:[%s16037_s17 + $0x8a0] sm:$0xff]  ;;  %v1225_v11 = vld [vmem:[%s16037_s17 + $0x8b0] sm:$0xff] }
  0x66   : > { %v1227_v12 = vld [vmem:[%s16037_s17 + $0x8c0] sm:$0xff]  ;;  %1224 = vst [vmem:[%s16042_s18 + $0x450] sm:$0xff] %v1223_v10  ;;  %1226 = vst [vmem:[%s16042_s18 + $0x458] sm:$0xff] %v1225_v11  ;;  %v1229_v13 = vld [vmem:[%s16037_s17 + $0x8d0] sm:$0xff] }
  0x67   : > { %1228 = vst [vmem:[%s16042_s18 + $0x460] sm:$0xff] %v1227_v12  ;;  %v1231_v14 = vld [vmem:[%s16037_s17 + $0x8e0] sm:$0xff]  ;;  %v1233_v15 = vld [vmem:[%s16037_s17 + $0x8f0] sm:$0xff]  ;;  %1230 = vst [vmem:[%s16042_s18 + $0x468] sm:$0xff] %v1229_v13 }
  0x68   : > { %1232 = vst [vmem:[%s16042_s18 + $0x470] sm:$0xff] %v1231_v14  ;;  %1234 = vst [vmem:[%s16042_s18 + $0x478] sm:$0xff] %v1233_v15  ;;  %v1235_v16 = vld [vmem:[%s16037_s17 + $0x900] sm:$0xff]  ;;  %v1237_v17 = vld [vmem:[%s16037_s17 + $0x910] sm:$0xff] }
  0x69   : > { %v1239_v18 = vld [vmem:[%s16037_s17 + $0x920] sm:$0xff]  ;;  %1236 = vst [vmem:[%s16042_s18 + $0x480] sm:$0xff] %v1235_v16  ;;  %1238 = vst [vmem:[%s16042_s18 + $0x488] sm:$0xff] %v1237_v17  ;;  %v1241_v19 = vld [vmem:[%s16037_s17 + $0x930] sm:$0xff] }
  0x6a   : > { %1240 = vst [vmem:[%s16042_s18 + $0x490] sm:$0xff] %v1239_v18  ;;  %v1243_v20 = vld [vmem:[%s16037_s17 + $0x940] sm:$0xff]  ;;  %v1245_v21 = vld [vmem:[%s16037_s17 + $0x950] sm:$0xff]  ;;  %1242 = vst [vmem:[%s16042_s18 + $0x498] sm:$0xff] %v1241_v19 }
  0x6b   : > { %1244 = vst [vmem:[%s16042_s18 + $0x4a0] sm:$0xff] %v1243_v20  ;;  %1246 = vst [vmem:[%s16042_s18 + $0x4a8] sm:$0xff] %v1245_v21  ;;  %v1247_v22 = vld [vmem:[%s16037_s17 + $0x960] sm:$0xff]  ;;  %v1249_v23 = vld [vmem:[%s16037_s17 + $0x970] sm:$0xff] }
  0x6c   : > { %v1251_v24 = vld [vmem:[%s16037_s17 + $0x980] sm:$0xff]  ;;  %1248 = vst [vmem:[%s16042_s18 + $0x4b0] sm:$0xff] %v1247_v22  ;;  %1250 = vst [vmem:[%s16042_s18 + $0x4b8] sm:$0xff] %v1249_v23  ;;  %v1253_v25 = vld [vmem:[%s16037_s17 + $0x990] sm:$0xff] }
  0x6d   : > { %1252 = vst [vmem:[%s16042_s18 + $0x4c0] sm:$0xff] %v1251_v24  ;;  %v1255_v26 = vld [vmem:[%s16037_s17 + $0x9a0] sm:$0xff]  ;;  %v1257_v27 = vld [vmem:[%s16037_s17 + $0x9b0] sm:$0xff]  ;;  %1254 = vst [vmem:[%s16042_s18 + $0x4c8] sm:$0xff] %v1253_v25 }
  0x6e   : > { %1256 = vst [vmem:[%s16042_s18 + $0x4d0] sm:$0xff] %v1255_v26  ;;  %1258 = vst [vmem:[%s16042_s18 + $0x4d8] sm:$0xff] %v1257_v27  ;;  %v1259_v28 = vld [vmem:[%s16037_s17 + $0x9c0] sm:$0xff]  ;;  %v1261_v29 = vld [vmem:[%s16037_s17 + $0x9d0] sm:$0xff] }
  0x6f   : > { %v1263_v30 = vld [vmem:[%s16037_s17 + $0x9e0] sm:$0xff]  ;;  %1260 = vst [vmem:[%s16042_s18 + $0x4e0] sm:$0xff] %v1259_v28  ;;  %1262 = vst [vmem:[%s16042_s18 + $0x4e8] sm:$0xff] %v1261_v29  ;;  %v1265_v31 = vld [vmem:[%s16037_s17 + $0x9f0] sm:$0xff] }
  0x70   : > { %1264 = vst [vmem:[%s16042_s18 + $0x4f0] sm:$0xff] %v1263_v30  ;;  %v1267_v32 = vld [vmem:[%s16037_s17 + $0xa00] sm:$0xff]  ;;  %v1269_v33 = vld [vmem:[%s16037_s17 + $0xa10] sm:$0xff]  ;;  %1266 = vst [vmem:[%s16042_s18 + $0x4f8] sm:$0xff] %v1265_v31 }
  0x71   : > { %1268 = vst [vmem:[%s16042_s18 + $0x500] sm:$0xff] %v1267_v32  ;;  %1270 = vst [vmem:[%s16042_s18 + $0x508] sm:$0xff] %v1269_v33  ;;  %v1271_v34 = vld [vmem:[%s16037_s17 + $0xa20] sm:$0xff]  ;;  %v1273_v35 = vld [vmem:[%s16037_s17 + $0xa30] sm:$0xff] }
  0x72   : > { %v1275_v36 = vld [vmem:[%s16037_s17 + $0xa40] sm:$0xff]  ;;  %1272 = vst [vmem:[%s16042_s18 + $0x510] sm:$0xff] %v1271_v34  ;;  %1274 = vst [vmem:[%s16042_s18 + $0x518] sm:$0xff] %v1273_v35  ;;  %v1277_v37 = vld [vmem:[%s16037_s17 + $0xa50] sm:$0xff] }
  0x73   : > { %1276 = vst [vmem:[%s16042_s18 + $0x520] sm:$0xff] %v1275_v36  ;;  %v1279_v38 = vld [vmem:[%s16037_s17 + $0xa60] sm:$0xff]  ;;  %v1281_v39 = vld [vmem:[%s16037_s17 + $0xa70] sm:$0xff]  ;;  %1278 = vst [vmem:[%s16042_s18 + $0x528] sm:$0xff] %v1277_v37 }
  0x74   : > { %1280 = vst [vmem:[%s16042_s18 + $0x530] sm:$0xff] %v1279_v38  ;;  %1282 = vst [vmem:[%s16042_s18 + $0x538] sm:$0xff] %v1281_v39  ;;  %v1283_v40 = vld [vmem:[%s16037_s17 + $0xa80] sm:$0xff]  ;;  %v1285_v41 = vld [vmem:[%s16037_s17 + $0xa90] sm:$0xff] }
  0x75   : > { %v1287_v42 = vld [vmem:[%s16037_s17 + $0xaa0] sm:$0xff]  ;;  %1284 = vst [vmem:[%s16042_s18 + $0x540] sm:$0xff] %v1283_v40  ;;  %1286 = vst [vmem:[%s16042_s18 + $0x548] sm:$0xff] %v1285_v41  ;;  %v1289_v43 = vld [vmem:[%s16037_s17 + $0xab0] sm:$0xff] }
  0x76   : > { %1288 = vst [vmem:[%s16042_s18 + $0x550] sm:$0xff] %v1287_v42  ;;  %v1291_v44 = vld [vmem:[%s16037_s17 + $0xac0] sm:$0xff]  ;;  %v1293_v45 = vld [vmem:[%s16037_s17 + $0xad0] sm:$0xff]  ;;  %1290 = vst [vmem:[%s16042_s18 + $0x558] sm:$0xff] %v1289_v43 }
  0x77   : > { %1292 = vst [vmem:[%s16042_s18 + $0x560] sm:$0xff] %v1291_v44  ;;  %1294 = vst [vmem:[%s16042_s18 + $0x568] sm:$0xff] %v1293_v45  ;;  %v1295_v46 = vld [vmem:[%s16037_s17 + $0xae0] sm:$0xff]  ;;  %v1297_v47 = vld [vmem:[%s16037_s17 + $0xaf0] sm:$0xff] }
  0x78   : > { %v1299_v48 = vld [vmem:[%s16037_s17 + $0xb00] sm:$0xff]  ;;  %1296 = vst [vmem:[%s16042_s18 + $0x570] sm:$0xff] %v1295_v46  ;;  %1298 = vst [vmem:[%s16042_s18 + $0x578] sm:$0xff] %v1297_v47  ;;  %v1301_v49 = vld [vmem:[%s16037_s17 + $0xb10] sm:$0xff] }
  0x79   : > { %1300 = vst [vmem:[%s16042_s18 + $0x580] sm:$0xff] %v1299_v48  ;;  %v1303_v50 = vld [vmem:[%s16037_s17 + $0xb20] sm:$0xff]  ;;  %v1305_v51 = vld [vmem:[%s16037_s17 + $0xb30] sm:$0xff]  ;;  %1302 = vst [vmem:[%s16042_s18 + $0x588] sm:$0xff] %v1301_v49 }
  0x7a   : > { %1304 = vst [vmem:[%s16042_s18 + $0x590] sm:$0xff] %v1303_v50  ;;  %1306 = vst [vmem:[%s16042_s18 + $0x598] sm:$0xff] %v1305_v51  ;;  %v1307_v52 = vld [vmem:[%s16037_s17 + $0xb40] sm:$0xff]  ;;  %v1309_v53 = vld [vmem:[%s16037_s17 + $0xb50] sm:$0xff] }
  0x7b   : > { %v1311_v54 = vld [vmem:[%s16037_s17 + $0xb60] sm:$0xff]  ;;  %1308 = vst [vmem:[%s16042_s18 + $0x5a0] sm:$0xff] %v1307_v52  ;;  %1310 = vst [vmem:[%s16042_s18 + $0x5a8] sm:$0xff] %v1309_v53  ;;  %v1313_v55 = vld [vmem:[%s16037_s17 + $0xb70] sm:$0xff] }
  0x7c   : > { %1312 = vst [vmem:[%s16042_s18 + $0x5b0] sm:$0xff] %v1311_v54  ;;  %v1315_v56 = vld [vmem:[%s16037_s17 + $0xb80] sm:$0xff]  ;;  %v1317_v57 = vld [vmem:[%s16037_s17 + $0xb90] sm:$0xff]  ;;  %1314 = vst [vmem:[%s16042_s18 + $0x5b8] sm:$0xff] %v1313_v55 }
  0x7d   : > { %1316 = vst [vmem:[%s16042_s18 + $0x5c0] sm:$0xff] %v1315_v56  ;;  %1318 = vst [vmem:[%s16042_s18 + $0x5c8] sm:$0xff] %v1317_v57  ;;  %v1319_v58 = vld [vmem:[%s16037_s17 + $0xba0] sm:$0xff]  ;;  %v1321_v59 = vld [vmem:[%s16037_s17 + $0xbb0] sm:$0xff] }
  0x7e   : > { %v1323_v60 = vld [vmem:[%s16037_s17 + $0xbc0] sm:$0xff]  ;;  %1320 = vst [vmem:[%s16042_s18 + $0x5d0] sm:$0xff] %v1319_v58  ;;  %1322 = vst [vmem:[%s16042_s18 + $0x5d8] sm:$0xff] %v1321_v59  ;;  %v1325_v61 = vld [vmem:[%s16037_s17 + $0xbd0] sm:$0xff] }
  0x7f   : > { %1324 = vst [vmem:[%s16042_s18 + $0x5e0] sm:$0xff] %v1323_v60  ;;  %v1327_v62 = vld [vmem:[%s16037_s17 + $0xbe0] sm:$0xff]  ;;  %v1329_v63 = vld [vmem:[%s16037_s17 + $0xbf0] sm:$0xff]  ;;  %1326 = vst [vmem:[%s16042_s18 + $0x5e8] sm:$0xff] %v1325_v61 }
  0x80   : > { %1328 = vst [vmem:[%s16042_s18 + $0x5f0] sm:$0xff] %v1327_v62  ;;  %1330 = vst [vmem:[%s16042_s18 + $0x5f8] sm:$0xff] %v1329_v63  ;;  %v1331_v0 = vld [vmem:[%s16037_s17 + $0xc00] sm:$0xff]  ;;  %v1333_v1 = vld [vmem:[%s16037_s17 + $0xc10] sm:$0xff] }
  0x81   : > { %v1335_v2 = vld [vmem:[%s16037_s17 + $0xc20] sm:$0xff]  ;;  %1332 = vst [vmem:[%s16042_s18 + $0x600] sm:$0xff] %v1331_v0  ;;  %1334 = vst [vmem:[%s16042_s18 + $0x608] sm:$0xff] %v1333_v1  ;;  %v1337_v3 = vld [vmem:[%s16037_s17 + $0xc30] sm:$0xff] }
  0x82   : > { %1336 = vst [vmem:[%s16042_s18 + $0x610] sm:$0xff] %v1335_v2  ;;  %v1339_v4 = vld [vmem:[%s16037_s17 + $0xc40] sm:$0xff]  ;;  %v1341_v5 = vld [vmem:[%s16037_s17 + $0xc50] sm:$0xff]  ;;  %1338 = vst [vmem:[%s16042_s18 + $0x618] sm:$0xff] %v1337_v3 }
  0x83   : > { %1340 = vst [vmem:[%s16042_s18 + $0x620] sm:$0xff] %v1339_v4  ;;  %1342 = vst [vmem:[%s16042_s18 + $0x628] sm:$0xff] %v1341_v5  ;;  %v1343_v6 = vld [vmem:[%s16037_s17 + $0xc60] sm:$0xff]  ;;  %v1345_v7 = vld [vmem:[%s16037_s17 + $0xc70] sm:$0xff] }
  0x84   : > { %v1347_v8 = vld [vmem:[%s16037_s17 + $0xc80] sm:$0xff]  ;;  %1344 = vst [vmem:[%s16042_s18 + $0x630] sm:$0xff] %v1343_v6  ;;  %1346 = vst [vmem:[%s16042_s18 + $0x638] sm:$0xff] %v1345_v7  ;;  %v1349_v9 = vld [vmem:[%s16037_s17 + $0xc90] sm:$0xff] }
  0x85   : > { %1348 = vst [vmem:[%s16042_s18 + $0x640] sm:$0xff] %v1347_v8  ;;  %v1351_v10 = vld [vmem:[%s16037_s17 + $0xca0] sm:$0xff]  ;;  %v1353_v11 = vld [vmem:[%s16037_s17 + $0xcb0] sm:$0xff]  ;;  %1350 = vst [vmem:[%s16042_s18 + $0x648] sm:$0xff] %v1349_v9 }
  0x86   : > { %1352 = vst [vmem:[%s16042_s18 + $0x650] sm:$0xff] %v1351_v10  ;;  %1354 = vst [vmem:[%s16042_s18 + $0x658] sm:$0xff] %v1353_v11  ;;  %v1355_v12 = vld [vmem:[%s16037_s17 + $0xcc0] sm:$0xff]  ;;  %v1357_v13 = vld [vmem:[%s16037_s17 + $0xcd0] sm:$0xff] }
  0x87   : > { %v1359_v14 = vld [vmem:[%s16037_s17 + $0xce0] sm:$0xff]  ;;  %1356 = vst [vmem:[%s16042_s18 + $0x660] sm:$0xff] %v1355_v12  ;;  %1358 = vst [vmem:[%s16042_s18 + $0x668] sm:$0xff] %v1357_v13  ;;  %v1361_v15 = vld [vmem:[%s16037_s17 + $0xcf0] sm:$0xff] }
  0x88   : > { %1360 = vst [vmem:[%s16042_s18 + $0x670] sm:$0xff] %v1359_v14  ;;  %v1363_v16 = vld [vmem:[%s16037_s17 + $0xd00] sm:$0xff]  ;;  %v1365_v17 = vld [vmem:[%s16037_s17 + $0xd10] sm:$0xff]  ;;  %1362 = vst [vmem:[%s16042_s18 + $0x678] sm:$0xff] %v1361_v15 }
  0x89   : > { %1364 = vst [vmem:[%s16042_s18 + $0x680] sm:$0xff] %v1363_v16  ;;  %1366 = vst [vmem:[%s16042_s18 + $0x688] sm:$0xff] %v1365_v17  ;;  %v1367_v18 = vld [vmem:[%s16037_s17 + $0xd20] sm:$0xff]  ;;  %v1369_v19 = vld [vmem:[%s16037_s17 + $0xd30] sm:$0xff] }
  0x8a   : > { %v1371_v20 = vld [vmem:[%s16037_s17 + $0xd40] sm:$0xff]  ;;  %1368 = vst [vmem:[%s16042_s18 + $0x690] sm:$0xff] %v1367_v18  ;;  %1370 = vst [vmem:[%s16042_s18 + $0x698] sm:$0xff] %v1369_v19  ;;  %v1373_v21 = vld [vmem:[%s16037_s17 + $0xd50] sm:$0xff] }
  0x8b   : > { %1372 = vst [vmem:[%s16042_s18 + $0x6a0] sm:$0xff] %v1371_v20  ;;  %v1375_v22 = vld [vmem:[%s16037_s17 + $0xd60] sm:$0xff]  ;;  %v1377_v23 = vld [vmem:[%s16037_s17 + $0xd70] sm:$0xff]  ;;  %1374 = vst [vmem:[%s16042_s18 + $0x6a8] sm:$0xff] %v1373_v21 }
  0x8c   : > { %1376 = vst [vmem:[%s16042_s18 + $0x6b0] sm:$0xff] %v1375_v22  ;;  %1378 = vst [vmem:[%s16042_s18 + $0x6b8] sm:$0xff] %v1377_v23  ;;  %v1379_v24 = vld [vmem:[%s16037_s17 + $0xd80] sm:$0xff]  ;;  %v1381_v25 = vld [vmem:[%s16037_s17 + $0xd90] sm:$0xff] }
  0x8d   : > { %v1383_v26 = vld [vmem:[%s16037_s17 + $0xda0] sm:$0xff]  ;;  %1380 = vst [vmem:[%s16042_s18 + $0x6c0] sm:$0xff] %v1379_v24  ;;  %1382 = vst [vmem:[%s16042_s18 + $0x6c8] sm:$0xff] %v1381_v25  ;;  %v1385_v27 = vld [vmem:[%s16037_s17 + $0xdb0] sm:$0xff] }
  0x8e   : > { %1384 = vst [vmem:[%s16042_s18 + $0x6d0] sm:$0xff] %v1383_v26  ;;  %v1387_v28 = vld [vmem:[%s16037_s17 + $0xdc0] sm:$0xff]  ;;  %v1389_v29 = vld [vmem:[%s16037_s17 + $0xdd0] sm:$0xff]  ;;  %1386 = vst [vmem:[%s16042_s18 + $0x6d8] sm:$0xff] %v1385_v27 }
  0x8f   : > { %1388 = vst [vmem:[%s16042_s18 + $0x6e0] sm:$0xff] %v1387_v28  ;;  %1390 = vst [vmem:[%s16042_s18 + $0x6e8] sm:$0xff] %v1389_v29  ;;  %v1391_v30 = vld [vmem:[%s16037_s17 + $0xde0] sm:$0xff]  ;;  %v1393_v31 = vld [vmem:[%s16037_s17 + $0xdf0] sm:$0xff] }
  0x90   : > { %v1395_v32 = vld [vmem:[%s16037_s17 + $0xe00] sm:$0xff]  ;;  %1392 = vst [vmem:[%s16042_s18 + $0x6f0] sm:$0xff] %v1391_v30  ;;  %1394 = vst [vmem:[%s16042_s18 + $0x6f8] sm:$0xff] %v1393_v31  ;;  %v1397_v33 = vld [vmem:[%s16037_s17 + $0xe10] sm:$0xff] }
  0x91   : > { %1396 = vst [vmem:[%s16042_s18 + $0x700] sm:$0xff] %v1395_v32  ;;  %v1399_v34 = vld [vmem:[%s16037_s17 + $0xe20] sm:$0xff]  ;;  %v1401_v35 = vld [vmem:[%s16037_s17 + $0xe30] sm:$0xff]  ;;  %1398 = vst [vmem:[%s16042_s18 + $0x708] sm:$0xff] %v1397_v33 }
  0x92   : > { %1400 = vst [vmem:[%s16042_s18 + $0x710] sm:$0xff] %v1399_v34  ;;  %1402 = vst [vmem:[%s16042_s18 + $0x718] sm:$0xff] %v1401_v35  ;;  %v1403_v36 = vld [vmem:[%s16037_s17 + $0xe40] sm:$0xff]  ;;  %v1405_v37 = vld [vmem:[%s16037_s17 + $0xe50] sm:$0xff] }
  0x93   : > { %v1407_v38 = vld [vmem:[%s16037_s17 + $0xe60] sm:$0xff]  ;;  %1404 = vst [vmem:[%s16042_s18 + $0x720] sm:$0xff] %v1403_v36  ;;  %1406 = vst [vmem:[%s16042_s18 + $0x728] sm:$0xff] %v1405_v37  ;;  %v1409_v39 = vld [vmem:[%s16037_s17 + $0xe70] sm:$0xff] }
  0x94   : > { %1408 = vst [vmem:[%s16042_s18 + $0x730] sm:$0xff] %v1407_v38  ;;  %v1411_v40 = vld [vmem:[%s16037_s17 + $0xe80] sm:$0xff]  ;;  %v1413_v41 = vld [vmem:[%s16037_s17 + $0xe90] sm:$0xff]  ;;  %1410 = vst [vmem:[%s16042_s18 + $0x738] sm:$0xff] %v1409_v39 }
  0x95   : > { %1412 = vst [vmem:[%s16042_s18 + $0x740] sm:$0xff] %v1411_v40  ;;  %1414 = vst [vmem:[%s16042_s18 + $0x748] sm:$0xff] %v1413_v41  ;;  %v1415_v42 = vld [vmem:[%s16037_s17 + $0xea0] sm:$0xff]  ;;  %v1417_v43 = vld [vmem:[%s16037_s17 + $0xeb0] sm:$0xff] }
  0x96   : > { %v1419_v44 = vld [vmem:[%s16037_s17 + $0xec0] sm:$0xff]  ;;  %1416 = vst [vmem:[%s16042_s18 + $0x750] sm:$0xff] %v1415_v42  ;;  %1418 = vst [vmem:[%s16042_s18 + $0x758] sm:$0xff] %v1417_v43  ;;  %v1421_v45 = vld [vmem:[%s16037_s17 + $0xed0] sm:$0xff] }
  0x97   : > { %1420 = vst [vmem:[%s16042_s18 + $0x760] sm:$0xff] %v1419_v44  ;;  %v1423_v46 = vld [vmem:[%s16037_s17 + $0xee0] sm:$0xff]  ;;  %v1425_v47 = vld [vmem:[%s16037_s17 + $0xef0] sm:$0xff]  ;;  %1422 = vst [vmem:[%s16042_s18 + $0x768] sm:$0xff] %v1421_v45 }
  0x98   : > { %1424 = vst [vmem:[%s16042_s18 + $0x770] sm:$0xff] %v1423_v46  ;;  %1426 = vst [vmem:[%s16042_s18 + $0x778] sm:$0xff] %v1425_v47  ;;  %v1427_v48 = vld [vmem:[%s16037_s17 + $0xf00] sm:$0xff]  ;;  %v1429_v49 = vld [vmem:[%s16037_s17 + $0xf10] sm:$0xff] }
  0x99   : > { %v1431_v50 = vld [vmem:[%s16037_s17 + $0xf20] sm:$0xff]  ;;  %1428 = vst [vmem:[%s16042_s18 + $0x780] sm:$0xff] %v1427_v48  ;;  %1430 = vst [vmem:[%s16042_s18 + $0x788] sm:$0xff] %v1429_v49  ;;  %v1433_v51 = vld [vmem:[%s16037_s17 + $0xf30] sm:$0xff] }
  0x9a   : > { %1432 = vst [vmem:[%s16042_s18 + $0x790] sm:$0xff] %v1431_v50  ;;  %v1435_v52 = vld [vmem:[%s16037_s17 + $0xf40] sm:$0xff]  ;;  %v1437_v53 = vld [vmem:[%s16037_s17 + $0xf50] sm:$0xff]  ;;  %1434 = vst [vmem:[%s16042_s18 + $0x798] sm:$0xff] %v1433_v51 }
  0x9b   : > { %1436 = vst [vmem:[%s16042_s18 + $0x7a0] sm:$0xff] %v1435_v52  ;;  %1438 = vst [vmem:[%s16042_s18 + $0x7a8] sm:$0xff] %v1437_v53  ;;  %v1439_v54 = vld [vmem:[%s16037_s17 + $0xf60] sm:$0xff]  ;;  %v1441_v55 = vld [vmem:[%s16037_s17 + $0xf70] sm:$0xff] }
  0x9c   : > { %v1443_v56 = vld [vmem:[%s16037_s17 + $0xf80] sm:$0xff]  ;;  %1440 = vst [vmem:[%s16042_s18 + $0x7b0] sm:$0xff] %v1439_v54  ;;  %1442 = vst [vmem:[%s16042_s18 + $0x7b8] sm:$0xff] %v1441_v55  ;;  %v1445_v57 = vld [vmem:[%s16037_s17 + $0xf90] sm:$0xff] }
  0x9d   : > { %1444 = vst [vmem:[%s16042_s18 + $0x7c0] sm:$0xff] %v1443_v56  ;;  %v1447_v58 = vld [vmem:[%s16037_s17 + $0xfa0] sm:$0xff]  ;;  %v1449_v59 = vld [vmem:[%s16037_s17 + $0xfb0] sm:$0xff]  ;;  %1446 = vst [vmem:[%s16042_s18 + $0x7c8] sm:$0xff] %v1445_v57 }
  0x9e   : > { %1448 = vst [vmem:[%s16042_s18 + $0x7d0] sm:$0xff] %v1447_v58  ;;  %1450 = vst [vmem:[%s16042_s18 + $0x7d8] sm:$0xff] %v1449_v59  ;;  %v1451_v60 = vld [vmem:[%s16037_s17 + $0xfc0] sm:$0xff]  ;;  %v1453_v61 = vld [vmem:[%s16037_s17 + $0xfd0] sm:$0xff] }
  0x9f   : > { %v1455_v62 = vld [vmem:[%s16037_s17 + $0xfe0] sm:$0xff]  ;;  %1452 = vst [vmem:[%s16042_s18 + $0x7e0] sm:$0xff] %v1451_v60  ;;  %1454 = vst [vmem:[%s16042_s18 + $0x7e8] sm:$0xff] %v1453_v61  ;;  %v1457_v63 = vld [vmem:[%s16037_s17 + $0xff0] sm:$0xff] }
  0xa0   : > { %1456 = vst [vmem:[%s16042_s18 + $0x7f0] sm:$0xff] %v1455_v62  ;;  %1458 = vst [vmem:[%s16042_s18 + $0x7f8] sm:$0xff] %v1457_v63 }
  0xa1 PF: > { %p12253_p7 = scmp.ge.s32.totalorder %s15903_s14, 1  ;;  %p1480_p8 = scmp.lt.s32.totalorder %s15903_s14, 5 }
  0xa3   : > { %p1481_p9 = pnand %p12253_p7, %p1480_p8 }
  0xa4   : > { %s1487_s6 = sand.u32 (!%p1481_p9), 1, %s15879_s25   ;;  %s12255_s8 = sshll.u32 (!%p1481_p9), %s15891_s28, 1 }
  0xa5   : > { %1484 = sbr.rel (%p1481_p9) target bundleno = 2359 (0x937), region = 106  ;;  %s12254_s12 = sshll.u32 (!%p1481_p9), %s1487_s6, 11 }
  0xa6   : > { %p1541_p10 = scmp.lt.s32.totalorder (!%p1481_p9), %s12255_s8, 3  ;;  %s12256_s15 = sshll.u32 (!%p1481_p9), %s15891_s28, 5 }
  0xa7   : > { %p1546_p11 = scmp.lt.s32.totalorder (!%p1481_p9), %s12256_s15, 63  ;;  %p1551_p12 = scmp.lt.s32.totalorder (!%p1481_p9), %s15891_s28, 1 }
  0xa8   : > { %s16576_s30 = scalar_lea.vmem (!%p1481_p9), [#allocation5], %s12254_s12  ;;  %p12259_p13 = scmp.ne.s32.totalorder (!%p1481_p9), %s15887_s27, 0 }
  0xaa   : > { %s21354_s8 = smov (!%p1541_p10, %s12255_s8), 3  ;;  %s21356_s15 = smov (!%p1546_p11, %s12256_s15), 63 }
  0xab   : > { %s21358_s28 = smov (!%p1551_p12, %s15891_s28), 1  ;;  %s12257_s22 = sshll.u32 %s21356_s15, 3 }
  0xac   : > { %s16569_s25 = scalar_lea.vmem %s21016_s11, %s12257_s22  ;;  %s12258_s17 = sshll.u32 %s21358_s28, 3 }
  0xad   : > { %s16574_s9 = scalar_lea.vmem %s21018_s13, %s12258_s17  ;;  %1559 = sbr.rel (%p12259_p13) target bundleno = 1666 (0x682), region = 114 }
  0xb2   : > { %v1695_v0 = vld [vmem:[%s21006_s1 + $0x38] sm:$0xff]  ;;  %v1694_v1 = vld [vmem:[%s21006_s1 + $0x30] sm:$0xff]  ;;  %vm1696_vm0 = vcmask 523264   ;;  %v1693_v2 = vld [vmem:[%s21006_s1 + $0x28] sm:$0xff]  ;;  %s21190_s19 = sld [smem:[#allocation57_spill]] }
  0xb3   : > { %14161 = vmatprep.subr.mxu0 %v1695_v0  ;;  %15377 = vmatprep.subr.mxu1 %v1695_v0  ;;  %v1560_v3 = vld [vmem:[%s21005_s0] sm:$0xff]  ;;  %v1691_v5 = vld [vmem:[%s21006_s1 + $0x18] sm:$0xff]  ;;  %v1690_v6 = vld [vmem:[%s21006_s1 + $0x10] sm:$0xff]  ;;  %s21290_s17 = sld [smem:[#allocation58_spill]] }
  0xb4   : > { %14162 = vmatpush3.msra.mxu0 %v1695_v0  ;;  %15385 = vmatpush3.msra.mxu1 %v1695_v0  ;;  %v1692_v4 = vld [vmem:[%s21006_s1 + $0x20] sm:$0xff]  ;;  %v1689_v7 = vld [vmem:[%s21006_s1 + $0x8] sm:$0xff]  ;;  %v1562_v10 = vld [vmem:[%s21005_s0 + $0x10] sm:$0xff] }
  0xb5   : > { %14163 = vmatprep.subr.mxu0 %v1694_v1  ;;  %14177 = vmatprep.mubr.msk.f32.mxu0 %vm1696_vm0, %v1560_v3  ;;  %v1688_v8 = vld [vmem:[%s21006_s1] sm:$0xff]  ;;  %v1561_v9 = vld [vmem:[%s21005_s0 + $0x8] sm:$0xff]  ;;  %v1658_v13 = vld [vmem:[%s21005_s0 + $0x310] sm:$0xff] }
  0xb6   : > { %14164 = vmatpush3.msra.mxu0 %v1694_v1  ;;  %15378 = vmatprep.subr.mxu1 %v1694_v1  ;;  %v1656_v11 = vld [vmem:[%s21005_s0 + $0x300] sm:$0xff]  ;;  %v1657_v12 = vld [vmem:[%s21005_s0 + $0x308] sm:$0xff]  ;;  %v1563_v14 = vld [vmem:[%s21005_s0 + $0x18] sm:$0xff] }
  0xb7   : > { %14165 = vmatprep.subr.mxu0 %v1693_v2  ;;  %15386 = vmatpush3.msra.mxu1 %v1694_v1  ;;  %v1564_v15 = vld [vmem:[%s21005_s0 + $0x20] sm:$0xff]  ;;  %v1659_v16 = vld [vmem:[%s21005_s0 + $0x318] sm:$0xff]  ;;  %v1565_v18 = vld [vmem:[%s21005_s0 + $0x28] sm:$0xff] }
  0xb8   : > { %14166 = vmatpush3.msra.mxu0 %v1693_v2  ;;  %15379 = vmatprep.subr.mxu1 %v1693_v2  ;;  %v1660_v17 = vld [vmem:[%s21005_s0 + $0x320] sm:$0xff]  ;;  %v1566_v19 = vld [vmem:[%s21005_s0 + $0x30] sm:$0xff]  ;;  %v1661_v20 = vld [vmem:[%s21005_s0 + $0x328] sm:$0xff] }
  0xb9   : > { %14167 = vmatprep.subr.mxu0 %v1692_v4  ;;  %15387 = vmatpush3.msra.mxu1 %v1693_v2  ;;  %v1662_v21 = vld [vmem:[%s21005_s0 + $0x330] sm:$0xff]  ;;  %v1567_v22 = vld [vmem:[%s21005_s0 + $0x38] sm:$0xff]  ;;  %v1568_v23 = vld [vmem:[%s21005_s0 + $0x40] sm:$0xff] }
  0xba   : > { %14168 = vmatpush3.msra.mxu0 %v1692_v4  ;;  %15380 = vmatprep.subr.mxu1 %v1692_v4  ;;  %v1663_v24 = vld [vmem:[%s21005_s0 + $0x338] sm:$0xff]  ;;  %v1664_v25 = vld [vmem:[%s21005_s0 + $0x340] sm:$0xff]  ;;  %v1569_v26 = vld [vmem:[%s21005_s0 + $0x48] sm:$0xff] }
  0xbb   : > { %14169 = vmatprep.subr.mxu0 %v1691_v5  ;;  %15388 = vmatpush3.msra.mxu1 %v1692_v4  ;;  %v1570_v27 = vld [vmem:[%s21005_s0 + $0x50] sm:$0xff]  ;;  %v1665_v28 = vld [vmem:[%s21005_s0 + $0x348] sm:$0xff]  ;;  %v1571_v30 = vld [vmem:[%s21005_s0 + $0x58] sm:$0xff] }
  0xbc   : > { %14170 = vmatpush3.msra.mxu0 %v1691_v5  ;;  %15381 = vmatprep.subr.mxu1 %v1691_v5  ;;  %v1666_v29 = vld [vmem:[%s21005_s0 + $0x350] sm:$0xff]  ;;  %v1572_v31 = vld [vmem:[%s21005_s0 + $0x60] sm:$0xff]  ;;  %v1667_v32 = vld [vmem:[%s21005_s0 + $0x358] sm:$0xff] }
  0xbd   : > { %14171 = vmatprep.subr.mxu0 %v1690_v6  ;;  %15389 = vmatpush3.msra.mxu1 %v1691_v5  ;;  %v1668_v33 = vld [vmem:[%s21005_s0 + $0x360] sm:$0xff]  ;;  %v1573_v34 = vld [vmem:[%s21005_s0 + $0x68] sm:$0xff]  ;;  %v1574_v35 = vld [vmem:[%s21005_s0 + $0x70] sm:$0xff] }
  0xbe   : > { %14172 = vmatpush3.msra.mxu0 %v1690_v6  ;;  %15382 = vmatprep.subr.mxu1 %v1690_v6  ;;  %v1669_v36 = vld [vmem:[%s21005_s0 + $0x368] sm:$0xff]  ;;  %v1670_v37 = vld [vmem:[%s21005_s0 + $0x370] sm:$0xff]  ;;  %v1575_v38 = vld [vmem:[%s21005_s0 + $0x78] sm:$0xff] }
  0xbf   : > { %14173 = vmatprep.subr.mxu0 %v1689_v7  ;;  %15390 = vmatpush3.msra.mxu1 %v1690_v6  ;;  %v1576_v39 = vld [vmem:[%s21005_s0 + $0x80] sm:$0xff]  ;;  %v1671_v40 = vld [vmem:[%s21005_s0 + $0x378] sm:$0xff]  ;;  %v1577_v42 = vld [vmem:[%s21005_s0 + $0x88] sm:$0xff] }
  0xc0   : > { %14174 = vmatpush3.msra.mxu0 %v1689_v7  ;;  %15383 = vmatprep.subr.mxu1 %v1689_v7  ;;  %v1672_v41 = vld [vmem:[%s21005_s0 + $0x380] sm:$0xff]  ;;  %v1578_v43 = vld [vmem:[%s21005_s0 + $0x90] sm:$0xff]  ;;  %v1673_v44 = vld [vmem:[%s21005_s0 + $0x388] sm:$0xff] }
  0xc1   : > { %14175 = vmatprep.subr.mxu0 %v1688_v8  ;;  %15391 = vmatpush3.msra.mxu1 %v1689_v7  ;;  %v1674_v45 = vld [vmem:[%s21005_s0 + $0x390] sm:$0xff]  ;;  %v1579_v46 = vld [vmem:[%s21005_s0 + $0x98] sm:$0xff]  ;;  %v1580_v47 = vld [vmem:[%s21005_s0 + $0xa0] sm:$0xff] }
  0xc2   : > { %14176 = vmatpush3.msra.mxu0 %v1688_v8  ;;  %15384 = vmatprep.subr.mxu1 %v1688_v8  ;;  %v1675_v48 = vld [vmem:[%s21005_s0 + $0x398] sm:$0xff]  ;;  %v1676_v49 = vld [vmem:[%s21005_s0 + $0x3a0] sm:$0xff]  ;;  %v1581_v50 = vld [vmem:[%s21005_s0 + $0xa8] sm:$0xff] }
  0xc3   : > { %14178 = vmatmul.mubr.msk.f32.vlgmr.msra.gmra.mxu0 %vm1696_vm0, %v1561_v9  ;;  %15392 = vmatpush3.msra.mxu1 %v1688_v8  ;;  %v1582_v51 = vld [vmem:[%s21005_s0 + $0xb0] sm:$0xff]  ;;  %v1677_v52 = vld [vmem:[%s21005_s0 + $0x3a8] sm:$0xff]  ;;  %v1583_v54 = vld [vmem:[%s21005_s0 + $0xb8] sm:$0xff] }
  0xc4   : > { %14180 = vmatprep.mubr.msk.f32.mxu0 %vm1696_vm0, %v1562_v10  ;;  %14321 = vmatprep.mubr.msk.f32.mxu1 %vm1696_vm0, %v1656_v11  ;;  %v1678_v53 = vld [vmem:[%s21005_s0 + $0x3b0] sm:$0xff]  ;;  %v1584_v55 = vld [vmem:[%s21005_s0 + $0xc0] sm:$0xff]  ;;  %v1679_v56 = vld [vmem:[%s21005_s0 + $0x3b8] sm:$0xff] }
  0xc5   : > { %14322 = vmatmul.mubr.msk.f32.vlgmr.msra.gmra.mxu1 %vm1696_vm0, %v1657_v12  ;;  %v1680_v57 = vld [vmem:[%s21005_s0 + $0x3c0] sm:$0xff]  ;;  %v1585_v58 = vld [vmem:[%s21005_s0 + $0xc8] sm:$0xff]  ;;  %v1586_v59 = vld [vmem:[%s21005_s0 + $0xd0] sm:$0xff] }
  0xc6   : > { %14324 = vmatprep.mubr.msk.f32.mxu1 %vm1696_vm0, %v1658_v13  ;;  %v1681_v60 = vld [vmem:[%s21005_s0 + $0x3c8] sm:$0xff]  ;;  %v1682_v61 = vld [vmem:[%s21005_s0 + $0x3d0] sm:$0xff]  ;;  %v1587_v62 = vld [vmem:[%s21005_s0 + $0xd8] sm:$0xff] }
  0xc7   : > { %14181 = vmatmul.mubr.msk.f32.gmra.mxu0 %vm1696_vm0, %v1563_v14  ;;  %v1588_v63 = vld [vmem:[%s21005_s0 + $0xe0] sm:$0xff]  ;;  %v1683_v0 = vld [vmem:[%s21005_s0 + $0x3d8] sm:$0xff]  ;;  %v1589_v2 = vld [vmem:[%s21005_s0 + $0xe8] sm:$0xff] }
  0xc8   : > { %14183 = vmatprep.mubr.msk.f32.mxu0 %vm1696_vm0, %v1564_v15  ;;  %v1684_v1 = vld [vmem:[%s21005_s0 + $0x3e0] sm:$0xff]  ;;  %v1590_v3 = vld [vmem:[%s21005_s0 + $0xf0] sm:$0xff]  ;;  %v1685_v4 = vld [vmem:[%s21005_s0 + $0x3e8] sm:$0xff] }
  0xc9   : > { %14325 = vmatmul.mubr.msk.f32.gmra.mxu1 %vm1696_vm0, %v1659_v16  ;;  %v1686_v5 = vld [vmem:[%s21005_s0 + $0x3f0] sm:$0xff]  ;;  %v1591_v6 = vld [vmem:[%s21005_s0 + $0xf8] sm:$0xff]  ;;  %v1592_v7 = vld [vmem:[%s21005_s0 + $0x100] sm:$0xff] }
  0xca   : > { %14327 = vmatprep.mubr.msk.f32.mxu1 %vm1696_vm0, %v1660_v17  ;;  %v1687_v8 = vld [vmem:[%s21005_s0 + $0x3f8] sm:$0xff]  ;;  %v1593_v9 = vld [vmem:[%s21005_s0 + $0x108] sm:$0xff]  ;;  %v1594_v10 = vld [vmem:[%s21005_s0 + $0x110] sm:$0xff] }
  0xcb   : > { %14184 = vmatmul.mubr.msk.f32.gmra.mxu0 %vm1696_vm0, %v1565_v18  ;;  %v1595_v11 = vld [vmem:[%s21005_s0 + $0x118] sm:$0xff]  ;;  %v1596_v12 = vld [vmem:[%s21005_s0 + $0x120] sm:$0xff]  ;;  %v1597_v13 = vld [vmem:[%s21005_s0 + $0x128] sm:$0xff] }
  0xcc   : > { %14186 = vmatprep.mubr.msk.f32.mxu0 %vm1696_vm0, %v1566_v19  ;;  %v1598_v14 = vld [vmem:[%s21005_s0 + $0x130] sm:$0xff]  ;;  %v1599_v15 = vld [vmem:[%s21005_s0 + $0x138] sm:$0xff]  ;;  %v1600_v16 = vld [vmem:[%s21005_s0 + $0x140] sm:$0xff] }
  0xcd   : > { %14328 = vmatmul.mubr.msk.f32.gmra.mxu1 %vm1696_vm0, %v1661_v20  ;;  %v1601_v17 = vld [vmem:[%s21005_s0 + $0x148] sm:$0xff]  ;;  %v1602_v18 = vld [vmem:[%s21005_s0 + $0x150] sm:$0xff]  ;;  %v1603_v19 = vld [vmem:[%s21005_s0 + $0x158] sm:$0xff] }
  0xce   : > { %14330 = vmatprep.mubr.msk.f32.mxu1 %vm1696_vm0, %v1662_v21  ;;  %v1604_v20 = vld [vmem:[%s21005_s0 + $0x160] sm:$0xff]  ;;  %v1605_v21 = vld [vmem:[%s21005_s0 + $0x168] sm:$0xff] }
  0xcf   : > { %14187 = vmatmul.mubr.msk.f32.gmra.mxu0 %vm1696_vm0, %v1567_v22  ;;  %v1606_v22 = vld [vmem:[%s21005_s0 + $0x170] sm:$0xff] }
  0xd0   : > { %14189 = vmatprep.mubr.msk.f32.mxu0 %vm1696_vm0, %v1568_v23  ;;  %v1607_v23 = vld [vmem:[%s21005_s0 + $0x178] sm:$0xff] }
  0xd1   : > { %14331 = vmatmul.mubr.msk.f32.gmra.mxu1 %vm1696_vm0, %v1663_v24  ;;  %v1608_v24 = vld [vmem:[%s21005_s0 + $0x180] sm:$0xff] }
  0xd2   : > { %14333 = vmatprep.mubr.msk.f32.mxu1 %vm1696_vm0, %v1664_v25  ;;  %v1609_v25 = vld [vmem:[%s21005_s0 + $0x188] sm:$0xff] }
  0xd3   : > { %14190 = vmatmul.mubr.msk.f32.gmra.mxu0 %vm1696_vm0, %v1569_v26  ;;  %v1610_v26 = vld [vmem:[%s21005_s0 + $0x190] sm:$0xff] }
  0xd4   : > { %14192 = vmatprep.mubr.msk.f32.mxu0 %vm1696_vm0, %v1570_v27  ;;  %v1611_v27 = vld [vmem:[%s21005_s0 + $0x198] sm:$0xff] }
  0xd5   : > { %14334 = vmatmul.mubr.msk.f32.gmra.mxu1 %vm1696_vm0, %v1665_v28  ;;  %v1612_v28 = vld [vmem:[%s21005_s0 + $0x1a0] sm:$0xff] }
  0xd6   : > { %14336 = vmatprep.mubr.msk.f32.mxu1 %vm1696_vm0, %v1666_v29  ;;  %v1613_v29 = vld [vmem:[%s21005_s0 + $0x1a8] sm:$0xff] }
  0xd7   : > { %14193 = vmatmul.mubr.msk.f32.gmra.mxu0 %vm1696_vm0, %v1571_v30  ;;  %v1614_v30 = vld [vmem:[%s21005_s0 + $0x1b0] sm:$0xff] }
  0xd8   : > { %14195 = vmatprep.mubr.msk.f32.mxu0 %vm1696_vm0, %v1572_v31  ;;  %v1615_v31 = vld [vmem:[%s21005_s0 + $0x1b8] sm:$0xff] }
  0xd9   : > { %14337 = vmatmul.mubr.msk.f32.gmra.mxu1 %vm1696_vm0, %v1667_v32  ;;  %v1616_v32 = vld [vmem:[%s21005_s0 + $0x1c0] sm:$0xff] }
  0xda   : > { %14339 = vmatprep.mubr.msk.f32.mxu1 %vm1696_vm0, %v1668_v33  ;;  %v1617_v33 = vld [vmem:[%s21005_s0 + $0x1c8] sm:$0xff] }
  0xdb   : > { %14196 = vmatmul.mubr.msk.f32.gmra.mxu0 %vm1696_vm0, %v1573_v34  ;;  %v1618_v34 = vld [vmem:[%s21005_s0 + $0x1d0] sm:$0xff] }
  0xdc   : > { %14198 = vmatprep.mubr.msk.f32.mxu0 %vm1696_vm0, %v1574_v35  ;;  %v1619_v35 = vld [vmem:[%s21005_s0 + $0x1d8] sm:$0xff] }
  0xdd   : > { %14340 = vmatmul.mubr.msk.f32.gmra.mxu1 %vm1696_vm0, %v1669_v36  ;;  %v1620_v36 = vld [vmem:[%s21005_s0 + $0x1e0] sm:$0xff] }
  0xde   : > { %14342 = vmatprep.mubr.msk.f32.mxu1 %vm1696_vm0, %v1670_v37  ;;  %v1621_v37 = vld [vmem:[%s21005_s0 + $0x1e8] sm:$0xff] }
  0xdf   : > { %14199 = vmatmul.mubr.msk.f32.gmra.mxu0 %vm1696_vm0, %v1575_v38  ;;  %v1622_v38 = vld [vmem:[%s21005_s0 + $0x1f0] sm:$0xff] }
  0xe0   : > { %14201 = vmatprep.mubr.msk.f32.mxu0 %vm1696_vm0, %v1576_v39  ;;  %v1623_v39 = vld [vmem:[%s21005_s0 + $0x1f8] sm:$0xff] }
  0xe1   : > { %14343 = vmatmul.mubr.msk.f32.gmra.mxu1 %vm1696_vm0, %v1671_v40  ;;  %v1624_v40 = vld [vmem:[%s21005_s0 + $0x200] sm:$0xff] }
  0xe2   : > { %14345 = vmatprep.mubr.msk.f32.mxu1 %vm1696_vm0, %v1672_v41  ;;  %v1625_v41 = vld [vmem:[%s21005_s0 + $0x208] sm:$0xff] }
  0xe3   : > { %14202 = vmatmul.mubr.msk.f32.gmra.mxu0 %vm1696_vm0, %v1577_v42  ;;  %v1626_v42 = vld [vmem:[%s21005_s0 + $0x210] sm:$0xff] }
  0xe4   : > { %14204 = vmatprep.mubr.msk.f32.mxu0 %vm1696_vm0, %v1578_v43  ;;  %v1627_v43 = vld [vmem:[%s21005_s0 + $0x218] sm:$0xff] }
  0xe5   : > { %14346 = vmatmul.mubr.msk.f32.gmra.mxu1 %vm1696_vm0, %v1673_v44  ;;  %v1628_v44 = vld [vmem:[%s21005_s0 + $0x220] sm:$0xff] }
  0xe6   : > { %14348 = vmatprep.mubr.msk.f32.mxu1 %vm1696_vm0, %v1674_v45  ;;  %v1629_v45 = vld [vmem:[%s21005_s0 + $0x228] sm:$0xff] }
  0xe7   : > { %14205 = vmatmul.mubr.msk.f32.gmra.mxu0 %vm1696_vm0, %v1579_v46  ;;  %v1630_v46 = vld [vmem:[%s21005_s0 + $0x230] sm:$0xff] }
  0xe8   : > { %14207 = vmatprep.mubr.msk.f32.mxu0 %vm1696_vm0, %v1580_v47  ;;  %v1631_v47 = vld [vmem:[%s21005_s0 + $0x238] sm:$0xff] }
  0xe9   : > { %14349 = vmatmul.mubr.msk.f32.gmra.mxu1 %vm1696_vm0, %v1675_v48  ;;  %v1632_v48 = vld [vmem:[%s21005_s0 + $0x240] sm:$0xff] }
  0xea   : > { %14351 = vmatprep.mubr.msk.f32.mxu1 %vm1696_vm0, %v1676_v49  ;;  %v1633_v49 = vld [vmem:[%s21005_s0 + $0x248] sm:$0xff] }
  0xeb   : > { %14208 = vmatmul.mubr.msk.f32.gmra.mxu0 %vm1696_vm0, %v1581_v50  ;;  %v1634_v50 = vld [vmem:[%s21005_s0 + $0x250] sm:$0xff] }
  0xec   : > { %14210 = vmatprep.mubr.msk.f32.mxu0 %vm1696_vm0, %v1582_v51  ;;  %v1635_v51 = vld [vmem:[%s21005_s0 + $0x258] sm:$0xff] }
  0xed   : > { %14352 = vmatmul.mubr.msk.f32.gmra.mxu1 %vm1696_vm0, %v1677_v52  ;;  %v1636_v52 = vld [vmem:[%s21005_s0 + $0x260] sm:$0xff] }
  0xee   : > { %14354 = vmatprep.mubr.msk.f32.mxu1 %vm1696_vm0, %v1678_v53  ;;  %v1637_v53 = vld [vmem:[%s21005_s0 + $0x268] sm:$0xff] }
  0xef   : > { %14211 = vmatmul.mubr.msk.f32.gmra.mxu0 %vm1696_vm0, %v1583_v54  ;;  %v1638_v54 = vld [vmem:[%s21005_s0 + $0x270] sm:$0xff] }
  0xf0   : > { %14213 = vmatprep.mubr.msk.f32.mxu0 %vm1696_vm0, %v1584_v55  ;;  %v12396_v55 = vld [vmem:[%s21008_s3 + $0x78] sm:$0xff] }
  0xf1   : > { %14355 = vmatmul.mubr.msk.f32.gmra.mxu1 %vm1696_vm0, %v1679_v56  ;;  %14369 = vmatprep.subr.mxu1 %v12396_v55  ;;  %v1639_v56 = vld [vmem:[%s21005_s0 + $0x278] sm:$0xff] }
  0xf2   : > { %14357 = vmatprep.mubr.msk.f32.mxu1 %vm1696_vm0, %v1680_v57  ;;  %14370 = vmatpush3.msra.mxu1 %v12396_v55  ;;  %v12532_v57 = vld [vmem:[%s21008_s3 + $0xb8] sm:$0xff] }
  0xf3   : > { %14214 = vmatmul.mubr.msk.f32.gmra.mxu0 %vm1696_vm0, %v1585_v58  ;;  %v1640_v58 = vld [vmem:[%s21005_s0 + $0x280] sm:$0xff]  ;;  %14593 = vmatprep.subr.mxu0 %v12532_v57 }
  0xf4   : > { %14216 = vmatprep.mubr.msk.f32.mxu0 %vm1696_vm0, %v1586_v59  ;;  %14594 = vmatpush3.msra.mxu0 %v12532_v57  ;;  %v1641_v59 = vld [vmem:[%s21005_s0 + $0x288] sm:$0xff] }
  0xf5   : > { %14358 = vmatmul.mubr.msk.f32.gmra.mxu1 %vm1696_vm0, %v1681_v60  ;;  %v1642_v60 = vld [vmem:[%s21005_s0 + $0x290] sm:$0xff] }
  0xf6   : > { %14360 = vmatprep.mubr.msk.f32.mxu1 %vm1696_vm0, %v1682_v61  ;;  %v12395_v61 = vld [vmem:[%s21008_s3 + $0x70] sm:$0xff] }
  0xf7   : > { %14217 = vmatmul.mubr.msk.f32.gmra.mxu0 %vm1696_vm0, %v1587_v62  ;;  %14371 = vmatprep.subr.mxu1 %v12395_v61  ;;  %v1643_v62 = vld [vmem:[%s21005_s0 + $0x298] sm:$0xff] }
  0xf8   : > { %14219 = vmatprep.mubr.msk.f32.mxu0 %vm1696_vm0, %v1588_v63  ;;  %14372 = vmatpush3.msra.mxu1 %v12395_v61  ;;  %v1644_v63 = vld [vmem:[%s21005_s0 + $0x2a0] sm:$0xff] }
  0xf9   : > { %14361 = vmatmul.mubr.msk.f32.gmra.mxu1 %vm1696_vm0, %v1683_v0  ;;  %v1645_v0 = vld [vmem:[%s21005_s0 + $0x2a8] sm:$0xff] }
  0xfa   : > { %14363 = vmatprep.mubr.msk.f32.mxu1 %vm1696_vm0, %v1684_v1  ;;  %v1646_v1 = vld [vmem:[%s21005_s0 + $0x2b0] sm:$0xff] }
  0xfb   : > { %14220 = vmatmul.mubr.msk.f32.gmra.mxu0 %vm1696_vm0, %v1589_v2  ;;  %v12394_v2 = vld [vmem:[%s21008_s3 + $0x68] sm:$0xff] }
  0xfc   : > { %14222 = vmatprep.mubr.msk.f32.mxu0 %vm1696_vm0, %v1590_v3  ;;  %14373 = vmatprep.subr.mxu1 %v12394_v2  ;;  %v1647_v3 = vld [vmem:[%s21005_s0 + $0x2b8] sm:$0xff] }
  0xfd   : > { %14364 = vmatmul.mubr.msk.f32.gmra.mxu1 %vm1696_vm0, %v1685_v4  ;;  %v1648_v4 = vld [vmem:[%s21005_s0 + $0x2c0] sm:$0xff] }
  0xfe   : > { %14366 = vmatprep.mubr.msk.f32.mxu1 %vm1696_vm0, %v1686_v5  ;;  %14374 = vmatpush3.msra.mxu1 %v12394_v2  ;;  %v1649_v5 = vld [vmem:[%s21005_s0 + $0x2c8] sm:$0xff] }
  0xff   : > { %14223 = vmatmul.mubr.msk.f32.gmra.mxu0 %vm1696_vm0, %v1591_v6  ;;  %v1650_v6 = vld [vmem:[%s21005_s0 + $0x2d0] sm:$0xff] }
 0x100   : > { %14225 = vmatprep.mubr.msk.f32.mxu0 %vm1696_vm0, %v1592_v7  ;;  %v12393_v7 = vld [vmem:[%s21008_s3 + $0x60] sm:$0xff] }
 0x101   : > { %14367 = vmatmul.mubr.msk.f32.gmra.mxu1 %vm1696_vm0, %v1687_v8  ;;  %14375 = vmatprep.subr.mxu1 %v12393_v7  ;;  %v1651_v8 = vld [vmem:[%s21005_s0 + $0x2d8] sm:$0xff] }
 0x102   : > { %14376 = vmatpush3.msra.mxu1 %v12393_v7 }
 0x103   : > { %14226 = vmatmul.mubr.msk.f32.gmra.mxu0 %vm1696_vm0, %v1593_v9  ;;  %v12531_v9 = vld [vmem:[%s21008_s3 + $0xb0] sm:$0xff] }
 0x104   : > { %14228 = vmatprep.mubr.msk.f32.mxu0 %vm1696_vm0, %v1594_v10  ;;  %v1652_v10 = vld [vmem:[%s21005_s0 + $0x2e0] sm:$0xff]  ;;  %14595 = vmatprep.subr.mxu0 %v12531_v9 }
 0x105   : > { %14596 = vmatpush3.msra.mxu0 %v12531_v9 }
 0x107   : > { %14229 = vmatmul.mubr.msk.f32.gmra.mxu0 %vm1696_vm0, %v1595_v11  ;;  %v1653_v11 = vld [vmem:[%s21005_s0 + $0x2e8] sm:$0xff] }
 0x108   : > { %14231 = vmatprep.mubr.msk.f32.mxu0 %vm1696_vm0, %v1596_v12  ;;  %v1654_v12 = vld [vmem:[%s21005_s0 + $0x2f0] sm:$0xff] }
 0x10b   : > { %14232 = vmatmul.mubr.msk.f32.gmra.mxu0 %vm1696_vm0, %v1597_v13  ;;  %v12392_v13 = vld [vmem:[%s21008_s3 + $0x58] sm:$0xff] }
 0x10c   : > { %14234 = vmatprep.mubr.msk.f32.mxu0 %vm1696_vm0, %v1598_v14  ;;  %14377 = vmatprep.subr.mxu1 %v12392_v13  ;;  %v1655_v14 = vld [vmem:[%s21005_s0 + $0x2f8] sm:$0xff] }
 0x10d   : > { %14378 = vmatpush3.msra.mxu1 %v12392_v13 }
 0x10f   : > { %14235 = vmatmul.mubr.msk.f32.gmra.mxu0 %vm1696_vm0, %v1599_v15  ;;  %v12391_v15 = vld [vmem:[%s21008_s3 + $0x50] sm:$0xff] }
 0x110   : > { %14237 = vmatprep.mubr.msk.f32.mxu0 %vm1696_vm0, %v1600_v16  ;;  %14379 = vmatprep.subr.mxu1 %v12391_v15 }
 0x111   : > { %14380 = vmatpush3.msra.mxu1 %v12391_v15 }
 0x113   : > { %14238 = vmatmul.mubr.msk.f32.gmra.mxu0 %vm1696_vm0, %v1601_v17 }
 0x114   : > { %14240 = vmatprep.mubr.msk.f32.mxu0 %vm1696_vm0, %v1602_v18 }
 0x117   : > { %14241 = vmatmul.mubr.msk.f32.gmra.mxu0 %vm1696_vm0, %v1603_v19 }
 0x118   : > { %14243 = vmatprep.mubr.msk.f32.mxu0 %vm1696_vm0, %v1604_v20 }
 0x11b   : > { %14244 = vmatmul.mubr.msk.f32.gmra.mxu0 %vm1696_vm0, %v1605_v21 }
 0x11c   : > { %14246 = vmatprep.mubr.msk.f32.mxu0 %vm1696_vm0, %v1606_v22  ;;  %v12390_v22 = vld [vmem:[%s21008_s3 + $0x48] sm:$0xff] }
 0x11d   : > { %14381 = vmatprep.subr.mxu1 %v12390_v22 }
 0x11e   : > { %14382 = vmatpush3.msra.mxu1 %v12390_v22 }
 0x11f   : > { %14247 = vmatmul.mubr.msk.f32.gmra.mxu0 %vm1696_vm0, %v1607_v23 }
 0x120   : > { %14249 = vmatprep.mubr.msk.f32.mxu0 %vm1696_vm0, %v1608_v24 }
 0x123   : > { %14250 = vmatmul.mubr.msk.f32.gmra.mxu0 %vm1696_vm0, %v1609_v25  ;;  %v12530_v25 = vld [vmem:[%s21008_s3 + $0xa8] sm:$0xff] }
 0x124   : > { %14252 = vmatprep.mubr.msk.f32.mxu0 %vm1696_vm0, %v1610_v26  ;;  %14597 = vmatprep.subr.mxu0 %v12530_v25 }
 0x125   : > { %14598 = vmatpush3.msra.mxu0 %v12530_v25 }
 0x127   : > { %14253 = vmatmul.mubr.msk.f32.gmra.mxu0 %vm1696_vm0, %v1611_v27  ;;  %v12529_v27 = vld [vmem:[%s21008_s3 + $0xa0] sm:$0xff] }
 0x128   : > { %14255 = vmatprep.mubr.msk.f32.mxu0 %vm1696_vm0, %v1612_v28  ;;  %14599 = vmatprep.subr.mxu0 %v12529_v27 }
 0x129   : > { %14600 = vmatpush3.msra.mxu0 %v12529_v27 }
 0x12b   : > { %14256 = vmatmul.mubr.msk.f32.gmra.mxu0 %vm1696_vm0, %v1613_v29 }
 0x12c   : > { %14258 = vmatprep.mubr.msk.f32.mxu0 %vm1696_vm0, %v1614_v30  ;;  %v12528_v30 = vld [vmem:[%s21008_s3 + $0x98] sm:$0xff] }
 0x12d   : > { %14601 = vmatprep.subr.mxu0 %v12528_v30 }
 0x12e   : > { %14602 = vmatpush3.msra.mxu0 %v12528_v30 }
 0x12f   : > { %14259 = vmatmul.mubr.msk.f32.gmra.mxu0 %vm1696_vm0, %v1615_v31 }
 0x130   : > { %14261 = vmatprep.mubr.msk.f32.mxu0 %vm1696_vm0, %v1616_v32  ;;  %v12527_v32 = vld [vmem:[%s21008_s3 + $0x90] sm:$0xff] }
 0x131   : > { %14603 = vmatprep.subr.mxu0 %v12527_v32 }
 0x132   : > { %14604 = vmatpush3.msra.mxu0 %v12527_v32 }
 0x133   : > { %14262 = vmatmul.mubr.msk.f32.gmra.mxu0 %vm1696_vm0, %v1617_v33  ;;  %v12389_v33 = vld [vmem:[%s21008_s3 + $0x40] sm:$0xff] }
 0x134   : > { %14264 = vmatprep.mubr.msk.f32.mxu0 %vm1696_vm0, %v1618_v34  ;;  %14383 = vmatprep.subr.mxu1 %v12389_v33 }
 0x135   : > { %14384 = vmatpush3.msra.mxu1 %v12389_v33 }
 0x137   : > { %14265 = vmatmul.mubr.msk.f32.gmra.mxu0 %vm1696_vm0, %v1619_v35 }
 0x138   : > { %14267 = vmatprep.mubr.msk.f32.mxu0 %vm1696_vm0, %v1620_v36  ;;  %v12526_v36 = vld [vmem:[%s21008_s3 + $0x88] sm:$0xff] }
 0x139   : > { %14605 = vmatprep.subr.mxu0 %v12526_v36 }
 0x13a   : > { %14606 = vmatpush3.msra.mxu0 %v12526_v36 }
 0x13b   : > { %14268 = vmatmul.mubr.msk.f32.gmra.mxu0 %vm1696_vm0, %v1621_v37 }
 0x13c   : > { %14270 = vmatprep.mubr.msk.f32.mxu0 %vm1696_vm0, %v1622_v38  ;;  %v12525_v38 = vld [vmem:[%s21008_s3 + $0x80] sm:$0xff] }
 0x13d   : > { %14607 = vmatprep.subr.mxu0 %v12525_v38 }
 0x13e   : > { %14608 = vmatpush3.msra.mxu0 %v12525_v38 }
 0x13f   : > { %14271 = vmatmul.mubr.msk.f32.gmra.mxu0 %vm1696_vm0, %v1623_v39 }
 0x140   : > { %14273 = vmatprep.mubr.msk.f32.mxu0 %vm1696_vm0, %v1624_v40 }
 0x143   : > { %14274 = vmatmul.mubr.msk.f32.gmra.mxu0 %vm1696_vm0, %v1625_v41 }
 0x144   : > { %14276 = vmatprep.mubr.msk.f32.mxu0 %vm1696_vm0, %v1626_v42  ;;  %v17202_v42 = vld [vmem:[%s21008_s3 + $0x38] sm:$0xff] }
 0x145   : > { %14481 = vmatprep.subr.mxu1 %v17202_v42 }
 0x147   : > { %14277 = vmatmul.mubr.msk.f32.gmra.mxu0 %vm1696_vm0, %v1627_v43 }
 0x148   : > { %14279 = vmatprep.mubr.msk.f32.mxu0 %vm1696_vm0, %v1628_v44 }
 0x14b   : > { %14280 = vmatmul.mubr.msk.f32.gmra.mxu0 %vm1696_vm0, %v1629_v45 }
 0x14c   : > { %14282 = vmatprep.mubr.msk.f32.mxu0 %vm1696_vm0, %v1630_v46 }
 0x14f   : > { %14283 = vmatmul.mubr.msk.f32.gmra.mxu0 %vm1696_vm0, %v1631_v47 }
 0x150   : > { %14285 = vmatprep.mubr.msk.f32.mxu0 %vm1696_vm0, %v1632_v48 }
 0x153   : > { %14286 = vmatmul.mubr.msk.f32.gmra.mxu0 %vm1696_vm0, %v1633_v49 }
 0x154   : > { %14288 = vmatprep.mubr.msk.f32.mxu0 %vm1696_vm0, %v1634_v50 }
 0x157   : > { %14289 = vmatmul.mubr.msk.f32.gmra.mxu0 %vm1696_vm0, %v1635_v51 }
 0x158   : > { %14291 = vmatprep.mubr.msk.f32.mxu0 %vm1696_vm0, %v1636_v52 }
 0x15b   : > { %14292 = vmatmul.mubr.msk.f32.gmra.mxu0 %vm1696_vm0, %v1637_v53 }
 0x15c   : > { %14294 = vmatprep.mubr.msk.f32.mxu0 %vm1696_vm0, %v1638_v54 }
 0x15f   : > { %14295 = vmatmul.mubr.msk.f32.gmra.mxu0 %vm1696_vm0, %v1639_v56 }
 0x160   : > { %14297 = vmatprep.mubr.msk.f32.mxu0 %vm1696_vm0, %v1640_v58 }
 0x163   : > { %14298 = vmatmul.mubr.msk.f32.gmra.mxu0 %vm1696_vm0, %v1641_v59 }
 0x164   : > { %14300 = vmatprep.mubr.msk.f32.mxu0 %vm1696_vm0, %v1642_v60 }
 0x167   : > { %14301 = vmatmul.mubr.msk.f32.gmra.mxu0 %vm1696_vm0, %v1643_v62 }
 0x168   : > { %14303 = vmatprep.mubr.msk.f32.mxu0 %vm1696_vm0, %v1644_v63 }
 0x16b   : > { %14304 = vmatmul.mubr.msk.f32.gmra.mxu0 %vm1696_vm0, %v1645_v0 }
 0x16c   : > { %14306 = vmatprep.mubr.msk.f32.mxu0 %vm1696_vm0, %v1646_v1 }
 0x16f   : > { %14307 = vmatmul.mubr.msk.f32.gmra.mxu0 %vm1696_vm0, %v1647_v3 }
 0x170   : > { %14309 = vmatprep.mubr.msk.f32.mxu0 %vm1696_vm0, %v1648_v4 }
 0x173   : > { %14310 = vmatmul.mubr.msk.f32.gmra.mxu0 %vm1696_vm0, %v1649_v5 }
 0x174   : > { %14312 = vmatprep.mubr.msk.f32.mxu0 %vm1696_vm0, %v1650_v6 }
 0x177   : > { %14313 = vmatmul.mubr.msk.f32.gmra.mxu0 %vm1696_vm0, %v1651_v8 }
 0x178   : > { %14315 = vmatprep.mubr.msk.f32.mxu0 %vm1696_vm0, %v1652_v10  ;;  %v17268_v10 = vld [vmem:[%s21007_s2] ss:$0 sm:$0xff] }
 0x17b   : > { %14316 = vmatmul.mubr.msk.f32.gmra.mxu0 %vm1696_vm0, %v1653_v11 }
 0x17c   : > { %14318 = vmatprep.mubr.msk.f32.mxu0 %vm1696_vm0, %v1654_v12 }
 0x17f   : > { %14319 = vmatmul.mubr.msk.f32.gmra.mxu0 %vm1696_vm0, %v1655_v14 }
 0x183   : > { %v17139_v16 = vpop.f32.mrf.mxu0 }
 0x185   : > { %v17141_v17 = vpop.f32.mrf.mxu0  ;;  %v17143_v18 = vpop.f32.mrf.mxu1 }
 0x187   : > { %v17145_v19 = vpop.f32.mrf.mxu0  ;;  %v17147_v20 = vpop.f32.mrf.mxu1 }
 0x189   : > { %v17149_v21 = vpop.f32.mrf.mxu0  ;;  %v17156_v24 = vpop.f32.mrf.mxu1 }
 0x18b   : > { %v17154_v23 = vpop.f32.mrf.mxu0  ;;  %v17168_v29 = vpop.f32.mrf.mxu1 }
 0x18d   : > { %v17161_v26 = vpop.f32.mrf.mxu0  ;;  %v17183_v35 = vpop.f32.mrf.mxu1 }
 0x18f   : > { %v17166_v28 = vpop.f32.mrf.mxu0  ;;  %v17195_v40 = vpop.f32.mrf.mxu1 }
 0x191   : > { %v17173_v31 = vpop.f32.mrf.mxu0  ;;  %v17206_v44 = vpop.f32.mrf.mxu1 }
 0x193   : > { %v17181_v34 = vpop.f32.mrf.mxu0  ;;  %v17213_v47 = vpop.f32.mrf.mxu1 }
 0x195   : > { %v17188_v37 = vpop.f32.mrf.mxu0  ;;  %v17219_v50 = vpop.f32.mrf.mxu1 }
 0x197   : > { %v17193_v39 = vpop.f32.mrf.mxu0  ;;  %v17225_v53 = vpop.f32.mrf.mxu1 }
 0x199   : > { %v17197_v41 = vpop.f32.mrf.mxu0  ;;  %v17231_v56 = vpop.f32.mrf.mxu1 }
 0x19b   : > { %v17204_v43 = vpop.f32.mrf.mxu0  ;;  %v17237_v59 = vpop.f32.mrf.mxu1 }
 0x19d   : > { %v17209_v45 = vpop.f32.mrf.mxu0  ;;  %v17243_v62 = vpop.f32.mrf.mxu1 }
 0x19f   : > { %v17211_v46 = vpop.f32.mrf.mxu0  ;;  %v17249_v1 = vpop.f32.mrf.mxu1 }
 0x1a1   : > { %v17215_v48 = vpop.f32.mrf.mxu0  ;;  %v17255_v4 = vpop.f32.mrf.mxu1 }
 0x1a3   : > { %v17217_v49 = vpop.f32.mrf.mxu0  ;;  %v17261_v7 = vpop.f32.mrf.mxu1 }
 0x1a5   : > { %v17221_v51 = vpop.f32.mrf.mxu0  ;;  %v17270_v11 = vpop.f32.mrf.mxu1 }
 0x1a7   : > { %v17223_v52 = vpop.f32.mrf.mxu0  ;;  %v17275_v25 = vpop.f32.mrf.mxu1 }
 0x1a9   : > { %v17227_v54 = vpop.f32.mrf.mxu0 }
 0x1ab   : > { %v17229_v55 = vpop.f32.mrf.mxu0 }
 0x1ad   : > { %v17233_v57 = vpop.f32.mrf.mxu0 }
 0x1af   : > { %v17235_v58 = vpop.f32.mrf.mxu0 }
 0x1b1   : > { %v17239_v60 = vpop.f32.mrf.mxu0 }
 0x1b3   : > { %v17241_v61 = vpop.f32.mrf.mxu0 }
 0x1b5   : > { %v17245_v63 = vpop.f32.mrf.mxu0 }
 0x1b7   : > { %v17247_v0 = vpop.f32.mrf.mxu0 }
 0x1b9   : > { %v17251_v2 = vpop.f32.mrf.mxu0 }
 0x1bb   : > { %v17253_v3 = vpop.f32.mrf.mxu0 }
 0x1bd   : > { %v17257_v5 = vpop.f32.mrf.mxu0 }
 0x1bf   : > { %v17259_v6 = vpop.f32.mrf.mxu0 }
 0x1c1   : > { %v17263_v8 = vpop.f32.mrf.mxu0 }
 0x1c3   : > { %v14227_v9 = vpop.f32.mrf.mxu0 }
 0x1c4   : > { %v2819_v12 = vmax.f32 %v14227_v9, %v17143_v18 }
 0x1c5   : > { %v2307_v13 = vpop.f32.mrf.mxu0 }
 0x1c6   : > { %v2890_v14 = vadd.f32 %v17268_v10, %v2819_v12  ;;  %v2818_v15 = vmax.f32 %v2307_v13, %v17147_v20  ;;  %v17282_v12 = vpop.f32.mrf.mxu1 }
 0x1c7   : > { %v14230_v22 = vpop.f32.mrf.mxu0 }
 0x1c8   : > { %v2954_v27 = vmax.f32 %v2890_v14, 0.0  ;;  %v2889_v30 = vadd.f32 %v17268_v10, %v2818_v15  ;;  %v2821_v32 = vmax.f32 %v14230_v22, %v17156_v24 }
 0x1c9   : > { %v2317_v33 = vpop.f32.mrf.mxu0 }
 0x1ca   : > { %3022 = vst.msk [vmem:[#allocation2 + $0x110] sm:$0xff] %vm1696_vm0, %v2954_v27  ;;  %v2953_v36 = vmax.f32 %v2889_v30, 0.0  ;;  %v2892_v38 = vadd.f32 %v17268_v10, %v2821_v32  ;;  %v2820_v18 = vmax.f32 %v2317_v33, %v17168_v29  ;;  %v17290_v29 = vpop.f32.mrf.mxu1 }
 0x1cb   : > { %v14233_v9 = vpop.f32.mrf.mxu0 }
 0x1cc   : > { %3021 = vst.msk [vmem:[#allocation2 + $0x108] sm:$0xff] %vm1696_vm0, %v2953_v36  ;;  %v2956_v20 = vmax.f32 %v2892_v38, 0.0  ;;  %v2891_v13 = vadd.f32 %v17268_v10, %v2820_v18  ;;  %v2823_v14 = vmax.f32 %v14233_v9, %v17183_v35 }
 0x1cd   : > { %v2327_v15 = vpop.f32.mrf.mxu0 }
 0x1ce   : > { %3024 = vst.msk [vmem:[#allocation2 + $0x120] sm:$0xff] %vm1696_vm0, %v2956_v20  ;;  %v2955_v24 = vmax.f32 %v2891_v13, 0.0  ;;  %v2894_v22 = vadd.f32 %v17268_v10, %v2823_v14  ;;  %v2822_v27 = vmax.f32 %v2327_v15, %v17195_v40  ;;  %v17298_v40 = vpop.f32.mrf.mxu1 }
 0x1cf   : > { %v14236_v30 = vpop.f32.mrf.mxu0 }
 0x1d0   : > { %3023 = vst.msk [vmem:[#allocation2 + $0x118] sm:$0xff] %vm1696_vm0, %v2955_v24  ;;  %v2958_v32 = vmax.f32 %v2894_v22, 0.0  ;;  %v2893_v33 = vadd.f32 %v17268_v10, %v2822_v27  ;;  %v2825_v36 = vmax.f32 %v14236_v30, %v17206_v44 }
 0x1d1   : > { %v2337_v38 = vpop.f32.mrf.mxu0 }
 0x1d2   : > { %3026 = vst.msk [vmem:[#allocation2 + $0x130] sm:$0xff] %vm1696_vm0, %v2958_v32  ;;  %v2957_v35 = vmax.f32 %v2893_v33, 0.0  ;;  %v2896_v18 = vadd.f32 %v17268_v10, %v2825_v36  ;;  %v2824_v9 = vmax.f32 %v2337_v38, %v17213_v47  ;;  %v17306_v47 = vpop.f32.mrf.mxu1 }
 0x1d3   : > { %v14239_v20 = vpop.f32.mrf.mxu0 }
 0x1d4   : > { %3025 = vst.msk [vmem:[#allocation2 + $0x128] sm:$0xff] %vm1696_vm0, %v2957_v35  ;;  %v2960_v13 = vmax.f32 %v2896_v18, 0.0  ;;  %v2895_v14 = vadd.f32 %v17268_v10, %v2824_v9  ;;  %v2827_v15 = vmax.f32 %v14239_v20, %v17219_v50 }
 0x1d5   : > { %v2347_v24 = vpop.f32.mrf.mxu0 }
 0x1d6   : > { %3028 = vst.msk [vmem:[#allocation2 + $0x140] sm:$0xff] %vm1696_vm0, %v2960_v13  ;;  %v2959_v44 = vmax.f32 %v2895_v14, 0.0  ;;  %v2898_v22 = vadd.f32 %v17268_v10, %v2827_v15  ;;  %v2826_v27 = vmax.f32 %v2347_v24, %v17225_v53  ;;  %v17314_v53 = vpop.f32.mrf.mxu1 }
 0x1d7   : > { %v14242_v30 = vpop.f32.mrf.mxu0 }
 0x1d8   : > { %3027 = vst.msk [vmem:[#allocation2 + $0x138] sm:$0xff] %vm1696_vm0, %v2959_v44  ;;  %v2962_v32 = vmax.f32 %v2898_v22, 0.0  ;;  %v2897_v33 = vadd.f32 %v17268_v10, %v2826_v27  ;;  %v2829_v36 = vmax.f32 %v14242_v30, %v17231_v56 }
 0x1d9   : > { %v2357_v38 = vpop.f32.mrf.mxu0 }
 0x1da   : > { %3030 = vst.msk [vmem:[#allocation2 + $0x150] sm:$0xff] %vm1696_vm0, %v2962_v32  ;;  %v2961_v50 = vmax.f32 %v2897_v33, 0.0  ;;  %v2900_v35 = vadd.f32 %v17268_v10, %v2829_v36  ;;  %v2828_v18 = vmax.f32 %v2357_v38, %v17237_v59  ;;  %v2737_v59 = vpop.f32.mrf.mxu1 }
 0x1db   : > { %v14245_v9 = vpop.f32.mrf.mxu0 }
 0x1dc   : > { %3029 = vst.msk [vmem:[#allocation2 + $0x148] sm:$0xff] %vm1696_vm0, %v2961_v50  ;;  %v2964_v20 = vmax.f32 %v2900_v35, 0.0  ;;  %v2899_v13 = vadd.f32 %v17268_v10, %v2828_v18  ;;  %v2831_v14 = vmax.f32 %v14245_v9, %v17243_v62  ;;  %v14359_v35 = vpop.f32.mrf.mxu1 }
 0x1dd   : > { %v2367_v15 = vpop.f32.mrf.mxu0 }
 0x1de   : > { %3032 = vst.msk [vmem:[#allocation2 + $0x160] sm:$0xff] %vm1696_vm0, %v2964_v20  ;;  %v2963_v56 = vmax.f32 %v2899_v13, 0.0  ;;  %v2902_v24 = vadd.f32 %v17268_v10, %v2831_v14  ;;  %v2830_v44 = vmax.f32 %v2367_v15, %v17249_v1 }
 0x1df   : > { %v14248_v22 = vpop.f32.mrf.mxu0 }
 0x1e0   : > { %3031 = vst.msk [vmem:[#allocation2 + $0x158] sm:$0xff] %vm1696_vm0, %v2963_v56  ;;  %v2966_v27 = vmax.f32 %v2902_v24, 0.0  ;;  %v2901_v30 = vadd.f32 %v17268_v10, %v2830_v44  ;;  %v2833_v32 = vmax.f32 %v14248_v22, %v17255_v4  ;;  %v2747_v56 = vpop.f32.mrf.mxu1 }
 0x1e1   : > { %v2377_v33 = vpop.f32.mrf.mxu0 }
 0x1e2   : > { %3034 = vst.msk [vmem:[#allocation2 + $0x170] sm:$0xff] %vm1696_vm0, %v2966_v27  ;;  %v2965_v62 = vmax.f32 %v2901_v30, 0.0  ;;  %v2904_v36 = vadd.f32 %v17268_v10, %v2833_v32  ;;  %v2832_v38 = vmax.f32 %v2377_v33, %v17261_v7  ;;  %v14362_v33 = vpop.f32.mrf.mxu1 }
 0x1e3   : > { %v14251_v50 = vpop.f32.mrf.mxu0 }
 0x1e4   : > { %3033 = vst.msk [vmem:[#allocation2 + $0x168] sm:$0xff] %vm1696_vm0, %v2965_v62  ;;  %v2968_v1 = vmax.f32 %v2904_v36, 0.0  ;;  %v2903_v18 = vadd.f32 %v17268_v10, %v2832_v38  ;;  %v2835_v9 = vmax.f32 %v14251_v50, %v17270_v11 }
 0x1e5   : > { %v2387_v20 = vpop.f32.mrf.mxu0 }
 0x1e6   : > { %3036 = vst.msk [vmem:[#allocation2 + $0x180] sm:$0xff] %vm1696_vm0, %v2968_v1  ;;  %v2967_v4 = vmax.f32 %v2903_v18, 0.0  ;;  %v2906_v13 = vadd.f32 %v17268_v10, %v2835_v9  ;;  %v2834_v14 = vmax.f32 %v2387_v20, %v17275_v25  ;;  %v2757_v9 = vpop.f32.mrf.mxu1 }
 0x1e7   : > { %v14254_v15 = vpop.f32.mrf.mxu0 }
 0x1e8   : > { %3035 = vst.msk [vmem:[#allocation2 + $0x178] sm:$0xff] %vm1696_vm0, %v2967_v4  ;;  %v2970_v7 = vmax.f32 %v2906_v13, 0.0  ;;  %v2905_v24 = vadd.f32 %v17268_v10, %v2834_v14  ;;  %v2837_v44 = vmax.f32 %v14254_v15, %v17282_v12 }
 0x1e9   : > { %v2397_v22 = vpop.f32.mrf.mxu0 }
 0x1ea   : > { %3038 = vst.msk [vmem:[#allocation2 + $0x190] sm:$0xff] %vm1696_vm0, %v2970_v7  ;;  %v2969_v11 = vmax.f32 %v2905_v24, 0.0  ;;  %v2908_v27 = vadd.f32 %v17268_v10, %v2837_v44  ;;  %v2836_v30 = vmax.f32 %v2397_v22, %v17290_v29  ;;  %v14365_v24 = vpop.f32.mrf.mxu1 }
 0x1eb   : > { %v14257_v32 = vpop.f32.mrf.mxu0 }
 0x1ec   : > { %3037 = vst.msk [vmem:[#allocation2 + $0x188] sm:$0xff] %vm1696_vm0, %v2969_v11  ;;  %v2972_v25 = vmax.f32 %v2908_v27, 0.0  ;;  %v2907_v62 = vadd.f32 %v17268_v10, %v2836_v30  ;;  %v2839_v36 = vmax.f32 %v14257_v32, %v17298_v40 }
 0x1ed   : > { %v2407_v38 = vpop.f32.mrf.mxu0 }
 0x1ee   : > { %3040 = vst.msk [vmem:[#allocation2 + $0x1a0] sm:$0xff] %vm1696_vm0, %v2972_v25  ;;  %v2971_v12 = vmax.f32 %v2907_v62, 0.0  ;;  %v2910_v50 = vadd.f32 %v17268_v10, %v2839_v36  ;;  %v2838_v1 = vmax.f32 %v2407_v38, %v17306_v47  ;;  %v2767_v25 = vpop.f32.mrf.mxu1 }
 0x1ef   : > { %v14260_v18 = vpop.f32.mrf.mxu0 }
 0x1f0   : > { %3039 = vst.msk [vmem:[#allocation2 + $0x198] sm:$0xff] %vm1696_vm0, %v2971_v12  ;;  %v2974_v29 = vmax.f32 %v2910_v50, 0.0  ;;  %v2909_v20 = vadd.f32 %v17268_v10, %v2838_v1  ;;  %v2841_v4 = vmax.f32 %v14260_v18, %v17314_v53  ;;  %v14368_v18 = vpop.f32.mrf.mxu1 }
 0x1f1   : > { %v2417_v13 = vpop.f32.mrf.mxu0 }
 0x1f2   : > { %3042 = vst.msk [vmem:[#allocation2 + $0x1b0] sm:$0xff] %vm1696_vm0, %v2974_v29  ;;  %v2973_v40 = vmax.f32 %v2909_v20, 0.0  ;;  %v2912_v14 = vadd.f32 %v17268_v10, %v2841_v4  ;;  %v2840_v15 = vmax.f32 %v2417_v13, %v2737_v59 }
 0x1f3   : > { %v14263_v7 = vpop.f32.mrf.mxu0 }
 0x1f4   : > { %3041 = vst.msk [vmem:[#allocation2 + $0x1a8] sm:$0xff] %vm1696_vm0, %v2973_v40  ;;  %v2976_v47 = vmax.f32 %v2912_v14, 0.0  ;;  %v2911_v44 = vadd.f32 %v17268_v10, %v2840_v15  ;;  %v2843_v22 = vmax.f32 %v14263_v7, %v14359_v35  ;;  %v2777_v15 = vpop.f32.mrf.mxu1 }
 0x1f5   : > { %v2427_v11 = vpop.f32.mrf.mxu0 }
 0x1f6   : > { %3044 = vst.msk [vmem:[#allocation2 + $0x1c0] sm:$0xff] %vm1696_vm0, %v2976_v47  ;;  %v2975_v27 = vmax.f32 %v2911_v44, 0.0  ;;  %v2914_v53 = vadd.f32 %v17268_v10, %v2843_v22  ;;  %v2842_v30 = vmax.f32 %v2427_v11, %v2747_v56 }
 0x1f7   : > { %v14266_v32 = vpop.f32.mrf.mxu0 }
 0x1f8   : > { %3043 = vst.msk [vmem:[#allocation2 + $0x1b8] sm:$0xff] %vm1696_vm0, %v2975_v27  ;;  %v2978_v59 = vmax.f32 %v2914_v53, 0.0  ;;  %v2913_v62 = vadd.f32 %v17268_v10, %v2842_v30  ;;  %v2845_v36 = vmax.f32 %v14266_v32, %v14362_v33 }
 0x1f9   : > { %v2437_v38 = vpop.f32.mrf.mxu0 }
 0x1fa   : > { %3046 = vst.msk [vmem:[#allocation2 + $0x1d0] sm:$0xff] %vm1696_vm0, %v2978_v59  ;;  %v2977_v12 = vmax.f32 %v2913_v62, 0.0  ;;  %v2916_v35 = vadd.f32 %v17268_v10, %v2845_v36  ;;  %v2844_v50 = vmax.f32 %v2437_v38, %v2757_v9 }
 0x1fb   : > { %v14269_v1 = vpop.f32.mrf.mxu0 }
 0x1fc   : > { %3045 = vst.msk [vmem:[#allocation2 + $0x1c8] sm:$0xff] %vm1696_vm0, %v2977_v12  ;;  %v2980_v56 = vmax.f32 %v2916_v35, 0.0  ;;  %v2915_v29 = vadd.f32 %v17268_v10, %v2844_v50  ;;  %v2847_v20 = vmax.f32 %v14269_v1, %v14365_v24 }
 0x1fd   : > { %v2447_v4 = vpop.f32.mrf.mxu0 }
 0x1fe   : > { %3048 = vst.msk [vmem:[#allocation2 + $0x1e0] sm:$0xff] %vm1696_vm0, %v2980_v56  ;;  %v2979_v13 = vmax.f32 %v2915_v29, 0.0  ;;  %v2918_v33 = vadd.f32 %v17268_v10, %v2847_v20  ;;  %v2846_v40 = vmax.f32 %v2447_v4, %v2767_v25 }
 0x1ff   : > { %v14272_v14 = vpop.f32.mrf.mxu0 }
 0x200   : > { %3047 = vst.msk [vmem:[#allocation2 + $0x1d8] sm:$0xff] %vm1696_vm0, %v2979_v13  ;;  %v2982_v9 = vmax.f32 %v2918_v33, 0.0  ;;  %v2917_v7 = vadd.f32 %v17268_v10, %v2846_v40  ;;  %v2849_v47 = vmax.f32 %v14272_v14, %v14368_v18  ;;  %v15905_v13 = vmov 0.0  }
 0x201   : > { %v2457_v44 = vpop.f32.mrf.mxu0  ;;  %2985 = vst.msk [vmem:[#allocation2] sm:$0xff] %vm1696_vm0, %v15905_v13  ;;  %8933 = vst [vmem:[#allocation4] sm:$0xff] %v15905_v13 }
 0x202   : > { %3050 = vst.msk [vmem:[#allocation2 + $0x1f0] sm:$0xff] %vm1696_vm0, %v2982_v9  ;;  %v2981_v22 = vmax.f32 %v2917_v7, 0.0  ;;  %v2920_v24 = vadd.f32 %v17268_v10, %v2849_v47  ;;  %v2848_v11 = vmax.f32 %v2457_v44, %v2777_v15  ;;  %8934 = vst [vmem:[#allocation4 + $0x8] sm:$0xff] %v15905_v13 }
 0x203   : > { %v14275_v27 = vpop.f32.mrf.mxu0  ;;  %2986 = vst.msk [vmem:[#allocation2 + $0x208] sm:$0xff] %vm1696_vm0, %v15905_v13  ;;  %2987 = vst.msk [vmem:[#allocation3] sm:$0xff] %vm1696_vm0, %v15905_v13 }
 0x204   : > { %3049 = vst.msk [vmem:[#allocation2 + $0x1e8] sm:$0xff] %vm1696_vm0, %v2981_v22  ;;  %v2984_v53 = vmax.f32 %v2920_v24, 0.0  ;;  %v2919_v30 = vadd.f32 %v17268_v10, %v2848_v11  ;;  %v2787_v32 = vmax.f32 %v17139_v16, %v14275_v27  ;;  %2988 = vst.msk [vmem:[#allocation3 + $0x208] sm:$0xff] %vm1696_vm0, %v15905_v13 }
 0x205   : > { %v2467_v25 = vpop.f32.mrf.mxu0 }
 0x206   : > { %3052 = vst.msk [vmem:[#allocation2 + $0x200] sm:$0xff] %vm1696_vm0, %v2984_v53  ;;  %v2983_v59 = vmax.f32 %v2919_v30, 0.0  ;;  %v2858_v62 = vadd.f32 %v17268_v10, %v2787_v32  ;;  %v2786_v36 = vmax.f32 %v17141_v17, %v2467_v25 }
 0x207   : > { %v14278_v38 = vpop.f32.mrf.mxu0 }
 0x208   : > { %3051 = vst.msk [vmem:[#allocation2 + $0x1f8] sm:$0xff] %vm1696_vm0, %v2983_v59  ;;  %v2922_v12 = vmax.f32 %v2858_v62, 0.0  ;;  %v2857_v35 = vadd.f32 %v17268_v10, %v2786_v36  ;;  %v2789_v50 = vmax.f32 %v17145_v19, %v14278_v38 }
 0x209   : > { %v2477_v1 = vpop.f32.mrf.mxu0 }
 0x20a   : > { %2990 = vst.msk [vmem:[#allocation2 + $0x10] sm:$0xff] %vm1696_vm0, %v2922_v12  ;;  %v2921_v16 = vmax.f32 %v2857_v35, 0.0  ;;  %v2860_v18 = vadd.f32 %v17268_v10, %v2789_v50  ;;  %v2788_v56 = vmax.f32 %v17149_v21, %v2477_v1 }
 0x20b   : > { %v14281_v29 = vpop.f32.mrf.mxu0 }
 0x20c   : > { %2989 = vst.msk [vmem:[#allocation2 + $0x8] sm:$0xff] %vm1696_vm0, %v2921_v16  ;;  %v2924_v17 = vmax.f32 %v2860_v18, 0.0  ;;  %v2859_v20 = vadd.f32 %v17268_v10, %v2788_v56  ;;  %v2791_v4 = vmax.f32 %v17154_v23, %v14281_v29 }
 0x20d   : > { %v2487_v19 = vpop.f32.mrf.mxu0 }
 0x20e   : > { %2992 = vst.msk [vmem:[#allocation2 + $0x20] sm:$0xff] %vm1696_vm0, %v2924_v17  ;;  %v2923_v21 = vmax.f32 %v2859_v20, 0.0  ;;  %v2862_v33 = vadd.f32 %v17268_v10, %v2791_v4  ;;  %v2790_v40 = vmax.f32 %v17161_v26, %v2487_v19 }
 0x20f   : > { %v14284_v23 = vpop.f32.mrf.mxu0 }
 0x210   : > { %2991 = vst.msk [vmem:[#allocation2 + $0x18] sm:$0xff] %vm1696_vm0, %v2923_v21  ;;  %v2926_v14 = vmax.f32 %v2862_v33, 0.0  ;;  %v2861_v15 = vadd.f32 %v17268_v10, %v2790_v40  ;;  %v2793_v9 = vmax.f32 %v17166_v28, %v14284_v23 }
 0x211   : > { %v2497_v7 = vpop.f32.mrf.mxu0  ;;  %v17392_v47 = vld [vmem:[#allocation2 + $0x10] sm:$0xff] }
 0x212   : > { %2994 = vst.msk [vmem:[#allocation2 + $0x30] sm:$0xff] %vm1696_vm0, %v2926_v14  ;;  %v2925_v44 = vmax.f32 %v2861_v15, 0.0  ;;  %v2864_v22 = vadd.f32 %v17268_v10, %v2793_v9  ;;  %v2792_v24 = vmax.f32 %v17173_v31, %v2497_v7  ;;  %14609 = vmatprep.mubr.msk.f32.mxu0 %vm1696_vm0, %v17392_v47  ;;  %v3123_v31 = vld [vmem:[%s21008_s3 + $0x30] sm:$0xff] }
 0x213   : > { %v14287_v26 = vpop.f32.mrf.mxu0  ;;  %v17399_v11 = vld [vmem:[#allocation2 + $0x8] sm:$0xff] }
 0x214   : > { %2993 = vst.msk [vmem:[#allocation2 + $0x28] sm:$0xff] %vm1696_vm0, %v2925_v44  ;;  %v2928_v27 = vmax.f32 %v2864_v22, 0.0  ;;  %v2863_v28 = vadd.f32 %v17268_v10, %v2792_v24  ;;  %v2795_v53 = vmax.f32 %v17181_v34, %v14287_v26  ;;  %14385 = vmatprep.mubr.msk.f32.mxu1 %vm1696_vm0, %v17399_v11 }
 0x215   : > { %v2507_v30 = vpop.f32.mrf.mxu0  ;;  %14386 = vmatmul.mubr.msk.f32.vlgmr.msra.gmra.mxu1 %vm1696_vm0, %v17392_v47 }
 0x216   : > { %2996 = vst.msk [vmem:[#allocation2 + $0x40] sm:$0xff] %vm1696_vm0, %v2928_v27  ;;  %v2927_v32 = vmax.f32 %v2863_v28, 0.0  ;;  %v2866_v25 = vadd.f32 %v17268_v10, %v2795_v53  ;;  %v2794_v59 = vmax.f32 %v17188_v37, %v2507_v30  ;;  %14482 = vmatpush3.msra.mxu1 %v17202_v42  ;;  %v17424_v37 = vld [vmem:[#allocation2 + $0x20] sm:$0xff]  ;;  %v3122_v42 = vld [vmem:[%s21008_s3 + $0x28] sm:$0xff] }
 0x217   : > { %v14290_v34 = vpop.f32.mrf.mxu0  ;;  %v17415_v62 = vld [vmem:[#allocation2 + $0x18] sm:$0xff]  ;;  %14483 = vmatprep.subr.mxu1 %v3123_v31 }
 0x218   : > { %2995 = vst.msk [vmem:[#allocation2 + $0x38] sm:$0xff] %vm1696_vm0, %v2927_v32  ;;  %v2930_v36 = vmax.f32 %v2866_v25, 0.0  ;;  %v2865_v38 = vadd.f32 %v17268_v10, %v2794_v59  ;;  %v2797_v12 = vmax.f32 %v17193_v39, %v14290_v34  ;;  %14388 = vmatprep.mubr.msk.f32.mxu1 %vm1696_vm0, %v17415_v62  ;;  %14610 = vmatmul.mubr.msk.f32.vlgmr.msra.gmra.mxu0 %vm1696_vm0, %v17415_v62 }
 0x219   : > { %v2517_v35 = vpop.f32.mrf.mxu0  ;;  %14389 = vmatmul.mubr.msk.f32.gmra.mxu1 %vm1696_vm0, %v17424_v37  ;;  %14612 = vmatprep.mubr.msk.f32.mxu0 %vm1696_vm0, %v17424_v37  ;;  %v17445_v20 = vld [vmem:[#allocation2 + $0x30] sm:$0xff] }
 0x21a   : > { %2998 = vst.msk [vmem:[#allocation2 + $0x50] sm:$0xff] %vm1696_vm0, %v2930_v36  ;;  %v2929_v39 = vmax.f32 %v2865_v38, 0.0  ;;  %v2868_v50 = vadd.f32 %v17268_v10, %v2797_v12  ;;  %v2796_v1 = vmax.f32 %v17197_v41, %v2517_v35  ;;  %14484 = vmatpush3.msra.mxu1 %v3123_v31  ;;  %v3121_v41 = vld [vmem:[%s21008_s3 + $0x20] sm:$0xff] }
 0x21b   : > { %v14293_v16 = vpop.f32.mrf.mxu0  ;;  %v17436_v18 = vld [vmem:[#allocation2 + $0x28] sm:$0xff]  ;;  %14485 = vmatprep.subr.mxu1 %v3122_v42 }
 0x21c   : > { %2997 = vst.msk [vmem:[#allocation2 + $0x48] sm:$0xff] %vm1696_vm0, %v2929_v39  ;;  %v2932_v56 = vmax.f32 %v2868_v50, 0.0  ;;  %v2867_v29 = vadd.f32 %v17268_v10, %v2796_v1  ;;  %v2799_v17 = vmax.f32 %v17204_v43, %v14293_v16  ;;  %14391 = vmatprep.mubr.msk.f32.mxu1 %vm1696_vm0, %v17436_v18  ;;  %14613 = vmatmul.mubr.msk.f32.gmra.mxu0 %vm1696_vm0, %v17436_v18 }
 0x21d   : > { %v2527_v4 = vpop.f32.mrf.mxu0  ;;  %14392 = vmatmul.mubr.msk.f32.gmra.mxu1 %vm1696_vm0, %v17445_v20  ;;  %14615 = vmatprep.mubr.msk.f32.mxu0 %vm1696_vm0, %v17445_v20  ;;  %v17466_v15 = vld [vmem:[#allocation2 + $0x40] sm:$0xff] }
 0x21e   : > { %3000 = vst.msk [vmem:[#allocation2 + $0x60] sm:$0xff] %vm1696_vm0, %v2932_v56  ;;  %v2931_v43 = vmax.f32 %v2867_v29, 0.0  ;;  %v2870_v13 = vadd.f32 %v17268_v10, %v2799_v17  ;;  %v2798_v19 = vmax.f32 %v17209_v45, %v2527_v4  ;;  %14486 = vmatpush3.msra.mxu1 %v3122_v42  ;;  %v3120_v45 = vld [vmem:[%s21008_s3 + $0x18] sm:$0xff] }
 0x21f   : > { %v14296_v21 = vpop.f32.mrf.mxu0  ;;  %v17457_v33 = vld [vmem:[#allocation2 + $0x38] sm:$0xff]  ;;  %14487 = vmatprep.subr.mxu1 %v3121_v41 }
 0x220   : > { %2999 = vst.msk [vmem:[#allocation2 + $0x58] sm:$0xff] %vm1696_vm0, %v2931_v43  ;;  %v2934_v40 = vmax.f32 %v2870_v13, 0.0  ;;  %v2869_v23 = vadd.f32 %v17268_v10, %v2798_v19  ;;  %v2801_v14 = vmax.f32 %v17211_v46, %v14296_v21  ;;  %14394 = vmatprep.mubr.msk.f32.mxu1 %vm1696_vm0, %v17457_v33  ;;  %14616 = vmatmul.mubr.msk.f32.gmra.mxu0 %vm1696_vm0, %v17457_v33 }
 0x221   : > { %v2537_v9 = vpop.f32.mrf.mxu0  ;;  %14395 = vmatmul.mubr.msk.f32.gmra.mxu1 %vm1696_vm0, %v17466_v15  ;;  %14618 = vmatprep.mubr.msk.f32.mxu0 %vm1696_vm0, %v17466_v15  ;;  %v17487_v53 = vld [vmem:[#allocation2 + $0x50] sm:$0xff] }
 0x222   : > { %3002 = vst.msk [vmem:[#allocation2 + $0x70] sm:$0xff] %vm1696_vm0, %v2934_v40  ;;  %v2933_v46 = vmax.f32 %v2869_v23, 0.0  ;;  %v2872_v7 = vadd.f32 %v17268_v10, %v2801_v14  ;;  %v2800_v44 = vmax.f32 %v17215_v48, %v2537_v9  ;;  %14488 = vmatpush3.msra.mxu1 %v3121_v41  ;;  %v3119_v48 = vld [vmem:[%s21008_s3 + $0x10] sm:$0xff] }
 0x223   : > { %v14299_v22 = vpop.f32.mrf.mxu0  ;;  %v17478_v24 = vld [vmem:[#allocation2 + $0x48] sm:$0xff]  ;;  %14489 = vmatprep.subr.mxu1 %v3120_v45 }
 0x224   : > { %3001 = vst.msk [vmem:[#allocation2 + $0x68] sm:$0xff] %vm1696_vm0, %v2933_v46  ;;  %v2936_v26 = vmax.f32 %v2872_v7, 0.0  ;;  %v2871_v27 = vadd.f32 %v17268_v10, %v2800_v44  ;;  %v2803_v28 = vmax.f32 %v17217_v49, %v14299_v22  ;;  %14397 = vmatprep.mubr.msk.f32.mxu1 %vm1696_vm0, %v17478_v24  ;;  %14619 = vmatmul.mubr.msk.f32.gmra.mxu0 %vm1696_vm0, %v17478_v24 }
 0x225   : > { %v2547_v31 = vpop.f32.mrf.mxu0  ;;  %14398 = vmatmul.mubr.msk.f32.gmra.mxu1 %vm1696_vm0, %v17487_v53  ;;  %14621 = vmatprep.mubr.msk.f32.mxu0 %vm1696_vm0, %v17487_v53  ;;  %v17508_v12 = vld [vmem:[#allocation2 + $0x60] sm:$0xff] }
 0x226   : > { %3004 = vst.msk [vmem:[#allocation2 + $0x80] sm:$0xff] %vm1696_vm0, %v2936_v26  ;;  %v2935_v49 = vmax.f32 %v2871_v27, 0.0  ;;  %v2874_v30 = vadd.f32 %v17268_v10, %v2803_v28  ;;  %v2802_v32 = vmax.f32 %v17221_v51, %v2547_v31  ;;  %14490 = vmatpush3.msra.mxu1 %v3120_v45  ;;  %v3118_v51 = vld [vmem:[%s21008_s3 + $0x8] sm:$0xff] }
 0x227   : > { %v14302_v25 = vpop.f32.mrf.mxu0  ;;  %v17499_v59 = vld [vmem:[#allocation2 + $0x58] sm:$0xff]  ;;  %14491 = vmatprep.subr.mxu1 %v3119_v48 }
 0x228   : > { %3003 = vst.msk [vmem:[#allocation2 + $0x78] sm:$0xff] %vm1696_vm0, %v2935_v49  ;;  %v2938_v34 = vmax.f32 %v2874_v30, 0.0  ;;  %v2873_v36 = vadd.f32 %v17268_v10, %v2802_v32  ;;  %v2805_v38 = vmax.f32 %v17223_v52, %v14302_v25  ;;  %14400 = vmatprep.mubr.msk.f32.mxu1 %vm1696_vm0, %v17499_v59  ;;  %14622 = vmatmul.mubr.msk.f32.gmra.mxu0 %vm1696_vm0, %v17499_v59 }
 0x229   : > { %v2557_v42 = vpop.f32.mrf.mxu0  ;;  %14401 = vmatmul.mubr.msk.f32.gmra.mxu1 %vm1696_vm0, %v17508_v12  ;;  %14624 = vmatprep.mubr.msk.f32.mxu0 %vm1696_vm0, %v17508_v12  ;;  %v17529_v17 = vld [vmem:[#allocation2 + $0x70] sm:$0xff] }
 0x22a   : > { %3006 = vst.msk [vmem:[#allocation2 + $0x90] sm:$0xff] %vm1696_vm0, %v2938_v34  ;;  %v2937_v52 = vmax.f32 %v2873_v36, 0.0  ;;  %v2876_v35 = vadd.f32 %v17268_v10, %v2805_v38  ;;  %v2804_v39 = vmax.f32 %v17227_v54, %v2557_v42  ;;  %14492 = vmatpush3.msra.mxu1 %v3119_v48  ;;  %v3117_v54 = vld [vmem:[%s21008_s3] sm:$0xff] }
 0x22b   : > { %v14305_v50 = vpop.f32.mrf.mxu0  ;;  %v17520_v1 = vld [vmem:[#allocation2 + $0x68] sm:$0xff]  ;;  %14493 = vmatprep.subr.mxu1 %v3118_v51 }
 0x22c   : > { %3005 = vst.msk [vmem:[#allocation2 + $0x88] sm:$0xff] %vm1696_vm0, %v2937_v52  ;;  %v2940_v16 = vmax.f32 %v2876_v35, 0.0  ;;  %v2875_v56 = vadd.f32 %v17268_v10, %v2804_v39  ;;  %v2807_v29 = vmax.f32 %v17229_v55, %v14305_v50  ;;  %14403 = vmatprep.mubr.msk.f32.mxu1 %vm1696_vm0, %v17520_v1  ;;  %14625 = vmatmul.mubr.msk.f32.gmra.mxu0 %vm1696_vm0, %v17520_v1 }
 0x22d   : > { %v2567_v41 = vpop.f32.mrf.mxu0  ;;  %14404 = vmatmul.mubr.msk.f32.gmra.mxu1 %vm1696_vm0, %v17529_v17  ;;  %14627 = vmatprep.mubr.msk.f32.mxu0 %vm1696_vm0, %v17529_v17  ;;  %v17550_v14 = vld [vmem:[#allocation2 + $0x80] sm:$0xff] }
 0x22e   : > { %3008 = vst.msk [vmem:[#allocation2 + $0xa0] sm:$0xff] %vm1696_vm0, %v2940_v16  ;;  %v2939_v55 = vmax.f32 %v2875_v56, 0.0  ;;  %v2878_v4 = vadd.f32 %v17268_v10, %v2807_v29  ;;  %v2806_v43 = vmax.f32 %v17233_v57, %v2567_v41  ;;  %14494 = vmatpush3.msra.mxu1 %v3118_v51 }
 0x22f   : > { %v14308_v13 = vpop.f32.mrf.mxu0  ;;  %v17541_v19 = vld [vmem:[#allocation2 + $0x78] sm:$0xff]  ;;  %14495 = vmatprep.subr.mxu1 %v3117_v54 }
 0x230   : > { %3007 = vst.msk [vmem:[#allocation2 + $0x98] sm:$0xff] %vm1696_vm0, %v2939_v55  ;;  %v2942_v21 = vmax.f32 %v2878_v4, 0.0  ;;  %v2877_v40 = vadd.f32 %v17268_v10, %v2806_v43  ;;  %v2809_v23 = vmax.f32 %v17235_v58, %v14308_v13  ;;  %14406 = vmatprep.mubr.msk.f32.mxu1 %vm1696_vm0, %v17541_v19  ;;  %14628 = vmatmul.mubr.msk.f32.gmra.mxu0 %vm1696_vm0, %v17541_v19 }
 0x231   : > { %v2577_v57 = vpop.f32.mrf.mxu0  ;;  %14407 = vmatmul.mubr.msk.f32.gmra.mxu1 %vm1696_vm0, %v17550_v14  ;;  %14630 = vmatprep.mubr.msk.f32.mxu0 %vm1696_vm0, %v17550_v14  ;;  %v17568_v27 = vld [vmem:[#allocation2 + $0x90] sm:$0xff] }
 0x232   : > { %3010 = vst.msk [vmem:[#allocation2 + $0xb0] sm:$0xff] %vm1696_vm0, %v2942_v21  ;;  %v2941_v45 = vmax.f32 %v2877_v40, 0.0  ;;  %v2880_v58 = vadd.f32 %v17268_v10, %v2809_v23  ;;  %v2808_v9 = vmax.f32 %v17239_v60, %v2577_v57  ;;  %14496 = vmatpush3.msra.mxu1 %v3117_v54 }
 0x233   : > { %v14311_v46 = vpop.f32.mrf.mxu0  ;;  %v17559_v7 = vld [vmem:[#allocation2 + $0x88] sm:$0xff] }
 0x234   : > { %3009 = vst.msk [vmem:[#allocation2 + $0xa8] sm:$0xff] %vm1696_vm0, %v2941_v45  ;;  %v2944_v44 = vmax.f32 %v2880_v58, 0.0  ;;  %v2879_v22 = vadd.f32 %v17268_v10, %v2808_v9  ;;  %v2811_v26 = vmax.f32 %v17241_v61, %v14311_v46  ;;  %14409 = vmatprep.mubr.msk.f32.mxu1 %vm1696_vm0, %v17559_v7  ;;  %14631 = vmatmul.mubr.msk.f32.gmra.mxu0 %vm1696_vm0, %v17559_v7 }
 0x235   : > { %v2587_v60 = vpop.f32.mrf.mxu0  ;;  %14410 = vmatmul.mubr.msk.f32.gmra.mxu1 %vm1696_vm0, %v17568_v27  ;;  %14633 = vmatprep.mubr.msk.f32.mxu0 %vm1696_vm0, %v17568_v27  ;;  %v17586_v34 = vld [vmem:[#allocation2 + $0xa0] sm:$0xff] }
 0x236   : > { %3012 = vst.msk [vmem:[#allocation2 + $0xc0] sm:$0xff] %vm1696_vm0, %v2944_v44  ;;  %v2943_v28 = vmax.f32 %v2879_v22, 0.0  ;;  %v2882_v61 = vadd.f32 %v17268_v10, %v2811_v26  ;;  %v2810_v48 = vmax.f32 %v17245_v63, %v2587_v60  ;;  %v17683_v26 = vld [vmem:[#allocation2 + $0x108] sm:$0xff]  ;;  %v17689_v60 = vld [vmem:[#allocation2 + $0x110] sm:$0xff] }
 0x237   : > { %v14314_v31 = vpop.f32.mrf.mxu0  ;;  %v17577_v49 = vld [vmem:[#allocation2 + $0x98] sm:$0xff] }
 0x238   : > { %3011 = vst.msk [vmem:[#allocation2 + $0xb8] sm:$0xff] %vm1696_vm0, %v2943_v28  ;;  %v2946_v30 = vmax.f32 %v2882_v61, 0.0  ;;  %v2881_v32 = vadd.f32 %v17268_v10, %v2810_v48  ;;  %v2813_v25 = vmax.f32 %v17247_v0, %v14314_v31  ;;  %14412 = vmatprep.mubr.msk.f32.mxu1 %vm1696_vm0, %v17577_v49  ;;  %14634 = vmatmul.mubr.msk.f32.gmra.mxu0 %vm1696_vm0, %v17577_v49  ;;  %v17695_v28 = vld [vmem:[#allocation2 + $0x118] sm:$0xff]  ;;  %v17701_v61 = vld [vmem:[#allocation2 + $0x120] sm:$0xff]  ;;  %v17707_v48 = vld [vmem:[#allocation2 + $0x128] sm:$0xff] }
 0x239   : > { %v2597_v36 = vpop.f32.mrf.mxu0  ;;  %14413 = vmatmul.mubr.msk.f32.gmra.mxu1 %vm1696_vm0, %v17586_v34  ;;  %14636 = vmatprep.mubr.msk.f32.mxu0 %vm1696_vm0, %v17586_v34  ;;  %v17604_v50 = vld [vmem:[#allocation2 + $0xb0] sm:$0xff] }
 0x23a   : > { %3014 = vst.msk [vmem:[#allocation2 + $0xd0] sm:$0xff] %vm1696_vm0, %v2946_v30  ;;  %v2945_v63 = vmax.f32 %v2881_v32, 0.0  ;;  %v2884_v0 = vadd.f32 %v17268_v10, %v2813_v25  ;;  %v2812_v38 = vmax.f32 %v17251_v2, %v2597_v36  ;;  %v17713_v31 = vld [vmem:[#allocation2 + $0x130] sm:$0xff]  ;;  %v17719_v30 = vld [vmem:[#allocation2 + $0x138] sm:$0xff]  ;;  %v17725_v32 = vld [vmem:[#allocation2 + $0x140] sm:$0xff] }
 0x23b   : > { %v14317_v51 = vpop.f32.mrf.mxu0  ;;  %v17595_v42 = vld [vmem:[#allocation2 + $0xa8] sm:$0xff]  ;;  %v17737_v36 = vld [vmem:[#allocation2 + $0x150] sm:$0xff] }
 0x23c   : > { %3013 = vst.msk [vmem:[#allocation2 + $0xc8] sm:$0xff] %vm1696_vm0, %v2945_v63  ;;  %v2948_v52 = vmax.f32 %v2884_v0, 0.0  ;;  %v2883_v35 = vadd.f32 %v17268_v10, %v2812_v38  ;;  %v2815_v39 = vmax.f32 %v17253_v3, %v14317_v51  ;;  %14415 = vmatprep.mubr.msk.f32.mxu1 %vm1696_vm0, %v17595_v42  ;;  %14637 = vmatmul.mubr.msk.f32.gmra.mxu0 %vm1696_vm0, %v17595_v42  ;;  %v17731_v25 = vld [vmem:[#allocation2 + $0x148] sm:$0xff]  ;;  %v17743_v63 = vld [vmem:[#allocation2 + $0x158] sm:$0xff]  ;;  %v17749_v0 = vld [vmem:[#allocation2 + $0x160] sm:$0xff] }
 0x23d   : > { %v2607_v16 = vpop.f32.mrf.mxu0  ;;  %14416 = vmatmul.mubr.msk.f32.gmra.mxu1 %vm1696_vm0, %v17604_v50  ;;  %14639 = vmatprep.mubr.msk.f32.mxu0 %vm1696_vm0, %v17604_v50  ;;  %v17622_v43 = vld [vmem:[#allocation2 + $0xc0] sm:$0xff]  ;;  %v17754_v38 = vld [vmem:[%s21010_s5 + $0x78] sm:$0xff]  ;;  %v17760_v51 = vld [vmem:[#allocation2 + $0x168] sm:$0xff] }
 0x23e   : > { %3016 = vst.msk [vmem:[#allocation2 + $0xe0] sm:$0xff] %vm1696_vm0, %v2948_v52  ;;  %v2947_v2 = vmax.f32 %v2883_v35, 0.0  ;;  %v2886_v3 = vadd.f32 %v17268_v10, %v2815_v39  ;;  %v2814_v56 = vmax.f32 %v17257_v5, %v2607_v16  ;;  %14705 = vmatprep.subr.mxu1 %v17754_v38  ;;  %v17767_v52 = vld [vmem:[#allocation2 + $0x170] sm:$0xff]  ;;  %v17773_v35 = vld [vmem:[#allocation2 + $0x178] sm:$0xff]  ;;  %v17779_v39 = vld [vmem:[#allocation2 + $0x180] sm:$0xff] }
 0x23f   : > { %v14320_v29 = vpop.f32.mrf.mxu0  ;;  %v17613_v54 = vld [vmem:[#allocation2 + $0xb8] sm:$0xff]  ;;  %v17785_v16 = vld [vmem:[#allocation2 + $0x188] sm:$0xff] }
 0x240   : > { %3015 = vst.msk [vmem:[#allocation2 + $0xd8] sm:$0xff] %vm1696_vm0, %v2947_v2  ;;  %v2950_v41 = vmax.f32 %v2886_v3, 0.0  ;;  %v2885_v55 = vadd.f32 %v17268_v10, %v2814_v56  ;;  %v2817_v4 = vmax.f32 %v17259_v6, %v14320_v29  ;;  %14418 = vmatprep.mubr.msk.f32.mxu1 %vm1696_vm0, %v17613_v54  ;;  %14640 = vmatmul.mubr.msk.f32.gmra.mxu0 %vm1696_vm0, %v17613_v54  ;;  %v17791_v2 = vld [vmem:[#allocation2 + $0x190] sm:$0xff]  ;;  %v17797_v3 = vld [vmem:[#allocation2 + $0x198] sm:$0xff]  ;;  %v17803_v56 = vld [vmem:[#allocation2 + $0x1a0] sm:$0xff] }
 0x241   : > { %v2617_v13 = vpop.f32.mrf.mxu0  ;;  %14419 = vmatmul.mubr.msk.f32.gmra.mxu1 %vm1696_vm0, %v17622_v43  ;;  %14642 = vmatprep.mubr.msk.f32.mxu0 %vm1696_vm0, %v17622_v43  ;;  %v17639_v45 = vld [vmem:[#allocation2 + $0xd0] sm:$0xff]  ;;  %v17809_v29 = vld [vmem:[#allocation2 + $0x1a8] sm:$0xff] }
 0x242   : > { %3018 = vst.msk [vmem:[#allocation2 + $0xf0] sm:$0xff] %vm1696_vm0, %v2950_v41  ;;  %v2949_v5 = vmax.f32 %v2885_v55, 0.0  ;;  %v2888_v6 = vadd.f32 %v17268_v10, %v2817_v4  ;;  %v2816_v21 = vmax.f32 %v17263_v8, %v2617_v13  ;;  %v17815_v41 = vld [vmem:[#allocation2 + $0x1b0] sm:$0xff]  ;;  %v17821_v55 = vld [vmem:[#allocation2 + $0x1b8] sm:$0xff]  ;;  %v17827_v4 = vld [vmem:[#allocation2 + $0x1c0] sm:$0xff] }
 0x243   : > { %v17631_v40 = vld [vmem:[#allocation2 + $0xc8] sm:$0xff] }
 0x244   : > { %3017 = vst.msk [vmem:[#allocation2 + $0xe8] sm:$0xff] %vm1696_vm0, %v2949_v5  ;;  %v2952_v23 = vmax.f32 %v2888_v6, 0.0  ;;  %v2887_v57 = vadd.f32 %v17268_v10, %v2816_v21  ;;  %14421 = vmatprep.mubr.msk.f32.mxu1 %vm1696_vm0, %v17631_v40  ;;  %14643 = vmatmul.mubr.msk.f32.gmra.mxu0 %vm1696_vm0, %v17631_v40  ;;  %v17833_v13 = vld [vmem:[#allocation2 + $0x1c8] sm:$0xff]  ;;  %v17839_v5 = vld [vmem:[#allocation2 + $0x1d0] sm:$0xff]  ;;  %v17845_v6 = vld [vmem:[#allocation2 + $0x1d8] sm:$0xff] }
 0x245   : > { %14422 = vmatmul.mubr.msk.f32.gmra.mxu1 %vm1696_vm0, %v17639_v45  ;;  %14645 = vmatprep.mubr.msk.f32.mxu0 %vm1696_vm0, %v17639_v45  ;;  %v17653_v10 = vld [vmem:[#allocation2 + $0xe0] sm:$0xff]  ;;  %21038 = vst [vmem:[#allocation9_spill] sm:$0xff] %v17845_v6 }
 0x246   : > { %3020 = vst.msk [vmem:[#allocation2 + $0x100] sm:$0xff] %vm1696_vm0, %v2952_v23  ;;  %v2951_v8 = vmax.f32 %v2887_v57, 0.0  ;;  %v17851_v21 = vld [vmem:[#allocation2 + $0x1e0] sm:$0xff]  ;;  %v17857_v23 = vld [vmem:[#allocation2 + $0x1e8] sm:$0xff]  ;;  %v17863_v57 = vld [vmem:[#allocation2 + $0x1f0] sm:$0xff] }
 0x247   : > { %v17646_v58 = vld [vmem:[#allocation2 + $0xd8] sm:$0xff]  ;;  %21039 = vst [vmem:[#allocation10_spill] sm:$0xff] %v17851_v21  ;;  %21040 = vst [vmem:[#allocation11_spill] sm:$0xff] %v17857_v23 }
 0x248   : > { %3019 = vst.msk [vmem:[#allocation2 + $0xf8] sm:$0xff] %vm1696_vm0, %v2951_v8  ;;  %14424 = vmatprep.mubr.msk.f32.mxu1 %vm1696_vm0, %v17646_v58  ;;  %14646 = vmatmul.mubr.msk.f32.gmra.mxu0 %vm1696_vm0, %v17646_v58  ;;  %21041 = vst [vmem:[#allocation12_spill] sm:$0xff] %v17863_v57  ;;  %v17869_v8 = vld [vmem:[#allocation2 + $0x1f8] sm:$0xff] }
 0x249   : > { %14425 = vmatmul.mubr.msk.f32.gmra.mxu1 %vm1696_vm0, %v17653_v10  ;;  %14648 = vmatprep.mubr.msk.f32.mxu0 %vm1696_vm0, %v17653_v10  ;;  %v17665_v46 = vld [vmem:[#allocation2 + $0xf0] sm:$0xff] }
 0x24b   : > { %v17659_v9 = vld [vmem:[#allocation2 + $0xe8] sm:$0xff] }
 0x24c   : > { %14427 = vmatprep.mubr.msk.f32.mxu1 %vm1696_vm0, %v17659_v9  ;;  %14649 = vmatmul.mubr.msk.f32.gmra.mxu0 %vm1696_vm0, %v17659_v9 }
 0x24d   : > { %14428 = vmatmul.mubr.msk.f32.gmra.mxu1 %vm1696_vm0, %v17665_v46  ;;  %14651 = vmatprep.mubr.msk.f32.mxu0 %vm1696_vm0, %v17665_v46  ;;  %v17677_v22 = vld [vmem:[#allocation2 + $0x100] sm:$0xff] }
 0x24f   : > { %v17671_v44 = vld [vmem:[#allocation2 + $0xf8] sm:$0xff] }
 0x250   : > { %14430 = vmatprep.mubr.msk.f32.mxu1 %vm1696_vm0, %v17671_v44  ;;  %14652 = vmatmul.mubr.msk.f32.gmra.mxu0 %vm1696_vm0, %v17671_v44 }
 0x251   : > { %14431 = vmatmul.mubr.msk.f32.gmra.mxu1 %vm1696_vm0, %v17677_v22  ;;  %14654 = vmatprep.mubr.msk.f32.mxu0 %vm1696_vm0, %v17677_v22 }
 0x252   : > { %14433 = vmatprep.mubr.msk.f32.mxu1 %vm1696_vm0, %v17683_v26 }
 0x254   : > { %14655 = vmatmul.mubr.msk.f32.gmra.mxu0 %vm1696_vm0, %v17683_v26 }
 0x255   : > { %14434 = vmatmul.mubr.msk.f32.gmra.mxu1 %vm1696_vm0, %v17689_v60  ;;  %14657 = vmatprep.mubr.msk.f32.mxu0 %vm1696_vm0, %v17689_v60 }
 0x256   : > { %14436 = vmatprep.mubr.msk.f32.mxu1 %vm1696_vm0, %v17695_v28 }
 0x258   : > { %14658 = vmatmul.mubr.msk.f32.gmra.mxu0 %vm1696_vm0, %v17695_v28 }
 0x259   : > { %14437 = vmatmul.mubr.msk.f32.gmra.mxu1 %vm1696_vm0, %v17701_v61  ;;  %14660 = vmatprep.mubr.msk.f32.mxu0 %vm1696_vm0, %v17701_v61 }
 0x25a   : > { %14439 = vmatprep.mubr.msk.f32.mxu1 %vm1696_vm0, %v17707_v48 }
 0x25c   : > { %14661 = vmatmul.mubr.msk.f32.gmra.mxu0 %vm1696_vm0, %v17707_v48 }
 0x25d   : > { %14440 = vmatmul.mubr.msk.f32.gmra.mxu1 %vm1696_vm0, %v17713_v31  ;;  %14663 = vmatprep.mubr.msk.f32.mxu0 %vm1696_vm0, %v17713_v31 }
 0x25e   : > { %14442 = vmatprep.mubr.msk.f32.mxu1 %vm1696_vm0, %v17719_v30 }
 0x260   : > { %14664 = vmatmul.mubr.msk.f32.gmra.mxu0 %vm1696_vm0, %v17719_v30 }
 0x261   : > { %14443 = vmatmul.mubr.msk.f32.gmra.mxu1 %vm1696_vm0, %v17725_v32  ;;  %14666 = vmatprep.mubr.msk.f32.mxu0 %vm1696_vm0, %v17725_v32 }
 0x262   : > { %14445 = vmatprep.mubr.msk.f32.mxu1 %vm1696_vm0, %v17731_v25 }
 0x264   : > { %14667 = vmatmul.mubr.msk.f32.gmra.mxu0 %vm1696_vm0, %v17731_v25 }
 0x265   : > { %14446 = vmatmul.mubr.msk.f32.gmra.mxu1 %vm1696_vm0, %v17737_v36  ;;  %14669 = vmatprep.mubr.msk.f32.mxu0 %vm1696_vm0, %v17737_v36 }
 0x266   : > { %14448 = vmatprep.mubr.msk.f32.mxu1 %vm1696_vm0, %v17743_v63 }
 0x268   : > { %14670 = vmatmul.mubr.msk.f32.gmra.mxu0 %vm1696_vm0, %v17743_v63 }
 0x269   : > { %14449 = vmatmul.mubr.msk.f32.gmra.mxu1 %vm1696_vm0, %v17749_v0  ;;  %14672 = vmatprep.mubr.msk.f32.mxu0 %vm1696_vm0, %v17749_v0 }
 0x26a   : > { %14451 = vmatprep.mubr.msk.f32.mxu1 %vm1696_vm0, %v17760_v51 }
 0x26c   : > { %14673 = vmatmul.mubr.msk.f32.gmra.mxu0 %vm1696_vm0, %v17760_v51 }
 0x26d   : > { %14452 = vmatmul.mubr.msk.f32.gmra.mxu1 %vm1696_vm0, %v17767_v52  ;;  %14675 = vmatprep.mubr.msk.f32.mxu0 %vm1696_vm0, %v17767_v52 }
 0x26e   : > { %14454 = vmatprep.mubr.msk.f32.mxu1 %vm1696_vm0, %v17773_v35 }
 0x270   : > { %14676 = vmatmul.mubr.msk.f32.gmra.mxu0 %vm1696_vm0, %v17773_v35 }
 0x271   : > { %14455 = vmatmul.mubr.msk.f32.gmra.mxu1 %vm1696_vm0, %v17779_v39  ;;  %14678 = vmatprep.mubr.msk.f32.mxu0 %vm1696_vm0, %v17779_v39 }
 0x272   : > { %14457 = vmatprep.mubr.msk.f32.mxu1 %vm1696_vm0, %v17785_v16 }
 0x274   : > { %14679 = vmatmul.mubr.msk.f32.gmra.mxu0 %vm1696_vm0, %v17785_v16 }
 0x275   : > { %14458 = vmatmul.mubr.msk.f32.gmra.mxu1 %vm1696_vm0, %v17791_v2  ;;  %14681 = vmatprep.mubr.msk.f32.mxu0 %vm1696_vm0, %v17791_v2 }
 0x276   : > { %14460 = vmatprep.mubr.msk.f32.mxu1 %vm1696_vm0, %v17797_v3 }
 0x278   : > { %14682 = vmatmul.mubr.msk.f32.gmra.mxu0 %vm1696_vm0, %v17797_v3 }
 0x279   : > { %14461 = vmatmul.mubr.msk.f32.gmra.mxu1 %vm1696_vm0, %v17803_v56  ;;  %14684 = vmatprep.mubr.msk.f32.mxu0 %vm1696_vm0, %v17803_v56 }
 0x27a   : > { %14463 = vmatprep.mubr.msk.f32.mxu1 %vm1696_vm0, %v17809_v29 }
 0x27c   : > { %14685 = vmatmul.mubr.msk.f32.gmra.mxu0 %vm1696_vm0, %v17809_v29 }
 0x27d   : > { %14464 = vmatmul.mubr.msk.f32.gmra.mxu1 %vm1696_vm0, %v17815_v41  ;;  %14687 = vmatprep.mubr.msk.f32.mxu0 %vm1696_vm0, %v17815_v41 }
 0x27e   : > { %14466 = vmatprep.mubr.msk.f32.mxu1 %vm1696_vm0, %v17821_v55 }
 0x280   : > { %14688 = vmatmul.mubr.msk.f32.gmra.mxu0 %vm1696_vm0, %v17821_v55 }
 0x281   : > { %14467 = vmatmul.mubr.msk.f32.gmra.mxu1 %vm1696_vm0, %v17827_v4  ;;  %14690 = vmatprep.mubr.msk.f32.mxu0 %vm1696_vm0, %v17827_v4 }
 0x282   : > { %14469 = vmatprep.mubr.msk.f32.mxu1 %vm1696_vm0, %v17833_v13 }
 0x284   : > { %14691 = vmatmul.mubr.msk.f32.gmra.mxu0 %vm1696_vm0, %v17833_v13 }
 0x285   : > { %14470 = vmatmul.mubr.msk.f32.gmra.mxu1 %vm1696_vm0, %v17839_v5  ;;  %14693 = vmatprep.mubr.msk.f32.mxu0 %vm1696_vm0, %v17839_v5 }
 0x286   : > { %14472 = vmatprep.mubr.msk.f32.mxu1 %vm1696_vm0, %v17845_v6 }
 0x288   : > { %14694 = vmatmul.mubr.msk.f32.gmra.mxu0 %vm1696_vm0, %v17845_v6  ;;  %v3125_v6 = vld [vmem:[#allocation2 + $0x200] sm:$0xff] }
 0x289   : > { %14473 = vmatmul.mubr.msk.f32.gmra.mxu1 %vm1696_vm0, %v17851_v21  ;;  %14696 = vmatprep.mubr.msk.f32.mxu0 %vm1696_vm0, %v17851_v21  ;;  %v3053_v21 = vld [vmem:[#allocation2] sm:$0xff] }
 0x28a   : > { %14475 = vmatprep.mubr.msk.f32.mxu1 %vm1696_vm0, %v17857_v23 }
 0x28c   : > { %14697 = vmatmul.mubr.msk.f32.gmra.mxu0 %vm1696_vm0, %v17857_v23  ;;  %v4163_v23 = vld [vmem:[#allocation2 + $0x208] sm:$0xff] }
 0x28d   : > { %14476 = vmatmul.mubr.msk.f32.gmra.mxu1 %vm1696_vm0, %v17863_v57  ;;  %14699 = vmatprep.mubr.msk.f32.mxu0 %vm1696_vm0, %v17863_v57  ;;  %v12604_v57 = vld [vmem:[%s21010_s5 + $0x70] sm:$0xff] }
 0x28e   : > { %14478 = vmatprep.mubr.msk.f32.mxu1 %vm1696_vm0, %v17869_v8 }
 0x290   : > { %14700 = vmatmul.mubr.msk.f32.gmra.mxu0 %vm1696_vm0, %v17869_v8 }
 0x291   : > { %14479 = vmatmul.mubr.msk.f32.gmra.mxu1 %vm1696_vm0, %v3125_v6  ;;  %14702 = vmatprep.mubr.msk.f32.mxu0 %vm1696_vm0, %v3125_v6  ;;  %v12603_v6 = vld [vmem:[%s21010_s5 + $0x68] sm:$0xff] }
 0x292   : > { %14497 = vmatprep.mubr.msk.f32.mxu1 %vm1696_vm0, %v3053_v21  ;;  %v12602_v21 = vld [vmem:[%s21010_s5 + $0x60] sm:$0xff] }
 0x294   : > { %14703 = vmatmul.mubr.msk.f32.gmra.mxu0 %vm1696_vm0, %v4163_v23  ;;  %v21048_v23 = vld [vmem:[#allocation11_spill] sm:$0xff] }
 0x295   : > { %14498 = vmatmul.mubr.msk.f32.vlgmr.msra.gmra.mxu1 %vm1696_vm0, %v17399_v11  ;;  %v12600_v11 = vld [vmem:[%s21010_s5 + $0x50] sm:$0xff] }
 0x296   : > { %14500 = vmatprep.mubr.msk.f32.mxu1 %vm1696_vm0, %v17392_v47  ;;  %14706 = vmatpush3.msra.mxu1 %v17754_v38  ;;  %v12601_v47 = vld [vmem:[%s21010_s5 + $0x58] sm:$0xff] }
 0x297   : > { %14707 = vmatprep.subr.mxu1 %v12604_v57 }
 0x298   : > { %14708 = vmatpush3.msra.mxu1 %v12604_v57 }
 0x299   : > { %14501 = vmatmul.mubr.msk.f32.gmra.mxu1 %vm1696_vm0, %v17415_v62  ;;  %14709 = vmatprep.subr.mxu1 %v12603_v6  ;;  %v12599_v62 = vld [vmem:[%s21010_s5 + $0x48] sm:$0xff] }
 0x29a   : > { %14503 = vmatprep.mubr.msk.f32.mxu1 %vm1696_vm0, %v17424_v37  ;;  %14710 = vmatpush3.msra.mxu1 %v12603_v6 }
 0x29b   : > { %14711 = vmatprep.subr.mxu1 %v12602_v21 }
 0x29c   : > { %14712 = vmatpush3.msra.mxu1 %v12602_v21 }
 0x29d   : > { %14504 = vmatmul.mubr.msk.f32.gmra.mxu1 %vm1696_vm0, %v17436_v18  ;;  %14713 = vmatprep.subr.mxu1 %v12601_v47 }
 0x29e   : > { %14506 = vmatprep.mubr.msk.f32.mxu1 %vm1696_vm0, %v17445_v20  ;;  %14714 = vmatpush3.msra.mxu1 %v12601_v47  ;;  %v5084_v20 = vld [vmem:[%s21010_s5 + $0x38] sm:$0xff] }
 0x29f   : > { %14715 = vmatprep.subr.mxu1 %v12600_v11  ;;  %14817 = vmatprep.subr.mxu0 %v5084_v20 }
 0x2a0   : > { %14716 = vmatpush3.msra.mxu1 %v12600_v11  ;;  %14818 = vmatpush3.msra.mxu0 %v5084_v20 }
 0x2a1   : > { %14507 = vmatmul.mubr.msk.f32.gmra.mxu1 %vm1696_vm0, %v17457_v33  ;;  %14717 = vmatprep.subr.mxu1 %v12599_v62 }
 0x2a2   : > { %14509 = vmatprep.mubr.msk.f32.mxu1 %vm1696_vm0, %v17466_v15  ;;  %14718 = vmatpush3.msra.mxu1 %v12599_v62  ;;  %v5083_v15 = vld [vmem:[%s21010_s5 + $0x30] sm:$0xff] }
 0x2a3   : > { %14819 = vmatprep.subr.mxu0 %v5083_v15 }
 0x2a4   : > { %14820 = vmatpush3.msra.mxu0 %v5083_v15 }
 0x2a5   : > { %14510 = vmatmul.mubr.msk.f32.gmra.mxu1 %vm1696_vm0, %v17478_v24 }
 0x2a6   : > { %14512 = vmatprep.mubr.msk.f32.mxu1 %vm1696_vm0, %v17487_v53 }
 0x2a9   : > { %14513 = vmatmul.mubr.msk.f32.gmra.mxu1 %vm1696_vm0, %v17499_v59  ;;  %v5082_v59 = vld [vmem:[%s21010_s5 + $0x28] sm:$0xff] }
 0x2aa   : > { %14515 = vmatprep.mubr.msk.f32.mxu1 %vm1696_vm0, %v17508_v12  ;;  %14821 = vmatprep.subr.mxu0 %v5082_v59 }
 0x2ab   : > { %14822 = vmatpush3.msra.mxu0 %v5082_v59 }
 0x2ad   : > { %14516 = vmatmul.mubr.msk.f32.gmra.mxu1 %vm1696_vm0, %v17520_v1  ;;  %v5081_v1 = vld [vmem:[%s21010_s5 + $0x20] sm:$0xff] }
 0x2ae   : > { %14518 = vmatprep.mubr.msk.f32.mxu1 %vm1696_vm0, %v17529_v17  ;;  %14823 = vmatprep.subr.mxu0 %v5081_v1 }
 0x2af   : > { %14824 = vmatpush3.msra.mxu0 %v5081_v1 }
 0x2b1   : > { %14519 = vmatmul.mubr.msk.f32.gmra.mxu1 %vm1696_vm0, %v17541_v19 }
 0x2b2   : > { %14521 = vmatprep.mubr.msk.f32.mxu1 %vm1696_vm0, %v17550_v14  ;;  %v5080_v14 = vld [vmem:[%s21010_s5 + $0x18] sm:$0xff] }
 0x2b3   : > { %14825 = vmatprep.subr.mxu0 %v5080_v14 }
 0x2b4   : > { %14826 = vmatpush3.msra.mxu0 %v5080_v14 }
 0x2b5   : > { %14522 = vmatmul.mubr.msk.f32.gmra.mxu1 %vm1696_vm0, %v17559_v7  ;;  %v12598_v7 = vld [vmem:[%s21010_s5 + $0x40] sm:$0xff] }
 0x2b6   : > { %14524 = vmatprep.mubr.msk.f32.mxu1 %vm1696_vm0, %v17568_v27  ;;  %14719 = vmatprep.subr.mxu1 %v12598_v7 }
 0x2b7   : > { %14720 = vmatpush3.msra.mxu1 %v12598_v7 }
 0x2b9   : > { %14525 = vmatmul.mubr.msk.f32.gmra.mxu1 %vm1696_vm0, %v17577_v49  ;;  %v5079_v49 = vld [vmem:[%s21010_s5 + $0x10] sm:$0xff] }
 0x2ba   : > { %14527 = vmatprep.mubr.msk.f32.mxu1 %vm1696_vm0, %v17586_v34  ;;  %14827 = vmatprep.subr.mxu0 %v5079_v49 }
 0x2bb   : > { %14828 = vmatpush3.msra.mxu0 %v5079_v49 }
 0x2bd   : > { %14528 = vmatmul.mubr.msk.f32.gmra.mxu1 %vm1696_vm0, %v17595_v42 }
 0x2be   : > { %14530 = vmatprep.mubr.msk.f32.mxu1 %vm1696_vm0, %v17604_v50  ;;  %v5078_v50 = vld [vmem:[%s21010_s5 + $0x8] sm:$0xff] }
 0x2bf   : > { %14829 = vmatprep.subr.mxu0 %v5078_v50 }
 0x2c0   : > { %14830 = vmatpush3.msra.mxu0 %v5078_v50 }
 0x2c1   : > { %14531 = vmatmul.mubr.msk.f32.gmra.mxu1 %vm1696_vm0, %v17613_v54 }
 0x2c2   : > { %14533 = vmatprep.mubr.msk.f32.mxu1 %vm1696_vm0, %v17622_v43  ;;  %v5077_v43 = vld [vmem:[%s21010_s5] sm:$0xff] }
 0x2c3   : > { %14831 = vmatprep.subr.mxu0 %v5077_v43 }
 0x2c4   : > { %14832 = vmatpush3.msra.mxu0 %v5077_v43 }
 0x2c5   : > { %14534 = vmatmul.mubr.msk.f32.gmra.mxu1 %vm1696_vm0, %v17631_v40  ;;  %v5013_v40 = vld [vmem:[#allocation3] sm:$0xff] }
 0x2c6   : > { %14536 = vmatprep.mubr.msk.f32.mxu1 %vm1696_vm0, %v17639_v45  ;;  %14833 = vmatprep.mubr.msk.f32.mxu0 %vm1696_vm0, %v5013_v40 }
 0x2c9   : > { %14537 = vmatmul.mubr.msk.f32.gmra.mxu1 %vm1696_vm0, %v17646_v58 }
 0x2ca   : > { %14539 = vmatprep.mubr.msk.f32.mxu1 %vm1696_vm0, %v17653_v10 }
 0x2cd   : > { %14540 = vmatmul.mubr.msk.f32.gmra.mxu1 %vm1696_vm0, %v17659_v9 }
 0x2ce   : > { %14542 = vmatprep.mubr.msk.f32.mxu1 %vm1696_vm0, %v17665_v46 }
 0x2d1   : > { %14543 = vmatmul.mubr.msk.f32.gmra.mxu1 %vm1696_vm0, %v17671_v44 }
 0x2d2   : > { %14545 = vmatprep.mubr.msk.f32.mxu1 %vm1696_vm0, %v17677_v22 }
 0x2d5   : > { %v17962_v37 = vpop.f32.mrf.mxu1  ;;  %14546 = vmatmul.mubr.msk.f32.gmra.mxu1 %vm1696_vm0, %v17683_v26 }
 0x2d6   : > { %14548 = vmatprep.mubr.msk.f32.mxu1 %vm1696_vm0, %v17689_v60  ;;  %v18061_v60 = vld [vmem:[%s21010_s5 + $0xb8] sm:$0xff] }
 0x2d7   : > { %v17968_v18 = vpop.f32.mrf.mxu1  ;;  %14929 = vmatprep.subr.mxu1 %v18061_v60 }
 0x2d8   : > { %v17982_v24 = vpop.f32.mrf.mxu0 }
 0x2d9   : > { %v17973_v33 = vpop.f32.mrf.mxu1  ;;  %14549 = vmatmul.mubr.msk.f32.gmra.mxu1 %vm1696_vm0, %v17695_v28 }
 0x2da   : > { %14551 = vmatprep.mubr.msk.f32.mxu1 %vm1696_vm0, %v17701_v61  ;;  %v17998_v17 = vpop.f32.mrf.mxu0 }
 0x2db   : > { %v17984_v53 = vpop.f32.mrf.mxu1 }
 0x2dc   : > { %v18017_v34 = vpop.f32.mrf.mxu0 }
 0x2dd   : > { %v17989_v12 = vpop.f32.mrf.mxu1  ;;  %14552 = vmatmul.mubr.msk.f32.gmra.mxu1 %vm1696_vm0, %v17707_v48 }
 0x2de   : > { %14554 = vmatprep.mubr.msk.f32.mxu1 %vm1696_vm0, %v17713_v31  ;;  %v18033_v45 = vpop.f32.mrf.mxu0 }
 0x2df   : > { %v18000_v19 = vpop.f32.mrf.mxu1 }
 0x2e0   : > { %v18044_v9 = vpop.f32.mrf.mxu0 }
 0x2e1   : > { %v18008_v27 = vpop.f32.mrf.mxu1  ;;  %14555 = vmatmul.mubr.msk.f32.gmra.mxu1 %vm1696_vm0, %v17719_v30 }
 0x2e2   : > { %14557 = vmatprep.mubr.msk.f32.mxu1 %vm1696_vm0, %v17725_v32  ;;  %v18054_v22 = vpop.f32.mrf.mxu0 }
 0x2e3   : > { %v18019_v42 = vpop.f32.mrf.mxu1 }
 0x2e4   : > { %v18070_v61 = vpop.f32.mrf.mxu0 }
 0x2e5   : > { %v18024_v54 = vpop.f32.mrf.mxu1  ;;  %14558 = vmatmul.mubr.msk.f32.gmra.mxu1 %vm1696_vm0, %v17731_v25 }
 0x2e6   : > { %14560 = vmatprep.mubr.msk.f32.mxu1 %vm1696_vm0, %v17737_v36  ;;  %v18080_v30 = vpop.f32.mrf.mxu0 }
 0x2e7   : > { %v18035_v58 = vpop.f32.mrf.mxu1 }
 0x2e8   : > { %v18090_v36 = vpop.f32.mrf.mxu0 }
 0x2e9   : > { %v18038_v10 = vpop.f32.mrf.mxu1  ;;  %14561 = vmatmul.mubr.msk.f32.gmra.mxu1 %vm1696_vm0, %v17743_v63 }
 0x2ea   : > { %14563 = vmatprep.mubr.msk.f32.mxu1 %vm1696_vm0, %v17749_v0  ;;  %v18100_v38 = vpop.f32.mrf.mxu0 }
 0x2eb   : > { %v18046_v46 = vpop.f32.mrf.mxu1 }
 0x2ed   : > { %v18048_v44 = vpop.f32.mrf.mxu1  ;;  %14564 = vmatmul.mubr.msk.f32.gmra.mxu1 %vm1696_vm0, %v17760_v51 }
 0x2ee   : > { %14566 = vmatprep.mubr.msk.f32.mxu1 %vm1696_vm0, %v17767_v52 }
 0x2ef   : > { %v18056_v26 = vpop.f32.mrf.mxu1 }
 0x2f1   : > { %v18063_v28 = vpop.f32.mrf.mxu1  ;;  %14567 = vmatmul.mubr.msk.f32.gmra.mxu1 %vm1696_vm0, %v17773_v35  ;;  %v18110_v35 = vpop.f32.mrf.mxu0 }
 0x2f2   : > { %14569 = vmatprep.mubr.msk.f32.mxu1 %vm1696_vm0, %v17779_v39 }
 0x2f3   : > { %v18072_v48 = vpop.f32.mrf.mxu1 }
 0x2f5   : > { %v18074_v31 = vpop.f32.mrf.mxu1  ;;  %14570 = vmatmul.mubr.msk.f32.gmra.mxu1 %vm1696_vm0, %v17785_v16 }
 0x2f6   : > { %14572 = vmatprep.mubr.msk.f32.mxu1 %vm1696_vm0, %v17791_v2  ;;  %v18120_v2 = vpop.f32.mrf.mxu0 }
 0x2f7   : > { %v18082_v32 = vpop.f32.mrf.mxu1 }
 0x2f9   : > { %v18084_v25 = vpop.f32.mrf.mxu1  ;;  %14573 = vmatmul.mubr.msk.f32.gmra.mxu1 %vm1696_vm0, %v17797_v3 }
 0x2fa   : > { %14575 = vmatprep.mubr.msk.f32.mxu1 %vm1696_vm0, %v17803_v56 }
 0x2fb   : > { %v18092_v63 = vpop.f32.mrf.mxu1 }
 0x2fd   : > { %v18094_v0 = vpop.f32.mrf.mxu1  ;;  %14576 = vmatmul.mubr.msk.f32.gmra.mxu1 %vm1696_vm0, %v17809_v29  ;;  %v21044_v29 = vld [vmem:[#allocation9_spill] sm:$0xff] }
 0x2fe   : > { %14578 = vmatprep.mubr.msk.f32.mxu1 %vm1696_vm0, %v17815_v41  ;;  %v21045_v41 = vld [vmem:[#allocation10_spill] sm:$0xff] }
 0x2ff   : > { %v18102_v51 = vpop.f32.mrf.mxu1 }
 0x301   : > { %v18104_v52 = vpop.f32.mrf.mxu1  ;;  %14579 = vmatmul.mubr.msk.f32.gmra.mxu1 %vm1696_vm0, %v17821_v55  ;;  %v18130_v55 = vpop.f32.mrf.mxu0 }
 0x302   : > { %14581 = vmatprep.mubr.msk.f32.mxu1 %vm1696_vm0, %v17827_v4 }
 0x303   : > { %v18112_v39 = vpop.f32.mrf.mxu1  ;;  %v18140_v57 = vpop.f32.mrf.mxu0 }
 0x305   : > { %v18114_v16 = vpop.f32.mrf.mxu1  ;;  %14582 = vmatmul.mubr.msk.f32.gmra.mxu1 %vm1696_vm0, %v17833_v13  ;;  %v18148_v47 = vpop.f32.mrf.mxu0 }
 0x306   : > { %14584 = vmatprep.mubr.msk.f32.mxu1 %vm1696_vm0, %v17839_v5  ;;  %v21049_v5 = vld [vmem:[#allocation12_spill] sm:$0xff] }
 0x307   : > { %v18122_v3 = vpop.f32.mrf.mxu1  ;;  %v18154_v20 = vpop.f32.mrf.mxu0 }
 0x308   : > { %21042 = vst [vmem:[#allocation13_spill] sm:$0xff] %v18122_v3 }
 0x309   : > { %v18124_v56 = vpop.f32.mrf.mxu1  ;;  %14585 = vmatmul.mubr.msk.f32.gmra.mxu1 %vm1696_vm0, %v21044_v29  ;;  %v18160_v1 = vpop.f32.mrf.mxu0 }
 0x30a   : > { %21043 = vst [vmem:[#allocation14_spill] sm:$0xff] %v18124_v56  ;;  %14587 = vmatprep.mubr.msk.f32.mxu1 %vm1696_vm0, %v21045_v41 }
 0x30b   : > { %v18132_v4 = vpop.f32.mrf.mxu1  ;;  %v18166_v49 = vpop.f32.mrf.mxu0 }
 0x30c   : > { %21046 = vst [vmem:[#allocation9_spill] sm:$0xff] %v18132_v4 }
 0x30d   : > { %v18134_v13 = vpop.f32.mrf.mxu1  ;;  %14588 = vmatmul.mubr.msk.f32.gmra.mxu1 %vm1696_vm0, %v21048_v23  ;;  %v18172_v43 = vpop.f32.mrf.mxu0 }
 0x30e   : > { %21047 = vst [vmem:[#allocation10_spill] sm:$0xff] %v18134_v13  ;;  %14590 = vmatprep.mubr.msk.f32.mxu1 %vm1696_vm0, %v21049_v5 }
 0x30f   : > { %v18142_v6 = vpop.f32.mrf.mxu1  ;;  %v18178_v41 = vpop.f32.mrf.mxu0 }
 0x310   : > { %21050 = vst [vmem:[#allocation11_spill] sm:$0xff] %v18142_v6 }
 0x311   : > { %v18144_v21 = vpop.f32.mrf.mxu1  ;;  %14591 = vmatmul.mubr.msk.f32.gmra.mxu1 %vm1696_vm0, %v17869_v8 }
 0x312   : > { %21051 = vst [vmem:[#allocation12_spill] sm:$0xff] %v18144_v21 }
 0x313   : > { %v18150_v11 = vpop.f32.mrf.mxu1 }
 0x314   : > { %21052 = vst [vmem:[#allocation15_spill] sm:$0xff] %v18150_v11 }
 0x315   : > { %v18152_v62 = vpop.f32.mrf.mxu1 }
 0x316   : > { %21053 = vst [vmem:[#allocation16_spill] sm:$0xff] %v18152_v62 }
 0x317   : > { %v18156_v15 = vpop.f32.mrf.mxu1 }
 0x318   : > { %21054 = vst [vmem:[#allocation17_spill] sm:$0xff] %v18156_v15 }
 0x319   : > { %v18158_v59 = vpop.f32.mrf.mxu1 }
 0x31a   : > { %21055 = vst [vmem:[#allocation18_spill] sm:$0xff] %v18158_v59 }
 0x31b   : > { %v18162_v14 = vpop.f32.mrf.mxu1 }
 0x31c   : > { %21056 = vst [vmem:[#allocation19_spill] sm:$0xff] %v18162_v14  ;;  %v18184_v14 = vpop.f32.mrf.mxu0 }
 0x31d   : > { %v18164_v7 = vpop.f32.mrf.mxu1 }
 0x31e   : > { %21057 = vst [vmem:[#allocation20_spill] sm:$0xff] %v18164_v7 }
 0x31f   : > { %v18168_v8 = vpop.f32.mrf.mxu1 }
 0x320   : > { %21058 = vst [vmem:[#allocation21_spill] sm:$0xff] %v18168_v8  ;;  %v18190_v8 = vpop.f32.mrf.mxu0 }
 0x321   : > { %v18170_v50 = vpop.f32.mrf.mxu1 }
 0x322   : > { %21059 = vst [vmem:[#allocation22_spill] sm:$0xff] %v18170_v50 }
 0x323   : > { %v18174_v40 = vpop.f32.mrf.mxu1 }
 0x324   : > { %21060 = vst [vmem:[#allocation23_spill] sm:$0xff] %v18174_v40  ;;  %v18196_v40 = vpop.f32.mrf.mxu0 }
 0x325   : > { %v18176_v29 = vpop.f32.mrf.mxu1 }
 0x326   : > { %21061 = vst [vmem:[#allocation24_spill] sm:$0xff] %v18176_v29 }
 0x327   : > { %v18180_v23 = vpop.f32.mrf.mxu1 }
 0x328   : > { %21062 = vst [vmem:[#allocation25_spill] sm:$0xff] %v18180_v23  ;;  %v18202_v23 = vpop.f32.mrf.mxu0 }
 0x329   : > { %v18182_v5 = vpop.f32.mrf.mxu1 }
 0x32a   : > { %21063 = vst [vmem:[#allocation26_spill] sm:$0xff] %v18182_v5 }
 0x32b   : > { %v18186_v7 = vpop.f32.mrf.mxu1 }
 0x32c   : > { %21064 = vst [vmem:[#allocation27_spill] sm:$0xff] %v18186_v7  ;;  %v18208_v7 = vpop.f32.mrf.mxu0 }
 0x32d   : > { %v18188_v59 = vpop.f32.mrf.mxu1  ;;  %21072 = vst [vmem:[#allocation35_spill] sm:$0xff] %v18208_v7 }
 0x32e   : > { %21065 = vst [vmem:[#allocation28_spill] sm:$0xff] %v18188_v59 }
 0x32f   : > { %v18192_v50 = vpop.f32.mrf.mxu1 }
 0x330   : > { %21066 = vst [vmem:[#allocation29_spill] sm:$0xff] %v18192_v50  ;;  %v18214_v50 = vpop.f32.mrf.mxu0 }
 0x331   : > { %v18194_v15 = vpop.f32.mrf.mxu1  ;;  %21075 = vst [vmem:[#allocation38_spill] sm:$0xff] %v18214_v50 }
 0x332   : > { %21067 = vst [vmem:[#allocation30_spill] sm:$0xff] %v18194_v15 }
 0x333   : > { %v18198_v29 = vpop.f32.mrf.mxu1 }
 0x334   : > { %21068 = vst [vmem:[#allocation31_spill] sm:$0xff] %v18198_v29  ;;  %v18220_v29 = vpop.f32.mrf.mxu0 }
 0x335   : > { %v18200_v62 = vpop.f32.mrf.mxu1  ;;  %21078 = vst [vmem:[#allocation41_spill] sm:$0xff] %v18220_v29 }
 0x336   : > { %21069 = vst [vmem:[#allocation32_spill] sm:$0xff] %v18200_v62 }
 0x337   : > { %v18204_v5 = vpop.f32.mrf.mxu1 }
 0x338   : > { %21070 = vst [vmem:[#allocation33_spill] sm:$0xff] %v18204_v5  ;;  %v18226_v5 = vpop.f32.mrf.mxu0 }
 0x339   : > { %v18206_v11 = vpop.f32.mrf.mxu1  ;;  %21081 = vst [vmem:[#allocation44_spill] sm:$0xff] %v18226_v5 }
 0x33a   : > { %21071 = vst [vmem:[#allocation34_spill] sm:$0xff] %v18206_v11 }
 0x33b   : > { %v18210_v59 = vpop.f32.mrf.mxu1 }
 0x33c   : > { %21073 = vst [vmem:[#allocation36_spill] sm:$0xff] %v18210_v59  ;;  %v18232_v59 = vpop.f32.mrf.mxu0 }
 0x33d   : > { %v18212_v21 = vpop.f32.mrf.mxu1  ;;  %21084 = vst [vmem:[#allocation47_spill] sm:$0xff] %v18232_v59 }
 0x33e   : > { %21074 = vst [vmem:[#allocation37_spill] sm:$0xff] %v18212_v21 }
 0x33f   : > { %v18216_v15 = vpop.f32.mrf.mxu1 }
 0x340   : > { %21076 = vst [vmem:[#allocation39_spill] sm:$0xff] %v18216_v15  ;;  %v18238_v15 = vpop.f32.mrf.mxu0 }
 0x341   : > { %v18218_v6 = vpop.f32.mrf.mxu1  ;;  %21087 = vst [vmem:[#allocation50_spill] sm:$0xff] %v18238_v15 }
 0x342   : > { %21077 = vst [vmem:[#allocation40_spill] sm:$0xff] %v18218_v6 }
 0x343   : > { %v18222_v62 = vpop.f32.mrf.mxu1 }
 0x344   : > { %21079 = vst [vmem:[#allocation42_spill] sm:$0xff] %v18222_v62  ;;  %v18244_v62 = vpop.f32.mrf.mxu0 }
 0x345   : > { %v18224_v13 = vpop.f32.mrf.mxu1  ;;  %21090 = vst [vmem:[#allocation53_spill] sm:$0xff] %v18244_v62 }
 0x346   : > { %21080 = vst [vmem:[#allocation43_spill] sm:$0xff] %v18224_v13 }
 0x347   : > { %v18228_v11 = vpop.f32.mrf.mxu1 }
 0x348   : > { %21082 = vst [vmem:[#allocation45_spill] sm:$0xff] %v18228_v11 }
 0x349   : > { %v18230_v4 = vpop.f32.mrf.mxu1 }
 0x34a   : > { %21083 = vst [vmem:[#allocation46_spill] sm:$0xff] %v18230_v4  ;;  %v18249_v4 = vpop.f32.mrf.mxu0 }
 0x34b   : > { %v18234_v21 = vpop.f32.mrf.mxu1  ;;  %21092 = vst [vmem:[#allocation55_spill] sm:$0xff] %v18249_v4 }
 0x34c   : > { %21085 = vst [vmem:[#allocation48_spill] sm:$0xff] %v18234_v21  ;;  %v18254_v21 = vld [vmem:[%s21009_s4] ss:$0 sm:$0xff] }
 0x34d   : > { %v18236_v56 = vpop.f32.mrf.mxu1 }
 0x34e   : > { %21086 = vst [vmem:[#allocation49_spill] sm:$0xff] %v18236_v56 }
 0x34f   : > { %v18240_v6 = vpop.f32.mrf.mxu1 }
 0x350   : > { %21088 = vst [vmem:[#allocation51_spill] sm:$0xff] %v18240_v6 }
 0x351   : > { %v18242_v29 = vpop.f32.mrf.mxu1 }
 0x352   : > { %21089 = vst [vmem:[#allocation52_spill] sm:$0xff] %v18242_v29 }
 0x353   : > { %v18246_v13 = vpop.f32.mrf.mxu1 }
 0x354   : > { %21091 = vst [vmem:[#allocation54_spill] sm:$0xff] %v18246_v13 }
 0x355   : > { %v14499_v5 = vpop.f32.mrf.mxu1 }
 0x356   : > { %v3787_v11 = vadd.f32 %v14499_v5, %v17962_v37  ;;  %v18261_v37 = vpop.f32.mrf.mxu0 }
 0x357   : > { %v3781_v56 = vpop.f32.mrf.mxu1 }
 0x358   : > { %v4751_v15 = vadd.f32 %v17982_v24, %v3787_v11  ;;  %v3782_v6 = vadd.f32 %v3781_v56, %v17968_v18 }
 0x359   : > { %v14502_v29 = vpop.f32.mrf.mxu1 }
 0x35a   : > { %v4822_v62 = vadd.f32 %v18254_v21, %v4751_v15  ;;  %v4750_v13 = vadd.f32 %v17998_v17, %v3782_v6  ;;  %v3797_v59 = vadd.f32 %v14502_v29, %v17973_v33  ;;  %v18270_v6 = vpop.f32.mrf.mxu0 }
 0x35b   : > { %v3791_v5 = vpop.f32.mrf.mxu1 }
 0x35c   : > { %v4886_v4 = vmax.f32 %v4822_v62, 0.0  ;;  %v4821_v50 = vadd.f32 %v18254_v21, %v4750_v13  ;;  %v4753_v3 = vadd.f32 %v18017_v34, %v3797_v59  ;;  %v3792_v7 = vadd.f32 %v3791_v5, %v17984_v53  ;;  %v18280_v59 = vpop.f32.mrf.mxu0 }
 0x35d   : > { %v14505_v24 = vpop.f32.mrf.mxu1 }
 0x35e   : > { %4950 = vst.msk [vmem:[#allocation3 + $0x10] sm:$0xff] %vm1696_vm0, %v4886_v4  ;;  %v4885_v18 = vmax.f32 %v4821_v50, 0.0  ;;  %v4824_v56 = vadd.f32 %v18254_v21, %v4753_v3  ;;  %v4752_v17 = vadd.f32 %v18033_v45, %v3792_v7  ;;  %v3807_v33 = vadd.f32 %v14505_v24, %v17989_v12 }
 0x35f   : > { %v3801_v11 = vpop.f32.mrf.mxu1 }
 0x360   : > { %4949 = vst.msk [vmem:[#allocation3 + $0x8] sm:$0xff] %vm1696_vm0, %v4885_v18  ;;  %v4888_v13 = vmax.f32 %v4824_v56, 0.0  ;;  %v4823_v34 = vadd.f32 %v18254_v21, %v4752_v17  ;;  %v4755_v53 = vadd.f32 %v18044_v9, %v3807_v33  ;;  %v3802_v62 = vadd.f32 %v3801_v11, %v18000_v19  ;;  %v18290_v56 = vpop.f32.mrf.mxu0 }
 0x361   : > { %v14508_v4 = vpop.f32.mrf.mxu1 }
 0x362   : > { %4952 = vst.msk [vmem:[#allocation3 + $0x20] sm:$0xff] %vm1696_vm0, %v4888_v13  ;;  %v4887_v3 = vmax.f32 %v4823_v34, 0.0  ;;  %v4826_v45 = vadd.f32 %v18254_v21, %v4755_v53  ;;  %v4754_v12 = vadd.f32 %v18054_v22, %v3802_v62  ;;  %v3817_v15 = vadd.f32 %v14508_v4, %v18008_v27  ;;  %v18308_v4 = vpop.f32.mrf.mxu0 }
 0x363   : > { %v3811_v7 = vpop.f32.mrf.mxu1 }
 0x364   : > { %4951 = vst.msk [vmem:[#allocation3 + $0x18] sm:$0xff] %vm1696_vm0, %v4887_v3  ;;  %v4890_v50 = vmax.f32 %v4826_v45, 0.0  ;;  %v4825_v9 = vadd.f32 %v18254_v21, %v4754_v12  ;;  %v4757_v19 = vadd.f32 %v18070_v61, %v3817_v15  ;;  %v3812_v29 = vadd.f32 %v3811_v7, %v18019_v42 }
 0x365   : > { %v14511_v5 = vpop.f32.mrf.mxu1 }
 0x366   : > { %4954 = vst.msk [vmem:[#allocation3 + $0x30] sm:$0xff] %vm1696_vm0, %v4890_v50  ;;  %v4889_v24 = vmax.f32 %v4825_v9, 0.0  ;;  %v4828_v22 = vadd.f32 %v18254_v21, %v4757_v19  ;;  %v4756_v27 = vadd.f32 %v18080_v30, %v3812_v29  ;;  %v3827_v18 = vadd.f32 %v14511_v5, %v18024_v54  ;;  %v5015_v30 = vld [vmem:[#allocation3 + $0x10] sm:$0xff]  ;;  %v12740_v54 = vld [vmem:[%s21010_s5 + $0xb0] sm:$0xff]  ;;  %v18325_v29 = vpop.f32.mrf.mxu0 }
 0x367   : > { %v3821_v17 = vpop.f32.mrf.mxu1  ;;  %v5014_v33 = vld [vmem:[#allocation3 + $0x8] sm:$0xff] }
 0x368   : > { %4953 = vst.msk [vmem:[#allocation3 + $0x28] sm:$0xff] %vm1696_vm0, %v4889_v24  ;;  %v4892_v11 = vmax.f32 %v4828_v22, 0.0  ;;  %v4827_v61 = vadd.f32 %v18254_v21, %v4756_v27  ;;  %v4759_v42 = vadd.f32 %v18090_v36, %v3827_v18  ;;  %v3822_v13 = vadd.f32 %v3821_v17, %v18035_v58  ;;  %14721 = vmatprep.mubr.msk.f32.mxu1 %vm1696_vm0, %v5014_v33 }
 0x369   : > { %14834 = vmatmul.mubr.msk.f32.vlgmr.msra.gmra.mxu0 %vm1696_vm0, %v5014_v33  ;;  %v14514_v34 = vpop.f32.mrf.mxu1  ;;  %14722 = vmatmul.mubr.msk.f32.vlgmr.msra.gmra.mxu1 %vm1696_vm0, %v5015_v30 }
 0x36a   : > { %14836 = vmatprep.mubr.msk.f32.mxu0 %vm1696_vm0, %v5015_v30  ;;  %4956 = vst.msk [vmem:[#allocation3 + $0x40] sm:$0xff] %vm1696_vm0, %v4892_v11  ;;  %v4891_v53 = vmax.f32 %v4827_v61, 0.0  ;;  %v4830_v36 = vadd.f32 %v18254_v21, %v4759_v42  ;;  %v4758_v58 = vadd.f32 %v18100_v38, %v3822_v13  ;;  %v3837_v62 = vadd.f32 %v14514_v34, %v18038_v10  ;;  %v5017_v10 = vld [vmem:[#allocation3 + $0x20] sm:$0xff]  ;;  %v18342_v42 = vpop.f32.mrf.mxu0 }
 0x36b   : > { %14930 = vmatpush3.msra.mxu1 %v18061_v60  ;;  %v3831_v3 = vpop.f32.mrf.mxu1  ;;  %v5016_v45 = vld [vmem:[#allocation3 + $0x18] sm:$0xff] }
 0x36c   : > { %14931 = vmatprep.subr.mxu1 %v12740_v54  ;;  %4955 = vst.msk [vmem:[#allocation3 + $0x38] sm:$0xff] %vm1696_vm0, %v4891_v53  ;;  %v4894_v12 = vmax.f32 %v4830_v36, 0.0  ;;  %v4829_v15 = vadd.f32 %v18254_v21, %v4758_v58  ;;  %v4761_v7 = vadd.f32 %v18110_v35, %v3837_v62  ;;  %v3832_v50 = vadd.f32 %v3831_v3, %v18046_v46  ;;  %v12739_v60 = vld [vmem:[%s21010_s5 + $0xa8] sm:$0xff] }
 0x36d   : > { %14724 = vmatprep.mubr.msk.f32.mxu1 %vm1696_vm0, %v5016_v45  ;;  %14837 = vmatmul.mubr.msk.f32.gmra.mxu0 %vm1696_vm0, %v5016_v45  ;;  %v14517_v38 = vpop.f32.mrf.mxu1  ;;  %v18359_v45 = vpop.f32.mrf.mxu0 }
 0x36e   : > { %14725 = vmatmul.mubr.msk.f32.gmra.mxu1 %vm1696_vm0, %v5017_v10  ;;  %14839 = vmatprep.mubr.msk.f32.mxu0 %vm1696_vm0, %v5017_v10  ;;  %4958 = vst.msk [vmem:[#allocation3 + $0x50] sm:$0xff] %vm1696_vm0, %v4894_v12  ;;  %v4893_v9 = vmax.f32 %v4829_v15, 0.0  ;;  %v4832_v35 = vadd.f32 %v18254_v21, %v4761_v7  ;;  %v4760_v46 = vadd.f32 %v18120_v2, %v3832_v50  ;;  %v12738_v2 = vld [vmem:[%s21010_s5 + $0xa0] sm:$0xff] }
 0x36f   : > { %v3847_v19 = vadd.f32 %v14517_v38, %v18048_v44  ;;  %14932 = vmatpush3.msra.mxu1 %v12740_v54  ;;  %v3841_v5 = vpop.f32.mrf.mxu1  ;;  %v5018_v24 = vld [vmem:[#allocation3 + $0x28] sm:$0xff]  ;;  %v5019_v44 = vld [vmem:[#allocation3 + $0x30] sm:$0xff] }
 0x370   : > { %14933 = vmatprep.subr.mxu1 %v12739_v60  ;;  %4957 = vst.msk [vmem:[#allocation3 + $0x48] sm:$0xff] %vm1696_vm0, %v4893_v9  ;;  %v4896_v22 = vmax.f32 %v4832_v35, 0.0  ;;  %v4831_v27 = vadd.f32 %v18254_v21, %v4760_v46  ;;  %v3842_v17 = vadd.f32 %v3841_v5, %v18056_v26  ;;  %14727 = vmatprep.mubr.msk.f32.mxu1 %vm1696_vm0, %v5018_v24  ;;  %v18380_v46 = vpop.f32.mrf.mxu0 }
 0x371   : > { %v4763_v18 = vadd.f32 %v18130_v55, %v3847_v19  ;;  %14840 = vmatmul.mubr.msk.f32.gmra.mxu0 %vm1696_vm0, %v5018_v24  ;;  %v14520_v33 = vpop.f32.mrf.mxu1  ;;  %14934 = vmatpush3.msra.mxu1 %v12739_v60 }
 0x372   : > { %14728 = vmatmul.mubr.msk.f32.gmra.mxu1 %vm1696_vm0, %v5019_v44  ;;  %14842 = vmatprep.mubr.msk.f32.mxu0 %vm1696_vm0, %v5019_v44  ;;  %4960 = vst.msk [vmem:[#allocation3 + $0x60] sm:$0xff] %vm1696_vm0, %v4896_v22  ;;  %v4895_v11 = vmax.f32 %v4831_v27, 0.0  ;;  %v4762_v26 = vadd.f32 %v18140_v57, %v3842_v17  ;;  %v3857_v61 = vadd.f32 %v14520_v33, %v18063_v28  ;;  %v5021_v28 = vld [vmem:[#allocation3 + $0x40] sm:$0xff]  ;;  %v12737_v57 = vld [vmem:[%s21010_s5 + $0x98] sm:$0xff]  ;;  %v18405_v33 = vpop.f32.mrf.mxu0 }
 0x373   : > { %v4834_v55 = vadd.f32 %v18254_v21, %v4763_v18  ;;  %v3851_v13 = vpop.f32.mrf.mxu1  ;;  %v5020_v30 = vld [vmem:[#allocation3 + $0x38] sm:$0xff]  ;;  %14935 = vmatprep.subr.mxu1 %v12738_v2 }
 0x374   : > { %4959 = vst.msk [vmem:[#allocation3 + $0x58] sm:$0xff] %vm1696_vm0, %v4895_v11  ;;  %v4833_v34 = vadd.f32 %v18254_v21, %v4762_v26  ;;  %v4765_v53 = vadd.f32 %v18148_v47, %v3857_v61  ;;  %v3852_v36 = vadd.f32 %v3851_v13, %v18072_v48  ;;  %14730 = vmatprep.mubr.msk.f32.mxu1 %vm1696_vm0, %v5020_v30 }
 0x375   : > { %v4898_v54 = vmax.f32 %v4834_v55, 0.0  ;;  %14843 = vmatmul.mubr.msk.f32.gmra.mxu0 %vm1696_vm0, %v5020_v30  ;;  %v14523_v58 = vpop.f32.mrf.mxu1  ;;  %14936 = vmatpush3.msra.mxu1 %v12738_v2 }
 0x376   : > { %14731 = vmatmul.mubr.msk.f32.gmra.mxu1 %vm1696_vm0, %v5021_v28  ;;  %14845 = vmatprep.mubr.msk.f32.mxu0 %vm1696_vm0, %v5021_v28  ;;  %v4897_v62 = vmax.f32 %v4833_v34, 0.0  ;;  %v4836_v47 = vadd.f32 %v18254_v21, %v4765_v53  ;;  %v4764_v48 = vadd.f32 %v18154_v20, %v3852_v36  ;;  %v3867_v3 = vadd.f32 %v14523_v58, %v18074_v31  ;;  %v18367_v31 = vld [vmem:[#allocation3 + $0x50] sm:$0xff]  ;;  %v12736_v20 = vld [vmem:[%s21010_s5 + $0x90] sm:$0xff]  ;;  %v18430_v36 = vpop.f32.mrf.mxu0 }
 0x377   : > { %4962 = vst.msk [vmem:[#allocation3 + $0x70] sm:$0xff] %vm1696_vm0, %v4898_v54  ;;  %v3861_v12 = vpop.f32.mrf.mxu1  ;;  %v5022_v15 = vld [vmem:[#allocation3 + $0x48] sm:$0xff]  ;;  %14937 = vmatprep.subr.mxu1 %v12737_v57 }
 0x378   : > { %4961 = vst.msk [vmem:[#allocation3 + $0x68] sm:$0xff] %vm1696_vm0, %v4897_v62  ;;  %v4900_v7 = vmax.f32 %v4836_v47, 0.0  ;;  %v4835_v50 = vadd.f32 %v18254_v21, %v4764_v48  ;;  %v4767_v10 = vadd.f32 %v18160_v1, %v3867_v3  ;;  %v3862_v60 = vadd.f32 %v3861_v12, %v18082_v32  ;;  %14733 = vmatprep.mubr.msk.f32.mxu1 %vm1696_vm0, %v5022_v15 }
 0x379   : > { %14846 = vmatmul.mubr.msk.f32.gmra.mxu0 %vm1696_vm0, %v5022_v15  ;;  %v14526_v38 = vpop.f32.mrf.mxu1  ;;  %14938 = vmatpush3.msra.mxu1 %v12737_v57  ;;  %v18452_v15 = vpop.f32.mrf.mxu0 }
 0x37a   : > { %14734 = vmatmul.mubr.msk.f32.gmra.mxu1 %vm1696_vm0, %v18367_v31  ;;  %14848 = vmatprep.mubr.msk.f32.mxu0 %vm1696_vm0, %v18367_v31  ;;  %4964 = vst.msk [vmem:[#allocation3 + $0x80] sm:$0xff] %vm1696_vm0, %v4900_v7  ;;  %v4899_v32 = vmax.f32 %v4835_v50, 0.0  ;;  %v4838_v1 = vadd.f32 %v18254_v21, %v4767_v10  ;;  %v4766_v9 = vadd.f32 %v18166_v49, %v3862_v60  ;;  %v12735_v49 = vld [vmem:[%s21010_s5 + $0x88] sm:$0xff] }
 0x37b   : > { %v3877_v35 = vadd.f32 %v14526_v38, %v18084_v25  ;;  %v3871_v19 = vpop.f32.mrf.mxu1  ;;  %v18382_v5 = vld [vmem:[#allocation3 + $0x58] sm:$0xff]  ;;  %14939 = vmatprep.subr.mxu1 %v12736_v20  ;;  %v18392_v25 = vld [vmem:[#allocation3 + $0x60] sm:$0xff] }
 0x37c   : > { %4963 = vst.msk [vmem:[#allocation3 + $0x78] sm:$0xff] %vm1696_vm0, %v4899_v32  ;;  %v4902_v24 = vmax.f32 %v4838_v1, 0.0  ;;  %v4837_v22 = vadd.f32 %v18254_v21, %v4766_v9  ;;  %v3872_v18 = vadd.f32 %v3871_v19, %v18092_v63  ;;  %14736 = vmatprep.mubr.msk.f32.mxu1 %vm1696_vm0, %v18382_v5  ;;  %14940 = vmatpush3.msra.mxu1 %v12736_v20  ;;  %v21093_v20 = vld [vmem:[#allocation35_spill] sm:$0xff]  ;;  %v21094_v32 = vld [vmem:[#allocation13_spill] sm:$0xff]  ;;  %v21095_v19 = vld [vmem:[#allocation38_spill] sm:$0xff] }
 0x37d   : > { %v4769_v27 = vadd.f32 %v18172_v43, %v3877_v35  ;;  %14849 = vmatmul.mubr.msk.f32.gmra.mxu0 %vm1696_vm0, %v18382_v5  ;;  %v14529_v17 = vpop.f32.mrf.mxu1  ;;  %14941 = vmatprep.subr.mxu1 %v12735_v49 }
 0x37e   : > { %14737 = vmatmul.mubr.msk.f32.gmra.mxu1 %vm1696_vm0, %v18392_v25  ;;  %14851 = vmatprep.mubr.msk.f32.mxu0 %vm1696_vm0, %v18392_v25  ;;  %4966 = vst.msk [vmem:[#allocation3 + $0x90] sm:$0xff] %vm1696_vm0, %v4902_v24  ;;  %v4901_v63 = vmax.f32 %v4837_v22, 0.0  ;;  %v4768_v44 = vadd.f32 %v18178_v41, %v3872_v18  ;;  %v3887_v2 = vadd.f32 %v14529_v17, %v18094_v0  ;;  %v18417_v0 = vld [vmem:[#allocation3 + $0x70] sm:$0xff]  ;;  %v21096_v22 = vld [vmem:[#allocation14_spill] sm:$0xff]  ;;  %v18474_v18 = vpop.f32.mrf.mxu0 }
 0x37f   : > { %v4840_v43 = vadd.f32 %v18254_v21, %v4769_v27  ;;  %v3881_v11 = vpop.f32.mrf.mxu1  ;;  %v18407_v55 = vld [vmem:[#allocation3 + $0x68] sm:$0xff]  ;;  %v12734_v41 = vld [vmem:[%s21010_s5 + $0x80] sm:$0xff]  ;;  %14942 = vmatpush3.msra.mxu1 %v12735_v49 }
 0x380   : > { %4965 = vst.msk [vmem:[#allocation3 + $0x88] sm:$0xff] %vm1696_vm0, %v4901_v63  ;;  %v4839_v61 = vadd.f32 %v18254_v21, %v4768_v44  ;;  %v4771_v13 = vadd.f32 %v18184_v14, %v3887_v2  ;;  %v3882_v30 = vadd.f32 %v3881_v11, %v18102_v51  ;;  %14739 = vmatprep.mubr.msk.f32.mxu1 %vm1696_vm0, %v18407_v55  ;;  %v21097_v44 = vld [vmem:[#allocation41_spill] sm:$0xff] }
 0x381   : > { %v4904_v26 = vmax.f32 %v4840_v43, 0.0  ;;  %14852 = vmatmul.mubr.msk.f32.gmra.mxu0 %vm1696_vm0, %v18407_v55  ;;  %v14532_v54 = vpop.f32.mrf.mxu1  ;;  %14943 = vmatprep.subr.mxu1 %v12734_v41  ;;  %v21098_v11 = vld [vmem:[#allocation9_spill] sm:$0xff] }
 0x382   : > { %14740 = vmatmul.mubr.msk.f32.gmra.mxu1 %vm1696_vm0, %v18417_v0  ;;  %14854 = vmatprep.mubr.msk.f32.mxu0 %vm1696_vm0, %v18417_v0  ;;  %v4903_v51 = vmax.f32 %v4839_v61, 0.0  ;;  %v4842_v14 = vadd.f32 %v18254_v21, %v4771_v13  ;;  %v4770_v34 = vadd.f32 %v18190_v8, %v3882_v30  ;;  %v3897_v53 = vadd.f32 %v14532_v54, %v18104_v52  ;;  %v18442_v52 = vld [vmem:[#allocation3 + $0x80] sm:$0xff]  ;;  %v21099_v54 = vld [vmem:[#allocation44_spill] sm:$0xff] }
 0x383   : > { %4968 = vst.msk [vmem:[#allocation3 + $0xa0] sm:$0xff] %vm1696_vm0, %v4904_v26  ;;  %v3891_v28 = vpop.f32.mrf.mxu1  ;;  %v18432_v57 = vld [vmem:[#allocation3 + $0x78] sm:$0xff]  ;;  %14944 = vmatpush3.msra.mxu1 %v12734_v41 }
 0x384   : > { %4967 = vst.msk [vmem:[#allocation3 + $0x98] sm:$0xff] %vm1696_vm0, %v4903_v51  ;;  %v4906_v58 = vmax.f32 %v4842_v14, 0.0  ;;  %v4841_v62 = vadd.f32 %v18254_v21, %v4770_v34  ;;  %v4773_v47 = vadd.f32 %v18196_v40, %v3897_v53  ;;  %v3892_v48 = vadd.f32 %v3891_v28, %v18112_v39  ;;  %14742 = vmatprep.mubr.msk.f32.mxu1 %vm1696_vm0, %v18432_v57  ;;  %v21100_v14 = vld [vmem:[#allocation10_spill] sm:$0xff]  ;;  %v18496_v53 = vpop.f32.mrf.mxu0 }
 0x385   : > { %14855 = vmatmul.mubr.msk.f32.gmra.mxu0 %vm1696_vm0, %v18432_v57  ;;  %v14535_v8 = vpop.f32.mrf.mxu1 }
 0x386   : > { %14743 = vmatmul.mubr.msk.f32.gmra.mxu1 %vm1696_vm0, %v18442_v52  ;;  %14857 = vmatprep.mubr.msk.f32.mxu0 %vm1696_vm0, %v18442_v52  ;;  %4970 = vst.msk [vmem:[#allocation3 + $0xb0] sm:$0xff] %vm1696_vm0, %v4906_v58  ;;  %v4905_v40 = vmax.f32 %v4841_v62, 0.0  ;;  %v4844_v39 = vadd.f32 %v18254_v21, %v4773_v47  ;;  %v4772_v3 = vadd.f32 %v18202_v23, %v3892_v48  ;;  %v21101_v48 = vld [vmem:[#allocation47_spill] sm:$0xff] }
 0x387   : > { %v3907_v12 = vadd.f32 %v14535_v8, %v18114_v16  ;;  %v3901_v7 = vpop.f32.mrf.mxu1  ;;  %v18454_v50 = vld [vmem:[#allocation3 + $0x88] sm:$0xff]  ;;  %v18464_v16 = vld [vmem:[#allocation3 + $0x90] sm:$0xff] }
 0x388   : > { %4969 = vst.msk [vmem:[#allocation3 + $0xa8] sm:$0xff] %vm1696_vm0, %v4905_v40  ;;  %v4908_v10 = vmax.f32 %v4844_v39, 0.0  ;;  %v4843_v60 = vadd.f32 %v18254_v21, %v4772_v3  ;;  %v3902_v1 = vadd.f32 %v3901_v7, %v21094_v32  ;;  %14745 = vmatprep.mubr.msk.f32.mxu1 %vm1696_vm0, %v18454_v50  ;;  %v21102_v40 = vld [vmem:[#allocation11_spill] sm:$0xff] }
 0x389   : > { %v4775_v38 = vadd.f32 %v21093_v20, %v3907_v12  ;;  %14858 = vmatmul.mubr.msk.f32.gmra.mxu0 %vm1696_vm0, %v18454_v50  ;;  %v14538_v23 = vpop.f32.mrf.mxu1 }
 0x38a   : > { %14746 = vmatmul.mubr.msk.f32.gmra.mxu1 %vm1696_vm0, %v18464_v16  ;;  %14860 = vmatprep.mubr.msk.f32.mxu0 %vm1696_vm0, %v18464_v16  ;;  %4972 = vst.msk [vmem:[#allocation3 + $0xc0] sm:$0xff] %vm1696_vm0, %v4908_v10  ;;  %v4907_v9 = vmax.f32 %v4843_v60, 0.0  ;;  %v4774_v24 = vadd.f32 %v21095_v19, %v3902_v1  ;;  %v3917_v27 = vadd.f32 %v14538_v23, %v21096_v22  ;;  %v18486_v61 = vld [vmem:[#allocation3 + $0xa0] sm:$0xff]  ;;  %v21103_v60 = vld [vmem:[#allocation50_spill] sm:$0xff]  ;;  %v18518_v1 = vpop.f32.mrf.mxu0 }
 0x38b   : > { %v4846_v35 = vadd.f32 %v18254_v21, %v4775_v38  ;;  %v3911_v49 = vpop.f32.mrf.mxu1  ;;  %v18476_v17 = vld [vmem:[#allocation3 + $0x98] sm:$0xff] }
 0x38c   : > { %4971 = vst.msk [vmem:[#allocation3 + $0xb8] sm:$0xff] %vm1696_vm0, %v4907_v9  ;;  %v4845_v43 = vadd.f32 %v18254_v21, %v4774_v24  ;;  %v4777_v2 = vadd.f32 %v21097_v44, %v3917_v27  ;;  %v3912_v26 = vadd.f32 %v3911_v49, %v21098_v11  ;;  %14748 = vmatprep.mubr.msk.f32.mxu1 %vm1696_vm0, %v18476_v17  ;;  %v21104_v38 = vld [vmem:[#allocation12_spill] sm:$0xff]  ;;  %v21105_v24 = vld [vmem:[#allocation53_spill] sm:$0xff]  ;;  %v21106_v27 = vld [vmem:[#allocation15_spill] sm:$0xff] }
 0x38d   : > { %v4910_v63 = vmax.f32 %v4846_v35, 0.0  ;;  %14861 = vmatmul.mubr.msk.f32.gmra.mxu0 %vm1696_vm0, %v18476_v17  ;;  %v14541_v13 = vpop.f32.mrf.mxu1  ;;  %v18508_v3 = vld [vmem:[#allocation3 + $0xb0] sm:$0xff] }
 0x38e   : > { %14749 = vmatmul.mubr.msk.f32.gmra.mxu1 %vm1696_vm0, %v18486_v61  ;;  %14863 = vmatprep.mubr.msk.f32.mxu0 %vm1696_vm0, %v18486_v61  ;;  %v4909_v30 = vmax.f32 %v4845_v43, 0.0  ;;  %v4848_v41 = vadd.f32 %v18254_v21, %v4777_v2  ;;  %v4776_v51 = vadd.f32 %v21099_v54, %v3912_v26  ;;  %v3927_v34 = vadd.f32 %v14541_v13, %v21100_v14  ;;  %v21107_v11 = vld [vmem:[#allocation55_spill] sm:$0xff]  ;;  %v21108_v13 = vld [vmem:[#allocation16_spill] sm:$0xff] }
 0x38f   : > { %4974 = vst.msk [vmem:[#allocation3 + $0xd0] sm:$0xff] %vm1696_vm0, %v4910_v63  ;;  %v3921_v28 = vpop.f32.mrf.mxu1  ;;  %v18498_v58 = vld [vmem:[#allocation3 + $0xa8] sm:$0xff] }
 0x390   : > { %4973 = vst.msk [vmem:[#allocation3 + $0xc8] sm:$0xff] %vm1696_vm0, %v4909_v30  ;;  %v4912_v62 = vmax.f32 %v4848_v41, 0.0  ;;  %v4847_v47 = vadd.f32 %v18254_v21, %v4776_v51  ;;  %v4779_v8 = vadd.f32 %v21101_v48, %v3927_v34  ;;  %v3922_v39 = vadd.f32 %v3921_v28, %v21102_v40  ;;  %14751 = vmatprep.mubr.msk.f32.mxu1 %vm1696_vm0, %v18498_v58  ;;  %v18540_v41 = vpop.f32.mrf.mxu0 }
 0x391   : > { %14864 = vmatmul.mubr.msk.f32.gmra.mxu0 %vm1696_vm0, %v18498_v58  ;;  %v14544_v12 = vpop.f32.mrf.mxu1  ;;  %v18530_v63 = vld [vmem:[#allocation3 + $0xc0] sm:$0xff] }
 0x392   : > { %14752 = vmatmul.mubr.msk.f32.gmra.mxu1 %vm1696_vm0, %v18508_v3  ;;  %14866 = vmatprep.mubr.msk.f32.mxu0 %vm1696_vm0, %v18508_v3  ;;  %4976 = vst.msk [vmem:[#allocation3 + $0xe0] sm:$0xff] %vm1696_vm0, %v4912_v62  ;;  %v4911_v7 = vmax.f32 %v4847_v47, 0.0  ;;  %v4850_v10 = vadd.f32 %v18254_v21, %v4779_v8  ;;  %v4778_v20 = vadd.f32 %v21103_v60, %v3922_v39  ;;  %v21109_v62 = vld [vmem:[#allocation17_spill] sm:$0xff] }
 0x393   : > { %v3937_v32 = vadd.f32 %v14544_v12, %v21104_v38  ;;  %v3931_v23 = vpop.f32.mrf.mxu1  ;;  %v18520_v9 = vld [vmem:[#allocation3 + $0xb8] sm:$0xff]  ;;  %v21110_v12 = vld [vmem:[#allocation18_spill] sm:$0xff] }
 0x394   : > { %4975 = vst.msk [vmem:[#allocation3 + $0xd8] sm:$0xff] %vm1696_vm0, %v4911_v7  ;;  %v4914_v35 = vmax.f32 %v4850_v10, 0.0  ;;  %v4849_v19 = vadd.f32 %v18254_v21, %v4778_v20  ;;  %v3932_v49 = vadd.f32 %v3931_v23, %v21106_v27  ;;  %14754 = vmatprep.mubr.msk.f32.mxu1 %vm1696_vm0, %v18520_v9  ;;  %v18562_v10 = vpop.f32.mrf.mxu0 }
 0x395   : > { %v4781_v22 = vadd.f32 %v21105_v24, %v3937_v32  ;;  %14867 = vmatmul.mubr.msk.f32.gmra.mxu0 %vm1696_vm0, %v18520_v9  ;;  %v14547_v43 = vpop.f32.mrf.mxu1 }
 0x396   : > { %14755 = vmatmul.mubr.msk.f32.gmra.mxu1 %vm1696_vm0, %v18530_v63  ;;  %14869 = vmatprep.mubr.msk.f32.mxu0 %vm1696_vm0, %v18530_v63  ;;  %4978 = vst.msk [vmem:[#allocation3 + $0xf0] sm:$0xff] %vm1696_vm0, %v4914_v35  ;;  %v4913_v44 = vmax.f32 %v4849_v19, 0.0  ;;  %v4780_v26 = vadd.f32 %v21107_v11, %v3932_v49  ;;  %v3947_v30 = vadd.f32 %v14547_v43, %v21108_v13  ;;  %v18552_v48 = vld [vmem:[#allocation3 + $0xd0] sm:$0xff]  ;;  %v21112_v49 = vld [vmem:[#allocation20_spill] sm:$0xff] }
 0x397   : > { %v4852_v2 = vadd.f32 %v18254_v21, %v4781_v22  ;;  %v3941_v54 = vpop.f32.mrf.mxu1  ;;  %v18542_v51 = vld [vmem:[#allocation3 + $0xc8] sm:$0xff]  ;;  %v21111_v35 = vld [vmem:[#allocation19_spill] sm:$0xff] }
 0x398   : > { %4977 = vst.msk [vmem:[#allocation3 + $0xe8] sm:$0xff] %vm1696_vm0, %v4913_v44  ;;  %v4851_v34 = vadd.f32 %v18254_v21, %v4780_v26  ;;  %v4783_v28 = vadd.f32 %v18261_v37, %v3947_v30  ;;  %v3942_v47 = vadd.f32 %v3941_v54, %v21109_v62  ;;  %14757 = vmatprep.mubr.msk.f32.mxu1 %vm1696_vm0, %v18542_v51  ;;  %v18584_v44 = vpop.f32.mrf.mxu0  ;;  %v21113_v54 = vld [vmem:[#allocation21_spill] sm:$0xff] }
 0x399   : > { %v4916_v14 = vmax.f32 %v4852_v2, 0.0  ;;  %14870 = vmatmul.mubr.msk.f32.gmra.mxu0 %vm1696_vm0, %v18542_v51  ;;  %v14550_v8 = vpop.f32.mrf.mxu1 }
 0x39a   : > { %14758 = vmatmul.mubr.msk.f32.gmra.mxu1 %vm1696_vm0, %v18552_v48  ;;  %14872 = vmatprep.mubr.msk.f32.mxu0 %vm1696_vm0, %v18552_v48  ;;  %v4915_v37 = vmax.f32 %v4851_v34, 0.0  ;;  %v4854_v40 = vadd.f32 %v18254_v21, %v4783_v28  ;;  %v4782_v39 = vadd.f32 %v18270_v6, %v3942_v47  ;;  %v3957_v7 = vadd.f32 %v14550_v8, %v21110_v12  ;;  %v18574_v6 = vld [vmem:[#allocation3 + $0xe0] sm:$0xff]  ;;  %v21114_v47 = vld [vmem:[#allocation22_spill] sm:$0xff] }
 0x39b   : > { %4980 = vst.msk [vmem:[#allocation3 + $0x100] sm:$0xff] %vm1696_vm0, %v4916_v14  ;;  %v3951_v60 = vpop.f32.mrf.mxu1  ;;  %v18564_v20 = vld [vmem:[#allocation3 + $0xd8] sm:$0xff] }
 0x39c   : > { %4979 = vst.msk [vmem:[#allocation3 + $0xf8] sm:$0xff] %vm1696_vm0, %v4915_v37  ;;  %v4918_v38 = vmax.f32 %v4854_v40, 0.0  ;;  %v4853_v32 = vadd.f32 %v18254_v21, %v4782_v39  ;;  %v4785_v23 = vadd.f32 %v18280_v59, %v3957_v7  ;;  %v3952_v19 = vadd.f32 %v3951_v60, %v21111_v35  ;;  %14760 = vmatprep.mubr.msk.f32.mxu1 %vm1696_vm0, %v18564_v20  ;;  %v18606_v37 = vpop.f32.mrf.mxu0 }
 0x39d   : > { %14873 = vmatmul.mubr.msk.f32.gmra.mxu0 %vm1696_vm0, %v18564_v20  ;;  %v14553_v24 = vpop.f32.mrf.mxu1 }
 0x39e   : > { %14761 = vmatmul.mubr.msk.f32.gmra.mxu1 %vm1696_vm0, %v18574_v6  ;;  %14875 = vmatprep.mubr.msk.f32.mxu0 %vm1696_vm0, %v18574_v6  ;;  %4982 = vst.msk [vmem:[#allocation3 + $0x110] sm:$0xff] %vm1696_vm0, %v4918_v38  ;;  %v4917_v59 = vmax.f32 %v4853_v32, 0.0  ;;  %v4856_v22 = vadd.f32 %v18254_v21, %v4785_v23  ;;  %v4784_v27 = vadd.f32 %v18290_v56, %v3952_v19  ;;  %v18596_v56 = vld [vmem:[#allocation3 + $0xf0] sm:$0xff] }
 0x39f   : > { %v3967_v43 = vadd.f32 %v14553_v24, %v21112_v49  ;;  %v3961_v2 = vpop.f32.mrf.mxu1  ;;  %v18586_v11 = vld [vmem:[#allocation3 + $0xe8] sm:$0xff]  ;;  %v21115_v38 = vld [vmem:[#allocation23_spill] sm:$0xff]  ;;  %v21116_v24 = vld [vmem:[#allocation24_spill] sm:$0xff] }
 0x3a0   : > { %4981 = vst.msk [vmem:[#allocation3 + $0x108] sm:$0xff] %vm1696_vm0, %v4917_v59  ;;  %v4920_v26 = vmax.f32 %v4856_v22, 0.0  ;;  %v4855_v13 = vadd.f32 %v18254_v21, %v4784_v27  ;;  %v3962_v14 = vadd.f32 %v3961_v2, %v21113_v54  ;;  %14763 = vmatprep.mubr.msk.f32.mxu1 %vm1696_vm0, %v18586_v11  ;;  %v18628_v22 = vpop.f32.mrf.mxu0 }
 0x3a1   : > { %v4787_v30 = vadd.f32 %v18308_v4, %v3967_v43  ;;  %14876 = vmatmul.mubr.msk.f32.gmra.mxu0 %vm1696_vm0, %v18586_v11  ;;  %v14556_v34 = vpop.f32.mrf.mxu1 }
 0x3a2   : > { %14764 = vmatmul.mubr.msk.f32.gmra.mxu1 %vm1696_vm0, %v18596_v56  ;;  %14878 = vmatprep.mubr.msk.f32.mxu0 %vm1696_vm0, %v18596_v56  ;;  %4984 = vst.msk [vmem:[#allocation3 + $0x120] sm:$0xff] %vm1696_vm0, %v4920_v26  ;;  %v4919_v4 = vmax.f32 %v4855_v13, 0.0  ;;  %v4786_v62 = vadd.f32 %v18325_v29, %v3962_v14  ;;  %v3977_v8 = vadd.f32 %v14556_v34, %v21114_v47  ;;  %v18618_v29 = vld [vmem:[#allocation3 + $0x100] sm:$0xff] }
 0x3a3   : > { %v4858_v28 = vadd.f32 %v18254_v21, %v4787_v30  ;;  %v3971_v40 = vpop.f32.mrf.mxu1  ;;  %v18608_v39 = vld [vmem:[#allocation3 + $0xf8] sm:$0xff]  ;;  %v21117_v13 = vld [vmem:[#allocation25_spill] sm:$0xff] }
 0x3a4   : > { %4983 = vst.msk [vmem:[#allocation3 + $0x118] sm:$0xff] %vm1696_vm0, %v4919_v4  ;;  %v4857_v7 = vadd.f32 %v18254_v21, %v4786_v62  ;;  %v4789_v60 = vadd.f32 %v18342_v42, %v3977_v8  ;;  %v3972_v32 = vadd.f32 %v3971_v40, %v21115_v38  ;;  %14766 = vmatprep.mubr.msk.f32.mxu1 %vm1696_vm0, %v18608_v39  ;;  %v21118_v4 = vld [vmem:[#allocation26_spill] sm:$0xff]  ;;  %v18650_v62 = vpop.f32.mrf.mxu0 }
 0x3a5   : > { %v4922_v12 = vmax.f32 %v4858_v28, 0.0  ;;  %14879 = vmatmul.mubr.msk.f32.gmra.mxu0 %vm1696_vm0, %v18608_v39  ;;  %v14559_v23 = vpop.f32.mrf.mxu1 }
 0x3a6   : > { %14767 = vmatmul.mubr.msk.f32.gmra.mxu1 %vm1696_vm0, %v18618_v29  ;;  %14881 = vmatprep.mubr.msk.f32.mxu0 %vm1696_vm0, %v18618_v29  ;;  %v4921_v42 = vmax.f32 %v4857_v7, 0.0  ;;  %v4860_v35 = vadd.f32 %v18254_v21, %v4789_v60  ;;  %v4788_v19 = vadd.f32 %v18359_v45, %v3972_v32  ;;  %v3987_v59 = vadd.f32 %v14559_v23, %v21116_v24  ;;  %v18640_v45 = vld [vmem:[#allocation3 + $0x110] sm:$0xff]  ;;  %v18672_v24 = vpop.f32.mrf.mxu0 }
 0x3a7   : > { %4986 = vst.msk [vmem:[#allocation3 + $0x130] sm:$0xff] %vm1696_vm0, %v4922_v12  ;;  %v3981_v27 = vpop.f32.mrf.mxu1  ;;  %v18630_v49 = vld [vmem:[#allocation3 + $0x108] sm:$0xff]  ;;  %v21119_v60 = vld [vmem:[#allocation27_spill] sm:$0xff] }
 0x3a8   : > { %4985 = vst.msk [vmem:[#allocation3 + $0x128] sm:$0xff] %vm1696_vm0, %v4921_v42  ;;  %v4924_v43 = vmax.f32 %v4860_v35, 0.0  ;;  %v4859_v2 = vadd.f32 %v18254_v21, %v4788_v19  ;;  %v4791_v26 = vadd.f32 %v18380_v46, %v3987_v59  ;;  %v3982_v30 = vadd.f32 %v3981_v27, %v21117_v13  ;;  %14769 = vmatprep.mubr.msk.f32.mxu1 %vm1696_vm0, %v18630_v49  ;;  %v21120_v35 = vld [vmem:[#allocation28_spill] sm:$0xff]  ;;  %v21121_v13 = vld [vmem:[#allocation29_spill] sm:$0xff] }
 0x3a9   : > { %14882 = vmatmul.mubr.msk.f32.gmra.mxu0 %vm1696_vm0, %v18630_v49  ;;  %v14562_v54 = vpop.f32.mrf.mxu1 }
 0x3aa   : > { %14770 = vmatmul.mubr.msk.f32.gmra.mxu1 %vm1696_vm0, %v18640_v45  ;;  %14884 = vmatprep.mubr.msk.f32.mxu0 %vm1696_vm0, %v18640_v45  ;;  %4988 = vst.msk [vmem:[#allocation3 + $0x140] sm:$0xff] %vm1696_vm0, %v4924_v43  ;;  %v4923_v46 = vmax.f32 %v4859_v2, 0.0  ;;  %v4862_v14 = vadd.f32 %v18254_v21, %v4791_v26  ;;  %v4790_v34 = vadd.f32 %v18405_v33, %v3982_v30  ;;  %v18662_v33 = vld [vmem:[#allocation3 + $0x120] sm:$0xff] }
 0x3ab   : > { %v3997_v28 = vadd.f32 %v14562_v54, %v21118_v4  ;;  %v3991_v47 = vpop.f32.mrf.mxu1  ;;  %v18652_v8 = vld [vmem:[#allocation3 + $0x118] sm:$0xff] }
 0x3ac   : > { %4987 = vst.msk [vmem:[#allocation3 + $0x138] sm:$0xff] %vm1696_vm0, %v4923_v46  ;;  %v4926_v40 = vmax.f32 %v4862_v14, 0.0  ;;  %v4861_v12 = vadd.f32 %v18254_v21, %v4790_v34  ;;  %v3992_v38 = vadd.f32 %v3991_v47, %v21119_v60  ;;  %14772 = vmatprep.mubr.msk.f32.mxu1 %vm1696_vm0, %v18652_v8  ;;  %v21122_v34 = vld [vmem:[#allocation30_spill] sm:$0xff] }
 0x3ad   : > { %v4793_v7 = vadd.f32 %v18430_v36, %v3997_v28  ;;  %14885 = vmatmul.mubr.msk.f32.gmra.mxu0 %vm1696_vm0, %v18652_v8  ;;  %v14565_v32 = vpop.f32.mrf.mxu1  ;;  %v18694_v28 = vpop.f32.mrf.mxu0 }
 0x3ae   : > { %14773 = vmatmul.mubr.msk.f32.gmra.mxu1 %vm1696_vm0, %v18662_v33  ;;  %14887 = vmatprep.mubr.msk.f32.mxu0 %vm1696_vm0, %v18662_v33  ;;  %4990 = vst.msk [vmem:[#allocation3 + $0x150] sm:$0xff] %vm1696_vm0, %v4926_v40  ;;  %v4925_v36 = vmax.f32 %v4861_v12, 0.0  ;;  %v4792_v42 = vadd.f32 %v18452_v15, %v3992_v38  ;;  %v4007_v19 = vadd.f32 %v14565_v32, %v21120_v35  ;;  %v18684_v15 = vld [vmem:[#allocation3 + $0x130] sm:$0xff]  ;;  %v21124_v35 = vld [vmem:[#allocation32_spill] sm:$0xff] }
 0x3af   : > { %v4864_v23 = vadd.f32 %v18254_v21, %v4793_v7  ;;  %v4001_v59 = vpop.f32.mrf.mxu1  ;;  %v18674_v27 = vld [vmem:[#allocation3 + $0x128] sm:$0xff]  ;;  %v21123_v38 = vld [vmem:[#allocation31_spill] sm:$0xff] }
 0x3b0   : > { %4989 = vst.msk [vmem:[#allocation3 + $0x148] sm:$0xff] %vm1696_vm0, %v4925_v36  ;;  %v4863_v2 = vadd.f32 %v18254_v21, %v4792_v42  ;;  %v4795_v26 = vadd.f32 %v18474_v18, %v4007_v19  ;;  %v4002_v30 = vadd.f32 %v4001_v59, %v21121_v13  ;;  %14775 = vmatprep.mubr.msk.f32.mxu1 %vm1696_vm0, %v18674_v27  ;;  %v18716_v59 = vpop.f32.mrf.mxu0 }
 0x3b1   : > { %v4928_v43 = vmax.f32 %v4864_v23, 0.0  ;;  %14888 = vmatmul.mubr.msk.f32.gmra.mxu0 %vm1696_vm0, %v18674_v27  ;;  %v14568_v54 = vpop.f32.mrf.mxu1 }
 0x3b2   : > { %14776 = vmatmul.mubr.msk.f32.gmra.mxu1 %vm1696_vm0, %v18684_v15  ;;  %14890 = vmatprep.mubr.msk.f32.mxu0 %vm1696_vm0, %v18684_v15  ;;  %v4927_v18 = vmax.f32 %v4863_v2, 0.0  ;;  %v4866_v46 = vadd.f32 %v18254_v21, %v4795_v26  ;;  %v4794_v14 = vadd.f32 %v18496_v53, %v4002_v30  ;;  %v4017_v4 = vadd.f32 %v14568_v54, %v21122_v34  ;;  %v18706_v53 = vld [vmem:[#allocation3 + $0x140] sm:$0xff] }
 0x3b3   : > { %4992 = vst.msk [vmem:[#allocation3 + $0x160] sm:$0xff] %vm1696_vm0, %v4928_v43  ;;  %v4011_v47 = vpop.f32.mrf.mxu1  ;;  %v18696_v40 = vld [vmem:[#allocation3 + $0x138] sm:$0xff]  ;;  %v21125_v54 = vld [vmem:[#allocation33_spill] sm:$0xff] }
 0x3b4   : > { %4991 = vst.msk [vmem:[#allocation3 + $0x158] sm:$0xff] %vm1696_vm0, %v4927_v18  ;;  %v4930_v12 = vmax.f32 %v4866_v46, 0.0  ;;  %v4865_v7 = vadd.f32 %v18254_v21, %v4794_v14  ;;  %v4797_v60 = vadd.f32 %v18518_v1, %v4017_v4  ;;  %v4012_v32 = vadd.f32 %v4011_v47, %v21123_v38  ;;  %14778 = vmatprep.mubr.msk.f32.mxu1 %vm1696_vm0, %v18696_v40  ;;  %v21126_v4 = vld [vmem:[#allocation34_spill] sm:$0xff] }
 0x3b5   : > { %14891 = vmatmul.mubr.msk.f32.gmra.mxu0 %vm1696_vm0, %v18696_v40  ;;  %v14571_v36 = vpop.f32.mrf.mxu1 }
 0x3b6   : > { %14779 = vmatmul.mubr.msk.f32.gmra.mxu1 %vm1696_vm0, %v18706_v53  ;;  %14893 = vmatprep.mubr.msk.f32.mxu0 %vm1696_vm0, %v18706_v53  ;;  %4994 = vst.msk [vmem:[#allocation3 + $0x170] sm:$0xff] %vm1696_vm0, %v4930_v12  ;;  %v4929_v1 = vmax.f32 %v4865_v7, 0.0  ;;  %v4868_v23 = vadd.f32 %v18254_v21, %v4797_v60  ;;  %v4796_v42 = vadd.f32 %v18540_v41, %v4012_v32  ;;  %v18728_v41 = vld [vmem:[#allocation3 + $0x150] sm:$0xff]  ;;  %v12814_v12 = vld [vmem:[%s21012_s7 + $0x78] sm:$0xff]  ;;  %v18741_v7 = vpop.f32.mrf.mxu0 }
 0x3b7   : > { %v4027_v19 = vadd.f32 %v14571_v36, %v21124_v35  ;;  %v4021_v43 = vpop.f32.mrf.mxu1  ;;  %v18718_v2 = vld [vmem:[#allocation3 + $0x148] sm:$0xff]  ;;  %15041 = vmatprep.subr.mxu0 %v12814_v12 }
 0x3b8   : > { %4993 = vst.msk [vmem:[#allocation3 + $0x168] sm:$0xff] %vm1696_vm0, %v4929_v1  ;;  %v4932_v26 = vmax.f32 %v4868_v23, 0.0  ;;  %v4867_v13 = vadd.f32 %v18254_v21, %v4796_v42  ;;  %v4022_v18 = vadd.f32 %v4021_v43, %v21125_v54  ;;  %14781 = vmatprep.mubr.msk.f32.mxu1 %vm1696_vm0, %v18718_v2  ;;  %15042 = vmatpush3.msra.mxu0 %v12814_v12 }
 0x3b9   : > { %v4799_v30 = vadd.f32 %v18562_v10, %v4027_v19  ;;  %14894 = vmatmul.mubr.msk.f32.gmra.mxu0 %vm1696_vm0, %v18718_v2  ;;  %v14574_v46 = vpop.f32.mrf.mxu1 }
 0x3ba   : > { %14782 = vmatmul.mubr.msk.f32.gmra.mxu1 %vm1696_vm0, %v18728_v41  ;;  %14896 = vmatprep.mubr.msk.f32.mxu0 %vm1696_vm0, %v18728_v41  ;;  %4996 = vst.msk [vmem:[#allocation3 + $0x180] sm:$0xff] %vm1696_vm0, %v4932_v26  ;;  %v4931_v10 = vmax.f32 %v4867_v13, 0.0  ;;  %v4798_v34 = vadd.f32 %v18584_v44, %v4022_v18  ;;  %v4037_v47 = vadd.f32 %v14574_v46, %v21126_v4  ;;  %v21127_v44 = vld [vmem:[#allocation36_spill] sm:$0xff]  ;;  %v18753_v42 = vld [vmem:[#allocation3 + $0x160] sm:$0xff] }
 0x3bb   : > { %v4870_v14 = vadd.f32 %v18254_v21, %v4799_v30  ;;  %v4031_v60 = vpop.f32.mrf.mxu1  ;;  %v18743_v38 = vld [vmem:[#allocation3 + $0x158] sm:$0xff]  ;;  %v21128_v26 = vld [vmem:[#allocation37_spill] sm:$0xff]  ;;  %v4711_v30 = vpop.f32.mrf.mxu0 }
 0x3bc   : > { %4995 = vst.msk [vmem:[#allocation3 + $0x178] sm:$0xff] %vm1696_vm0, %v4931_v10  ;;  %v4869_v36 = vadd.f32 %v18254_v21, %v4798_v34  ;;  %v4801_v1 = vadd.f32 %v18606_v37, %v4037_v47  ;;  %v4032_v23 = vadd.f32 %v4031_v60, %v21127_v44  ;;  %14784 = vmatprep.mubr.msk.f32.mxu1 %vm1696_vm0, %v18743_v38  ;;  %v21129_v34 = vld [vmem:[#allocation39_spill] sm:$0xff] }
 0x3bd   : > { %v4934_v32 = vmax.f32 %v4870_v14, 0.0  ;;  %14897 = vmatmul.mubr.msk.f32.gmra.mxu0 %vm1696_vm0, %v18743_v38  ;;  %v14577_v35 = vpop.f32.mrf.mxu1 }
 0x3be   : > { %14785 = vmatmul.mubr.msk.f32.gmra.mxu1 %vm1696_vm0, %v18753_v42  ;;  %14899 = vmatprep.mubr.msk.f32.mxu0 %vm1696_vm0, %v18753_v42  ;;  %v4933_v37 = vmax.f32 %v4869_v36, 0.0  ;;  %v4872_v19 = vadd.f32 %v18254_v21, %v4801_v1  ;;  %v4800_v43 = vadd.f32 %v18628_v22, %v4032_v23  ;;  %v4047_v13 = vadd.f32 %v14577_v35, %v21128_v26  ;;  %v18773_v22 = vld [vmem:[#allocation3 + $0x170] sm:$0xff]  ;;  %v14698_v1 = vpop.f32.mrf.mxu0 }
 0x3bf   : > { %4998 = vst.msk [vmem:[#allocation3 + $0x190] sm:$0xff] %vm1696_vm0, %v4934_v32  ;;  %v4041_v54 = vpop.f32.mrf.mxu1  ;;  %v18763_v18 = vld [vmem:[#allocation3 + $0x168] sm:$0xff]  ;;  %v21130_v32 = vld [vmem:[#allocation40_spill] sm:$0xff] }
 0x3c0   : > { %4997 = vst.msk [vmem:[#allocation3 + $0x188] sm:$0xff] %vm1696_vm0, %v4933_v37  ;;  %v4936_v46 = vmax.f32 %v4872_v19, 0.0  ;;  %v4871_v10 = vadd.f32 %v18254_v21, %v4800_v43  ;;  %v4803_v14 = vadd.f32 %v18650_v62, %v4047_v13  ;;  %v4042_v4 = vadd.f32 %v4041_v54, %v21129_v34  ;;  %14787 = vmatprep.mubr.msk.f32.mxu1 %vm1696_vm0, %v18763_v18  ;;  %v18789_v37 = vld [vmem:[%s21009_s4] ss:$0 sm:$0xff]  ;;  %v21131_v43 = vld [vmem:[#allocation42_spill] sm:$0xff]  ;;  %v4721_v34 = vpop.f32.mrf.mxu0 }
 0x3c1   : > { %14900 = vmatmul.mubr.msk.f32.gmra.mxu0 %vm1696_vm0, %v18763_v18  ;;  %v14580_v47 = vpop.f32.mrf.mxu1  ;;  %v18798_v26 = vld [vmem:[#allocation3 + $0x180] sm:$0xff] }
 0x3c2   : > { %14788 = vmatmul.mubr.msk.f32.gmra.mxu1 %vm1696_vm0, %v18773_v22  ;;  %14902 = vmatprep.mubr.msk.f32.mxu0 %vm1696_vm0, %v18773_v22  ;;  %5000 = vst.msk [vmem:[#allocation3 + $0x1a0] sm:$0xff] %vm1696_vm0, %v4936_v46  ;;  %v4935_v62 = vmax.f32 %v4871_v10, 0.0  ;;  %v4874_v12 = vadd.f32 %v18254_v21, %v4803_v14  ;;  %v4802_v60 = vadd.f32 %v18672_v24, %v4042_v4  ;;  %v21132_v10 = vld [vmem:[#allocation43_spill] sm:$0xff] }
 0x3c3   : > { %v4057_v36 = vadd.f32 %v14580_v47, %v21130_v32  ;;  %v4051_v44 = vpop.f32.mrf.mxu1  ;;  %v18783_v23 = vld [vmem:[#allocation3 + $0x178] sm:$0xff]  ;;  %v21133_v32 = vld [vmem:[#allocation45_spill] sm:$0xff] }
 0x3c4   : > { %4999 = vst.msk [vmem:[#allocation3 + $0x198] sm:$0xff] %vm1696_vm0, %v4935_v62  ;;  %v4938_v35 = vmax.f32 %v4874_v12, 0.0  ;;  %v4873_v19 = vadd.f32 %v18789_v37, %v4802_v60  ;;  %v4052_v24 = vadd.f32 %v4051_v44, %v21131_v43  ;;  %14790 = vmatprep.mubr.msk.f32.mxu1 %vm1696_vm0, %v18783_v23 }
 0x3c5   : > { %v4805_v21 = vadd.f32 %v18694_v28, %v4057_v36  ;;  %14903 = vmatmul.mubr.msk.f32.gmra.mxu0 %vm1696_vm0, %v18783_v23  ;;  %v14583_v13 = vpop.f32.mrf.mxu1 }
 0x3c6   : > { %14791 = vmatmul.mubr.msk.f32.gmra.mxu1 %vm1696_vm0, %v18798_v26  ;;  %14905 = vmatprep.mubr.msk.f32.mxu0 %vm1696_vm0, %v18798_v26  ;;  %5002 = vst.msk [vmem:[#allocation3 + $0x1b0] sm:$0xff] %vm1696_vm0, %v4938_v35  ;;  %v4937_v28 = vmax.f32 %v4873_v19, 0.0  ;;  %v4804_v46 = vadd.f32 %v18716_v59, %v4052_v24  ;;  %v4067_v14 = vadd.f32 %v14583_v13, %v21132_v10  ;;  %v18818_v59 = vld [vmem:[#allocation3 + $0x190] sm:$0xff]  ;;  %v12813_v24 = vld [vmem:[%s21012_s7 + $0x70] sm:$0xff]  ;;  %v14701_v13 = vpop.f32.mrf.mxu0 }
 0x3c7   : > { %v4876_v54 = vadd.f32 %v18789_v37, %v4805_v21  ;;  %v4061_v4 = vpop.f32.mrf.mxu1  ;;  %v18808_v47 = vld [vmem:[#allocation3 + $0x188] sm:$0xff]  ;;  %15043 = vmatprep.subr.mxu0 %v12813_v24 }
 0x3c8   : > { %5001 = vst.msk [vmem:[#allocation3 + $0x1a8] sm:$0xff] %vm1696_vm0, %v4937_v28  ;;  %v4875_v12 = vadd.f32 %v18789_v37, %v4804_v46  ;;  %v4807_v60 = vadd.f32 %v18741_v7, %v4067_v14  ;;  %v4062_v36 = vadd.f32 %v4061_v4, %v21133_v32  ;;  %14793 = vmatprep.mubr.msk.f32.mxu1 %vm1696_vm0, %v18808_v47  ;;  %v21134_v21 = vld [vmem:[#allocation46_spill] sm:$0xff]  ;;  %v21135_v4 = vld [vmem:[#allocation48_spill] sm:$0xff] }
 0x3c9   : > { %v4940_v62 = vmax.f32 %v4876_v54, 0.0  ;;  %14906 = vmatmul.mubr.msk.f32.gmra.mxu0 %vm1696_vm0, %v18808_v47  ;;  %v14586_v44 = vpop.f32.mrf.mxu1 }
 0x3ca   : > { %14794 = vmatmul.mubr.msk.f32.gmra.mxu1 %vm1696_vm0, %v18818_v59  ;;  %14908 = vmatprep.mubr.msk.f32.mxu0 %vm1696_vm0, %v18818_v59  ;;  %v4939_v7 = vmax.f32 %v4875_v12, 0.0  ;;  %v4878_v35 = vadd.f32 %v18789_v37, %v4807_v60  ;;  %v4806_v19 = vadd.f32 %v4711_v30, %v4062_v36  ;;  %v4077_v43 = vadd.f32 %v14586_v44, %v21134_v21  ;;  %v18839_v30 = vld [vmem:[#allocation3 + $0x1a0] sm:$0xff] }
 0x3cb   : > { %5004 = vst.msk [vmem:[#allocation3 + $0x1c0] sm:$0xff] %vm1696_vm0, %v4940_v62  ;;  %v4071_v28 = vpop.f32.mrf.mxu1  ;;  %v18830_v54 = vld [vmem:[#allocation3 + $0x198] sm:$0xff]  ;;  %21136 = vst [vmem:[#allocation35_spill] sm:$0xff] %v18839_v30  ;;  %v21137_v36 = vld [vmem:[#allocation49_spill] sm:$0xff]  ;;  %15044 = vmatpush3.msra.mxu0 %v12813_v24 }
 0x3cc   : > { %5003 = vst.msk [vmem:[#allocation3 + $0x1b8] sm:$0xff] %vm1696_vm0, %v4939_v7  ;;  %v4942_v46 = vmax.f32 %v4878_v35, 0.0  ;;  %v4877_v10 = vadd.f32 %v18789_v37, %v4806_v19  ;;  %v4809_v14 = vadd.f32 %v14698_v1, %v4077_v43  ;;  %v4072_v62 = vadd.f32 %v4071_v28, %v21135_v4  ;;  %14796 = vmatprep.mubr.msk.f32.mxu1 %vm1696_vm0, %v18830_v54  ;;  %v4731_v7 = vpop.f32.mrf.mxu0  ;;  %v21138_v4 = vld [vmem:[#allocation51_spill] sm:$0xff] }
 0x3cd   : > { %14909 = vmatmul.mubr.msk.f32.gmra.mxu0 %vm1696_vm0, %v18830_v54  ;;  %v14589_v12 = vpop.f32.mrf.mxu1 }
 0x3ce   : > { %14797 = vmatmul.mubr.msk.f32.gmra.mxu1 %vm1696_vm0, %v18839_v30  ;;  %14911 = vmatprep.mubr.msk.f32.mxu0 %vm1696_vm0, %v18839_v30  ;;  %5006 = vst.msk [vmem:[#allocation3 + $0x1d0] sm:$0xff] %vm1696_vm0, %v4942_v46  ;;  %v4941_v1 = vmax.f32 %v4877_v10, 0.0  ;;  %v4880_v60 = vadd.f32 %v18789_v37, %v4809_v14  ;;  %v4808_v32 = vadd.f32 %v4721_v34, %v4072_v62  ;;  %v18857_v34 = vld [vmem:[#allocation3 + $0x1b0] sm:$0xff]  ;;  %v14704_v46 = vpop.f32.mrf.mxu0  ;;  %v21139_v62 = vld [vmem:[#allocation52_spill] sm:$0xff] }
 0x3cf   : > { %v4087_v44 = vadd.f32 %v14589_v12, %v21137_v36  ;;  %v4081_v35 = vpop.f32.mrf.mxu1  ;;  %v18848_v19 = vld [vmem:[#allocation3 + $0x1a8] sm:$0xff] }
 0x3d0   : > { %5005 = vst.msk [vmem:[#allocation3 + $0x1c8] sm:$0xff] %vm1696_vm0, %v4941_v1  ;;  %v4944_v21 = vmax.f32 %v4880_v60, 0.0  ;;  %v4879_v43 = vadd.f32 %v18789_v37, %v4808_v32  ;;  %v4082_v30 = vadd.f32 %v4081_v35, %v21138_v4  ;;  %14799 = vmatprep.mubr.msk.f32.mxu1 %vm1696_vm0, %v18848_v19  ;;  %v21140_v35 = vld [vmem:[#allocation54_spill] sm:$0xff] }
 0x3d1   : > { %v4811_v28 = vadd.f32 %v14701_v13, %v4087_v44  ;;  %14912 = vmatmul.mubr.msk.f32.gmra.mxu0 %vm1696_vm0, %v18848_v19  ;;  %v14592_v24 = vpop.f32.mrf.mxu1 }
 0x3d2   : > { %14800 = vmatmul.mubr.msk.f32.gmra.mxu1 %vm1696_vm0, %v18857_v34  ;;  %14914 = vmatprep.mubr.msk.f32.mxu0 %vm1696_vm0, %v18857_v34  ;;  %5008 = vst.msk [vmem:[#allocation3 + $0x1e0] sm:$0xff] %vm1696_vm0, %v4944_v21  ;;  %v4943_v13 = vmax.f32 %v4879_v43, 0.0  ;;  %v4810_v14 = vadd.f32 %v4731_v7, %v4082_v30  ;;  %v4097_v12 = vadd.f32 %v14592_v24, %v21139_v62  ;;  %v18875_v30 = vld [vmem:[#allocation3 + $0x1c0] sm:$0xff]  ;;  %v4741_v7 = vpop.f32.mrf.mxu0 }
 0x3d3   : > { %v4882_v10 = vadd.f32 %v18789_v37, %v4811_v28  ;;  %v4091_v1 = vpop.f32.mrf.mxu1  ;;  %v18866_v60 = vld [vmem:[#allocation3 + $0x1b8] sm:$0xff] }
 0x3d4   : > { %5007 = vst.msk [vmem:[#allocation3 + $0x1d8] sm:$0xff] %vm1696_vm0, %v4943_v13  ;;  %v4881_v36 = vadd.f32 %v18789_v37, %v4810_v14  ;;  %v4813_v44 = vadd.f32 %v14704_v46, %v4097_v12  ;;  %v4092_v4 = vadd.f32 %v4091_v1, %v21140_v35  ;;  %14802 = vmatprep.mubr.msk.f32.mxu1 %vm1696_vm0, %v18866_v60  ;;  %v6060_v35 = vld [vmem:[#allocation3 + $0x10] sm:$0xff] }
 0x3d5   : > { %v4946_v32 = vmax.f32 %v4882_v10, 0.0  ;;  %14915 = vmatmul.mubr.msk.f32.gmra.mxu0 %vm1696_vm0, %v18866_v60  ;;  %v18891_v10 = vld [vmem:[#allocation3 + $0x1d0] sm:$0xff] }
 0x3d6   : > { %14803 = vmatmul.mubr.msk.f32.gmra.mxu1 %vm1696_vm0, %v18875_v30  ;;  %14917 = vmatprep.mubr.msk.f32.mxu0 %vm1696_vm0, %v18875_v30  ;;  %v4945_v21 = vmax.f32 %v4881_v36, 0.0  ;;  %v4884_v43 = vadd.f32 %v18789_v37, %v4813_v44  ;;  %v4812_v28 = vadd.f32 %v4741_v7, %v4092_v4  ;;  %v6061_v4 = vld [vmem:[#allocation3 + $0x18] sm:$0xff]  ;;  %v6062_v7 = vld [vmem:[#allocation3 + $0x20] sm:$0xff] }
 0x3d7   : > { %5010 = vst.msk [vmem:[#allocation3 + $0x1f0] sm:$0xff] %vm1696_vm0, %v4946_v32  ;;  %v18883_v24 = vld [vmem:[#allocation3 + $0x1c8] sm:$0xff] }
 0x3d8   : > { %5009 = vst.msk [vmem:[#allocation3 + $0x1e8] sm:$0xff] %vm1696_vm0, %v4945_v21  ;;  %v4948_v46 = vmax.f32 %v4884_v43, 0.0  ;;  %v4883_v13 = vadd.f32 %v18789_v37, %v4812_v28  ;;  %14805 = vmatprep.mubr.msk.f32.mxu1 %vm1696_vm0, %v18883_v24  ;;  %v12812_v37 = vld [vmem:[%s21012_s7 + $0x68] sm:$0xff]  ;;  %v12811_v21 = vld [vmem:[%s21012_s7 + $0x60] sm:$0xff]  ;;  %v15452_v43 = vld [vmem:[#allocation3 + $0x28] sm:$0xff] }
 0x3d9   : > { %14918 = vmatmul.mubr.msk.f32.gmra.mxu0 %vm1696_vm0, %v18883_v24  ;;  %15045 = vmatprep.subr.mxu0 %v12812_v37  ;;  %v18908_v12 = vld [vmem:[#allocation3 + $0x1e0] sm:$0xff]  ;;  %v15453_v28 = vld [vmem:[#allocation3 + $0x30] sm:$0xff] }
 0x3da   : > { %14806 = vmatmul.mubr.msk.f32.gmra.mxu1 %vm1696_vm0, %v18891_v10  ;;  %14920 = vmatprep.mubr.msk.f32.mxu0 %vm1696_vm0, %v18891_v10  ;;  %5012 = vst.msk [vmem:[#allocation3 + $0x200] sm:$0xff] %vm1696_vm0, %v4948_v46  ;;  %v4947_v14 = vmax.f32 %v4883_v13, 0.0  ;;  %v15454_v46 = vld [vmem:[#allocation3 + $0x38] sm:$0xff]  ;;  %v15455_v13 = vld [vmem:[#allocation3 + $0x40] sm:$0xff] }
 0x3db   : > { %v18901_v62 = vld [vmem:[#allocation3 + $0x1d8] sm:$0xff]  ;;  %15046 = vmatpush3.msra.mxu0 %v12812_v37  ;;  %v12810_v37 = vld [vmem:[%s21012_s7 + $0x58] sm:$0xff] }
 0x3dc   : > { %5011 = vst.msk [vmem:[#allocation3 + $0x1f8] sm:$0xff] %vm1696_vm0, %v4947_v14  ;;  %14808 = vmatprep.mubr.msk.f32.mxu1 %vm1696_vm0, %v18901_v62  ;;  %15047 = vmatprep.subr.mxu0 %v12811_v21  ;;  %v15456_v14 = vld [vmem:[#allocation3 + $0x48] sm:$0xff] }
 0x3dd   : > { %14921 = vmatmul.mubr.msk.f32.gmra.mxu0 %vm1696_vm0, %v18901_v62 }
 0x3de   : > { %14809 = vmatmul.mubr.msk.f32.gmra.mxu1 %vm1696_vm0, %v18908_v12  ;;  %14923 = vmatprep.mubr.msk.f32.mxu0 %vm1696_vm0, %v18908_v12  ;;  %v18920_v32 = vld [vmem:[#allocation3 + $0x1f0] sm:$0xff] }
 0x3df   : > { %v18914_v1 = vld [vmem:[#allocation3 + $0x1e8] sm:$0xff]  ;;  %15048 = vmatpush3.msra.mxu0 %v12811_v21 }
 0x3e0   : > { %14811 = vmatprep.mubr.msk.f32.mxu1 %vm1696_vm0, %v18914_v1  ;;  %15049 = vmatprep.subr.mxu0 %v12810_v37 }
 0x3e1   : > { %14924 = vmatmul.mubr.msk.f32.gmra.mxu0 %vm1696_vm0, %v18914_v1  ;;  %v18932_v44 = vld [vmem:[#allocation3 + $0x200] sm:$0xff] }
 0x3e2   : > { %14812 = vmatmul.mubr.msk.f32.gmra.mxu1 %vm1696_vm0, %v18920_v32  ;;  %14926 = vmatprep.mubr.msk.f32.mxu0 %vm1696_vm0, %v18920_v32 }
 0x3e3   : > { %v18926_v36 = vld [vmem:[#allocation3 + $0x1f8] sm:$0xff]  ;;  %15050 = vmatpush3.msra.mxu0 %v12810_v37 }
 0x3e4   : > { %14814 = vmatprep.mubr.msk.f32.mxu1 %vm1696_vm0, %v18926_v36 }
 0x3e5   : > { %14927 = vmatmul.mubr.msk.f32.gmra.mxu0 %vm1696_vm0, %v18926_v36 }
 0x3e6   : > { %14815 = vmatmul.mubr.msk.f32.gmra.mxu1 %vm1696_vm0, %v18932_v44 }
 0x3e7   : > { %14945 = vmatprep.mubr.msk.f32.mxu1 %vm1696_vm0, %v6060_v35 }
 0x3ea   : > { %14946 = vmatmul.mubr.msk.f32.vlgmr.msra.gmra.mxu1 %vm1696_vm0, %v6061_v4 }
 0x3eb   : > { %14948 = vmatprep.mubr.msk.f32.mxu1 %vm1696_vm0, %v6062_v7 }
 0x3ee   : > { %14949 = vmatmul.mubr.msk.f32.gmra.mxu1 %vm1696_vm0, %v15452_v43 }
 0x3ef   : > { %14951 = vmatprep.mubr.msk.f32.mxu1 %vm1696_vm0, %v15453_v28 }
 0x3f2   : > { %14952 = vmatmul.mubr.msk.f32.gmra.mxu1 %vm1696_vm0, %v15454_v46 }
 0x3f3   : > { %14954 = vmatprep.mubr.msk.f32.mxu1 %vm1696_vm0, %v15455_v13 }
 0x3f6   : > { %14955 = vmatmul.mubr.msk.f32.gmra.mxu1 %vm1696_vm0, %v15456_v14 }
 0x3f7   : > { %14957 = vmatprep.mubr.msk.f32.mxu1 %vm1696_vm0, %v18367_v31  ;;  %v12809_v31 = vld [vmem:[%s21012_s7 + $0x50] sm:$0xff] }
 0x3f8   : > { %15051 = vmatprep.subr.mxu0 %v12809_v31 }
 0x3f9   : > { %15052 = vmatpush3.msra.mxu0 %v12809_v31 }
 0x3fa   : > { %14958 = vmatmul.mubr.msk.f32.gmra.mxu1 %vm1696_vm0, %v18382_v5  ;;  %v12808_v5 = vld [vmem:[%s21012_s7 + $0x48] sm:$0xff] }
 0x3fb   : > { %14960 = vmatprep.mubr.msk.f32.mxu1 %vm1696_vm0, %v18392_v25  ;;  %15053 = vmatprep.subr.mxu0 %v12808_v5 }
 0x3fc   : > { %15054 = vmatpush3.msra.mxu0 %v12808_v5 }
 0x3fe   : > { %14961 = vmatmul.mubr.msk.f32.gmra.mxu1 %vm1696_vm0, %v18407_v55 }
 0x3ff   : > { %14963 = vmatprep.mubr.msk.f32.mxu1 %vm1696_vm0, %v18417_v0  ;;  %v7044_v0 = vld [vmem:[%s21012_s7 + $0x38] sm:$0xff] }
 0x400   : > { %15153 = vmatprep.subr.mxu1 %v7044_v0 }
 0x401   : > { %15154 = vmatpush3.msra.mxu1 %v7044_v0 }
 0x402   : > { %14964 = vmatmul.mubr.msk.f32.gmra.mxu1 %vm1696_vm0, %v18432_v57 }
 0x403   : > { %14966 = vmatprep.mubr.msk.f32.mxu1 %vm1696_vm0, %v18442_v52 }
 0x406   : > { %14967 = vmatmul.mubr.msk.f32.gmra.mxu1 %vm1696_vm0, %v18454_v50  ;;  %v7043_v50 = vld [vmem:[%s21012_s7 + $0x30] sm:$0xff] }
 0x407   : > { %14969 = vmatprep.mubr.msk.f32.mxu1 %vm1696_vm0, %v18464_v16  ;;  %15155 = vmatprep.subr.mxu1 %v7043_v50 }
 0x408   : > { %15156 = vmatpush3.msra.mxu1 %v7043_v50 }
 0x40a   : > { %14970 = vmatmul.mubr.msk.f32.gmra.mxu1 %vm1696_vm0, %v18476_v17  ;;  %v7042_v17 = vld [vmem:[%s21012_s7 + $0x28] sm:$0xff] }
 0x40b   : > { %14972 = vmatprep.mubr.msk.f32.mxu1 %vm1696_vm0, %v18486_v61  ;;  %15157 = vmatprep.subr.mxu1 %v7042_v17 }
 0x40c   : > { %15158 = vmatpush3.msra.mxu1 %v7042_v17 }
 0x40e   : > { %14973 = vmatmul.mubr.msk.f32.gmra.mxu1 %vm1696_vm0, %v18498_v58 }
 0x40f   : > { %14975 = vmatprep.mubr.msk.f32.mxu1 %vm1696_vm0, %v18508_v3  ;;  %v12807_v3 = vld [vmem:[%s21012_s7 + $0x40] sm:$0xff] }
 0x410   : > { %15055 = vmatprep.subr.mxu0 %v12807_v3 }
 0x411   : > { %15056 = vmatpush3.msra.mxu0 %v12807_v3 }
 0x412   : > { %14976 = vmatmul.mubr.msk.f32.gmra.mxu1 %vm1696_vm0, %v18520_v9  ;;  %v7041_v9 = vld [vmem:[%s21012_s7 + $0x20] sm:$0xff] }
 0x413   : > { %14978 = vmatprep.mubr.msk.f32.mxu1 %vm1696_vm0, %v18530_v63  ;;  %15159 = vmatprep.subr.mxu1 %v7041_v9 }
 0x414   : > { %15160 = vmatpush3.msra.mxu1 %v7041_v9 }
 0x416   : > { %14979 = vmatmul.mubr.msk.f32.gmra.mxu1 %vm1696_vm0, %v18542_v51  ;;  %v7040_v51 = vld [vmem:[%s21012_s7 + $0x18] sm:$0xff] }
 0x417   : > { %14981 = vmatprep.mubr.msk.f32.mxu1 %vm1696_vm0, %v18552_v48  ;;  %15161 = vmatprep.subr.mxu1 %v7040_v51 }
 0x418   : > { %15162 = vmatpush3.msra.mxu1 %v7040_v51 }
 0x41a   : > { %14982 = vmatmul.mubr.msk.f32.gmra.mxu1 %vm1696_vm0, %v18564_v20 }
 0x41b   : > { %14984 = vmatprep.mubr.msk.f32.mxu1 %vm1696_vm0, %v18574_v6  ;;  %v7039_v6 = vld [vmem:[%s21012_s7 + $0x10] sm:$0xff] }
 0x41c   : > { %15163 = vmatprep.subr.mxu1 %v7039_v6 }
 0x41d   : > { %15164 = vmatpush3.msra.mxu1 %v7039_v6 }
 0x41e   : > { %14985 = vmatmul.mubr.msk.f32.gmra.mxu1 %vm1696_vm0, %v18586_v11 }
 0x41f   : > { %14987 = vmatprep.mubr.msk.f32.mxu1 %vm1696_vm0, %v18596_v56  ;;  %v7038_v56 = vld [vmem:[%s21012_s7 + $0x8] sm:$0xff] }
 0x420   : > { %15165 = vmatprep.subr.mxu1 %v7038_v56 }
 0x421   : > { %15166 = vmatpush3.msra.mxu1 %v7038_v56 }
 0x422   : > { %14988 = vmatmul.mubr.msk.f32.gmra.mxu1 %vm1696_vm0, %v18608_v39 }
 0x423   : > { %14990 = vmatprep.mubr.msk.f32.mxu1 %vm1696_vm0, %v18618_v29 }
 0x426   : > { %14991 = vmatmul.mubr.msk.f32.gmra.mxu1 %vm1696_vm0, %v18630_v49  ;;  %v7037_v49 = vld [vmem:[%s21012_s7] sm:$0xff] }
 0x427   : > { %14993 = vmatprep.mubr.msk.f32.mxu1 %vm1696_vm0, %v18640_v45  ;;  %15167 = vmatprep.subr.mxu1 %v7037_v49 }
 0x428   : > { %15168 = vmatpush3.msra.mxu1 %v7037_v49 }
 0x429   : > { %v19006_v25 = vpop.f32.mrf.mxu0  ;;  %v19008_v55 = vpop.f32.mrf.mxu1 }
 0x42a   : > { %14994 = vmatmul.mubr.msk.f32.gmra.mxu1 %vm1696_vm0, %v18652_v8 }
 0x42b   : > { %14996 = vmatprep.mubr.msk.f32.mxu1 %vm1696_vm0, %v18662_v33  ;;  %v19017_v57 = vpop.f32.mrf.mxu0  ;;  %v19019_v52 = vpop.f32.mrf.mxu1 }
 0x42d   : > { %v19033_v61 = vpop.f32.mrf.mxu0 }
 0x42e   : > { %v19024_v16 = vpop.f32.mrf.mxu1  ;;  %14997 = vmatmul.mubr.msk.f32.gmra.mxu1 %vm1696_vm0, %v18674_v27 }
 0x42f   : > { %14999 = vmatprep.mubr.msk.f32.mxu1 %vm1696_vm0, %v18684_v15  ;;  %v19052_v48 = vpop.f32.mrf.mxu0 }
 0x430   : > { %v19035_v58 = vpop.f32.mrf.mxu1 }
 0x431   : > { %v19068_v39 = vpop.f32.mrf.mxu0 }
 0x432   : > { %v19043_v63 = vpop.f32.mrf.mxu1  ;;  %15000 = vmatmul.mubr.msk.f32.gmra.mxu1 %vm1696_vm0, %v18696_v40 }
 0x433   : > { %15002 = vmatprep.mubr.msk.f32.mxu1 %vm1696_vm0, %v18706_v53  ;;  %v19081_v8 = vpop.f32.mrf.mxu0  ;;  %v19098_v53 = vld [vmem:[%s21012_s7 + $0xb8] sm:$0xff] }
 0x434   : > { %v19054_v20 = vpop.f32.mrf.mxu1  ;;  %15265 = vmatprep.subr.mxu0 %v19098_v53 }
 0x435   : > { %v19091_v15 = vpop.f32.mrf.mxu0 }
 0x436   : > { %v19059_v11 = vpop.f32.mrf.mxu1  ;;  %15003 = vmatmul.mubr.msk.f32.gmra.mxu1 %vm1696_vm0, %v18718_v2 }
 0x437   : > { %15005 = vmatprep.mubr.msk.f32.mxu1 %vm1696_vm0, %v18728_v41  ;;  %v19107_v41 = vpop.f32.mrf.mxu0 }
 0x438   : > { %v19070_v29 = vpop.f32.mrf.mxu1 }
 0x43a   : > { %v19075_v45 = vpop.f32.mrf.mxu1  ;;  %15006 = vmatmul.mubr.msk.f32.gmra.mxu1 %vm1696_vm0, %v18743_v38 }
 0x43b   : > { %15008 = vmatprep.mubr.msk.f32.mxu1 %vm1696_vm0, %v18753_v42 }
 0x43c   : > { %v19083_v33 = vpop.f32.mrf.mxu1 }
 0x43e   : > { %v19085_v27 = vpop.f32.mrf.mxu1  ;;  %15009 = vmatmul.mubr.msk.f32.gmra.mxu1 %vm1696_vm0, %v18763_v18  ;;  %v19117_v18 = vpop.f32.mrf.mxu0 }
 0x43f   : > { %15011 = vmatprep.mubr.msk.f32.mxu1 %vm1696_vm0, %v18773_v22 }
 0x440   : > { %v19093_v40 = vpop.f32.mrf.mxu1  ;;  %v19127_v35 = vpop.f32.mrf.mxu0 }
 0x442   : > { %v19100_v2 = vpop.f32.mrf.mxu1  ;;  %15012 = vmatmul.mubr.msk.f32.gmra.mxu1 %vm1696_vm0, %v18783_v23 }
 0x443   : > { %15014 = vmatprep.mubr.msk.f32.mxu1 %vm1696_vm0, %v18798_v26  ;;  %v21141_v26 = vld [vmem:[#allocation35_spill] sm:$0xff] }
 0x444   : > { %v19109_v38 = vpop.f32.mrf.mxu1 }
 0x446   : > { %v19111_v42 = vpop.f32.mrf.mxu1  ;;  %15015 = vmatmul.mubr.msk.f32.gmra.mxu1 %vm1696_vm0, %v18808_v47 }
 0x447   : > { %15017 = vmatprep.mubr.msk.f32.mxu1 %vm1696_vm0, %v18818_v59  ;;  %v19137_v59 = vpop.f32.mrf.mxu0 }
 0x448   : > { %v19119_v22 = vpop.f32.mrf.mxu1 }
 0x449   : > { %v19147_v21 = vpop.f32.mrf.mxu0 }
 0x44a   : > { %v19121_v23 = vpop.f32.mrf.mxu1  ;;  %15018 = vmatmul.mubr.msk.f32.gmra.mxu1 %vm1696_vm0, %v18830_v54 }
 0x44b   : > { %15020 = vmatprep.mubr.msk.f32.mxu1 %vm1696_vm0, %v21141_v26 }
 0x44c   : > { %v19129_v4 = vpop.f32.mrf.mxu1 }
 0x44e   : > { %v19131_v47 = vpop.f32.mrf.mxu1  ;;  %15021 = vmatmul.mubr.msk.f32.gmra.mxu1 %vm1696_vm0, %v18848_v19 }
 0x44f   : > { %15023 = vmatprep.mubr.msk.f32.mxu1 %vm1696_vm0, %v18857_v34  ;;  %v19157_v34 = vpop.f32.mrf.mxu0 }
 0x450   : > { %v19139_v7 = vpop.f32.mrf.mxu1 }
 0x452   : > { %v19141_v54 = vpop.f32.mrf.mxu1  ;;  %15024 = vmatmul.mubr.msk.f32.gmra.mxu1 %vm1696_vm0, %v18866_v60 }
 0x453   : > { %15026 = vmatprep.mubr.msk.f32.mxu1 %vm1696_vm0, %v18875_v30  ;;  %v19167_v30 = vpop.f32.mrf.mxu0 }
 0x454   : > { %v19149_v43 = vpop.f32.mrf.mxu1 }
 0x456   : > { %v19151_v19 = vpop.f32.mrf.mxu1  ;;  %15027 = vmatmul.mubr.msk.f32.gmra.mxu1 %vm1696_vm0, %v18883_v24 }
 0x457   : > { %15029 = vmatprep.mubr.msk.f32.mxu1 %vm1696_vm0, %v18891_v10  ;;  %v19177_v10 = vpop.f32.mrf.mxu0 }
 0x458   : > { %v19159_v28 = vpop.f32.mrf.mxu1 }
 0x459   : > { %v19187_v14 = vpop.f32.mrf.mxu0 }
 0x45a   : > { %v19161_v60 = vpop.f32.mrf.mxu1  ;;  %15030 = vmatmul.mubr.msk.f32.gmra.mxu1 %vm1696_vm0, %v18901_v62 }
 0x45b   : > { %15032 = vmatprep.mubr.msk.f32.mxu1 %vm1696_vm0, %v18908_v12  ;;  %v6123_v12 = vld [vmem:[#allocation3 + $0x208] sm:$0xff] }
 0x45c   : > { %v19169_v46 = vpop.f32.mrf.mxu1 }
 0x45d   : > { %21142 = vst [vmem:[#allocation13_spill] sm:$0xff] %v19169_v46 }
 0x45e   : > { %v19171_v24 = vpop.f32.mrf.mxu1  ;;  %15033 = vmatmul.mubr.msk.f32.gmra.mxu1 %vm1696_vm0, %v18914_v1  ;;  %v6973_v1 = vld [vmem:[#allocation2] sm:$0xff] }
 0x45f   : > { %21143 = vst [vmem:[#allocation38_spill] sm:$0xff] %v19171_v24  ;;  %15035 = vmatprep.mubr.msk.f32.mxu1 %vm1696_vm0, %v18920_v32  ;;  %v19195_v32 = vpop.f32.mrf.mxu0 }
 0x460   : > { %v19179_v13 = vpop.f32.mrf.mxu1 }
 0x461   : > { %21144 = vst [vmem:[#allocation14_spill] sm:$0xff] %v19179_v13  ;;  %v19201_v0 = vpop.f32.mrf.mxu0 }
 0x462   : > { %v19181_v62 = vpop.f32.mrf.mxu1  ;;  %15036 = vmatmul.mubr.msk.f32.gmra.mxu1 %vm1696_vm0, %v18926_v36 }
 0x463   : > { %21145 = vst [vmem:[#allocation41_spill] sm:$0xff] %v19181_v62  ;;  %15038 = vmatprep.mubr.msk.f32.mxu1 %vm1696_vm0, %v18932_v44  ;;  %v19207_v17 = vpop.f32.mrf.mxu0 }
 0x464   : > { %v19189_v37 = vpop.f32.mrf.mxu1 }
 0x465   : > { %21146 = vst [vmem:[#allocation9_spill] sm:$0xff] %v19189_v37  ;;  %v19213_v51 = vpop.f32.mrf.mxu0 }
 0x466   : > { %v19191_v31 = vpop.f32.mrf.mxu1  ;;  %15039 = vmatmul.mubr.msk.f32.gmra.mxu1 %vm1696_vm0, %v6123_v12 }
 0x467   : > { %21147 = vst [vmem:[#allocation44_spill] sm:$0xff] %v19191_v31  ;;  %15169 = vmatprep.mubr.msk.f32.mxu1 %vm1696_vm0, %v6973_v1  ;;  %v19219_v49 = vpop.f32.mrf.mxu0 }
 0x468   : > { %v19197_v5 = vpop.f32.mrf.mxu1 }
 0x469   : > { %21148 = vst [vmem:[#allocation10_spill] sm:$0xff] %v19197_v5  ;;  %v19225_v1 = vpop.f32.mrf.mxu0 }
 0x46a   : > { %v19199_v36 = vpop.f32.mrf.mxu1 }
 0x46b   : > { %21149 = vst [vmem:[#allocation47_spill] sm:$0xff] %v19199_v36 }
 0x46c   : > { %v19203_v44 = vpop.f32.mrf.mxu1 }
 0x46d   : > { %21150 = vst [vmem:[#allocation11_spill] sm:$0xff] %v19203_v44 }
 0x46e   : > { %v19205_v50 = vpop.f32.mrf.mxu1 }
 0x46f   : > { %21151 = vst [vmem:[#allocation50_spill] sm:$0xff] %v19205_v50 }
 0x470   : > { %v19209_v3 = vpop.f32.mrf.mxu1 }
 0x471   : > { %21152 = vst [vmem:[#allocation12_spill] sm:$0xff] %v19209_v3  ;;  %v19231_v3 = vpop.f32.mrf.mxu0 }
 0x472   : > { %v19211_v9 = vpop.f32.mrf.mxu1 }
 0x473   : > { %21153 = vst [vmem:[#allocation53_spill] sm:$0xff] %v19211_v9 }
 0x474   : > { %v19215_v6 = vpop.f32.mrf.mxu1 }
 0x475   : > { %21154 = vst [vmem:[#allocation15_spill] sm:$0xff] %v19215_v6  ;;  %v19237_v6 = vpop.f32.mrf.mxu0 }
 0x476   : > { %v19217_v56 = vpop.f32.mrf.mxu1 }
 0x477   : > { %21155 = vst [vmem:[#allocation55_spill] sm:$0xff] %v19217_v56 }
 0x478   : > { %v19221_v26 = vpop.f32.mrf.mxu1 }
 0x479   : > { %21156 = vst [vmem:[#allocation16_spill] sm:$0xff] %v19221_v26  ;;  %v19243_v26 = vpop.f32.mrf.mxu0 }
 0x47a   : > { %v19223_v12 = vpop.f32.mrf.mxu1  ;;  %21164 = vst [vmem:[#allocation24_spill] sm:$0xff] %v19243_v26 }
 0x47b   : > { %21157 = vst [vmem:[#allocation17_spill] sm:$0xff] %v19223_v12 }
 0x47c   : > { %v19227_v50 = vpop.f32.mrf.mxu1 }
 0x47d   : > { %21158 = vst [vmem:[#allocation18_spill] sm:$0xff] %v19227_v50  ;;  %v19249_v50 = vpop.f32.mrf.mxu0 }
 0x47e   : > { %v19229_v44 = vpop.f32.mrf.mxu1  ;;  %21167 = vst [vmem:[#allocation27_spill] sm:$0xff] %v19249_v50 }
 0x47f   : > { %21159 = vst [vmem:[#allocation19_spill] sm:$0xff] %v19229_v44 }
 0x480   : > { %v19233_v9 = vpop.f32.mrf.mxu1 }
 0x481   : > { %21160 = vst [vmem:[#allocation20_spill] sm:$0xff] %v19233_v9  ;;  %v19255_v9 = vpop.f32.mrf.mxu0 }
 0x482   : > { %v19235_v36 = vpop.f32.mrf.mxu1  ;;  %21170 = vst [vmem:[#allocation30_spill] sm:$0xff] %v19255_v9 }
 0x483   : > { %21161 = vst [vmem:[#allocation21_spill] sm:$0xff] %v19235_v36 }
 0x484   : > { %v19239_v56 = vpop.f32.mrf.mxu1 }
 0x485   : > { %21162 = vst [vmem:[#allocation22_spill] sm:$0xff] %v19239_v56  ;;  %v19261_v56 = vpop.f32.mrf.mxu0 }
 0x486   : > { %v19241_v5 = vpop.f32.mrf.mxu1  ;;  %21173 = vst [vmem:[#allocation33_spill] sm:$0xff] %v19261_v56 }
 0x487   : > { %21163 = vst [vmem:[#allocation23_spill] sm:$0xff] %v19241_v5 }
 0x488   : > { %v19245_v12 = vpop.f32.mrf.mxu1 }
 0x489   : > { %21165 = vst [vmem:[#allocation25_spill] sm:$0xff] %v19245_v12  ;;  %v19267_v12 = vpop.f32.mrf.mxu0 }
 0x48a   : > { %v19247_v31 = vpop.f32.mrf.mxu1  ;;  %21176 = vst [vmem:[#allocation37_spill] sm:$0xff] %v19267_v12 }
 0x48b   : > { %21166 = vst [vmem:[#allocation26_spill] sm:$0xff] %v19247_v31 }
 0x48c   : > { %v19251_v44 = vpop.f32.mrf.mxu1 }
 0x48d   : > { %21168 = vst [vmem:[#allocation28_spill] sm:$0xff] %v19251_v44  ;;  %v19273_v44 = vpop.f32.mrf.mxu0 }
 0x48e   : > { %v19253_v37 = vpop.f32.mrf.mxu1  ;;  %21179 = vst [vmem:[#allocation42_spill] sm:$0xff] %v19273_v44 }
 0x48f   : > { %21169 = vst [vmem:[#allocation29_spill] sm:$0xff] %v19253_v37 }
 0x490   : > { %v19257_v36 = vpop.f32.mrf.mxu1 }
 0x491   : > { %21171 = vst [vmem:[#allocation31_spill] sm:$0xff] %v19257_v36  ;;  %v19279_v36 = vpop.f32.mrf.mxu0 }
 0x492   : > { %v19259_v62 = vpop.f32.mrf.mxu1  ;;  %21182 = vst [vmem:[#allocation46_spill] sm:$0xff] %v19279_v36 }
 0x493   : > { %21172 = vst [vmem:[#allocation32_spill] sm:$0xff] %v19259_v62 }
 0x494   : > { %v19263_v5 = vpop.f32.mrf.mxu1 }
 0x495   : > { %21174 = vst [vmem:[#allocation34_spill] sm:$0xff] %v19263_v5  ;;  %v19285_v5 = vpop.f32.mrf.mxu0 }
 0x496   : > { %v19265_v13 = vpop.f32.mrf.mxu1  ;;  %21185 = vst [vmem:[#allocation51_spill] sm:$0xff] %v19285_v5 }
 0x497   : > { %21175 = vst [vmem:[#allocation36_spill] sm:$0xff] %v19265_v13 }
 0x498   : > { %v19269_v31 = vpop.f32.mrf.mxu1 }
 0x499   : > { %21177 = vst [vmem:[#allocation39_spill] sm:$0xff] %v19269_v31  ;;  %v19291_v31 = vpop.f32.mrf.mxu0 }
 0x49a   : > { %v19271_v24 = vpop.f32.mrf.mxu1  ;;  %21188 = vst [vmem:[#allocation35_spill] sm:$0xff] %v19291_v31  ;;  %v5757_v31 = vadd.f32 %v19033_v61, %v19024_v16 }
 0x49b   : > { %21178 = vst [vmem:[#allocation40_spill] sm:$0xff] %v19271_v24 }
 0x49c   : > { %v19275_v37 = vpop.f32.mrf.mxu1 }
 0x49d   : > { %21180 = vst [vmem:[#allocation43_spill] sm:$0xff] %v19275_v37  ;;  %v5747_v37 = vadd.f32 %v19006_v25, %v19008_v55  ;;  %v5752_v55 = vadd.f32 %v19052_v48, %v19035_v58  ;;  %v5762_v58 = vadd.f32 %v19081_v8, %v19054_v20  ;;  %v5772_v20 = vadd.f32 %v19107_v41, %v19070_v29 }
 0x49e   : > { %v19277_v9 = vpop.f32.mrf.mxu1  ;;  %v5782_v41 = vadd.f32 %v19127_v35, %v19083_v33  ;;  %v5797_v33 = vadd.f32 %v19137_v59, %v19085_v27 }
 0x49f   : > { %21181 = vst [vmem:[#allocation45_spill] sm:$0xff] %v19277_v9 }
 0x4a0   : > { %v19281_v62 = vpop.f32.mrf.mxu1 }
 0x4a1   : > { %21183 = vst [vmem:[#allocation48_spill] sm:$0xff] %v19281_v62  ;;  %v19300_v62 = vld [vmem:[%s21190_s19] ss:$0 sm:$0xff] }
 0x4a2   : > { %v19283_v56 = vpop.f32.mrf.mxu1 }
 0x4a3   : > { %21184 = vst [vmem:[#allocation49_spill] sm:$0xff] %v19283_v56  ;;  %v5742_v56 = vadd.f32 %v19017_v57, %v19019_v52  ;;  %v5767_v52 = vadd.f32 %v19068_v39, %v19043_v63  ;;  %v5777_v63 = vadd.f32 %v19091_v15, %v19059_v11  ;;  %v5787_v11 = vadd.f32 %v19117_v18, %v19075_v45  ;;  %v12949_v18 = vld [vmem:[%s21012_s7 + $0xb0] sm:$0xff] }
 0x4a4   : > { %v19287_v13 = vpop.f32.mrf.mxu1 }
 0x4a5   : > { %21186 = vst [vmem:[#allocation52_spill] sm:$0xff] %v19287_v13  ;;  %v19304_v13 = vpop.f32.mrf.mxu0 }
 0x4a6   : > { %v19289_v12 = vpop.f32.mrf.mxu1 }
 0x4a7   : > { %21187 = vst [vmem:[#allocation54_spill] sm:$0xff] %v19289_v12  ;;  %v19312_v26 = vpop.f32.mrf.mxu0 }
 0x4a8   : > { %v19293_v24 = vpop.f32.mrf.mxu1 }
 0x4a9   : > { %21189 = vst [vmem:[#allocation56_spill] sm:$0xff] %v19293_v24 }
 0x4aa   : > { %v14947_v9 = vpop.f32.mrf.mxu1 }
 0x4ab   : > { %v6711_v5 = vadd.f32 %v14947_v9, %v5747_v37 }
 0x4ac   : > { %v6391_v12 = vpop.f32.mrf.mxu1 }
 0x4ad   : > { %v6782_v24 = vadd.f32 %v19300_v62, %v6711_v5  ;;  %v6710_v36 = vadd.f32 %v6391_v12, %v5742_v56 }
 0x4ae   : > { %v14950_v25 = vpop.f32.mrf.mxu1 }
 0x4af   : > { %v6846_v44 = vmax.f32 %v6782_v24, 0.0  ;;  %v6781_v50 = vadd.f32 %v19300_v62, %v6710_v36  ;;  %v6713_v46 = vadd.f32 %v14950_v25, %v5757_v31  ;;  %v19322_v36 = vpop.f32.mrf.mxu0 }
 0x4b0   : > { %v6401_v57 = vpop.f32.mrf.mxu1 }
 0x4b1   : > { %6910 = vst.msk [vmem:[#allocation2 + $0x10] sm:$0xff] %vm1696_vm0, %v6846_v44  ;;  %v6845_v16 = vmax.f32 %v6781_v50, 0.0  ;;  %v6784_v61 = vadd.f32 %v19300_v62, %v6713_v46  ;;  %v6712_v37 = vadd.f32 %v6401_v57, %v5752_v55  ;;  %v19332_v25 = vpop.f32.mrf.mxu0 }
 0x4b2   : > { %v14953_v5 = vpop.f32.mrf.mxu1 }
 0x4b3   : > { %6909 = vst.msk [vmem:[#allocation2 + $0x8] sm:$0xff] %vm1696_vm0, %v6845_v16  ;;  %v6848_v48 = vmax.f32 %v6784_v61, 0.0  ;;  %v6783_v24 = vadd.f32 %v19300_v62, %v6712_v37  ;;  %v6715_v31 = vadd.f32 %v14953_v5, %v5767_v52 }
 0x4b4   : > { %v6411_v9 = vpop.f32.mrf.mxu1 }
 0x4b5   : > { %6912 = vst.msk [vmem:[#allocation2 + $0x20] sm:$0xff] %vm1696_vm0, %v6848_v48  ;;  %v6847_v39 = vmax.f32 %v6783_v24, 0.0  ;;  %v6786_v46 = vadd.f32 %v19300_v62, %v6715_v31  ;;  %v6714_v44 = vadd.f32 %v6411_v9, %v5762_v58  ;;  %v19347_v58 = vpop.f32.mrf.mxu0 }
 0x4b6   : > { %v14956_v50 = vpop.f32.mrf.mxu1 }
 0x4b7   : > { %6911 = vst.msk [vmem:[#allocation2 + $0x18] sm:$0xff] %vm1696_vm0, %v6847_v39  ;;  %v6850_v8 = vmax.f32 %v6786_v46, 0.0  ;;  %v6785_v56 = vadd.f32 %v19300_v62, %v6714_v44  ;;  %v6717_v12 = vadd.f32 %v14956_v50, %v5777_v63  ;;  %v5792_v39 = vadd.f32 %v19147_v21, %v19093_v40  ;;  %v19365_v50 = vpop.f32.mrf.mxu0 }
 0x4b8   : > { %v6421_v55 = vpop.f32.mrf.mxu1  ;;  %v6975_v45 = vld [vmem:[#allocation2 + $0x10] sm:$0xff]  ;;  %v5807_v40 = vadd.f32 %v19157_v34, %v19100_v2  ;;  %v12947_v34 = vld [vmem:[%s21012_s7 + $0xa0] sm:$0xff] }
 0x4b9   : > { %6914 = vst.msk [vmem:[#allocation2 + $0x30] sm:$0xff] %vm1696_vm0, %v6850_v8  ;;  %v6849_v15 = vmax.f32 %v6785_v56, 0.0  ;;  %v6788_v57 = vadd.f32 %v19300_v62, %v6717_v12  ;;  %v6716_v52 = vadd.f32 %v6421_v55, %v5772_v20 }
 0x4ba   : > { %v14959_v16 = vpop.f32.mrf.mxu1  ;;  %v6974_v29 = vld [vmem:[#allocation2 + $0x8] sm:$0xff] }
 0x4bb   : > { %6913 = vst.msk [vmem:[#allocation2 + $0x28] sm:$0xff] %vm1696_vm0, %v6849_v15  ;;  %v6852_v61 = vmax.f32 %v6788_v57, 0.0  ;;  %v6787_v37 = vadd.f32 %v19300_v62, %v6716_v52  ;;  %v6719_v5 = vadd.f32 %v14959_v16, %v5787_v11  ;;  %15057 = vmatprep.mubr.msk.f32.mxu0 %vm1696_vm0, %v6974_v29  ;;  %15170 = vmatmul.mubr.msk.f32.vlgmr.msra.gmra.mxu1 %vm1696_vm0, %v6974_v29  ;;  %v19382_v16 = vpop.f32.mrf.mxu0 }
 0x4bc   : > { %v6431_v48 = vpop.f32.mrf.mxu1  ;;  %15058 = vmatmul.mubr.msk.f32.vlgmr.msra.gmra.mxu0 %vm1696_vm0, %v6975_v45  ;;  %15172 = vmatprep.mubr.msk.f32.mxu1 %vm1696_vm0, %v6975_v45  ;;  %v6977_v59 = vld [vmem:[#allocation2 + $0x20] sm:$0xff]  ;;  %v5802_v11 = vadd.f32 %v19167_v30, %v19109_v38  ;;  %v5817_v38 = vadd.f32 %v19177_v10, %v19111_v42  ;;  %v5812_v45 = vadd.f32 %v19187_v14, %v19119_v22  ;;  %v12946_v10 = vld [vmem:[%s21012_s7 + $0x98] sm:$0xff] }
 0x4bd   : > { %6916 = vst.msk [vmem:[#allocation2 + $0x40] sm:$0xff] %vm1696_vm0, %v6852_v61  ;;  %v6851_v35 = vmax.f32 %v6787_v37, 0.0  ;;  %v6790_v24 = vadd.f32 %v19300_v62, %v6719_v5  ;;  %v6718_v31 = vadd.f32 %v6431_v48, %v5782_v41  ;;  %15266 = vmatpush3.msra.mxu0 %v19098_v53  ;;  %v12948_v53 = vld [vmem:[%s21012_s7 + $0xa8] sm:$0xff]  ;;  %v5827_v22 = vadd.f32 %v19195_v32, %v19121_v23 }
 0x4be   : > { %v14962_v9 = vpop.f32.mrf.mxu1  ;;  %v6976_v63 = vld [vmem:[#allocation2 + $0x18] sm:$0xff]  ;;  %15267 = vmatprep.subr.mxu0 %v12949_v18 }
 0x4bf   : > { %6915 = vst.msk [vmem:[#allocation2 + $0x38] sm:$0xff] %vm1696_vm0, %v6851_v35  ;;  %v6854_v46 = vmax.f32 %v6790_v24, 0.0  ;;  %v6789_v44 = vadd.f32 %v19300_v62, %v6718_v31  ;;  %v6721_v27 = vadd.f32 %v14962_v9, %v5797_v33  ;;  %15060 = vmatprep.mubr.msk.f32.mxu0 %vm1696_vm0, %v6976_v63  ;;  %15173 = vmatmul.mubr.msk.f32.gmra.mxu1 %vm1696_vm0, %v6976_v63  ;;  %v19399_v35 = vpop.f32.mrf.mxu0 }
 0x4c0   : > { %v6441_v20 = vpop.f32.mrf.mxu1  ;;  %15061 = vmatmul.mubr.msk.f32.gmra.mxu0 %vm1696_vm0, %v6977_v59  ;;  %15175 = vmatprep.mubr.msk.f32.mxu1 %vm1696_vm0, %v6977_v59  ;;  %v6979_v2 = vld [vmem:[#allocation2 + $0x30] sm:$0xff] }
 0x4c1   : > { %6918 = vst.msk [vmem:[#allocation2 + $0x50] sm:$0xff] %vm1696_vm0, %v6854_v46  ;;  %v6853_v21 = vmax.f32 %v6789_v44, 0.0  ;;  %v6792_v8 = vadd.f32 %v19300_v62, %v6721_v27  ;;  %v6720_v56 = vadd.f32 %v6441_v20, %v5792_v39  ;;  %15268 = vmatpush3.msra.mxu0 %v12949_v18  ;;  %v5822_v46 = vadd.f32 %v19201_v0, %v19129_v4  ;;  %v12945_v59 = vld [vmem:[%s21012_s7 + $0x90] sm:$0xff] }
 0x4c2   : > { %v14965_v12 = vpop.f32.mrf.mxu1  ;;  %v6978_v55 = vld [vmem:[#allocation2 + $0x28] sm:$0xff]  ;;  %15269 = vmatprep.subr.mxu0 %v12948_v53  ;;  %v5837_v0 = vadd.f32 %v19207_v17, %v19131_v47 }
 0x4c3   : > { %6917 = vst.msk [vmem:[#allocation2 + $0x48] sm:$0xff] %vm1696_vm0, %v6853_v21  ;;  %v6856_v15 = vmax.f32 %v6792_v8, 0.0  ;;  %v6791_v57 = vadd.f32 %v19300_v62, %v6720_v56  ;;  %v6723_v52 = vadd.f32 %v14965_v12, %v5807_v40  ;;  %15063 = vmatprep.mubr.msk.f32.mxu0 %vm1696_vm0, %v6978_v55  ;;  %15176 = vmatmul.mubr.msk.f32.gmra.mxu1 %vm1696_vm0, %v6978_v55 }
 0x4c4   : > { %v6451_v29 = vpop.f32.mrf.mxu1  ;;  %15064 = vmatmul.mubr.msk.f32.gmra.mxu0 %vm1696_vm0, %v6979_v2  ;;  %15178 = vmatprep.mubr.msk.f32.mxu1 %vm1696_vm0, %v6979_v2  ;;  %v6981_v42 = vld [vmem:[#allocation2 + $0x40] sm:$0xff]  ;;  %v5832_v12 = vadd.f32 %v19213_v51, %v19139_v7  ;;  %v5847_v51 = vadd.f32 %v19219_v49, %v19141_v54 }
 0x4c5   : > { %6920 = vst.msk [vmem:[#allocation2 + $0x60] sm:$0xff] %vm1696_vm0, %v6856_v15  ;;  %v6855_v30 = vmax.f32 %v6791_v57, 0.0  ;;  %v6794_v41 = vadd.f32 %v19300_v62, %v6723_v52  ;;  %v6722_v61 = vadd.f32 %v6451_v29, %v5802_v11  ;;  %15270 = vmatpush3.msra.mxu0 %v12948_v53  ;;  %v19422_v53 = vpop.f32.mrf.mxu0  ;;  %v12944_v15 = vld [vmem:[%s21012_s7 + $0x88] sm:$0xff] }
 0x4c6   : > { %v14968_v37 = vpop.f32.mrf.mxu1  ;;  %v6980_v5 = vld [vmem:[#allocation2 + $0x38] sm:$0xff]  ;;  %15271 = vmatprep.subr.mxu0 %v12947_v34 }
 0x4c7   : > { %6919 = vst.msk [vmem:[#allocation2 + $0x58] sm:$0xff] %vm1696_vm0, %v6855_v30  ;;  %v6858_v18 = vmax.f32 %v6794_v41, 0.0  ;;  %v6793_v48 = vadd.f32 %v19300_v62, %v6722_v61  ;;  %v6725_v33 = vadd.f32 %v14968_v37, %v5817_v38  ;;  %15066 = vmatprep.mubr.msk.f32.mxu0 %vm1696_vm0, %v6980_v5  ;;  %15179 = vmatmul.mubr.msk.f32.gmra.mxu1 %vm1696_vm0, %v6980_v5  ;;  %v19447_v57 = vpop.f32.mrf.mxu0  ;;  %v12943_v37 = vld [vmem:[%s21012_s7 + $0x80] sm:$0xff] }
 0x4c8   : > { %v6461_v24 = vpop.f32.mrf.mxu1  ;;  %15067 = vmatmul.mubr.msk.f32.gmra.mxu0 %vm1696_vm0, %v6981_v42  ;;  %15181 = vmatprep.mubr.msk.f32.mxu1 %vm1696_vm0, %v6981_v42  ;;  %v19417_v32 = vld [vmem:[#allocation2 + $0x50] sm:$0xff]  ;;  %v5842_v30 = vadd.f32 %v19225_v1, %v19149_v43  ;;  %v5857_v1 = vadd.f32 %v19231_v3, %v19151_v19 }
 0x4c9   : > { %6922 = vst.msk [vmem:[#allocation2 + $0x70] sm:$0xff] %vm1696_vm0, %v6858_v18  ;;  %v6857_v14 = vmax.f32 %v6793_v48, 0.0  ;;  %v6796_v31 = vadd.f32 %v19300_v62, %v6725_v33  ;;  %v6724_v9 = vadd.f32 %v6461_v24, %v5812_v45  ;;  %15272 = vmatpush3.msra.mxu0 %v12947_v34  ;;  %v19472_v5 = vpop.f32.mrf.mxu0 }
 0x4ca   : > { %v14971_v63 = vpop.f32.mrf.mxu1  ;;  %v19407_v39 = vld [vmem:[#allocation2 + $0x48] sm:$0xff]  ;;  %15273 = vmatprep.subr.mxu0 %v12946_v10 }
 0x4cb   : > { %6921 = vst.msk [vmem:[#allocation2 + $0x68] sm:$0xff] %vm1696_vm0, %v6857_v14  ;;  %v6860_v44 = vmax.f32 %v6796_v31, 0.0  ;;  %v6795_v27 = vadd.f32 %v19300_v62, %v6724_v9  ;;  %v6727_v23 = vadd.f32 %v14971_v63, %v5827_v22  ;;  %15069 = vmatprep.mubr.msk.f32.mxu0 %vm1696_vm0, %v19407_v39  ;;  %15182 = vmatmul.mubr.msk.f32.gmra.mxu1 %vm1696_vm0, %v19407_v39  ;;  %v19494_v14 = vpop.f32.mrf.mxu0 }
 0x4cc   : > { %v6471_v4 = vpop.f32.mrf.mxu1  ;;  %15070 = vmatmul.mubr.msk.f32.gmra.mxu0 %vm1696_vm0, %v19417_v32  ;;  %15184 = vmatprep.mubr.msk.f32.mxu1 %vm1696_vm0, %v19417_v32  ;;  %v19442_v17 = vld [vmem:[#allocation2 + $0x60] sm:$0xff] }
 0x4cd   : > { %6924 = vst.msk [vmem:[#allocation2 + $0x80] sm:$0xff] %vm1696_vm0, %v6860_v44  ;;  %v6859_v20 = vmax.f32 %v6795_v27, 0.0  ;;  %v6798_v40 = vadd.f32 %v19300_v62, %v6727_v23  ;;  %v6726_v21 = vadd.f32 %v6471_v4, %v5822_v46  ;;  %15274 = vmatpush3.msra.mxu0 %v12946_v10  ;;  %v5852_v10 = vadd.f32 %v19237_v6, %v19159_v28  ;;  %v21191_v28 = vld [vmem:[#allocation24_spill] sm:$0xff]  ;;  %v21192_v23 = vld [vmem:[#allocation13_spill] sm:$0xff] }
 0x4ce   : > { %v14974_v8 = vpop.f32.mrf.mxu1  ;;  %v19432_v56 = vld [vmem:[#allocation2 + $0x58] sm:$0xff]  ;;  %15275 = vmatprep.subr.mxu0 %v12945_v59  ;;  %v5867_v6 = vadd.f32 %v21191_v28, %v19161_v60 }
 0x4cf   : > { %6923 = vst.msk [vmem:[#allocation2 + $0x78] sm:$0xff] %vm1696_vm0, %v6859_v20  ;;  %v6862_v55 = vmax.f32 %v6798_v40, 0.0  ;;  %v6797_v11 = vadd.f32 %v19300_v62, %v6726_v21  ;;  %v6729_v47 = vadd.f32 %v14974_v8, %v5837_v0  ;;  %15072 = vmatprep.mubr.msk.f32.mxu0 %vm1696_vm0, %v19432_v56  ;;  %15185 = vmatmul.mubr.msk.f32.gmra.mxu1 %vm1696_vm0, %v19432_v56  ;;  %v19516_v21 = vpop.f32.mrf.mxu0 }
 0x4d0   : > { %v6481_v7 = vpop.f32.mrf.mxu1  ;;  %15073 = vmatmul.mubr.msk.f32.gmra.mxu0 %vm1696_vm0, %v19442_v17  ;;  %15187 = vmatprep.mubr.msk.f32.mxu1 %vm1696_vm0, %v19442_v17  ;;  %v19467_v49 = vld [vmem:[#allocation2 + $0x70] sm:$0xff] }
 0x4d1   : > { %6926 = vst.msk [vmem:[#allocation2 + $0x90] sm:$0xff] %vm1696_vm0, %v6862_v55  ;;  %v6861_v52 = vmax.f32 %v6797_v11, 0.0  ;;  %v6800_v2 = vadd.f32 %v19300_v62, %v6729_v47  ;;  %v6728_v34 = vadd.f32 %v6481_v7, %v5832_v12  ;;  %15276 = vmatpush3.msra.mxu0 %v12945_v59  ;;  %v21193_v59 = vld [vmem:[#allocation27_spill] sm:$0xff]  ;;  %v21194_v12 = vld [vmem:[#allocation38_spill] sm:$0xff] }
 0x4d2   : > { %v14977_v29 = vpop.f32.mrf.mxu1  ;;  %v19457_v38 = vld [vmem:[#allocation2 + $0x68] sm:$0xff]  ;;  %15277 = vmatprep.subr.mxu0 %v12944_v15  ;;  %v5862_v4 = vadd.f32 %v21193_v59, %v21192_v23  ;;  %v21195_v55 = vld [vmem:[#allocation30_spill] sm:$0xff] }
 0x4d3   : > { %6925 = vst.msk [vmem:[#allocation2 + $0x88] sm:$0xff] %vm1696_vm0, %v6861_v52  ;;  %v6864_v41 = vmax.f32 %v6800_v2, 0.0  ;;  %v6799_v61 = vadd.f32 %v19300_v62, %v6728_v34  ;;  %v6731_v54 = vadd.f32 %v14977_v29, %v5847_v51  ;;  %15075 = vmatprep.mubr.msk.f32.mxu0 %vm1696_vm0, %v19457_v38  ;;  %15188 = vmatmul.mubr.msk.f32.gmra.mxu1 %vm1696_vm0, %v19457_v38  ;;  %v21196_v2 = vld [vmem:[#allocation14_spill] sm:$0xff]  ;;  %v21197_v34 = vld [vmem:[#allocation33_spill] sm:$0xff]  ;;  %v21202_v59 = vld [vmem:[#allocation44_spill] sm:$0xff] }
 0x4d4   : > { %v6491_v43 = vpop.f32.mrf.mxu1  ;;  %15076 = vmatmul.mubr.msk.f32.gmra.mxu0 %vm1696_vm0, %v19467_v49  ;;  %15190 = vmatprep.mubr.msk.f32.mxu1 %vm1696_vm0, %v19467_v49  ;;  %v19492_v3 = vld [vmem:[#allocation2 + $0x80] sm:$0xff]  ;;  %v5877_v11 = vadd.f32 %v21195_v55, %v21194_v12  ;;  %v5872_v29 = vadd.f32 %v21197_v34, %v21196_v2 }
 0x4d5   : > { %6928 = vst.msk [vmem:[#allocation2 + $0xa0] sm:$0xff] %vm1696_vm0, %v6864_v41  ;;  %v6863_v45 = vmax.f32 %v6799_v61, 0.0  ;;  %v6802_v18 = vadd.f32 %v19300_v62, %v6731_v54  ;;  %v6730_v48 = vadd.f32 %v6491_v43, %v5842_v30  ;;  %15278 = vmatpush3.msra.mxu0 %v12944_v15 }
 0x4d6   : > { %v14980_v33 = vpop.f32.mrf.mxu1  ;;  %v19482_v42 = vld [vmem:[#allocation2 + $0x78] sm:$0xff]  ;;  %15279 = vmatprep.subr.mxu0 %v12943_v37 }
 0x4d7   : > { %6927 = vst.msk [vmem:[#allocation2 + $0x98] sm:$0xff] %vm1696_vm0, %v6863_v45  ;;  %v6866_v24 = vmax.f32 %v6802_v18, 0.0  ;;  %v6801_v22 = vadd.f32 %v19300_v62, %v6730_v48  ;;  %v6733_v19 = vadd.f32 %v14980_v33, %v5857_v1  ;;  %15078 = vmatprep.mubr.msk.f32.mxu0 %vm1696_vm0, %v19482_v42  ;;  %15191 = vmatmul.mubr.msk.f32.gmra.mxu1 %vm1696_vm0, %v19482_v42  ;;  %v21198_v1 = vld [vmem:[#allocation41_spill] sm:$0xff] }
 0x4d8   : > { %v6501_v31 = vpop.f32.mrf.mxu1  ;;  %15079 = vmatmul.mubr.msk.f32.gmra.mxu0 %vm1696_vm0, %v19492_v3  ;;  %15193 = vmatprep.mubr.msk.f32.mxu1 %vm1696_vm0, %v19492_v3  ;;  %v19514_v60 = vld [vmem:[#allocation2 + $0x90] sm:$0xff] }
 0x4d9   : > { %6930 = vst.msk [vmem:[#allocation2 + $0xb0] sm:$0xff] %vm1696_vm0, %v6866_v24  ;;  %v6865_v9 = vmax.f32 %v6801_v22, 0.0  ;;  %v6804_v63 = vadd.f32 %v19300_v62, %v6733_v19  ;;  %v6732_v46 = vadd.f32 %v6501_v31, %v5852_v10  ;;  %15280 = vmatpush3.msra.mxu0 %v12943_v37  ;;  %v19538_v37 = vpop.f32.mrf.mxu0  ;;  %v21199_v45 = vld [vmem:[#allocation37_spill] sm:$0xff]  ;;  %v21201_v31 = vld [vmem:[#allocation42_spill] sm:$0xff] }
 0x4da   : > { %v14983_v44 = vpop.f32.mrf.mxu1  ;;  %v19504_v27 = vld [vmem:[#allocation2 + $0x88] sm:$0xff]  ;;  %v5887_v18 = vadd.f32 %v21199_v45, %v21198_v1  ;;  %v21200_v19 = vld [vmem:[#allocation9_spill] sm:$0xff] }
 0x4db   : > { %6929 = vst.msk [vmem:[#allocation2 + $0xa8] sm:$0xff] %vm1696_vm0, %v6865_v9  ;;  %v6868_v0 = vmax.f32 %v6804_v63, 0.0  ;;  %v6803_v20 = vadd.f32 %v19300_v62, %v6732_v46  ;;  %v6735_v40 = vadd.f32 %v14983_v44, %v5867_v6  ;;  %15081 = vmatprep.mubr.msk.f32.mxu0 %vm1696_vm0, %v19504_v27  ;;  %15194 = vmatmul.mubr.msk.f32.gmra.mxu1 %vm1696_vm0, %v19504_v27  ;;  %v19560_v44 = vpop.f32.mrf.mxu0 }
 0x4dc   : > { %v6511_v8 = vpop.f32.mrf.mxu1  ;;  %15082 = vmatmul.mubr.msk.f32.gmra.mxu0 %vm1696_vm0, %v19514_v60  ;;  %15196 = vmatprep.mubr.msk.f32.mxu1 %vm1696_vm0, %v19514_v60  ;;  %v19536_v54 = vld [vmem:[#allocation2 + $0xa0] sm:$0xff]  ;;  %v5882_v28 = vadd.f32 %v21201_v31, %v21200_v19 }
 0x4dd   : > { %6932 = vst.msk [vmem:[#allocation2 + $0xc0] sm:$0xff] %vm1696_vm0, %v6868_v0  ;;  %v6867_v47 = vmax.f32 %v6803_v20, 0.0  ;;  %v6806_v15 = vadd.f32 %v19300_v62, %v6735_v40  ;;  %v6734_v7 = vadd.f32 %v6511_v8, %v5862_v4  ;;  %v21203_v4 = vld [vmem:[#allocation46_spill] sm:$0xff] }
 0x4de   : > { %v14986_v51 = vpop.f32.mrf.mxu1  ;;  %v19526_v52 = vld [vmem:[#allocation2 + $0x98] sm:$0xff]  ;;  %v5897_v0 = vadd.f32 %v21203_v4, %v21202_v59 }
 0x4df   : > { %6931 = vst.msk [vmem:[#allocation2 + $0xb8] sm:$0xff] %vm1696_vm0, %v6867_v47  ;;  %v6870_v30 = vmax.f32 %v6806_v15, 0.0  ;;  %v6805_v41 = vadd.f32 %v19300_v62, %v6734_v7  ;;  %v6737_v61 = vadd.f32 %v14986_v51, %v5877_v11  ;;  %15084 = vmatprep.mubr.msk.f32.mxu0 %vm1696_vm0, %v19526_v52  ;;  %15197 = vmatmul.mubr.msk.f32.gmra.mxu1 %vm1696_vm0, %v19526_v52  ;;  %v21204_v11 = vld [vmem:[#allocation10_spill] sm:$0xff]  ;;  %v21205_v47 = vld [vmem:[#allocation51_spill] sm:$0xff] }
 0x4e0   : > { %v6521_v43 = vpop.f32.mrf.mxu1  ;;  %15085 = vmatmul.mubr.msk.f32.gmra.mxu0 %vm1696_vm0, %v19536_v54  ;;  %15199 = vmatprep.mubr.msk.f32.mxu1 %vm1696_vm0, %v19536_v54  ;;  %v19558_v46 = vld [vmem:[#allocation2 + $0xb0] sm:$0xff]  ;;  %v5892_v15 = vadd.f32 %v21205_v47, %v21204_v11 }
 0x4e1   : > { %6934 = vst.msk [vmem:[#allocation2 + $0xd0] sm:$0xff] %vm1696_vm0, %v6870_v30  ;;  %v6869_v48 = vmax.f32 %v6805_v41, 0.0  ;;  %v6808_v33 = vadd.f32 %v19300_v62, %v6737_v61  ;;  %v6736_v10 = vadd.f32 %v6521_v43, %v5872_v29  ;;  %v19582_v29 = vpop.f32.mrf.mxu0  ;;  %v21206_v41 = vld [vmem:[#allocation47_spill] sm:$0xff] }
 0x4e2   : > { %v14989_v24 = vpop.f32.mrf.mxu1  ;;  %v19548_v22 = vld [vmem:[#allocation2 + $0xa8] sm:$0xff]  ;;  %v21207_v61 = vld [vmem:[#allocation35_spill] sm:$0xff] }
 0x4e3   : > { %6933 = vst.msk [vmem:[#allocation2 + $0xc8] sm:$0xff] %vm1696_vm0, %v6869_v48  ;;  %v6872_v6 = vmax.f32 %v6808_v33, 0.0  ;;  %v6807_v9 = vadd.f32 %v19300_v62, %v6736_v10  ;;  %v6739_v63 = vadd.f32 %v14989_v24, %v5887_v18  ;;  %15087 = vmatprep.mubr.msk.f32.mxu0 %vm1696_vm0, %v19548_v22  ;;  %15200 = vmatmul.mubr.msk.f32.gmra.mxu1 %vm1696_vm0, %v19548_v22  ;;  %v21208_v10 = vld [vmem:[#allocation11_spill] sm:$0xff] }
 0x4e4   : > { %v6531_v23 = vpop.f32.mrf.mxu1  ;;  %15088 = vmatmul.mubr.msk.f32.gmra.mxu0 %vm1696_vm0, %v19558_v46  ;;  %15202 = vmatprep.mubr.msk.f32.mxu1 %vm1696_vm0, %v19558_v46  ;;  %v19580_v34 = vld [vmem:[#allocation2 + $0xc0] sm:$0xff]  ;;  %v5907_v43 = vadd.f32 %v21207_v61, %v21206_v41  ;;  %v5902_v24 = vadd.f32 %v19304_v13, %v21208_v10  ;;  %v21209_v13 = vld [vmem:[#allocation50_spill] sm:$0xff] }
 0x4e5   : > { %6936 = vst.msk [vmem:[#allocation2 + $0xe0] sm:$0xff] %vm1696_vm0, %v6872_v6  ;;  %v6871_v20 = vmax.f32 %v6807_v9, 0.0  ;;  %v6810_v40 = vadd.f32 %v19300_v62, %v6739_v63  ;;  %v6738_v8 = vadd.f32 %v6531_v23, %v5882_v28  ;;  %v19604_v9 = vpop.f32.mrf.mxu0  ;;  %v5917_v23 = vadd.f32 %v19312_v26, %v21209_v13 }
 0x4e6   : > { %v14992_v12 = vpop.f32.mrf.mxu1  ;;  %v19570_v55 = vld [vmem:[#allocation2 + $0xb8] sm:$0xff] }
 0x4e7   : > { %6935 = vst.msk [vmem:[#allocation2 + $0xd8] sm:$0xff] %vm1696_vm0, %v6871_v20  ;;  %v6874_v7 = vmax.f32 %v6810_v40, 0.0  ;;  %v6809_v51 = vadd.f32 %v19300_v62, %v6738_v8  ;;  %v6741_v2 = vadd.f32 %v14992_v12, %v5897_v0  ;;  %15090 = vmatprep.mubr.msk.f32.mxu0 %vm1696_vm0, %v19570_v55  ;;  %15203 = vmatmul.mubr.msk.f32.gmra.mxu1 %vm1696_vm0, %v19570_v55  ;;  %v21210_v8 = vld [vmem:[#allocation12_spill] sm:$0xff] }
 0x4e8   : > { %v6541_v30 = vpop.f32.mrf.mxu1  ;;  %15091 = vmatmul.mubr.msk.f32.gmra.mxu0 %vm1696_vm0, %v19580_v34  ;;  %15205 = vmatprep.mubr.msk.f32.mxu1 %vm1696_vm0, %v19580_v34  ;;  %v19602_v6 = vld [vmem:[#allocation2 + $0xd0] sm:$0xff]  ;;  %v5912_v12 = vadd.f32 %v19322_v36, %v21210_v8 }
 0x4e9   : > { %6938 = vst.msk [vmem:[#allocation2 + $0xf0] sm:$0xff] %vm1696_vm0, %v6874_v7  ;;  %v6873_v1 = vmax.f32 %v6809_v51, 0.0  ;;  %v6812_v45 = vadd.f32 %v19300_v62, %v6741_v2  ;;  %v6740_v18 = vadd.f32 %v6541_v30, %v5892_v15  ;;  %v19626_v7 = vpop.f32.mrf.mxu0  ;;  %v21211_v36 = vld [vmem:[#allocation53_spill] sm:$0xff] }
 0x4ea   : > { %v14995_v48 = vpop.f32.mrf.mxu1  ;;  %v19592_v33 = vld [vmem:[#allocation2 + $0xc8] sm:$0xff]  ;;  %v5927_v2 = vadd.f32 %v19332_v25, %v21211_v36 }
 0x4eb   : > { %6937 = vst.msk [vmem:[#allocation2 + $0xe8] sm:$0xff] %vm1696_vm0, %v6873_v1  ;;  %v6876_v19 = vmax.f32 %v6812_v45, 0.0  ;;  %v6811_v31 = vadd.f32 %v19300_v62, %v6740_v18  ;;  %v6743_v28 = vadd.f32 %v14995_v48, %v5907_v43  ;;  %15093 = vmatprep.mubr.msk.f32.mxu0 %vm1696_vm0, %v19592_v33  ;;  %15206 = vmatmul.mubr.msk.f32.gmra.mxu1 %vm1696_vm0, %v19592_v33  ;;  %v21212_v45 = vld [vmem:[#allocation15_spill] sm:$0xff] }
 0x4ec   : > { %v6551_v63 = vpop.f32.mrf.mxu1  ;;  %15094 = vmatmul.mubr.msk.f32.gmra.mxu0 %vm1696_vm0, %v19602_v6  ;;  %15208 = vmatprep.mubr.msk.f32.mxu1 %vm1696_vm0, %v19602_v6  ;;  %v19624_v26 = vld [vmem:[#allocation2 + $0xe0] sm:$0xff]  ;;  %v5922_v18 = vadd.f32 %v19347_v58, %v21212_v45 }
 0x4ed   : > { %6940 = vst.msk [vmem:[#allocation2 + $0x100] sm:$0xff] %vm1696_vm0, %v6876_v19  ;;  %v6875_v59 = vmax.f32 %v6811_v31, 0.0  ;;  %v6814_v4 = vadd.f32 %v19300_v62, %v6743_v28  ;;  %v6742_v0 = vadd.f32 %v6551_v63, %v5902_v24  ;;  %v19648_v19 = vpop.f32.mrf.mxu0  ;;  %v21213_v58 = vld [vmem:[#allocation55_spill] sm:$0xff] }
 0x4ee   : > { %v14998_v20 = vpop.f32.mrf.mxu1  ;;  %v19614_v40 = vld [vmem:[#allocation2 + $0xd8] sm:$0xff]  ;;  %v5937_v28 = vadd.f32 %v19365_v50, %v21213_v58 }
 0x4ef   : > { %6939 = vst.msk [vmem:[#allocation2 + $0xf8] sm:$0xff] %vm1696_vm0, %v6875_v59  ;;  %v6878_v11 = vmax.f32 %v6814_v4, 0.0  ;;  %v6813_v47 = vadd.f32 %v19300_v62, %v6742_v0  ;;  %v6745_v15 = vadd.f32 %v14998_v20, %v5917_v23  ;;  %15096 = vmatprep.mubr.msk.f32.mxu0 %vm1696_vm0, %v19614_v40  ;;  %15209 = vmatmul.mubr.msk.f32.gmra.mxu1 %vm1696_vm0, %v19614_v40  ;;  %v21214_v0 = vld [vmem:[#allocation16_spill] sm:$0xff] }
 0x4f0   : > { %v6561_v51 = vpop.f32.mrf.mxu1  ;;  %15097 = vmatmul.mubr.msk.f32.gmra.mxu0 %vm1696_vm0, %v19624_v26  ;;  %15211 = vmatprep.mubr.msk.f32.mxu1 %vm1696_vm0, %v19624_v26  ;;  %v19646_v25 = vld [vmem:[#allocation2 + $0xf0] sm:$0xff]  ;;  %v5932_v20 = vadd.f32 %v19382_v16, %v21214_v0  ;;  %v21218_v0 = vld [vmem:[#allocation20_spill] sm:$0xff] }
 0x4f1   : > { %6942 = vst.msk [vmem:[#allocation2 + $0x110] sm:$0xff] %vm1696_vm0, %v6878_v11  ;;  %v6877_v30 = vmax.f32 %v6813_v47, 0.0  ;;  %v6816_v41 = vadd.f32 %v19300_v62, %v6745_v15  ;;  %v6744_v61 = vadd.f32 %v6561_v51, %v5912_v12  ;;  %v19670_v47 = vpop.f32.mrf.mxu0  ;;  %v21215_v16 = vld [vmem:[#allocation17_spill] sm:$0xff] }
 0x4f2   : > { %v15001_v43 = vpop.f32.mrf.mxu1  ;;  %v19636_v1 = vld [vmem:[#allocation2 + $0xe8] sm:$0xff]  ;;  %v5947_v51 = vadd.f32 %v19399_v35, %v21215_v16 }
 0x4f3   : > { %6941 = vst.msk [vmem:[#allocation2 + $0x108] sm:$0xff] %vm1696_vm0, %v6877_v30  ;;  %v6880_v48 = vmax.f32 %v6816_v41, 0.0  ;;  %v6815_v10 = vadd.f32 %v19300_v62, %v6744_v61  ;;  %v6747_v24 = vadd.f32 %v15001_v43, %v5927_v2  ;;  %15099 = vmatprep.mubr.msk.f32.mxu0 %vm1696_vm0, %v19636_v1  ;;  %15212 = vmatmul.mubr.msk.f32.gmra.mxu1 %vm1696_vm0, %v19636_v1  ;;  %v21216_v43 = vld [vmem:[#allocation18_spill] sm:$0xff] }
 0x4f4   : > { %v6571_v31 = vpop.f32.mrf.mxu1  ;;  %15100 = vmatmul.mubr.msk.f32.gmra.mxu0 %vm1696_vm0, %v19646_v25  ;;  %15214 = vmatprep.mubr.msk.f32.mxu1 %vm1696_vm0, %v19646_v25  ;;  %v19668_v50 = vld [vmem:[#allocation2 + $0x100] sm:$0xff]  ;;  %v5942_v45 = vadd.f32 %v19422_v53, %v21216_v43 }
 0x4f5   : > { %6944 = vst.msk [vmem:[#allocation2 + $0x120] sm:$0xff] %vm1696_vm0, %v6880_v48  ;;  %v6879_v63 = vmax.f32 %v6815_v10, 0.0  ;;  %v6818_v13 = vadd.f32 %v19300_v62, %v6747_v24  ;;  %v6746_v23 = vadd.f32 %v6571_v31, %v5922_v18  ;;  %v19692_v24 = vpop.f32.mrf.mxu0  ;;  %v21217_v53 = vld [vmem:[#allocation19_spill] sm:$0xff] }
 0x4f6   : > { %v15004_v59 = vpop.f32.mrf.mxu1  ;;  %v19658_v4 = vld [vmem:[#allocation2 + $0xf8] sm:$0xff]  ;;  %v5957_v58 = vadd.f32 %v19447_v57, %v21217_v53 }
 0x4f7   : > { %6943 = vst.msk [vmem:[#allocation2 + $0x118] sm:$0xff] %vm1696_vm0, %v6879_v63  ;;  %v6882_v8 = vmax.f32 %v6818_v13, 0.0  ;;  %v6817_v12 = vadd.f32 %v19300_v62, %v6746_v23  ;;  %v6749_v11 = vadd.f32 %v15004_v59, %v5937_v28  ;;  %15102 = vmatprep.mubr.msk.f32.mxu0 %vm1696_vm0, %v19658_v4  ;;  %15215 = vmatmul.mubr.msk.f32.gmra.mxu1 %vm1696_vm0, %v19658_v4 }
 0x4f8   : > { %v6581_v15 = vpop.f32.mrf.mxu1  ;;  %15103 = vmatmul.mubr.msk.f32.gmra.mxu0 %vm1696_vm0, %v19668_v50  ;;  %15217 = vmatprep.mubr.msk.f32.mxu1 %vm1696_vm0, %v19668_v50  ;;  %v19690_v35 = vld [vmem:[#allocation2 + $0x110] sm:$0xff] }
 0x4f9   : > { %6946 = vst.msk [vmem:[#allocation2 + $0x130] sm:$0xff] %vm1696_vm0, %v6882_v8  ;;  %v6881_v36 = vmax.f32 %v6817_v12, 0.0  ;;  %v6820_v2 = vadd.f32 %v19300_v62, %v6749_v11  ;;  %v6748_v30 = vadd.f32 %v6581_v15, %v5932_v20  ;;  %v5952_v20 = vadd.f32 %v19472_v5, %v21218_v0  ;;  %v19714_v15 = vpop.f32.mrf.mxu0  ;;  %v21219_v5 = vld [vmem:[#allocation21_spill] sm:$0xff] }
 0x4fa   : > { %v15007_v41 = vpop.f32.mrf.mxu1  ;;  %v19680_v61 = vld [vmem:[#allocation2 + $0x108] sm:$0xff] }
 0x4fb   : > { %6945 = vst.msk [vmem:[#allocation2 + $0x128] sm:$0xff] %vm1696_vm0, %v6881_v36  ;;  %v6884_v18 = vmax.f32 %v6820_v2, 0.0  ;;  %v6819_v48 = vadd.f32 %v19300_v62, %v6748_v30  ;;  %v6751_v10 = vadd.f32 %v15007_v41, %v5947_v51  ;;  %15105 = vmatprep.mubr.msk.f32.mxu0 %vm1696_vm0, %v19680_v61  ;;  %15218 = vmatmul.mubr.msk.f32.gmra.mxu1 %vm1696_vm0, %v19680_v61  ;;  %v19736_v53 = vpop.f32.mrf.mxu0 }
 0x4fc   : > { %v6591_v31 = vpop.f32.mrf.mxu1  ;;  %15106 = vmatmul.mubr.msk.f32.gmra.mxu0 %vm1696_vm0, %v19690_v35  ;;  %15220 = vmatprep.mubr.msk.f32.mxu1 %vm1696_vm0, %v19690_v35  ;;  %v19712_v57 = vld [vmem:[#allocation2 + $0x120] sm:$0xff]  ;;  %v5967_v51 = vadd.f32 %v19494_v14, %v21219_v5 }
 0x4fd   : > { %6948 = vst.msk [vmem:[#allocation2 + $0x140] sm:$0xff] %vm1696_vm0, %v6884_v18  ;;  %v6883_v28 = vmax.f32 %v6819_v48, 0.0  ;;  %v6822_v63 = vadd.f32 %v19300_v62, %v6751_v10  ;;  %v6750_v13 = vadd.f32 %v6591_v31, %v5942_v45  ;;  %v21220_v45 = vld [vmem:[#allocation22_spill] sm:$0xff] }
 0x4fe   : > { %v15010_v23 = vpop.f32.mrf.mxu1  ;;  %v19702_v59 = vld [vmem:[#allocation2 + $0x118] sm:$0xff]  ;;  %v5962_v18 = vadd.f32 %v19516_v21, %v21220_v45  ;;  %v21221_v21 = vld [vmem:[#allocation23_spill] sm:$0xff] }
 0x4ff   : > { %6947 = vst.msk [vmem:[#allocation2 + $0x138] sm:$0xff] %vm1696_vm0, %v6883_v28  ;;  %v6886_v8 = vmax.f32 %v6822_v63, 0.0  ;;  %v6821_v12 = vadd.f32 %v19300_v62, %v6750_v13  ;;  %v6753_v11 = vadd.f32 %v15010_v23, %v5957_v58  ;;  %15108 = vmatprep.mubr.msk.f32.mxu0 %vm1696_vm0, %v19702_v59  ;;  %15221 = vmatmul.mubr.msk.f32.gmra.mxu1 %vm1696_vm0, %v19702_v59 }
 0x500   : > { %v6601_v16 = vpop.f32.mrf.mxu1  ;;  %15109 = vmatmul.mubr.msk.f32.gmra.mxu0 %vm1696_vm0, %v19712_v57  ;;  %15223 = vmatprep.mubr.msk.f32.mxu1 %vm1696_vm0, %v19712_v57  ;;  %v19734_v14 = vld [vmem:[#allocation2 + $0x130] sm:$0xff]  ;;  %v5977_v28 = vadd.f32 %v19538_v37, %v21221_v21 }
 0x501   : > { %6950 = vst.msk [vmem:[#allocation2 + $0x150] sm:$0xff] %vm1696_vm0, %v6886_v8  ;;  %v6885_v36 = vmax.f32 %v6821_v12, 0.0  ;;  %v6824_v2 = vadd.f32 %v19300_v62, %v6753_v11  ;;  %v6752_v30 = vadd.f32 %v6601_v16, %v5952_v20  ;;  %v21222_v8 = vld [vmem:[#allocation25_spill] sm:$0xff] }
 0x502   : > { %v15013_v41 = vpop.f32.mrf.mxu1  ;;  %v19724_v43 = vld [vmem:[#allocation2 + $0x128] sm:$0xff]  ;;  %v5972_v12 = vadd.f32 %v19560_v44, %v21222_v8  ;;  %v21223_v44 = vld [vmem:[#allocation26_spill] sm:$0xff] }
 0x503   : > { %6949 = vst.msk [vmem:[#allocation2 + $0x148] sm:$0xff] %vm1696_vm0, %v6885_v36  ;;  %v6888_v48 = vmax.f32 %v6824_v2, 0.0  ;;  %v6823_v10 = vadd.f32 %v19300_v62, %v6752_v30  ;;  %v6755_v31 = vadd.f32 %v15013_v41, %v5967_v51  ;;  %15111 = vmatprep.mubr.msk.f32.mxu0 %vm1696_vm0, %v19724_v43  ;;  %15224 = vmatmul.mubr.msk.f32.gmra.mxu1 %vm1696_vm0, %v19724_v43  ;;  %v19758_v51 = vpop.f32.mrf.mxu0 }
 0x504   : > { %v6611_v58 = vpop.f32.mrf.mxu1  ;;  %15112 = vmatmul.mubr.msk.f32.gmra.mxu0 %vm1696_vm0, %v19734_v14  ;;  %15226 = vmatprep.mubr.msk.f32.mxu1 %vm1696_vm0, %v19734_v14  ;;  %v19756_v37 = vld [vmem:[#allocation2 + $0x140] sm:$0xff]  ;;  %v5987_v2 = vadd.f32 %v19582_v29, %v21223_v44 }
 0x505   : > { %6952 = vst.msk [vmem:[#allocation2 + $0x160] sm:$0xff] %vm1696_vm0, %v6888_v48  ;;  %v6887_v63 = vmax.f32 %v6823_v10, 0.0  ;;  %v6826_v13 = vadd.f32 %v19300_v62, %v6755_v31  ;;  %v6754_v23 = vadd.f32 %v6611_v58, %v5962_v18  ;;  %v21224_v10 = vld [vmem:[#allocation28_spill] sm:$0xff] }
 0x506   : > { %v15016_v0 = vpop.f32.mrf.mxu1  ;;  %v19746_v20 = vld [vmem:[#allocation2 + $0x138] sm:$0xff]  ;;  %v5982_v31 = vadd.f32 %v19604_v9, %v21224_v10  ;;  %v21225_v9 = vld [vmem:[#allocation29_spill] sm:$0xff] }
 0x507   : > { %6951 = vst.msk [vmem:[#allocation2 + $0x158] sm:$0xff] %vm1696_vm0, %v6887_v63  ;;  %v6890_v11 = vmax.f32 %v6826_v13, 0.0  ;;  %v6825_v16 = vadd.f32 %v19300_v62, %v6754_v23  ;;  %v6757_v5 = vadd.f32 %v15016_v0, %v5977_v28  ;;  %15114 = vmatprep.mubr.msk.f32.mxu0 %vm1696_vm0, %v19746_v20  ;;  %15227 = vmatmul.mubr.msk.f32.gmra.mxu1 %vm1696_vm0, %v19746_v20  ;;  %v19780_v63 = vpop.f32.mrf.mxu0 }
 0x508   : > { %v6621_v36 = vpop.f32.mrf.mxu1  ;;  %15115 = vmatmul.mubr.msk.f32.gmra.mxu0 %vm1696_vm0, %v19756_v37  ;;  %15229 = vmatprep.mubr.msk.f32.mxu1 %vm1696_vm0, %v19756_v37  ;;  %v19778_v29 = vld [vmem:[#allocation2 + $0x150] sm:$0xff]  ;;  %v5997_v23 = vadd.f32 %v19626_v7, %v21225_v9 }
 0x509   : > { %6954 = vst.msk [vmem:[#allocation2 + $0x170] sm:$0xff] %vm1696_vm0, %v6890_v11  ;;  %v6889_v30 = vmax.f32 %v6825_v16, 0.0  ;;  %v6828_v41 = vadd.f32 %v19300_v62, %v6757_v5  ;;  %v6756_v45 = vadd.f32 %v6621_v36, %v5972_v12  ;;  %v21226_v5 = vld [vmem:[#allocation31_spill] sm:$0xff] }
 0x50a   : > { %v15019_v18 = vpop.f32.mrf.mxu1  ;;  %v19768_v48 = vld [vmem:[#allocation2 + $0x148] sm:$0xff]  ;;  %v5992_v36 = vadd.f32 %v19648_v19, %v21226_v5 }
 0x50b   : > { %6953 = vst.msk [vmem:[#allocation2 + $0x168] sm:$0xff] %vm1696_vm0, %v6889_v30  ;;  %v6892_v58 = vmax.f32 %v6828_v41, 0.0  ;;  %v6827_v21 = vadd.f32 %v19300_v62, %v6756_v45  ;;  %v6759_v28 = vadd.f32 %v15019_v18, %v5987_v2  ;;  %15117 = vmatprep.mubr.msk.f32.mxu0 %vm1696_vm0, %v19768_v48  ;;  %15230 = vmatmul.mubr.msk.f32.gmra.mxu1 %vm1696_vm0, %v19768_v48  ;;  %v14922_v41 = vpop.f32.mrf.mxu0  ;;  %v21227_v19 = vld [vmem:[#allocation32_spill] sm:$0xff] }
 0x50c   : > { %v6631_v13 = vpop.f32.mrf.mxu1  ;;  %15118 = vmatmul.mubr.msk.f32.gmra.mxu0 %vm1696_vm0, %v19778_v29  ;;  %15232 = vmatprep.mubr.msk.f32.mxu1 %vm1696_vm0, %v19778_v29  ;;  %v19800_v7 = vld [vmem:[#allocation2 + $0x160] sm:$0xff]  ;;  %v6007_v18 = vadd.f32 %v19670_v47, %v21227_v19 }
 0x50d   : > { %6956 = vst.msk [vmem:[#allocation2 + $0x180] sm:$0xff] %vm1696_vm0, %v6892_v58  ;;  %v6891_v0 = vmax.f32 %v6827_v21, 0.0  ;;  %v6830_v8 = vadd.f32 %v19300_v62, %v6759_v28  ;;  %v6758_v12 = vadd.f32 %v6631_v13, %v5982_v31  ;;  %v21228_v13 = vld [vmem:[#allocation34_spill] sm:$0xff]  ;;  %v21230_v19 = vld [vmem:[#allocation39_spill] sm:$0xff] }
 0x50e   : > { %v15022_v11 = vpop.f32.mrf.mxu1  ;;  %v19790_v16 = vld [vmem:[#allocation2 + $0x158] sm:$0xff]  ;;  %v6002_v9 = vadd.f32 %v19692_v24, %v21228_v13  ;;  %v21229_v24 = vld [vmem:[#allocation36_spill] sm:$0xff] }
 0x50f   : > { %6955 = vst.msk [vmem:[#allocation2 + $0x178] sm:$0xff] %vm1696_vm0, %v6891_v0  ;;  %v6894_v44 = vmax.f32 %v6830_v8, 0.0  ;;  %v6829_v2 = vadd.f32 %v19300_v62, %v6758_v12  ;;  %v6761_v30 = vadd.f32 %v15022_v11, %v5997_v23  ;;  %15120 = vmatprep.mubr.msk.f32.mxu0 %vm1696_vm0, %v19790_v16  ;;  %15233 = vmatmul.mubr.msk.f32.gmra.mxu1 %vm1696_vm0, %v19790_v16  ;;  %v6031_v12 = vpop.f32.mrf.mxu0 }
 0x510   : > { %v6641_v45 = vpop.f32.mrf.mxu1  ;;  %15121 = vmatmul.mubr.msk.f32.gmra.mxu0 %vm1696_vm0, %v19800_v7  ;;  %15235 = vmatprep.mubr.msk.f32.mxu1 %vm1696_vm0, %v19800_v7  ;;  %v19820_v47 = vld [vmem:[#allocation2 + $0x170] sm:$0xff]  ;;  %v6017_v5 = vadd.f32 %v19714_v15, %v21229_v24 }
 0x511   : > { %6958 = vst.msk [vmem:[#allocation2 + $0x190] sm:$0xff] %vm1696_vm0, %v6894_v44  ;;  %v6893_v10 = vmax.f32 %v6829_v2, 0.0  ;;  %v6832_v31 = vadd.f32 %v19300_v62, %v6761_v30  ;;  %v6760_v58 = vadd.f32 %v6641_v45, %v5992_v36 }
 0x512   : > { %v15025_v21 = vpop.f32.mrf.mxu1  ;;  %v19810_v28 = vld [vmem:[#allocation2 + $0x168] sm:$0xff] }
 0x513   : > { %6957 = vst.msk [vmem:[#allocation2 + $0x188] sm:$0xff] %vm1696_vm0, %v6893_v10  ;;  %v6896_v23 = vmax.f32 %v6832_v31, 0.0  ;;  %v6831_v0 = vadd.f32 %v19300_v62, %v6760_v58  ;;  %v6763_v8 = vadd.f32 %v15025_v21, %v6007_v18  ;;  %15123 = vmatprep.mubr.msk.f32.mxu0 %vm1696_vm0, %v19810_v28  ;;  %15236 = vmatmul.mubr.msk.f32.gmra.mxu1 %vm1696_vm0, %v19810_v28  ;;  %v14925_v21 = vpop.f32.mrf.mxu0 }
 0x514   : > { %v6651_v11 = vpop.f32.mrf.mxu1  ;;  %15124 = vmatmul.mubr.msk.f32.gmra.mxu0 %vm1696_vm0, %v19820_v47  ;;  %15238 = vmatprep.mubr.msk.f32.mxu1 %vm1696_vm0, %v19820_v47  ;;  %v6012_v18 = vadd.f32 %v19736_v53, %v21230_v19  ;;  %v19840_v15 = vld [vmem:[#allocation2 + $0x180] sm:$0xff]  ;;  %v21231_v53 = vld [vmem:[#allocation40_spill] sm:$0xff] }
 0x515   : > { %6960 = vst.msk [vmem:[#allocation2 + $0x1a0] sm:$0xff] %vm1696_vm0, %v6896_v23  ;;  %v6895_v36 = vmax.f32 %v6831_v0, 0.0  ;;  %v6834_v44 = vadd.f32 %v19300_v62, %v6763_v8  ;;  %v6762_v2 = vadd.f32 %v6651_v11, %v6002_v9  ;;  %v19852_v23 = vld [vmem:[%s21190_s19] ss:$0 sm:$0xff]  ;;  %v6041_v19 = vpop.f32.mrf.mxu0 }
 0x516   : > { %v15028_v30 = vpop.f32.mrf.mxu1  ;;  %v19830_v45 = vld [vmem:[#allocation2 + $0x178] sm:$0xff] }
 0x517   : > { %6959 = vst.msk [vmem:[#allocation2 + $0x198] sm:$0xff] %vm1696_vm0, %v6895_v36  ;;  %v6898_v10 = vmax.f32 %v6834_v44, 0.0  ;;  %v6833_v31 = vadd.f32 %v19300_v62, %v6762_v2  ;;  %v6765_v58 = vadd.f32 %v15028_v30, %v6017_v5  ;;  %15126 = vmatprep.mubr.msk.f32.mxu0 %vm1696_vm0, %v19830_v45  ;;  %15239 = vmatmul.mubr.msk.f32.gmra.mxu1 %vm1696_vm0, %v19830_v45  ;;  %v21232_v5 = vld [vmem:[#allocation43_spill] sm:$0xff] }
 0x518   : > { %v6661_v13 = vpop.f32.mrf.mxu1  ;;  %15127 = vmatmul.mubr.msk.f32.gmra.mxu0 %vm1696_vm0, %v19840_v15  ;;  %15241 = vmatprep.mubr.msk.f32.mxu1 %vm1696_vm0, %v19840_v15  ;;  %v6027_v62 = vadd.f32 %v19758_v51, %v21231_v53  ;;  %v6022_v36 = vadd.f32 %v19780_v63, %v21232_v5  ;;  %v19865_v30 = vld [vmem:[#allocation2 + $0x190] sm:$0xff] }
 0x519   : > { %6962 = vst.msk [vmem:[#allocation2 + $0x1b0] sm:$0xff] %vm1696_vm0, %v6898_v10  ;;  %v6897_v9 = vmax.f32 %v6833_v31, 0.0  ;;  %v6836_v0 = vadd.f32 %v19852_v23, %v6765_v58  ;;  %v6764_v8 = vadd.f32 %v6661_v13, %v6012_v18  ;;  %v21233_v63 = vld [vmem:[#allocation45_spill] sm:$0xff] }
 0x51a   : > { %v15031_v11 = vpop.f32.mrf.mxu1  ;;  %v19855_v24 = vld [vmem:[#allocation2 + $0x188] sm:$0xff]  ;;  %v6037_v10 = vadd.f32 %v14922_v41, %v21233_v63 }
 0x51b   : > { %6961 = vst.msk [vmem:[#allocation2 + $0x1a8] sm:$0xff] %vm1696_vm0, %v6897_v9  ;;  %v6900_v51 = vmax.f32 %v6836_v0, 0.0  ;;  %v6835_v44 = vadd.f32 %v19852_v23, %v6764_v8  ;;  %v6767_v2 = vadd.f32 %v15031_v11, %v6027_v62  ;;  %15129 = vmatprep.mubr.msk.f32.mxu0 %vm1696_vm0, %v19855_v24  ;;  %15242 = vmatmul.mubr.msk.f32.gmra.mxu1 %vm1696_vm0, %v19855_v24  ;;  %v21235_v9 = vld [vmem:[#allocation48_spill] sm:$0xff] }
 0x51c   : > { %v6671_v18 = vpop.f32.mrf.mxu1  ;;  %15130 = vmatmul.mubr.msk.f32.gmra.mxu0 %vm1696_vm0, %v19865_v30  ;;  %15244 = vmatprep.mubr.msk.f32.mxu1 %vm1696_vm0, %v19865_v30  ;;  %v6032_v0 = vadd.f32 %v6031_v12, %v21235_v9  ;;  %v19883_v41 = vld [vmem:[#allocation2 + $0x1a0] sm:$0xff]  ;;  %v21236_v12 = vld [vmem:[#allocation49_spill] sm:$0xff] }
 0x51d   : > { %6964 = vst.msk [vmem:[#allocation2 + $0x1c0] sm:$0xff] %vm1696_vm0, %v6900_v51  ;;  %v6899_v31 = vmax.f32 %v6835_v44, 0.0  ;;  %v6838_v58 = vadd.f32 %v19852_v23, %v6767_v2  ;;  %v6766_v13 = vadd.f32 %v6671_v18, %v6022_v36  ;;  %v14928_v36 = vpop.f32.mrf.mxu0  ;;  %v6047_v44 = vadd.f32 %v14925_v21, %v21236_v12 }
 0x51e   : > { %v15034_v53 = vpop.f32.mrf.mxu1  ;;  %v19874_v62 = vld [vmem:[#allocation2 + $0x198] sm:$0xff] }
 0x51f   : > { %21234 = vst [vmem:[#allocation24_spill] sm:$0xff] %v19874_v62  ;;  %6963 = vst.msk [vmem:[#allocation2 + $0x1b8] sm:$0xff] %vm1696_vm0, %v6899_v31  ;;  %v6902_v8 = vmax.f32 %v6838_v58, 0.0  ;;  %v6837_v11 = vadd.f32 %v19852_v23, %v6766_v13  ;;  %v6769_v5 = vadd.f32 %v15034_v53, %v6037_v10  ;;  %15132 = vmatprep.mubr.msk.f32.mxu0 %vm1696_vm0, %v19874_v62  ;;  %15245 = vmatmul.mubr.msk.f32.gmra.mxu1 %vm1696_vm0, %v19874_v62  ;;  %v21238_v58 = vld [vmem:[#allocation52_spill] sm:$0xff] }
 0x520   : > { %v6681_v51 = vpop.f32.mrf.mxu1  ;;  %15133 = vmatmul.mubr.msk.f32.gmra.mxu0 %vm1696_vm0, %v19883_v41  ;;  %15247 = vmatprep.mubr.msk.f32.mxu1 %vm1696_vm0, %v19883_v41  ;;  %v6042_v13 = vadd.f32 %v6041_v19, %v21238_v58  ;;  %v19901_v21 = vld [vmem:[#allocation2 + $0x1b0] sm:$0xff]  ;;  %v21239_v19 = vld [vmem:[#allocation54_spill] sm:$0xff] }
 0x521   : > { %6966 = vst.msk [vmem:[#allocation2 + $0x1d0] sm:$0xff] %vm1696_vm0, %v6902_v8  ;;  %v6901_v2 = vmax.f32 %v6837_v11, 0.0  ;;  %v6840_v18 = vadd.f32 %v19852_v23, %v6769_v5  ;;  %v6768_v63 = vadd.f32 %v6681_v51, %v6032_v0  ;;  %v6051_v0 = vpop.f32.mrf.mxu0  ;;  %v6057_v11 = vadd.f32 %v14928_v36, %v21239_v19 }
 0x522   : > { %v15037_v10 = vpop.f32.mrf.mxu1  ;;  %v19892_v31 = vld [vmem:[#allocation2 + $0x1a8] sm:$0xff] }
 0x523   : > { %21237 = vst [vmem:[#allocation13_spill] sm:$0xff] %v19892_v31  ;;  %6965 = vst.msk [vmem:[#allocation2 + $0x1c8] sm:$0xff] %vm1696_vm0, %v6901_v2  ;;  %v6904_v53 = vmax.f32 %v6840_v18, 0.0  ;;  %v6839_v9 = vadd.f32 %v19852_v23, %v6768_v63  ;;  %v6771_v62 = vadd.f32 %v15037_v10, %v6047_v44  ;;  %15135 = vmatprep.mubr.msk.f32.mxu0 %vm1696_vm0, %v19892_v31  ;;  %15248 = vmatmul.mubr.msk.f32.gmra.mxu1 %vm1696_vm0, %v19892_v31  ;;  %v21240_v18 = vld [vmem:[#allocation56_spill] sm:$0xff] }
 0x524   : > { %v6691_v8 = vpop.f32.mrf.mxu1  ;;  %15136 = vmatmul.mubr.msk.f32.gmra.mxu0 %vm1696_vm0, %v19901_v21  ;;  %15250 = vmatprep.mubr.msk.f32.mxu1 %vm1696_vm0, %v19901_v21  ;;  %v6052_v63 = vadd.f32 %v6051_v0, %v21240_v18  ;;  %v19919_v36 = vld [vmem:[#allocation2 + $0x1c0] sm:$0xff] }
 0x525   : > { %6968 = vst.msk [vmem:[#allocation2 + $0x1e0] sm:$0xff] %vm1696_vm0, %v6904_v53  ;;  %v6903_v5 = vmax.f32 %v6839_v9, 0.0  ;;  %v6842_v51 = vadd.f32 %v19852_v23, %v6771_v62  ;;  %v6770_v12 = vadd.f32 %v6691_v8, %v6042_v13 }
 0x526   : > { %v15040_v44 = vpop.f32.mrf.mxu1  ;;  %v19910_v2 = vld [vmem:[#allocation2 + $0x1b8] sm:$0xff] }
 0x527   : > { %6967 = vst.msk [vmem:[#allocation2 + $0x1d8] sm:$0xff] %vm1696_vm0, %v6903_v5  ;;  %v6906_v10 = vmax.f32 %v6842_v51, 0.0  ;;  %v6841_v58 = vadd.f32 %v19852_v23, %v6770_v12  ;;  %v6773_v31 = vadd.f32 %v15040_v44, %v6057_v11  ;;  %15138 = vmatprep.mubr.msk.f32.mxu0 %vm1696_vm0, %v19910_v2  ;;  %15251 = vmatmul.mubr.msk.f32.gmra.mxu1 %vm1696_vm0, %v19910_v2 }
 0x528   : > { %v6701_v62 = vpop.f32.mrf.mxu1  ;;  %15139 = vmatmul.mubr.msk.f32.gmra.mxu0 %vm1696_vm0, %v19919_v36  ;;  %15253 = vmatprep.mubr.msk.f32.mxu1 %vm1696_vm0, %v19919_v36  ;;  %v19935_v11 = vld [vmem:[#allocation2 + $0x1d0] sm:$0xff] }
 0x529   : > { %6970 = vst.msk [vmem:[#allocation2 + $0x1f0] sm:$0xff] %vm1696_vm0, %v6906_v10  ;;  %v6905_v13 = vmax.f32 %v6841_v58, 0.0  ;;  %v6844_v53 = vadd.f32 %v19852_v23, %v6773_v31  ;;  %v6772_v9 = vadd.f32 %v6701_v62, %v6052_v63  ;;  %v15458_v63 = vld [vmem:[#allocation2 + $0x10] sm:$0xff]  ;;  %v15459_v10 = vld [vmem:[#allocation2 + $0x18] sm:$0xff]  ;;  %v15460_v58 = vld [vmem:[#allocation2 + $0x20] sm:$0xff] }
 0x52a   : > { %v19927_v0 = vld [vmem:[#allocation2 + $0x1c8] sm:$0xff] }
 0x52b   : > { %6969 = vst.msk [vmem:[#allocation2 + $0x1e8] sm:$0xff] %vm1696_vm0, %v6905_v13  ;;  %v6908_v8 = vmax.f32 %v6844_v53, 0.0  ;;  %v6843_v19 = vadd.f32 %v19852_v23, %v6772_v9  ;;  %15141 = vmatprep.mubr.msk.f32.mxu0 %vm1696_vm0, %v19927_v0  ;;  %15254 = vmatmul.mubr.msk.f32.gmra.mxu1 %vm1696_vm0, %v19927_v0  ;;  %v15461_v62 = vld [vmem:[#allocation2 + $0x28] sm:$0xff]  ;;  %v15462_v13 = vld [vmem:[#allocation2 + $0x30] sm:$0xff]  ;;  %v15463_v53 = vld [vmem:[#allocation2 + $0x38] sm:$0xff] }
 0x52c   : > { %15142 = vmatmul.mubr.msk.f32.gmra.mxu0 %vm1696_vm0, %v19935_v11  ;;  %15256 = vmatprep.mubr.msk.f32.mxu1 %vm1696_vm0, %v19935_v11  ;;  %v19949_v23 = vld [vmem:[#allocation2 + $0x1e0] sm:$0xff] }
 0x52d   : > { %6972 = vst.msk [vmem:[#allocation2 + $0x200] sm:$0xff] %vm1696_vm0, %v6908_v8  ;;  %v6907_v31 = vmax.f32 %v6843_v19, 0.0  ;;  %v15464_v9 = vld [vmem:[#allocation2 + $0x40] sm:$0xff] }
 0x52e   : > { %v19942_v5 = vld [vmem:[#allocation2 + $0x1d8] sm:$0xff] }
 0x52f   : > { %6971 = vst.msk [vmem:[#allocation2 + $0x1f8] sm:$0xff] %vm1696_vm0, %v6907_v31  ;;  %15144 = vmatprep.mubr.msk.f32.mxu0 %vm1696_vm0, %v19942_v5  ;;  %15257 = vmatmul.mubr.msk.f32.gmra.mxu1 %vm1696_vm0, %v19942_v5 }
 0x530   : > { %15145 = vmatmul.mubr.msk.f32.gmra.mxu0 %vm1696_vm0, %v19949_v23  ;;  %15259 = vmatprep.mubr.msk.f32.mxu1 %vm1696_vm0, %v19949_v23  ;;  %v19961_v12 = vld [vmem:[#allocation2 + $0x1f0] sm:$0xff] }
 0x532   : > { %v19955_v51 = vld [vmem:[#allocation2 + $0x1e8] sm:$0xff] }
 0x533   : > { %15147 = vmatprep.mubr.msk.f32.mxu0 %vm1696_vm0, %v19955_v51  ;;  %15260 = vmatmul.mubr.msk.f32.gmra.mxu1 %vm1696_vm0, %v19955_v51 }
 0x534   : > { %15148 = vmatmul.mubr.msk.f32.gmra.mxu0 %vm1696_vm0, %v19961_v12  ;;  %15262 = vmatprep.mubr.msk.f32.mxu1 %vm1696_vm0, %v19961_v12  ;;  %v19973_v18 = vld [vmem:[#allocation2 + $0x200] sm:$0xff] }
 0x536   : > { %v19967_v44 = vld [vmem:[#allocation2 + $0x1f8] sm:$0xff] }
 0x537   : > { %15150 = vmatprep.mubr.msk.f32.mxu0 %vm1696_vm0, %v19967_v44  ;;  %15263 = vmatmul.mubr.msk.f32.gmra.mxu1 %vm1696_vm0, %v19967_v44 }
 0x538   : > { %15151 = vmatmul.mubr.msk.f32.gmra.mxu0 %vm1696_vm0, %v19973_v18 }
 0x539   : > { %15281 = vmatprep.mubr.msk.f32.mxu0 %vm1696_vm0, %v15458_v63 }
 0x53c   : > { %15282 = vmatmul.mubr.msk.f32.vlgmr.msra.gmra.mxu0 %vm1696_vm0, %v15459_v10 }
 0x53d   : > { %15284 = vmatprep.mubr.msk.f32.mxu0 %vm1696_vm0, %v15460_v58 }
 0x540   : > { %15285 = vmatmul.mubr.msk.f32.gmra.mxu0 %vm1696_vm0, %v15461_v62 }
 0x541   : > { %15287 = vmatprep.mubr.msk.f32.mxu0 %vm1696_vm0, %v15462_v13 }
 0x544   : > { %15288 = vmatmul.mubr.msk.f32.gmra.mxu0 %vm1696_vm0, %v15463_v53 }
 0x545   : > { %15290 = vmatprep.mubr.msk.f32.mxu0 %vm1696_vm0, %v15464_v9 }
 0x548   : > { %15291 = vmatmul.mubr.msk.f32.gmra.mxu0 %vm1696_vm0, %v19407_v39 }
 0x549   : > { %15293 = vmatprep.mubr.msk.f32.mxu0 %vm1696_vm0, %v19417_v32 }
 0x54c   : > { %15294 = vmatmul.mubr.msk.f32.gmra.mxu0 %vm1696_vm0, %v19432_v56 }
 0x54d   : > { %15296 = vmatprep.mubr.msk.f32.mxu0 %vm1696_vm0, %v19442_v17 }
 0x550   : > { %15297 = vmatmul.mubr.msk.f32.gmra.mxu0 %vm1696_vm0, %v19457_v38 }
 0x551   : > { %15299 = vmatprep.mubr.msk.f32.mxu0 %vm1696_vm0, %v19467_v49 }
 0x554   : > { %15300 = vmatmul.mubr.msk.f32.gmra.mxu0 %vm1696_vm0, %v19482_v42 }
 0x555   : > { %15302 = vmatprep.mubr.msk.f32.mxu0 %vm1696_vm0, %v19492_v3 }
 0x558   : > { %15303 = vmatmul.mubr.msk.f32.gmra.mxu0 %vm1696_vm0, %v19504_v27 }
 0x559   : > { %15305 = vmatprep.mubr.msk.f32.mxu0 %vm1696_vm0, %v19514_v60 }
 0x55c   : > { %15306 = vmatmul.mubr.msk.f32.gmra.mxu0 %vm1696_vm0, %v19526_v52 }
 0x55d   : > { %15308 = vmatprep.mubr.msk.f32.mxu0 %vm1696_vm0, %v19536_v54 }
 0x560   : > { %15309 = vmatmul.mubr.msk.f32.gmra.mxu0 %vm1696_vm0, %v19548_v22 }
 0x561   : > { %15311 = vmatprep.mubr.msk.f32.mxu0 %vm1696_vm0, %v19558_v46 }
 0x564   : > { %15312 = vmatmul.mubr.msk.f32.gmra.mxu0 %vm1696_vm0, %v19570_v55 }
 0x565   : > { %15314 = vmatprep.mubr.msk.f32.mxu0 %vm1696_vm0, %v19580_v34 }
 0x568   : > { %15315 = vmatmul.mubr.msk.f32.gmra.mxu0 %vm1696_vm0, %v19592_v33 }
 0x569   : > { %15317 = vmatprep.mubr.msk.f32.mxu0 %vm1696_vm0, %v19602_v6 }
 0x56c   : > { %15318 = vmatmul.mubr.msk.f32.gmra.mxu0 %vm1696_vm0, %v19614_v40 }
 0x56d   : > { %15320 = vmatprep.mubr.msk.f32.mxu0 %vm1696_vm0, %v19624_v26 }
 0x570   : > { %15321 = vmatmul.mubr.msk.f32.gmra.mxu0 %vm1696_vm0, %v19636_v1 }
 0x571   : > { %15323 = vmatprep.mubr.msk.f32.mxu0 %vm1696_vm0, %v19646_v25 }
 0x574   : > { %15324 = vmatmul.mubr.msk.f32.gmra.mxu0 %vm1696_vm0, %v19658_v4 }
 0x575   : > { %15326 = vmatprep.mubr.msk.f32.mxu0 %vm1696_vm0, %v19668_v50 }
 0x578   : > { %15327 = vmatmul.mubr.msk.f32.gmra.mxu0 %vm1696_vm0, %v19680_v61 }
 0x579   : > { %15329 = vmatprep.mubr.msk.f32.mxu0 %vm1696_vm0, %v19690_v35 }
 0x57b   : > { %v20036_v39 = vpop.f32.mrf.mxu1 }
 0x57c   : > { %v20038_v32 = vpop.f32.mrf.mxu0  ;;  %15330 = vmatmul.mubr.msk.f32.gmra.mxu0 %vm1696_vm0, %v19702_v59  ;;  %v21241_v59 = vld [vmem:[#allocation24_spill] sm:$0xff] }
 0x57d   : > { %15332 = vmatprep.mubr.msk.f32.mxu0 %vm1696_vm0, %v19712_v57  ;;  %v20044_v56 = vpop.f32.mrf.mxu1 }
 0x57e   : > { %v20046_v17 = vpop.f32.mrf.mxu0 }
 0x57f   : > { %v20054_v49 = vpop.f32.mrf.mxu1 }
 0x580   : > { %v20048_v38 = vpop.f32.mrf.mxu0  ;;  %15333 = vmatmul.mubr.msk.f32.gmra.mxu0 %vm1696_vm0, %v19724_v43 }
 0x581   : > { %15335 = vmatprep.mubr.msk.f32.mxu0 %vm1696_vm0, %v19734_v14  ;;  %v20064_v27 = vpop.f32.mrf.mxu1 }
 0x582   : > { %v20056_v42 = vpop.f32.mrf.mxu0 }
 0x583   : > { %v20074_v54 = vpop.f32.mrf.mxu1 }
 0x584   : > { %v20058_v3 = vpop.f32.mrf.mxu0  ;;  %15336 = vmatmul.mubr.msk.f32.gmra.mxu0 %vm1696_vm0, %v19746_v20  ;;  %v21242_v20 = vld [vmem:[#allocation13_spill] sm:$0xff] }
 0x585   : > { %15338 = vmatprep.mubr.msk.f32.mxu0 %vm1696_vm0, %v19756_v37  ;;  %v20084_v55 = vpop.f32.mrf.mxu1 }
 0x586   : > { %v20066_v60 = vpop.f32.mrf.mxu0 }
 0x587   : > { %v20094_v6 = vpop.f32.mrf.mxu1 }
 0x588   : > { %v20068_v52 = vpop.f32.mrf.mxu0  ;;  %15339 = vmatmul.mubr.msk.f32.gmra.mxu0 %vm1696_vm0, %v19768_v48 }
 0x589   : > { %15341 = vmatprep.mubr.msk.f32.mxu0 %vm1696_vm0, %v19778_v29  ;;  %v20104_v1 = vpop.f32.mrf.mxu1 }
 0x58a   : > { %v20076_v22 = vpop.f32.mrf.mxu0 }
 0x58b   : > { %v20114_v50 = vpop.f32.mrf.mxu1 }
 0x58c   : > { %v20078_v46 = vpop.f32.mrf.mxu0  ;;  %15342 = vmatmul.mubr.msk.f32.gmra.mxu0 %vm1696_vm0, %v19790_v16 }
 0x58d   : > { %15344 = vmatprep.mubr.msk.f32.mxu0 %vm1696_vm0, %v19800_v7  ;;  %v20124_v57 = vpop.f32.mrf.mxu1 }
 0x58e   : > { %v20086_v34 = vpop.f32.mrf.mxu0 }
 0x58f   : > { %v20134_v37 = vpop.f32.mrf.mxu1 }
 0x590   : > { %v20088_v33 = vpop.f32.mrf.mxu0  ;;  %15345 = vmatmul.mubr.msk.f32.gmra.mxu0 %vm1696_vm0, %v19810_v28 }
 0x591   : > { %15347 = vmatprep.mubr.msk.f32.mxu0 %vm1696_vm0, %v19820_v47  ;;  %v20144_v16 = vpop.f32.mrf.mxu1 }
 0x592   : > { %v20096_v40 = vpop.f32.mrf.mxu0 }
 0x593   : > { %v20154_v47 = vpop.f32.mrf.mxu1 }
 0x594   : > { %v20098_v26 = vpop.f32.mrf.mxu0  ;;  %15348 = vmatmul.mubr.msk.f32.gmra.mxu0 %vm1696_vm0, %v19830_v45 }
 0x595   : > { %15350 = vmatprep.mubr.msk.f32.mxu0 %vm1696_vm0, %v19840_v15 }
 0x596   : > { %v20106_v25 = vpop.f32.mrf.mxu0 }
 0x598   : > { %v20108_v4 = vpop.f32.mrf.mxu0  ;;  %15351 = vmatmul.mubr.msk.f32.gmra.mxu0 %vm1696_vm0, %v19855_v24  ;;  %v20164_v24 = vpop.f32.mrf.mxu1 }
 0x599   : > { %15353 = vmatprep.mubr.msk.f32.mxu0 %vm1696_vm0, %v19865_v30 }
 0x59a   : > { %v20116_v61 = vpop.f32.mrf.mxu0 }
 0x59c   : > { %v20118_v35 = vpop.f32.mrf.mxu0  ;;  %15354 = vmatmul.mubr.msk.f32.gmra.mxu0 %vm1696_vm0, %v21241_v59 }
 0x59d   : > { %15356 = vmatprep.mubr.msk.f32.mxu0 %vm1696_vm0, %v19883_v41 }
 0x59e   : > { %v20126_v43 = vpop.f32.mrf.mxu0 }
 0x5a0   : > { %v20128_v14 = vpop.f32.mrf.mxu0  ;;  %15357 = vmatmul.mubr.msk.f32.gmra.mxu0 %vm1696_vm0, %v21242_v20 }
 0x5a1   : > { %15359 = vmatprep.mubr.msk.f32.mxu0 %vm1696_vm0, %v19901_v21  ;;  %v20174_v21 = vpop.f32.mrf.mxu1 }
 0x5a2   : > { %v20136_v48 = vpop.f32.mrf.mxu0 }
 0x5a3   : > { %v20184_v8 = vpop.f32.mrf.mxu1 }
 0x5a4   : > { %v20138_v29 = vpop.f32.mrf.mxu0  ;;  %15360 = vmatmul.mubr.msk.f32.gmra.mxu0 %vm1696_vm0, %v19910_v2 }
 0x5a5   : > { %15362 = vmatprep.mubr.msk.f32.mxu0 %vm1696_vm0, %v19919_v36  ;;  %v20191_v31 = vpop.f32.mrf.mxu1 }
 0x5a6   : > { %v20146_v7 = vpop.f32.mrf.mxu0 }
 0x5a8   : > { %v20148_v28 = vpop.f32.mrf.mxu0  ;;  %15363 = vmatmul.mubr.msk.f32.gmra.mxu0 %vm1696_vm0, %v19927_v0  ;;  %v8083_v0 = vld [vmem:[#allocation2 + $0x208] sm:$0xff] }
 0x5a9   : > { %15365 = vmatprep.mubr.msk.f32.mxu0 %vm1696_vm0, %v19935_v11 }
 0x5aa   : > { %v20156_v45 = vpop.f32.mrf.mxu0 }
 0x5ac   : > { %v20158_v15 = vpop.f32.mrf.mxu0  ;;  %15366 = vmatmul.mubr.msk.f32.gmra.mxu0 %vm1696_vm0, %v19942_v5 }
 0x5ad   : > { %15368 = vmatprep.mubr.msk.f32.mxu0 %vm1696_vm0, %v19949_v23 }
 0x5ae   : > { %v20166_v30 = vpop.f32.mrf.mxu0 }
 0x5af   : > { %21243 = vst [vmem:[#allocation27_spill] sm:$0xff] %v20166_v30 }
 0x5b0   : > { %v20168_v41 = vpop.f32.mrf.mxu0  ;;  %15369 = vmatmul.mubr.msk.f32.gmra.mxu0 %vm1696_vm0, %v19955_v51  ;;  %v20197_v51 = vpop.f32.mrf.mxu1 }
 0x5b1   : > { %21244 = vst [vmem:[#allocation38_spill] sm:$0xff] %v20168_v41  ;;  %15371 = vmatprep.mubr.msk.f32.mxu0 %vm1696_vm0, %v19961_v12 }
 0x5b2   : > { %v20176_v2 = vpop.f32.mrf.mxu0 }
 0x5b3   : > { %21245 = vst [vmem:[#allocation30_spill] sm:$0xff] %v20176_v2 }
 0x5b4   : > { %v20178_v36 = vpop.f32.mrf.mxu0  ;;  %15372 = vmatmul.mubr.msk.f32.gmra.mxu0 %vm1696_vm0, %v19967_v44 }
 0x5b5   : > { %21246 = vst [vmem:[#allocation14_spill] sm:$0xff] %v20178_v36  ;;  %15374 = vmatprep.mubr.msk.f32.mxu0 %vm1696_vm0, %v19973_v18  ;;  %v20203_v18 = vpop.f32.mrf.mxu1 }
 0x5b6   : > { %v20186_v19 = vpop.f32.mrf.mxu0 }
 0x5b7   : > { %21247 = vst [vmem:[#allocation33_spill] sm:$0xff] %v20186_v19  ;;  %v20209_v58 = vpop.f32.mrf.mxu1 }
 0x5b8   : > { %v20188_v11 = vpop.f32.mrf.mxu0  ;;  %15375 = vmatmul.mubr.msk.f32.gmra.mxu0 %vm1696_vm0, %v8083_v0 }
 0x5b9   : > { %21248 = vst [vmem:[#allocation41_spill] sm:$0xff] %v20188_v11  ;;  %v20215_v53 = vpop.f32.mrf.mxu1 }
 0x5ba   : > { %v20193_v5 = vpop.f32.mrf.mxu0 }
 0x5bb   : > { %21249 = vst [vmem:[#allocation37_spill] sm:$0xff] %v20193_v5  ;;  %v20221_v20 = vpop.f32.mrf.mxu1 }
 0x5bc   : > { %v20195_v23 = vpop.f32.mrf.mxu0 }
 0x5bd   : > { %21250 = vst [vmem:[#allocation9_spill] sm:$0xff] %v20195_v23 }
 0x5be   : > { %v20199_v12 = vpop.f32.mrf.mxu0 }
 0x5bf   : > { %21251 = vst [vmem:[#allocation42_spill] sm:$0xff] %v20199_v12 }
 0x5c0   : > { %v20201_v44 = vpop.f32.mrf.mxu0 }
 0x5c1   : > { %21252 = vst [vmem:[#allocation44_spill] sm:$0xff] %v20201_v44 }
 0x5c2   : > { %v20205_v63 = vpop.f32.mrf.mxu0 }
 0x5c3   : > { %21253 = vst [vmem:[#allocation46_spill] sm:$0xff] %v20205_v63  ;;  %v20227_v63 = vpop.f32.mrf.mxu1 }
 0x5c4   : > { %v20207_v10 = vpop.f32.mrf.mxu0 }
 0x5c5   : > { %21254 = vst [vmem:[#allocation10_spill] sm:$0xff] %v20207_v10 }
 0x5c6   : > { %v20211_v62 = vpop.f32.mrf.mxu0 }
 0x5c7   : > { %21255 = vst [vmem:[#allocation51_spill] sm:$0xff] %v20211_v62  ;;  %v20233_v62 = vpop.f32.mrf.mxu1 }
 0x5c8   : > { %v20213_v13 = vpop.f32.mrf.mxu0 }
 0x5c9   : > { %21256 = vst [vmem:[#allocation47_spill] sm:$0xff] %v20213_v13 }
 0x5ca   : > { %v20217_v9 = vpop.f32.mrf.mxu0 }
 0x5cb   : > { %21257 = vst [vmem:[#allocation35_spill] sm:$0xff] %v20217_v9  ;;  %v20239_v9 = vpop.f32.mrf.mxu1 }
 0x5cc   : > { %v20219_v59 = vpop.f32.mrf.mxu0 }
 0x5cd   : > { %21258 = vst [vmem:[#allocation11_spill] sm:$0xff] %v20219_v59 }
 0x5ce   : > { %v20223_v0 = vpop.f32.mrf.mxu0 }
 0x5cf   : > { %21259 = vst [vmem:[#allocation50_spill] sm:$0xff] %v20223_v0  ;;  %v20245_v0 = vpop.f32.mrf.mxu1 }
 0x5d0   : > { %v20225_v44 = vpop.f32.mrf.mxu0  ;;  %21267 = vst [vmem:[#allocation19_spill] sm:$0xff] %v20245_v0 }
 0x5d1   : > { %21260 = vst [vmem:[#allocation12_spill] sm:$0xff] %v20225_v44 }
 0x5d2   : > { %v20229_v10 = vpop.f32.mrf.mxu0 }
 0x5d3   : > { %21261 = vst [vmem:[#allocation53_spill] sm:$0xff] %v20229_v10  ;;  %v20251_v10 = vpop.f32.mrf.mxu1 }
 0x5d4   : > { %v20231_v12 = vpop.f32.mrf.mxu0  ;;  %21270 = vst [vmem:[#allocation22_spill] sm:$0xff] %v20251_v10 }
 0x5d5   : > { %21262 = vst [vmem:[#allocation15_spill] sm:$0xff] %v20231_v12 }
 0x5d6   : > { %v20235_v13 = vpop.f32.mrf.mxu0 }
 0x5d7   : > { %21263 = vst [vmem:[#allocation55_spill] sm:$0xff] %v20235_v13  ;;  %v20257_v13 = vpop.f32.mrf.mxu1 }
 0x5d8   : > { %v20237_v23 = vpop.f32.mrf.mxu0  ;;  %21273 = vst [vmem:[#allocation26_spill] sm:$0xff] %v20257_v13 }
 0x5d9   : > { %21264 = vst [vmem:[#allocation16_spill] sm:$0xff] %v20237_v23 }
 0x5da   : > { %v20241_v59 = vpop.f32.mrf.mxu0 }
 0x5db   : > { %21265 = vst [vmem:[#allocation17_spill] sm:$0xff] %v20241_v59  ;;  %v20263_v59 = vpop.f32.mrf.mxu1 }
 0x5dc   : > { %v20243_v5 = vpop.f32.mrf.mxu0  ;;  %21276 = vst [vmem:[#allocation31_spill] sm:$0xff] %v20263_v59 }
 0x5dd   : > { %21266 = vst [vmem:[#allocation18_spill] sm:$0xff] %v20243_v5 }
 0x5de   : > { %v20247_v44 = vpop.f32.mrf.mxu0 }
 0x5df   : > { %21268 = vst [vmem:[#allocation20_spill] sm:$0xff] %v20247_v44  ;;  %v20269_v44 = vpop.f32.mrf.mxu1 }
 0x5e0   : > { %v20249_v11 = vpop.f32.mrf.mxu0  ;;  %21279 = vst [vmem:[#allocation36_spill] sm:$0xff] %v20269_v44 }
 0x5e1   : > { %21269 = vst [vmem:[#allocation21_spill] sm:$0xff] %v20249_v11 }
 0x5e2   : > { %v20253_v12 = vpop.f32.mrf.mxu0 }
 0x5e3   : > { %21271 = vst [vmem:[#allocation23_spill] sm:$0xff] %v20253_v12  ;;  %v20275_v12 = vpop.f32.mrf.mxu1 }
 0x5e4   : > { %v20255_v19 = vpop.f32.mrf.mxu0  ;;  %21282 = vst [vmem:[#allocation43_spill] sm:$0xff] %v20275_v12 }
 0x5e5   : > { %21272 = vst [vmem:[#allocation25_spill] sm:$0xff] %v20255_v19 }
 0x5e6   : > { %v20259_v23 = vpop.f32.mrf.mxu0 }
 0x5e7   : > { %21274 = vst [vmem:[#allocation28_spill] sm:$0xff] %v20259_v23  ;;  %v20281_v23 = vpop.f32.mrf.mxu1 }
 0x5e8   : > { %v20261_v36 = vpop.f32.mrf.mxu0  ;;  %21285 = vst [vmem:[#allocation49_spill] sm:$0xff] %v20281_v23 }
 0x5e9   : > { %21275 = vst [vmem:[#allocation29_spill] sm:$0xff] %v20261_v36 }
 0x5ea   : > { %v20265_v5 = vpop.f32.mrf.mxu0 }
 0x5eb   : > { %21277 = vst [vmem:[#allocation32_spill] sm:$0xff] %v20265_v5  ;;  %v20287_v5 = vpop.f32.mrf.mxu1 }
 0x5ec   : > { %v20267_v2 = vpop.f32.mrf.mxu0  ;;  %21288 = vst [vmem:[#allocation56_spill] sm:$0xff] %v20287_v5  ;;  %v7717_v5 = vadd.f32 %v20054_v49, %v20048_v38 }
 0x5ed   : > { %21278 = vst [vmem:[#allocation34_spill] sm:$0xff] %v20267_v2 }
 0x5ee   : > { %v20271_v11 = vpop.f32.mrf.mxu0 }
 0x5ef   : > { %21280 = vst [vmem:[#allocation39_spill] sm:$0xff] %v20271_v11  ;;  %v7707_v11 = vadd.f32 %v20036_v39, %v20038_v32  ;;  %v7712_v32 = vadd.f32 %v20064_v27, %v20056_v42  ;;  %v7722_v42 = vadd.f32 %v20084_v55, %v20066_v60  ;;  %v7732_v60 = vadd.f32 %v20104_v1, %v20076_v22 }
 0x5f0   : > { %v20273_v10 = vpop.f32.mrf.mxu0  ;;  %v7742_v22 = vadd.f32 %v20124_v57, %v20086_v34  ;;  %v7752_v34 = vadd.f32 %v20144_v16, %v20096_v40  ;;  %v7762_v40 = vadd.f32 %v20164_v24, %v20106_v25  ;;  %v7772_v25 = vadd.f32 %v20184_v8, %v20116_v61 }
 0x5f1   : > { %21281 = vst [vmem:[#allocation40_spill] sm:$0xff] %v20273_v10  ;;  %v7782_v61 = vadd.f32 %v20197_v51, %v20126_v43  ;;  %v7792_v43 = vadd.f32 %v20209_v58, %v20136_v48  ;;  %v7802_v48 = vadd.f32 %v20221_v20, %v20146_v7  ;;  %v7812_v7 = vadd.f32 %v20233_v62, %v20156_v45  ;;  %v21291_v45 = vld [vmem:[#allocation27_spill] sm:$0xff] }
 0x5f2   : > { %v20277_v19 = vpop.f32.mrf.mxu0  ;;  %v21292_v62 = vld [vmem:[#allocation19_spill] sm:$0xff] }
 0x5f3   : > { %21283 = vst [vmem:[#allocation45_spill] sm:$0xff] %v20277_v19  ;;  %v20296_v19 = vld [vmem:[%s21290_s17] ss:$0 sm:$0xff] }
 0x5f4   : > { %v20279_v13 = vpop.f32.mrf.mxu0 }
 0x5f5   : > { %21284 = vst [vmem:[#allocation48_spill] sm:$0xff] %v20279_v13  ;;  %v7702_v13 = vadd.f32 %v20044_v56, %v20046_v17  ;;  %v7727_v17 = vadd.f32 %v20074_v54, %v20058_v3  ;;  %v7737_v3 = vadd.f32 %v20094_v6, %v20068_v52  ;;  %v7747_v52 = vadd.f32 %v20114_v50, %v20078_v46 }
 0x5f6   : > { %v20283_v36 = vpop.f32.mrf.mxu0  ;;  %v7757_v46 = vadd.f32 %v20134_v37, %v20088_v33  ;;  %v7767_v33 = vadd.f32 %v20154_v47, %v20098_v26  ;;  %v7777_v26 = vadd.f32 %v20174_v21, %v20108_v4  ;;  %v7787_v4 = vadd.f32 %v20191_v31, %v20118_v35 }
 0x5f7   : > { %21286 = vst [vmem:[#allocation52_spill] sm:$0xff] %v20283_v36  ;;  %v20300_v36 = vpop.f32.mrf.mxu1  ;;  %v7797_v35 = vadd.f32 %v20203_v18, %v20128_v14  ;;  %v7807_v14 = vadd.f32 %v20215_v53, %v20138_v29  ;;  %v7817_v29 = vadd.f32 %v20227_v63, %v20148_v28  ;;  %v7827_v28 = vadd.f32 %v20239_v9, %v20158_v15  ;;  %v21293_v15 = vld [vmem:[#allocation38_spill] sm:$0xff] }
 0x5f8   : > { %v20285_v59 = vpop.f32.mrf.mxu0  ;;  %v21294_v9 = vld [vmem:[#allocation22_spill] sm:$0xff] }
 0x5f9   : > { %21287 = vst [vmem:[#allocation54_spill] sm:$0xff] %v20285_v59  ;;  %v20308_v30 = vpop.f32.mrf.mxu1 }
 0x5fa   : > { %v20289_v2 = vpop.f32.mrf.mxu0 }
 0x5fb   : > { %21289 = vst [vmem:[#allocation24_spill] sm:$0xff] %v20289_v2 }
 0x5fc   : > { %v15283_v10 = vpop.f32.mrf.mxu0 }
 0x5fd   : > { %v8671_v23 = vadd.f32 %v15283_v10, %v7707_v11 }
 0x5fe   : > { %v8351_v59 = vpop.f32.mrf.mxu0 }
 0x5ff   : > { %v8742_v2 = vadd.f32 %v20296_v19, %v8671_v23  ;;  %v8670_v12 = vadd.f32 %v8351_v59, %v7702_v13 }
 0x600   : > { %v15286_v39 = vpop.f32.mrf.mxu0 }
 0x601   : > { %v8806_v44 = vmax.f32 %v8742_v2, 0.0  ;;  %v8741_v41 = vadd.f32 %v20296_v19, %v8670_v12  ;;  %v8673_v0 = vadd.f32 %v15286_v39, %v7717_v5  ;;  %v20318_v12 = vpop.f32.mrf.mxu1 }
 0x602   : > { %v8361_v56 = vpop.f32.mrf.mxu0 }
 0x603   : > { %8870 = vst.msk [vmem:[#allocation3 + $0x10] sm:$0xff] %vm1696_vm0, %v8806_v44  ;;  %v8805_v38 = vmax.f32 %v8741_v41, 0.0  ;;  %v8744_v49 = vadd.f32 %v20296_v19, %v8673_v0  ;;  %v8672_v11 = vadd.f32 %v8361_v56, %v7712_v32  ;;  %v20328_v39 = vpop.f32.mrf.mxu1 }
 0x604   : > { %v15289_v23 = vpop.f32.mrf.mxu0 }
 0x605   : > { %8869 = vst.msk [vmem:[#allocation3 + $0x8] sm:$0xff] %vm1696_vm0, %v8805_v38  ;;  %v8808_v27 = vmax.f32 %v8744_v49, 0.0  ;;  %v8743_v2 = vadd.f32 %v20296_v19, %v8672_v11  ;;  %v8675_v5 = vadd.f32 %v15289_v23, %v7727_v17  ;;  %v20338_v23 = vpop.f32.mrf.mxu1 }
 0x606   : > { %v8371_v10 = vpop.f32.mrf.mxu0 }
 0x607   : > { %8872 = vst.msk [vmem:[#allocation3 + $0x20] sm:$0xff] %vm1696_vm0, %v8808_v27  ;;  %v8807_v54 = vmax.f32 %v8743_v2, 0.0  ;;  %v8746_v41 = vadd.f32 %v20296_v19, %v8675_v5  ;;  %v8674_v44 = vadd.f32 %v8371_v10, %v7722_v42 }
 0x608   : > { %v15292_v13 = vpop.f32.mrf.mxu0 }
 0x609   : > { %8871 = vst.msk [vmem:[#allocation3 + $0x18] sm:$0xff] %vm1696_vm0, %v8807_v54  ;;  %v8810_v55 = vmax.f32 %v8746_v41, 0.0  ;;  %v8745_v59 = vadd.f32 %v20296_v19, %v8674_v44  ;;  %v8677_v0 = vadd.f32 %v15292_v13, %v7737_v3  ;;  %v20348_v54 = vpop.f32.mrf.mxu1 }
 0x60a   : > { %v8381_v32 = vpop.f32.mrf.mxu0 }
 0x60b   : > { %8874 = vst.msk [vmem:[#allocation3 + $0x30] sm:$0xff] %vm1696_vm0, %v8810_v55  ;;  %v8809_v6 = vmax.f32 %v8745_v59, 0.0  ;;  %v8748_v56 = vadd.f32 %v20296_v19, %v8677_v0  ;;  %v8676_v17 = vadd.f32 %v8381_v32, %v7732_v60  ;;  %v20358_v0 = vpop.f32.mrf.mxu1 }
 0x60c   : > { %v15295_v38 = vpop.f32.mrf.mxu0 }
 0x60d   : > { %8873 = vst.msk [vmem:[#allocation3 + $0x28] sm:$0xff] %vm1696_vm0, %v8809_v6  ;;  %v8812_v1 = vmax.f32 %v8748_v56, 0.0  ;;  %v8747_v49 = vadd.f32 %v20296_v19, %v8676_v17  ;;  %v8679_v11 = vadd.f32 %v15295_v38, %v7747_v52 }
 0x60e   : > { %v8391_v42 = vpop.f32.mrf.mxu0 }
 0x60f   : > { %8876 = vst.msk [vmem:[#allocation3 + $0x40] sm:$0xff] %vm1696_vm0, %v8812_v1  ;;  %v8811_v50 = vmax.f32 %v8747_v49, 0.0  ;;  %v8750_v27 = vadd.f32 %v20296_v19, %v8679_v11  ;;  %v8678_v2 = vadd.f32 %v8391_v42, %v7742_v22  ;;  %v20368_v22 = vpop.f32.mrf.mxu1 }
 0x610   : > { %v15298_v5 = vpop.f32.mrf.mxu0 }
 0x611   : > { %8875 = vst.msk [vmem:[#allocation3 + $0x38] sm:$0xff] %vm1696_vm0, %v8811_v50  ;;  %v8814_v57 = vmax.f32 %v8750_v27, 0.0  ;;  %v8749_v10 = vadd.f32 %v20296_v19, %v8678_v2  ;;  %v8681_v3 = vadd.f32 %v15298_v5, %v7757_v46  ;;  %v20378_v27 = vpop.f32.mrf.mxu1 }
 0x612   : > { %v8401_v41 = vpop.f32.mrf.mxu0 }
 0x613   : > { %8878 = vst.msk [vmem:[#allocation3 + $0x50] sm:$0xff] %vm1696_vm0, %v8814_v57  ;;  %v8813_v37 = vmax.f32 %v8749_v10, 0.0  ;;  %v8752_v44 = vadd.f32 %v20296_v19, %v8681_v3  ;;  %v8680_v13 = vadd.f32 %v8401_v41, %v7752_v34  ;;  %v20388_v41 = vpop.f32.mrf.mxu1 }
 0x614   : > { %v15301_v60 = vpop.f32.mrf.mxu0 }
 0x615   : > { %8877 = vst.msk [vmem:[#allocation3 + $0x48] sm:$0xff] %vm1696_vm0, %v8813_v37  ;;  %v8816_v16 = vmax.f32 %v8752_v44, 0.0  ;;  %v8751_v55 = vadd.f32 %v20296_v19, %v8680_v13  ;;  %v8683_v59 = vadd.f32 %v15301_v60, %v7767_v33 }
 0x616   : > { %v8411_v32 = vpop.f32.mrf.mxu0 }
 0x617   : > { %8880 = vst.msk [vmem:[#allocation3 + $0x60] sm:$0xff] %vm1696_vm0, %v8816_v16  ;;  %v8815_v47 = vmax.f32 %v8751_v55, 0.0  ;;  %v8754_v52 = vadd.f32 %v20296_v19, %v8683_v59  ;;  %v8682_v6 = vadd.f32 %v8411_v32, %v7762_v40  ;;  %v20398_v16 = vpop.f32.mrf.mxu1 }
 0x618   : > { %v15304_v56 = vpop.f32.mrf.mxu0 }
 0x619   : > { %8879 = vst.msk [vmem:[#allocation3 + $0x58] sm:$0xff] %vm1696_vm0, %v8815_v47  ;;  %v8818_v24 = vmax.f32 %v8754_v52, 0.0  ;;  %v8753_v17 = vadd.f32 %v20296_v19, %v8682_v6  ;;  %v8685_v38 = vadd.f32 %v15304_v56, %v7777_v26  ;;  %v20408_v6 = vpop.f32.mrf.mxu1 }
 0x61a   : > { %v8421_v1 = vpop.f32.mrf.mxu0 }
 0x61b   : > { %8882 = vst.msk [vmem:[#allocation3 + $0x70] sm:$0xff] %vm1696_vm0, %v8818_v24  ;;  %v8817_v21 = vmax.f32 %v8753_v17, 0.0  ;;  %v8756_v49 = vadd.f32 %v20296_v19, %v8685_v38  ;;  %v8684_v11 = vadd.f32 %v8421_v1, %v7772_v25  ;;  %v7822_v38 = vadd.f32 %v21292_v62, %v21291_v45 }
 0x61c   : > { %v15307_v42 = vpop.f32.mrf.mxu0 }
 0x61d   : > { %8881 = vst.msk [vmem:[#allocation3 + $0x68] sm:$0xff] %vm1696_vm0, %v8817_v21  ;;  %v8820_v8 = vmax.f32 %v8756_v49, 0.0  ;;  %v8755_v46 = vadd.f32 %v20296_v19, %v8684_v11  ;;  %v8687_v50 = vadd.f32 %v15307_v42, %v7787_v4  ;;  %v20418_v49 = vpop.f32.mrf.mxu1  ;;  %v7837_v42 = vadd.f32 %v21294_v9, %v21293_v15 }
 0x61e   : > { %v8431_v2 = vpop.f32.mrf.mxu0 }
 0x61f   : > { %8884 = vst.msk [vmem:[#allocation3 + $0x80] sm:$0xff] %vm1696_vm0, %v8820_v8  ;;  %v8819_v31 = vmax.f32 %v8755_v46, 0.0  ;;  %v8758_v5 = vadd.f32 %v20296_v19, %v8687_v50  ;;  %v8686_v34 = vadd.f32 %v8431_v2, %v7782_v61  ;;  %v21295_v2 = vld [vmem:[#allocation30_spill] sm:$0xff] }
 0x620   : > { %v15310_v57 = vpop.f32.mrf.mxu0 }
 0x621   : > { %8883 = vst.msk [vmem:[#allocation3 + $0x78] sm:$0xff] %vm1696_vm0, %v8819_v31  ;;  %v8822_v51 = vmax.f32 %v8758_v5, 0.0  ;;  %v8757_v10 = vadd.f32 %v20296_v19, %v8686_v34  ;;  %v8689_v3 = vadd.f32 %v15310_v57, %v7797_v35  ;;  %v21296_v35 = vld [vmem:[#allocation26_spill] sm:$0xff] }
 0x622   : > { %v8441_v33 = vpop.f32.mrf.mxu0  ;;  %v7832_v31 = vadd.f32 %v21296_v35, %v21295_v2 }
 0x623   : > { %8886 = vst.msk [vmem:[#allocation3 + $0x90] sm:$0xff] %vm1696_vm0, %v8822_v51  ;;  %v8821_v18 = vmax.f32 %v8757_v10, 0.0  ;;  %v8760_v37 = vadd.f32 %v20296_v19, %v8689_v3  ;;  %v8688_v44 = vadd.f32 %v8441_v33, %v7792_v43  ;;  %v20428_v43 = vpop.f32.mrf.mxu1  ;;  %v21297_v10 = vld [vmem:[#allocation14_spill] sm:$0xff]  ;;  %v21298_v3 = vld [vmem:[#allocation31_spill] sm:$0xff] }
 0x624   : > { %v15313_v13 = vpop.f32.mrf.mxu0  ;;  %v7847_v33 = vadd.f32 %v21298_v3, %v21297_v10 }
 0x625   : > { %8885 = vst.msk [vmem:[#allocation3 + $0x88] sm:$0xff] %vm1696_vm0, %v8821_v18  ;;  %v8824_v58 = vmax.f32 %v8760_v37, 0.0  ;;  %v8759_v60 = vadd.f32 %v20296_v19, %v8688_v44  ;;  %v8691_v40 = vadd.f32 %v15313_v13, %v7807_v14  ;;  %v21299_v13 = vld [vmem:[#allocation33_spill] sm:$0xff] }
 0x626   : > { %v8451_v55 = vpop.f32.mrf.mxu0 }
 0x627   : > { %8888 = vst.msk [vmem:[#allocation3 + $0xa0] sm:$0xff] %vm1696_vm0, %v8824_v58  ;;  %v8823_v53 = vmax.f32 %v8759_v60, 0.0  ;;  %v8762_v59 = vadd.f32 %v20296_v19, %v8691_v40  ;;  %v8690_v32 = vadd.f32 %v8451_v55, %v7802_v48  ;;  %v21300_v48 = vld [vmem:[#allocation36_spill] sm:$0xff] }
 0x628   : > { %v15316_v26 = vpop.f32.mrf.mxu0  ;;  %v7842_v58 = vadd.f32 %v21300_v48, %v21299_v13 }
 0x629   : > { %8887 = vst.msk [vmem:[#allocation3 + $0x98] sm:$0xff] %vm1696_vm0, %v8823_v53  ;;  %v8826_v20 = vmax.f32 %v8762_v59, 0.0  ;;  %v8761_v47 = vadd.f32 %v20296_v19, %v8690_v32  ;;  %v8693_v52 = vadd.f32 %v15316_v26, %v7817_v29  ;;  %v20438_v29 = vpop.f32.mrf.mxu1  ;;  %v21301_v59 = vld [vmem:[#allocation41_spill] sm:$0xff]  ;;  %v21302_v32 = vld [vmem:[#allocation43_spill] sm:$0xff] }
 0x62a   : > { %v8461_v56 = vpop.f32.mrf.mxu0  ;;  %v7857_v26 = vadd.f32 %v21302_v32, %v21301_v59 }
 0x62b   : > { %8890 = vst.msk [vmem:[#allocation3 + $0xb0] sm:$0xff] %vm1696_vm0, %v8826_v20  ;;  %v8825_v63 = vmax.f32 %v8761_v47, 0.0  ;;  %v8764_v25 = vadd.f32 %v20296_v19, %v8693_v52  ;;  %v8692_v24 = vadd.f32 %v8461_v56, %v7812_v7  ;;  %v21303_v56 = vld [vmem:[#allocation37_spill] sm:$0xff]  ;;  %v20448_v45 = vpop.f32.mrf.mxu1 }
 0x62c   : > { %v15319_v17 = vpop.f32.mrf.mxu0 }
 0x62d   : > { %8889 = vst.msk [vmem:[#allocation3 + $0xa8] sm:$0xff] %vm1696_vm0, %v8825_v63  ;;  %v8828_v1 = vmax.f32 %v8764_v25, 0.0  ;;  %v8763_v4 = vadd.f32 %v20296_v19, %v8692_v24  ;;  %v8695_v21 = vadd.f32 %v15319_v17, %v7827_v28  ;;  %v21304_v28 = vld [vmem:[#allocation49_spill] sm:$0xff]  ;;  %v20458_v2 = vpop.f32.mrf.mxu1 }
 0x62e   : > { %v8471_v11 = vpop.f32.mrf.mxu0  ;;  %v7852_v63 = vadd.f32 %v21304_v28, %v21303_v56 }
 0x62f   : > { %8892 = vst.msk [vmem:[#allocation3 + $0xc0] sm:$0xff] %vm1696_vm0, %v8828_v1  ;;  %v8827_v61 = vmax.f32 %v8763_v4, 0.0  ;;  %v8766_v8 = vadd.f32 %v20296_v19, %v8695_v21  ;;  %v8694_v46 = vadd.f32 %v8471_v11, %v7822_v38  ;;  %v21305_v38 = vld [vmem:[#allocation9_spill] sm:$0xff]  ;;  %v21306_v1 = vld [vmem:[#allocation56_spill] sm:$0xff] }
 0x630   : > { %v15322_v50 = vpop.f32.mrf.mxu0  ;;  %v7867_v4 = vadd.f32 %v21306_v1, %v21305_v38 }
 0x631   : > { %8891 = vst.msk [vmem:[#allocation3 + $0xb8] sm:$0xff] %vm1696_vm0, %v8827_v61  ;;  %v8830_v5 = vmax.f32 %v8766_v8, 0.0  ;;  %v8765_v34 = vadd.f32 %v20296_v19, %v8694_v46  ;;  %v8697_v57 = vadd.f32 %v15322_v50, %v7837_v42  ;;  %v21307_v42 = vld [vmem:[#allocation42_spill] sm:$0xff] }
 0x632   : > { %v8481_v51 = vpop.f32.mrf.mxu0  ;;  %v7862_v61 = vadd.f32 %v20300_v36, %v21307_v42  ;;  %v21309_v36 = vld [vmem:[#allocation46_spill] sm:$0xff] }
 0x633   : > { %8894 = vst.msk [vmem:[#allocation3 + $0xd0] sm:$0xff] %vm1696_vm0, %v8830_v5  ;;  %v8829_v14 = vmax.f32 %v8765_v34, 0.0  ;;  %v8768_v18 = vadd.f32 %v20296_v19, %v8697_v57  ;;  %v8696_v37 = vadd.f32 %v8481_v51, %v7832_v31  ;;  %v21308_v31 = vld [vmem:[#allocation44_spill] sm:$0xff]  ;;  %v7872_v3 = vadd.f32 %v20318_v12, %v21309_v36  ;;  %v21311_v12 = vld [vmem:[#allocation51_spill] sm:$0xff] }
 0x634   : > { %v15325_v44 = vpop.f32.mrf.mxu0  ;;  %v7877_v5 = vadd.f32 %v20308_v30, %v21308_v31  ;;  %v21310_v30 = vld [vmem:[#allocation10_spill] sm:$0xff] }
 0x635   : > { %8893 = vst.msk [vmem:[#allocation3 + $0xc8] sm:$0xff] %vm1696_vm0, %v8829_v14  ;;  %v8832_v60 = vmax.f32 %v8768_v18, 0.0  ;;  %v8767_v40 = vadd.f32 %v20296_v19, %v8696_v37  ;;  %v8699_v55 = vadd.f32 %v15325_v44, %v7847_v33  ;;  %v20468_v37 = vpop.f32.mrf.mxu1  ;;  %v7887_v13 = vadd.f32 %v20328_v39, %v21310_v30  ;;  %v21312_v39 = vld [vmem:[#allocation47_spill] sm:$0xff] }
 0x636   : > { %v8491_v53 = vpop.f32.mrf.mxu0 }
 0x637   : > { %8896 = vst.msk [vmem:[#allocation3 + $0xe0] sm:$0xff] %vm1696_vm0, %v8832_v60  ;;  %v8831_v7 = vmax.f32 %v8767_v40, 0.0  ;;  %v8770_v20 = vadd.f32 %v20296_v19, %v8699_v55  ;;  %v8698_v47 = vadd.f32 %v8491_v53, %v7842_v58  ;;  %v7882_v55 = vadd.f32 %v20338_v23, %v21311_v12  ;;  %v21313_v23 = vld [vmem:[#allocation35_spill] sm:$0xff] }
 0x638   : > { %v15328_v52 = vpop.f32.mrf.mxu0 }
 0x639   : > { %8895 = vst.msk [vmem:[#allocation3 + $0xd8] sm:$0xff] %vm1696_vm0, %v8831_v7  ;;  %v8834_v25 = vmax.f32 %v8770_v20, 0.0  ;;  %v8769_v24 = vadd.f32 %v20296_v19, %v8698_v47  ;;  %v8701_v17 = vadd.f32 %v15328_v52, %v7857_v26  ;;  %v20478_v26 = vpop.f32.mrf.mxu1  ;;  %v7897_v20 = vadd.f32 %v20348_v54, %v21312_v39  ;;  %v21314_v54 = vld [vmem:[#allocation11_spill] sm:$0xff] }
 0x63a   : > { %v8501_v62 = vpop.f32.mrf.mxu0  ;;  %v7907_v1 = vadd.f32 %v20368_v22, %v21314_v54  ;;  %v21316_v22 = vld [vmem:[#allocation12_spill] sm:$0xff] }
 0x63b   : > { %8898 = vst.msk [vmem:[#allocation3 + $0xf0] sm:$0xff] %vm1696_vm0, %v8834_v25  ;;  %v8833_v21 = vmax.f32 %v8769_v24, 0.0  ;;  %v8772_v11 = vadd.f32 %v20296_v19, %v8701_v17  ;;  %v8700_v15 = vadd.f32 %v8501_v62, %v7852_v63  ;;  %v7892_v63 = vadd.f32 %v20358_v0, %v21313_v23  ;;  %v20488_v62 = vpop.f32.mrf.mxu1  ;;  %v21315_v0 = vld [vmem:[#allocation50_spill] sm:$0xff] }
 0x63c   : > { %v15331_v9 = vpop.f32.mrf.mxu0 }
 0x63d   : > { %8897 = vst.msk [vmem:[#allocation3 + $0xe8] sm:$0xff] %vm1696_vm0, %v8833_v21  ;;  %v8836_v8 = vmax.f32 %v8772_v11, 0.0  ;;  %v8771_v46 = vadd.f32 %v20296_v19, %v8700_v15  ;;  %v8703_v50 = vadd.f32 %v15331_v9, %v7867_v4  ;;  %v7902_v9 = vadd.f32 %v20378_v27, %v21315_v0  ;;  %v21317_v27 = vld [vmem:[#allocation53_spill] sm:$0xff] }
 0x63e   : > { %v8511_v35 = vpop.f32.mrf.mxu0 }
 0x63f   : > { %8900 = vst.msk [vmem:[#allocation3 + $0x100] sm:$0xff] %vm1696_vm0, %v8836_v8  ;;  %v8835_v34 = vmax.f32 %v8771_v46, 0.0  ;;  %v8774_v57 = vadd.f32 %v20296_v19, %v8703_v50  ;;  %v8702_v51 = vadd.f32 %v8511_v35, %v7862_v61  ;;  %v20498_v46 = vpop.f32.mrf.mxu1  ;;  %v7917_v35 = vadd.f32 %v20388_v41, %v21316_v22  ;;  %v21318_v41 = vld [vmem:[#allocation15_spill] sm:$0xff] }
 0x640   : > { %v15334_v10 = vpop.f32.mrf.mxu0  ;;  %v21325_v22 = vld [vmem:[#allocation23_spill] sm:$0xff] }
 0x641   : > { %8899 = vst.msk [vmem:[#allocation3 + $0xf8] sm:$0xff] %vm1696_vm0, %v8835_v34  ;;  %v8838_v33 = vmax.f32 %v8774_v57, 0.0  ;;  %v8773_v14 = vadd.f32 %v20296_v19, %v8702_v51  ;;  %v8705_v18 = vadd.f32 %v15334_v10, %v7877_v5  ;;  %v7912_v51 = vadd.f32 %v20398_v16, %v21317_v27  ;;  %v21319_v16 = vld [vmem:[#allocation55_spill] sm:$0xff]  ;;  %v21326_v27 = vld [vmem:[#allocation25_spill] sm:$0xff] }
 0x642   : > { %v8521_v44 = vpop.f32.mrf.mxu0 }
 0x643   : > { %8902 = vst.msk [vmem:[#allocation3 + $0x110] sm:$0xff] %vm1696_vm0, %v8838_v33  ;;  %v8837_v48 = vmax.f32 %v8773_v14, 0.0  ;;  %v8776_v58 = vadd.f32 %v20296_v19, %v8705_v18  ;;  %v8704_v60 = vadd.f32 %v8521_v44, %v7872_v3  ;;  %v20508_v33 = vpop.f32.mrf.mxu1  ;;  %v7927_v18 = vadd.f32 %v20408_v6, %v21318_v41 }
 0x644   : > { %v15337_v40 = vpop.f32.mrf.mxu0 }
 0x645   : > { %8901 = vst.msk [vmem:[#allocation3 + $0x108] sm:$0xff] %vm1696_vm0, %v8837_v48  ;;  %v8840_v53 = vmax.f32 %v8776_v58, 0.0  ;;  %v8775_v59 = vadd.f32 %v20296_v19, %v8704_v60  ;;  %v8707_v32 = vadd.f32 %v15337_v40, %v7887_v13  ;;  %v7922_v58 = vadd.f32 %v20418_v49, %v21319_v16 }
 0x646   : > { %v8531_v7 = vpop.f32.mrf.mxu0 }
 0x647   : > { %8904 = vst.msk [vmem:[#allocation3 + $0x120] sm:$0xff] %vm1696_vm0, %v8840_v53  ;;  %v8839_v47 = vmax.f32 %v8775_v59, 0.0  ;;  %v8778_v52 = vadd.f32 %v20296_v19, %v8707_v32  ;;  %v8706_v56 = vadd.f32 %v8531_v7, %v7882_v55  ;;  %v7971_v55 = vpop.f32.mrf.mxu1  ;;  %v21320_v59 = vld [vmem:[#allocation16_spill] sm:$0xff] }
 0x648   : > { %v15340_v28 = vpop.f32.mrf.mxu0  ;;  %v7937_v6 = vadd.f32 %v20428_v43, %v21320_v59 }
 0x649   : > { %8903 = vst.msk [vmem:[#allocation3 + $0x118] sm:$0xff] %vm1696_vm0, %v8839_v47  ;;  %v8842_v25 = vmax.f32 %v8778_v52, 0.0  ;;  %v8777_v24 = vadd.f32 %v20296_v19, %v8706_v56  ;;  %v8709_v17 = vadd.f32 %v15340_v28, %v7897_v20  ;;  %v21321_v47 = vld [vmem:[#allocation17_spill] sm:$0xff]  ;;  %v15255_v23 = vpop.f32.mrf.mxu1 }
 0x64a   : > { %v8541_v38 = vpop.f32.mrf.mxu0  ;;  %v7932_v49 = vadd.f32 %v20438_v29, %v21321_v47 }
 0x64b   : > { %8906 = vst.msk [vmem:[#allocation3 + $0x130] sm:$0xff] %vm1696_vm0, %v8842_v25  ;;  %v8841_v4 = vmax.f32 %v8777_v24, 0.0  ;;  %v8780_v21 = vadd.f32 %v20296_v19, %v8709_v17  ;;  %v8708_v11 = vadd.f32 %v8541_v38, %v7892_v63  ;;  %v21322_v25 = vld [vmem:[#allocation18_spill] sm:$0xff] }
 0x64c   : > { %v15343_v15 = vpop.f32.mrf.mxu0  ;;  %v7947_v43 = vadd.f32 %v20448_v45, %v21322_v25 }
 0x64d   : > { %8905 = vst.msk [vmem:[#allocation3 + $0x128] sm:$0xff] %vm1696_vm0, %v8841_v4  ;;  %v8844_v42 = vmax.f32 %v8780_v21, 0.0  ;;  %v8779_v61 = vadd.f32 %v20296_v19, %v8708_v11  ;;  %v8711_v8 = vadd.f32 %v15343_v15, %v7907_v1  ;;  %v21323_v1 = vld [vmem:[#allocation20_spill] sm:$0xff]  ;;  %v7981_v15 = vpop.f32.mrf.mxu1 }
 0x64e   : > { %v8551_v50 = vpop.f32.mrf.mxu0  ;;  %v7942_v29 = vadd.f32 %v20458_v2, %v21323_v1  ;;  %v7952_v2 = vadd.f32 %v20478_v26, %v21325_v22 }
 0x64f   : > { %8908 = vst.msk [vmem:[#allocation3 + $0x140] sm:$0xff] %vm1696_vm0, %v8844_v42  ;;  %v8843_v31 = vmax.f32 %v8779_v61, 0.0  ;;  %v8782_v5 = vadd.f32 %v20296_v19, %v8711_v8  ;;  %v8710_v34 = vadd.f32 %v8551_v50, %v7902_v9  ;;  %v21324_v9 = vld [vmem:[#allocation21_spill] sm:$0xff] }
 0x650   : > { %v15346_v57 = vpop.f32.mrf.mxu0  ;;  %v7957_v45 = vadd.f32 %v20468_v37, %v21324_v9  ;;  %v7967_v37 = vadd.f32 %v20488_v62, %v21326_v27 }
 0x651   : > { %8907 = vst.msk [vmem:[#allocation3 + $0x138] sm:$0xff] %vm1696_vm0, %v8843_v31  ;;  %v8846_v10 = vmax.f32 %v8782_v5, 0.0  ;;  %v8781_v36 = vadd.f32 %v20296_v19, %v8710_v34  ;;  %v8713_v3 = vadd.f32 %v15346_v57, %v7917_v35  ;;  %v15258_v34 = vpop.f32.mrf.mxu1 }
 0x652   : > { %v8561_v14 = vpop.f32.mrf.mxu0 }
 0x653   : > { %8910 = vst.msk [vmem:[#allocation3 + $0x150] sm:$0xff] %vm1696_vm0, %v8846_v10  ;;  %v8845_v44 = vmax.f32 %v8781_v36, 0.0  ;;  %v8784_v30 = vadd.f32 %v20296_v19, %v8713_v3  ;;  %v8712_v13 = vadd.f32 %v8561_v14, %v7912_v51  ;;  %v21327_v14 = vld [vmem:[#allocation28_spill] sm:$0xff] }
 0x654   : > { %v15349_v48 = vpop.f32.mrf.mxu0  ;;  %v7962_v26 = vadd.f32 %v20498_v46, %v21327_v14 }
 0x655   : > { %8909 = vst.msk [vmem:[#allocation3 + $0x148] sm:$0xff] %vm1696_vm0, %v8845_v44  ;;  %v8848_v60 = vmax.f32 %v8784_v30, 0.0  ;;  %v8783_v40 = vadd.f32 %v20296_v19, %v8712_v13  ;;  %v8715_v12 = vadd.f32 %v15349_v48, %v7927_v18  ;;  %v7991_v30 = vpop.f32.mrf.mxu1  ;;  %v21328_v48 = vld [vmem:[#allocation29_spill] sm:$0xff] }
 0x656   : > { %v8571_v53 = vpop.f32.mrf.mxu0  ;;  %v7977_v62 = vadd.f32 %v20508_v33, %v21328_v48 }
 0x657   : > { %8912 = vst.msk [vmem:[#allocation3 + $0x160] sm:$0xff] %vm1696_vm0, %v8848_v60  ;;  %v8847_v32 = vmax.f32 %v8783_v40, 0.0  ;;  %v8786_v7 = vadd.f32 %v20296_v19, %v8715_v12  ;;  %v8714_v39 = vadd.f32 %v8571_v53, %v7922_v58  ;;  %v21329_v12 = vld [vmem:[#allocation32_spill] sm:$0xff] }
 0x658   : > { %v15352_v20 = vpop.f32.mrf.mxu0  ;;  %v7972_v46 = vadd.f32 %v7971_v55, %v21329_v12 }
 0x659   : > { %8911 = vst.msk [vmem:[#allocation3 + $0x158] sm:$0xff] %vm1696_vm0, %v8847_v32  ;;  %v8850_v52 = vmax.f32 %v8786_v7, 0.0  ;;  %v8785_v56 = vadd.f32 %v20296_v19, %v8714_v39  ;;  %v8717_v28 = vadd.f32 %v15352_v20, %v7937_v6  ;;  %v15261_v32 = vpop.f32.mrf.mxu1  ;;  %v21330_v39 = vld [vmem:[#allocation34_spill] sm:$0xff] }
 0x65a   : > { %v8581_v63 = vpop.f32.mrf.mxu0  ;;  %v7987_v20 = vadd.f32 %v15255_v23, %v21330_v39 }
 0x65b   : > { %8914 = vst.msk [vmem:[#allocation3 + $0x170] sm:$0xff] %vm1696_vm0, %v8850_v52  ;;  %v8849_v24 = vmax.f32 %v8785_v56, 0.0  ;;  %v8788_v17 = vadd.f32 %v20296_v19, %v8717_v28  ;;  %v8716_v38 = vadd.f32 %v8581_v63, %v7932_v49  ;;  %v21331_v56 = vld [vmem:[#allocation39_spill] sm:$0xff] }
 0x65c   : > { %v15355_v54 = vpop.f32.mrf.mxu0  ;;  %v7982_v28 = vadd.f32 %v7981_v15, %v21331_v56 }
 0x65d   : > { %8913 = vst.msk [vmem:[#allocation3 + $0x168] sm:$0xff] %vm1696_vm0, %v8849_v24  ;;  %v8852_v4 = vmax.f32 %v8788_v17, 0.0  ;;  %v8787_v21 = vadd.f32 %v20296_v19, %v8716_v38  ;;  %v8719_v11 = vadd.f32 %v15355_v54, %v7947_v43  ;;  %v8001_v43 = vpop.f32.mrf.mxu1  ;;  %v21332_v17 = vld [vmem:[#allocation40_spill] sm:$0xff] }
 0x65e   : > { %v8591_v0 = vpop.f32.mrf.mxu0  ;;  %v7997_v38 = vadd.f32 %v15258_v34, %v21332_v17 }
 0x65f   : > { %8916 = vst.msk [vmem:[#allocation3 + $0x180] sm:$0xff] %vm1696_vm0, %v8852_v4  ;;  %v8851_v42 = vmax.f32 %v8787_v21, 0.0  ;;  %v8790_v61 = vadd.f32 %v20296_v19, %v8719_v11  ;;  %v8718_v8 = vadd.f32 %v8591_v0, %v7942_v29  ;;  %v21333_v4 = vld [vmem:[#allocation45_spill] sm:$0xff]  ;;  %v15264_v9 = vpop.f32.mrf.mxu1 }
 0x660   : > { %v15358_v50 = vpop.f32.mrf.mxu0  ;;  %v7992_v21 = vadd.f32 %v7991_v30, %v21333_v4 }
 0x661   : > { %8915 = vst.msk [vmem:[#allocation3 + $0x178] sm:$0xff] %vm1696_vm0, %v8851_v42  ;;  %v8854_v35 = vmax.f32 %v8790_v61, 0.0  ;;  %v8789_v31 = vadd.f32 %v20296_v19, %v8718_v8  ;;  %v8721_v5 = vadd.f32 %v15358_v50, %v7957_v45  ;;  %v21334_v42 = vld [vmem:[#allocation48_spill] sm:$0xff]  ;;  %v8011_v27 = vpop.f32.mrf.mxu1 }
 0x662   : > { %v8601_v57 = vpop.f32.mrf.mxu0  ;;  %v8007_v61 = vadd.f32 %v15261_v32, %v21334_v42 }
 0x663   : > { %8918 = vst.msk [vmem:[#allocation3 + $0x190] sm:$0xff] %vm1696_vm0, %v8854_v35  ;;  %v8853_v51 = vmax.f32 %v8789_v31, 0.0  ;;  %v8792_v10 = vadd.f32 %v20296_v19, %v8721_v5  ;;  %v8720_v36 = vadd.f32 %v8601_v57, %v7952_v2  ;;  %v21335_v35 = vld [vmem:[#allocation52_spill] sm:$0xff] }
 0x664   : > { %v15361_v3 = vpop.f32.mrf.mxu0  ;;  %v8002_v31 = vadd.f32 %v8001_v43, %v21335_v35 }
 0x665   : > { %8917 = vst.msk [vmem:[#allocation3 + $0x188] sm:$0xff] %vm1696_vm0, %v8853_v51  ;;  %v8856_v41 = vmax.f32 %v8792_v10, 0.0  ;;  %v8791_v18 = vadd.f32 %v20296_v19, %v8720_v36  ;;  %v8723_v44 = vadd.f32 %v15361_v3, %v7967_v37  ;;  %v21336_v51 = vld [vmem:[#allocation54_spill] sm:$0xff] }
 0x666   : > { %v8611_v13 = vpop.f32.mrf.mxu0  ;;  %v8017_v10 = vadd.f32 %v15264_v9, %v21336_v51 }
 0x667   : > { %8920 = vst.msk [vmem:[#allocation3 + $0x1a0] sm:$0xff] %vm1696_vm0, %v8856_v41  ;;  %v8855_v16 = vmax.f32 %v8791_v18, 0.0  ;;  %v8794_v58 = vadd.f32 %v20296_v19, %v8723_v44  ;;  %v8722_v60 = vadd.f32 %v8611_v13, %v7962_v26  ;;  %v21337_v41 = vld [vmem:[#allocation24_spill] sm:$0xff] }
 0x668   : > { %v15364_v40 = vpop.f32.mrf.mxu0  ;;  %v8012_v18 = vadd.f32 %v8011_v27, %v21337_v41 }
 0x669   : > { %8919 = vst.msk [vmem:[#allocation3 + $0x198] sm:$0xff] %vm1696_vm0, %v8855_v16  ;;  %v8858_v53 = vmax.f32 %v8794_v58, 0.0  ;;  %v8793_v59 = vadd.f32 %v20296_v19, %v8722_v60  ;;  %v8725_v6 = vadd.f32 %v15364_v40, %v7977_v62 }
 0x66a   : > { %v8621_v7 = vpop.f32.mrf.mxu0 }
 0x66b   : > { %8922 = vst.msk [vmem:[#allocation3 + $0x1b0] sm:$0xff] %vm1696_vm0, %v8858_v53  ;;  %v8857_v33 = vmax.f32 %v8793_v59, 0.0  ;;  %v8796_v47 = vadd.f32 %v20296_v19, %v8725_v6  ;;  %v8724_v49 = vadd.f32 %v8621_v7, %v7972_v46 }
 0x66c   : > { %v15367_v52 = vpop.f32.mrf.mxu0 }
 0x66d   : > { %8921 = vst.msk [vmem:[#allocation3 + $0x1a8] sm:$0xff] %vm1696_vm0, %v8857_v33  ;;  %v8860_v55 = vmax.f32 %v8796_v47, 0.0  ;;  %v8795_v63 = vadd.f32 %v20296_v19, %v8724_v49  ;;  %v8727_v25 = vadd.f32 %v15367_v52, %v7987_v20 }
 0x66e   : > { %v8631_v24 = vpop.f32.mrf.mxu0 }
 0x66f   : > { %8924 = vst.msk [vmem:[#allocation3 + $0x1c0] sm:$0xff] %vm1696_vm0, %v8860_v55  ;;  %v8859_v23 = vmax.f32 %v8795_v63, 0.0  ;;  %v8798_v54 = vadd.f32 %v20296_v19, %v8727_v25  ;;  %v8726_v1 = vadd.f32 %v8631_v24, %v7982_v28 }
 0x670   : > { %v15370_v29 = vpop.f32.mrf.mxu0 }
 0x671   : > { %8923 = vst.msk [vmem:[#allocation3 + $0x1b8] sm:$0xff] %vm1696_vm0, %v8859_v23  ;;  %v8862_v11 = vmax.f32 %v8798_v54, 0.0  ;;  %v8797_v15 = vadd.f32 %v20296_v19, %v8726_v1  ;;  %v8729_v0 = vadd.f32 %v15370_v29, %v7997_v38 }
 0x672   : > { %v8641_v45 = vpop.f32.mrf.mxu0 }
 0x673   : > { %8926 = vst.msk [vmem:[#allocation3 + $0x1d0] sm:$0xff] %vm1696_vm0, %v8862_v11  ;;  %v8861_v8 = vmax.f32 %v8797_v15, 0.0  ;;  %v8800_v50 = vadd.f32 %v20296_v19, %v8729_v0  ;;  %v8728_v22 = vadd.f32 %v8641_v45, %v7992_v21 }
 0x674   : > { %v15373_v2 = vpop.f32.mrf.mxu0 }
 0x675   : > { %8925 = vst.msk [vmem:[#allocation3 + $0x1c8] sm:$0xff] %vm1696_vm0, %v8861_v8  ;;  %v8864_v5 = vmax.f32 %v8800_v50, 0.0  ;;  %v8799_v34 = vadd.f32 %v20296_v19, %v8728_v22  ;;  %v8731_v57 = vadd.f32 %v15373_v2, %v8007_v61 }
 0x676   : > { %v8651_v37 = vpop.f32.mrf.mxu0 }
 0x677   : > { %8928 = vst.msk [vmem:[#allocation3 + $0x1e0] sm:$0xff] %vm1696_vm0, %v8864_v5  ;;  %v8863_v36 = vmax.f32 %v8799_v34, 0.0  ;;  %v8802_v3 = vadd.f32 %v20296_v19, %v8731_v57  ;;  %v8730_v14 = vadd.f32 %v8651_v37, %v8002_v31 }
 0x678   : > { %v15376_v26 = vpop.f32.mrf.mxu0 }
 0x679   : > { %8927 = vst.msk [vmem:[#allocation3 + $0x1d8] sm:$0xff] %vm1696_vm0, %v8863_v36  ;;  %v8866_v44 = vmax.f32 %v8802_v3, 0.0  ;;  %v8801_v30 = vadd.f32 %v20296_v19, %v8730_v14  ;;  %v8733_v13 = vadd.f32 %v15376_v26, %v8017_v10 }
 0x67a   : > { %v8661_v48 = vpop.f32.mrf.mxu0 }
 0x67b   : > { %8930 = vst.msk [vmem:[#allocation3 + $0x1f0] sm:$0xff] %vm1696_vm0, %v8866_v44  ;;  %v8865_v62 = vmax.f32 %v8801_v30, 0.0  ;;  %v8804_v16 = vadd.f32 %v20296_v19, %v8733_v13  ;;  %v8732_v58 = vadd.f32 %v8661_v48, %v8012_v18 }
 0x67d   : > { %8929 = vst.msk [vmem:[#allocation3 + $0x1e8] sm:$0xff] %vm1696_vm0, %v8865_v62  ;;  %v8868_v60 = vmax.f32 %v8804_v16, 0.0  ;;  %v8803_v40 = vadd.f32 %v20296_v19, %v8732_v58 }
 0x67f   : > { %8932 = vst.msk [vmem:[#allocation3 + $0x200] sm:$0xff] %vm1696_vm0, %v8868_v60  ;;  %v8867_v12 = vmax.f32 %v8803_v40, 0.0 }
 0x681   : > { %8931 = vst.msk [vmem:[#allocation3 + $0x1f8] sm:$0xff] %vm1696_vm0, %v8867_v12 }
 0x682 PF: > { %v15465_v46 = vld [vmem:[%s16576_s30 + $0x34] ss:$8 sps:$4 sm:$0xff]   ;;  %v15906_v59 = vmov 0   ;;  %v15469_v19 = vld [vmem:[%s16576_s30 + $0x30] ss:$8 sps:$4 sm:$0xff]   ;;  %s13016_s18 = sshll.u32 %s15887_s27, 8 }
 0x683   : > { %v15467_v53 = vld [vmem:[%s16576_s30 + $0x74] ss:$8 sps:$4 sm:$0xff]   ;;  %9334 = vmatprep.mubr.bf16.mxu0 %v15906_v59  ;;  %9418 = vmatprep.mubr.bf16.mxu1 %v15906_v59  ;;  %v15470_v6 = vld [vmem:[%s16576_s30 + $0x70] ss:$8 sps:$4 sm:$0xff]   ;;  %v15471_v32 = vld [vmem:[%s16576_s30 + $0x24] ss:$8 sps:$4 sm:$0xff]  }
 0x684   : > { %9310 = vmatprep.subr.bf16.mxu0 %v15465_v46  ;;  %9394 = vmatprep.subr.bf16.mxu1 %v15467_v53  ;;  %v15473_v7 = vld [vmem:[%s16576_s30 + $0x64] ss:$8 sps:$4 sm:$0xff]   ;;  %v15475_v39 = vld [vmem:[%s16576_s30 + $0x20] ss:$8 sps:$4 sm:$0xff]   ;;  %v15477_v33 = vld [vmem:[%s16576_s30 + $0x14] ss:$8 sps:$4 sm:$0xff]  }
 0x685   : > { %9311 = vmatpush1.bf16.msra.mxu0 %v15469_v19  ;;  %9395 = vmatpush1.bf16.msra.mxu1 %v15470_v6  ;;  %v15476_v20 = vld [vmem:[%s16576_s30 + $0x60] ss:$8 sps:$4 sm:$0xff]   ;;  %v15479_v47 = vld [vmem:[%s16576_s30 + $0x54] ss:$8 sps:$4 sm:$0xff]   ;;  %v15481_v49 = vld [vmem:[%s16576_s30 + $0x10] ss:$8 sps:$4 sm:$0xff]  }
 0x686   : > { %9312 = vmatprep.subr.bf16.mxu0 %v15471_v32  ;;  %9396 = vmatprep.subr.bf16.mxu1 %v15473_v7  ;;  %v15482_v52 = vld [vmem:[%s16576_s30 + $0x50] ss:$8 sps:$4 sm:$0xff]   ;;  %v15483_v56 = vld [vmem:[%s16576_s30 + $0x4] ss:$8 sps:$4 sm:$0xff]   ;;  %v15487_v55 = vld [vmem:[%s16576_s30] ss:$8 sps:$4 sm:$0xff]  }
 0x687   : > { %v15485_v28 = vld [vmem:[%s16576_s30 + $0x44] ss:$8 sps:$4 sm:$0xff]   ;;  %v15488_v63 = vld [vmem:[%s16576_s30 + $0x40] ss:$8 sps:$4 sm:$0xff]   ;;  %s20606_s6 = scalar_lea.vmem [#allocation3], %s13016_s18  ;;  %vm9298_vm1 = vcmask 523264  }
 0x688   : > { %v13017_v25 = vld [vmem:[%s20606_s6 + $0x8] sm:$0xff]  ;;  %v13018_v43 = vld [vmem:[%s20606_s6 + $0x10] sm:$0xff]  ;;  %v13019_v22 = vld [vmem:[%s20606_s6 + $0x18] sm:$0xff]  ;;  %p13337_p0 = scmp.ne.s32.totalorder %s15887_s27, 1 }
 0x689   : > { %9313 = vmatpush1.bf16.msra.mxu0 %v15475_v39  ;;  %9397 = vmatpush1.bf16.msra.mxu1 %v15476_v20  ;;  %v15491_v24 = vld [vmem:[%s16576_s30 + $0xb4] ss:$8 sps:$4 sm:$0xff]   ;;  %v8970_v38 = vpack.c.bf16 %v13017_v25, %v13017_v25  ;;  %v8971_v23 = vpack.c.bf16 %v13018_v43, %v13018_v43  ;;  %v15489_v54 = vld [vmem:[%s16576_s30 + $0xb0] ss:$8 sps:$4 sm:$0xff]   ;;  %v15497_v29 = vld [vmem:[%s16576_s30 + $0xa4] ss:$8 sps:$4 sm:$0xff]   ;;  %v8972_v5 = vpack.c.bf16 %v13019_v22, %v13019_v22  ;;  %s21338_s16 = scalar_lea.vmem (!%p13337_p0), %s21015_s10, %s21354_s8 }
 0x68a   : > { %9314 = vmatprep.subr.bf16.mxu0 %v15477_v33  ;;  %9398 = vmatprep.subr.bf16.mxu1 %v15479_v47  ;;  %v15494_v17 = vld [vmem:[%s16576_s30 + $0xf4] ss:$8 sps:$4 sm:$0xff]   ;;  %v15492_v1 = vld [vmem:[%s16576_s30 + $0xf0] ss:$8 sps:$4 sm:$0xff]   ;;  %v15500_v4 = vld [vmem:[%s16576_s30 + $0xe4] ss:$8 sps:$4 sm:$0xff]  }
 0x68b   : > { %v15495_v21 = vld [vmem:[%s16576_s30 + $0xa0] ss:$8 sps:$4 sm:$0xff]   ;;  %v15503_v15 = vld [vmem:[%s16576_s30 + $0x94] ss:$8 sps:$4 sm:$0xff]   ;;  %v15501_v9 = vld [vmem:[%s16576_s30 + $0x90] ss:$8 sps:$4 sm:$0xff]  }
 0x68c   : > { %v15498_v11 = vld [vmem:[%s16576_s30 + $0xe0] ss:$8 sps:$4 sm:$0xff]   ;;  %v15506_v0 = vld [vmem:[%s16576_s30 + $0xd4] ss:$8 sps:$4 sm:$0xff]   ;;  %v15504_v45 = vld [vmem:[%s16576_s30 + $0xd0] ss:$8 sps:$4 sm:$0xff]  }
 0x68d   : > { %9315 = vmatpush1.bf16.msra.mxu0 %v15481_v49  ;;  %9399 = vmatpush1.bf16.msra.mxu1 %v15482_v52  ;;  %v15509_v42 = vld [vmem:[%s16576_s30 + $0x84] ss:$8 sps:$4 sm:$0xff]   ;;  %v15507_v8 = vld [vmem:[%s16576_s30 + $0x80] ss:$8 sps:$4 sm:$0xff]   ;;  %v13020_v2 = vld [vmem:[%s20606_s6 + $0x20] sm:$0xff]  ;;  %s21339_s28 = sld [smem:[#allocation60_spill]] (!%p13337_p0) }
 0x68e   : > { %9316 = vmatprep.subr.bf16.mxu0 %v15483_v56  ;;  %9400 = vmatprep.subr.bf16.mxu1 %v15485_v28  ;;  %v15512_v61 = vld [vmem:[%s16576_s30 + $0xc4] ss:$8 sps:$4 sm:$0xff]   ;;  %v15510_v50 = vld [vmem:[%s16576_s30 + $0xc0] ss:$8 sps:$4 sm:$0xff]   ;;  %v15515_v35 = vld [vmem:[%s16576_s30 + $0x134] ss:$8 sps:$4 sm:$0xff]   ;;  %v8973_v34 = vpack.c.bf16 %v13020_v2, %v13020_v2 }
 0x68f   : > { %v15518_v31 = vld [vmem:[%s16576_s30 + $0x174] ss:$8 sps:$4 sm:$0xff]   ;;  %v15513_v57 = vld [vmem:[%s16576_s30 + $0x130] ss:$8 sps:$4 sm:$0xff]   ;;  %v15521_v37 = vld [vmem:[%s16576_s30 + $0x124] ss:$8 sps:$4 sm:$0xff]  }
 0x690   : > { %v15516_v27 = vld [vmem:[%s16576_s30 + $0x170] ss:$8 sps:$4 sm:$0xff]   ;;  %v15524_v51 = vld [vmem:[%s16576_s30 + $0x164] ss:$8 sps:$4 sm:$0xff]   ;;  %v15519_v10 = vld [vmem:[%s16576_s30 + $0x120] ss:$8 sps:$4 sm:$0xff]  }
 0x691   : > { %9317 = vmatpush1.bf16.msra.mxu0 %v15487_v55  ;;  %9401 = vmatpush1.bf16.msra.mxu1 %v15488_v63  ;;  %v15522_v36 = vld [vmem:[%s16576_s30 + $0x160] ss:$8 sps:$4 sm:$0xff]   ;;  %v15527_v3 = vld [vmem:[%s16576_s30 + $0x114] ss:$8 sps:$4 sm:$0xff]   ;;  %v15525_v26 = vld [vmem:[%s16576_s30 + $0x110] ss:$8 sps:$4 sm:$0xff]  }
 0x692   : > { %9478 = vmatprep.subr.bf16.mxu0 %v15491_v24  ;;  %9562 = vmatprep.subr.bf16.mxu1 %v15494_v17  ;;  %v15530_v14 = vld [vmem:[%s16576_s30 + $0x154] ss:$8 sps:$4 sm:$0xff]   ;;  %v15528_v41 = vld [vmem:[%s16576_s30 + $0x150] ss:$8 sps:$4 sm:$0xff]   ;;  %v15533_v18 = vld [vmem:[%s16576_s30 + $0x104] ss:$8 sps:$4 sm:$0xff]  }
 0x693   : > { %v15536_v44 = vld [vmem:[%s16576_s30 + $0x144] ss:$8 sps:$4 sm:$0xff]   ;;  %v15531_v30 = vld [vmem:[%s16576_s30 + $0x100] ss:$8 sps:$4 sm:$0xff]   ;;  %v13021_v48 = vld [vmem:[%s20606_s6 + $0x28] sm:$0xff] }
 0x694   : > { %13057 = vmatmul.mubr.msk.bf16.vlgmr.msra.gmra.mxu0 %vm9298_vm1, %v8970_v38  ;;  %13066 = vmatmul.mubr.msk.bf16.vlgmr.msra.gmra.mxu1 %vm9298_vm1, %v8971_v23  ;;  %v15534_v13 = vld [vmem:[%s16576_s30 + $0x140] ss:$8 sps:$4 sm:$0xff]   ;;  %v15539_v16 = vld [vmem:[%s16576_s30 + $0x1b4] ss:$8 sps:$4 sm:$0xff]   ;;  %v8974_v60 = vpack.c.bf16 %v13021_v48, %v13021_v48  ;;  %v15537_v12 = vld [vmem:[%s16576_s30 + $0x1b0] ss:$8 sps:$4 sm:$0xff]  }
 0x695   : > { %9479 = vmatpush1.bf16.msra.mxu0 %v15489_v54  ;;  %9563 = vmatpush1.bf16.msra.mxu1 %v15492_v1  ;;  %v13022_v62 = vld [vmem:[%s20606_s6 + $0x30] sm:$0xff]  ;;  %v15542_v58 = vld [vmem:[%s16576_s30 + $0x1f4] ss:$8 sps:$4 sm:$0xff]   ;;  %v15540_v46 = vld [vmem:[%s16576_s30 + $0x1f0] ss:$8 sps:$4 sm:$0xff]  }
 0x696   : > { %9480 = vmatprep.subr.bf16.mxu0 %v15497_v29  ;;  %9564 = vmatprep.subr.bf16.mxu1 %v15500_v4  ;;  %v8975_v40 = vpack.c.bf16 %v13022_v62, %v13022_v62  ;;  %v15545_v53 = vld [vmem:[%s16576_s30 + $0x1a4] ss:$8 sps:$4 sm:$0xff]   ;;  %v15543_v6 = vld [vmem:[%s16576_s30 + $0x1a0] ss:$8 sps:$4 sm:$0xff]   ;;  %v15551_v7 = vld [vmem:[%s16576_s30 + $0x194] ss:$8 sps:$4 sm:$0xff]  }
 0x697   : > { %9502 = vmatprep.mubr.bf16.mxu0 %v15906_v59  ;;  %9586 = vmatprep.mubr.bf16.mxu1 %v15906_v59  ;;  %v15548_v19 = vld [vmem:[%s16576_s30 + $0x1e4] ss:$8 sps:$4 sm:$0xff]   ;;  %v15546_v32 = vld [vmem:[%s16576_s30 + $0x1e0] ss:$8 sps:$4 sm:$0xff]   ;;  %v15554_v39 = vld [vmem:[%s16576_s30 + $0x1d4] ss:$8 sps:$4 sm:$0xff]  }
 0x698   : > { %v15549_v20 = vld [vmem:[%s16576_s30 + $0x190] ss:$8 sps:$4 sm:$0xff]   ;;  %v15557_v47 = vld [vmem:[%s16576_s30 + $0x184] ss:$8 sps:$4 sm:$0xff]   ;;  %v15555_v52 = vld [vmem:[%s16576_s30 + $0x180] ss:$8 sps:$4 sm:$0xff]  }
 0x699   : > { %9481 = vmatpush1.bf16.msra.mxu0 %v15495_v21  ;;  %9565 = vmatpush1.bf16.msra.mxu1 %v15498_v11  ;;  %v15552_v33 = vld [vmem:[%s16576_s30 + $0x1d0] ss:$8 sps:$4 sm:$0xff]   ;;  %v15560_v49 = vld [vmem:[%s16576_s30 + $0x1c4] ss:$8 sps:$4 sm:$0xff]   ;;  %v15558_v56 = vld [vmem:[%s16576_s30 + $0x1c0] ss:$8 sps:$4 sm:$0xff]  }
 0x69a   : > { %9482 = vmatprep.subr.bf16.mxu0 %v15503_v15  ;;  %9566 = vmatprep.subr.bf16.mxu1 %v15506_v0  ;;  %v13023_v28 = vld [vmem:[%s20606_s6 + $0x38] sm:$0xff]  ;;  %v13024_v55 = vld [vmem:[%s20606_s6 + $0x40] sm:$0xff] }
 0x69b   : > { %v15563_v63 = vld [vmem:[%s16576_s30 + $0x234] ss:$8 sps:$4 sm:$0xff]   ;;  %v8976_v43 = vpack.c.bf16 %v13023_v28, %v13023_v28  ;;  %v8977_v24 = vpack.c.bf16 %v13024_v55, %v13024_v55  ;;  %v15561_v17 = vld [vmem:[%s16576_s30 + $0x230] ss:$8 sps:$4 sm:$0xff]   ;;  %v15569_v23 = vld [vmem:[%s16576_s30 + $0x224] ss:$8 sps:$4 sm:$0xff]  }
 0x69c   : > { %v15566_v25 = vld [vmem:[%s16576_s30 + $0x274] ss:$8 sps:$4 sm:$0xff]   ;;  %v15564_v38 = vld [vmem:[%s16576_s30 + $0x270] ss:$8 sps:$4 sm:$0xff]   ;;  %v15572_v54 = vld [vmem:[%s16576_s30 + $0x264] ss:$8 sps:$4 sm:$0xff]  }
 0x69d   : > { %9483 = vmatpush1.bf16.msra.mxu0 %v15501_v9  ;;  %9567 = vmatpush1.bf16.msra.mxu1 %v15504_v45  ;;  %v15567_v1 = vld [vmem:[%s16576_s30 + $0x220] ss:$8 sps:$4 sm:$0xff]   ;;  %v15575_v4 = vld [vmem:[%s16576_s30 + $0x214] ss:$8 sps:$4 sm:$0xff]   ;;  %v15573_v11 = vld [vmem:[%s16576_s30 + $0x210] ss:$8 sps:$4 sm:$0xff]  }
 0x69e   : > { %9484 = vmatprep.subr.bf16.mxu0 %v15509_v42  ;;  %9568 = vmatprep.subr.bf16.mxu1 %v15512_v61  ;;  %v15570_v29 = vld [vmem:[%s16576_s30 + $0x260] ss:$8 sps:$4 sm:$0xff]   ;;  %v15578_v21 = vld [vmem:[%s16576_s30 + $0x254] ss:$8 sps:$4 sm:$0xff]   ;;  %v15576_v15 = vld [vmem:[%s16576_s30 + $0x250] ss:$8 sps:$4 sm:$0xff]  }
 0x69f   : > { %v15581_v0 = vld [vmem:[%s16576_s30 + $0x204] ss:$8 sps:$4 sm:$0xff]   ;;  %v15579_v45 = vld [vmem:[%s16576_s30 + $0x200] ss:$8 sps:$4 sm:$0xff]   ;;  %v13025_v61 = vld [vmem:[%s20606_s6 + $0x48] sm:$0xff] }
 0x6a0   : > { %v15584_v9 = vld [vmem:[%s16576_s30 + $0x244] ss:$8 sps:$4 sm:$0xff]   ;;  %v15582_v42 = vld [vmem:[%s16576_s30 + $0x240] ss:$8 sps:$4 sm:$0xff]   ;;  %v15590_v22 = vld [vmem:[%s16576_s30 + $0x2f4] ss:$8 sps:$4 sm:$0xff]   ;;  %v8978_v2 = vpack.c.bf16 %v13025_v61, %v13025_v61 }
 0x6a1   : > { %9485 = vmatpush1.bf16.msra.mxu0 %v15507_v8  ;;  %9569 = vmatpush1.bf16.msra.mxu1 %v15510_v50  ;;  %v13026_v8 = vld [vmem:[%s20606_s6 + $0x50] sm:$0xff]  ;;  %v15587_v50 = vld [vmem:[%s16576_s30 + $0x2b4] ss:$8 sps:$4 sm:$0xff]  }
 0x6a2   : > { %9646 = vmatprep.subr.bf16.mxu0 %v15515_v35  ;;  %9730 = vmatprep.subr.bf16.mxu1 %v15518_v31  ;;  %v8979_v35 = vpack.c.bf16 %v13026_v8, %v13026_v8  ;;  %v15585_v31 = vld [vmem:[%s16576_s30 + $0x2b0] ss:$8 sps:$4 sm:$0xff]   ;;  %v15614_v48 = vld [vmem:[%s16576_s30 + $0x374] ss:$8 sps:$4 sm:$0xff]  }
 0x6a3   : > { %v15638_v28 = vld [vmem:[%s16576_s30 + $0x3f4] ss:$8 sps:$4 sm:$0xff]  }
 0x6a4   : > { %13075 = vmatmul.mubr.msk.bf16.vlgmr.msra.gmra.mxu0 %vm9298_vm1, %v8972_v5  ;;  %13084 = vmatmul.mubr.msk.bf16.vlgmr.msra.gmra.mxu1 %vm9298_vm1, %v8973_v34  ;;  %v15588_v5 = vld [vmem:[%s16576_s30 + $0x2f0] ss:$8 sps:$4 sm:$0xff]   ;;  %v15593_v34 = vld [vmem:[%s16576_s30 + $0x2a4] ss:$8 sps:$4 sm:$0xff]   ;;  %v15662_v61 = vld [vmem:[%s16576_s30 + $0x474] ss:$8 sps:$4 sm:$0xff]  }
 0x6a5   : > { %9647 = vmatpush1.bf16.msra.mxu0 %v15513_v57  ;;  %9731 = vmatpush1.bf16.msra.mxu1 %v15516_v27  ;;  %v15596_v57 = vld [vmem:[%s16576_s30 + $0x2e4] ss:$8 sps:$4 sm:$0xff]   ;;  %v15591_v27 = vld [vmem:[%s16576_s30 + $0x2a0] ss:$8 sps:$4 sm:$0xff]  }
 0x6a6   : > { %9648 = vmatprep.subr.bf16.mxu0 %v15521_v37  ;;  %9732 = vmatprep.subr.bf16.mxu1 %v15524_v51  ;;  %v15594_v37 = vld [vmem:[%s16576_s30 + $0x2e0] ss:$8 sps:$4 sm:$0xff]   ;;  %v15599_v51 = vld [vmem:[%s16576_s30 + $0x294] ss:$8 sps:$4 sm:$0xff]  }
 0x6a7   : > { %9670 = vmatprep.mubr.bf16.mxu0 %v15906_v59  ;;  %9754 = vmatprep.mubr.bf16.mxu1 %v15906_v59 }
 0x6a9   : > { %9649 = vmatpush1.bf16.msra.mxu0 %v15519_v10  ;;  %9733 = vmatpush1.bf16.msra.mxu1 %v15522_v36  ;;  %v15602_v10 = vld [vmem:[%s16576_s30 + $0x2d4] ss:$8 sps:$4 sm:$0xff]   ;;  %v15597_v36 = vld [vmem:[%s16576_s30 + $0x290] ss:$8 sps:$4 sm:$0xff]  }
 0x6aa   : > { %9650 = vmatprep.subr.bf16.mxu0 %v15527_v3  ;;  %9734 = vmatprep.subr.bf16.mxu1 %v15530_v14  ;;  %v15600_v3 = vld [vmem:[%s16576_s30 + $0x2d0] ss:$8 sps:$4 sm:$0xff]   ;;  %v15605_v14 = vld [vmem:[%s16576_s30 + $0x284] ss:$8 sps:$4 sm:$0xff]  }
 0x6ad   : > { %9651 = vmatpush1.bf16.msra.mxu0 %v15525_v26  ;;  %9735 = vmatpush1.bf16.msra.mxu1 %v15528_v41  ;;  %v15608_v26 = vld [vmem:[%s16576_s30 + $0x2c4] ss:$8 sps:$4 sm:$0xff]   ;;  %v15603_v41 = vld [vmem:[%s16576_s30 + $0x280] ss:$8 sps:$4 sm:$0xff]  }
 0x6ae   : > { %9652 = vmatprep.subr.bf16.mxu0 %v15533_v18  ;;  %9736 = vmatprep.subr.bf16.mxu1 %v15536_v44  ;;  %v15606_v18 = vld [vmem:[%s16576_s30 + $0x2c0] ss:$8 sps:$4 sm:$0xff]  }
 0x6af   : > { %v13027_v44 = vld [vmem:[%s20606_s6 + $0x58] sm:$0xff] }
 0x6b0   : > { %v8980_v62 = vpack.c.bf16 %v13027_v44, %v13027_v44  ;;  %v15686_v44 = vld [vmem:[%s16576_s30 + $0x4f4] ss:$8 sps:$4 sm:$0xff]  }
 0x6b1   : > { %9653 = vmatpush1.bf16.msra.mxu0 %v15531_v30  ;;  %9737 = vmatpush1.bf16.msra.mxu1 %v15534_v13  ;;  %v13028_v30 = vld [vmem:[%s20606_s6 + $0x60] sm:$0xff] }
 0x6b2   : > { %9814 = vmatprep.subr.bf16.mxu0 %v15539_v16  ;;  %9898 = vmatprep.subr.bf16.mxu1 %v15542_v58  ;;  %v15611_v13 = vld [vmem:[%s16576_s30 + $0x334] ss:$8 sps:$4 sm:$0xff]   ;;  %v8981_v16 = vpack.c.bf16 %v13028_v30, %v13028_v30  ;;  %v15609_v58 = vld [vmem:[%s16576_s30 + $0x330] ss:$8 sps:$4 sm:$0xff]  }
 0x6b4   : > { %13093 = vmatmul.mubr.msk.bf16.vlgmr.msra.gmra.mxu0 %vm9298_vm1, %v8974_v60  ;;  %13102 = vmatmul.mubr.msk.bf16.vlgmr.msra.gmra.mxu1 %vm9298_vm1, %v8975_v40  ;;  %v15612_v60 = vld [vmem:[%s16576_s30 + $0x370] ss:$8 sps:$4 sm:$0xff]   ;;  %v15617_v40 = vld [vmem:[%s16576_s30 + $0x324] ss:$8 sps:$4 sm:$0xff]  }
 0x6b5   : > { %9815 = vmatpush1.bf16.msra.mxu0 %v15537_v12  ;;  %9899 = vmatpush1.bf16.msra.mxu1 %v15540_v46  ;;  %v15620_v12 = vld [vmem:[%s16576_s30 + $0x364] ss:$8 sps:$4 sm:$0xff]   ;;  %v15615_v46 = vld [vmem:[%s16576_s30 + $0x320] ss:$8 sps:$4 sm:$0xff]  }
 0x6b6   : > { %9816 = vmatprep.subr.bf16.mxu0 %v15545_v53  ;;  %9900 = vmatprep.subr.bf16.mxu1 %v15548_v19  ;;  %v15618_v53 = vld [vmem:[%s16576_s30 + $0x360] ss:$8 sps:$4 sm:$0xff]   ;;  %v15623_v19 = vld [vmem:[%s16576_s30 + $0x314] ss:$8 sps:$4 sm:$0xff]  }
 0x6b7   : > { %9838 = vmatprep.mubr.bf16.mxu0 %v15906_v59  ;;  %9922 = vmatprep.mubr.bf16.mxu1 %v15906_v59 }
 0x6b9   : > { %9817 = vmatpush1.bf16.msra.mxu0 %v15543_v6  ;;  %9901 = vmatpush1.bf16.msra.mxu1 %v15546_v32  ;;  %v15626_v6 = vld [vmem:[%s16576_s30 + $0x354] ss:$8 sps:$4 sm:$0xff]   ;;  %v15621_v32 = vld [vmem:[%s16576_s30 + $0x310] ss:$8 sps:$4 sm:$0xff]  }
 0x6ba   : > { %9818 = vmatprep.subr.bf16.mxu0 %v15551_v7  ;;  %9902 = vmatprep.subr.bf16.mxu1 %v15554_v39  ;;  %v15624_v7 = vld [vmem:[%s16576_s30 + $0x350] ss:$8 sps:$4 sm:$0xff]   ;;  %v15629_v39 = vld [vmem:[%s16576_s30 + $0x304] ss:$8 sps:$4 sm:$0xff]  }
 0x6bd   : > { %9819 = vmatpush1.bf16.msra.mxu0 %v15549_v20  ;;  %9903 = vmatpush1.bf16.msra.mxu1 %v15552_v33  ;;  %v15632_v20 = vld [vmem:[%s16576_s30 + $0x344] ss:$8 sps:$4 sm:$0xff]   ;;  %v15627_v33 = vld [vmem:[%s16576_s30 + $0x300] ss:$8 sps:$4 sm:$0xff]  }
 0x6be   : > { %9820 = vmatprep.subr.bf16.mxu0 %v15557_v47  ;;  %9904 = vmatprep.subr.bf16.mxu1 %v15560_v49  ;;  %v15630_v47 = vld [vmem:[%s16576_s30 + $0x340] ss:$8 sps:$4 sm:$0xff]   ;;  %v13029_v49 = vld [vmem:[%s20606_s6 + $0x68] sm:$0xff] }
 0x6bf   : > { %v8982_v55 = vpack.c.bf16 %v13029_v49, %v13029_v49  ;;  %v15710_v49 = vld [vmem:[%s16576_s30 + $0x574] ss:$8 sps:$4 sm:$0xff]  }
 0x6c1   : > { %9821 = vmatpush1.bf16.msra.mxu0 %v15555_v52  ;;  %9905 = vmatpush1.bf16.msra.mxu1 %v15558_v56  ;;  %v13030_v52 = vld [vmem:[%s20606_s6 + $0x70] sm:$0xff]  ;;  %v15635_v56 = vld [vmem:[%s16576_s30 + $0x3b4] ss:$8 sps:$4 sm:$0xff]  }
 0x6c2   : > { %9982 = vmatprep.subr.bf16.mxu0 %v15563_v63  ;;  %10066 = vmatprep.subr.bf16.mxu1 %v15566_v25  ;;  %v8983_v63 = vpack.c.bf16 %v13030_v52, %v13030_v52  ;;  %v15633_v25 = vld [vmem:[%s16576_s30 + $0x3b0] ss:$8 sps:$4 sm:$0xff]  }
 0x6c4   : > { %13111 = vmatmul.mubr.msk.bf16.vlgmr.msra.gmra.mxu0 %vm9298_vm1, %v8976_v43  ;;  %13120 = vmatmul.mubr.msk.bf16.vlgmr.msra.gmra.mxu1 %vm9298_vm1, %v8977_v24  ;;  %v15636_v43 = vld [vmem:[%s16576_s30 + $0x3f0] ss:$8 sps:$4 sm:$0xff]   ;;  %v15641_v24 = vld [vmem:[%s16576_s30 + $0x3a4] ss:$8 sps:$4 sm:$0xff]  }
 0x6c5   : > { %9983 = vmatpush1.bf16.msra.mxu0 %v15561_v17  ;;  %10067 = vmatpush1.bf16.msra.mxu1 %v15564_v38  ;;  %v15644_v17 = vld [vmem:[%s16576_s30 + $0x3e4] ss:$8 sps:$4 sm:$0xff]   ;;  %v15639_v38 = vld [vmem:[%s16576_s30 + $0x3a0] ss:$8 sps:$4 sm:$0xff]  }
 0x6c6   : > { %9984 = vmatprep.subr.bf16.mxu0 %v15569_v23  ;;  %10068 = vmatprep.subr.bf16.mxu1 %v15572_v54  ;;  %v15642_v23 = vld [vmem:[%s16576_s30 + $0x3e0] ss:$8 sps:$4 sm:$0xff]   ;;  %v15647_v54 = vld [vmem:[%s16576_s30 + $0x394] ss:$8 sps:$4 sm:$0xff]  }
 0x6c7   : > { %10006 = vmatprep.mubr.bf16.mxu0 %v15906_v59  ;;  %10090 = vmatprep.mubr.bf16.mxu1 %v15906_v59 }
 0x6c9   : > { %9985 = vmatpush1.bf16.msra.mxu0 %v15567_v1  ;;  %10069 = vmatpush1.bf16.msra.mxu1 %v15570_v29  ;;  %v15650_v1 = vld [vmem:[%s16576_s30 + $0x3d4] ss:$8 sps:$4 sm:$0xff]   ;;  %v15645_v29 = vld [vmem:[%s16576_s30 + $0x390] ss:$8 sps:$4 sm:$0xff]  }
 0x6ca   : > { %9986 = vmatprep.subr.bf16.mxu0 %v15575_v4  ;;  %10070 = vmatprep.subr.bf16.mxu1 %v15578_v21  ;;  %v15648_v4 = vld [vmem:[%s16576_s30 + $0x3d0] ss:$8 sps:$4 sm:$0xff]   ;;  %v15653_v21 = vld [vmem:[%s16576_s30 + $0x384] ss:$8 sps:$4 sm:$0xff]  }
 0x6cd   : > { %9987 = vmatpush1.bf16.msra.mxu0 %v15573_v11  ;;  %10071 = vmatpush1.bf16.msra.mxu1 %v15576_v15  ;;  %v15656_v11 = vld [vmem:[%s16576_s30 + $0x3c4] ss:$8 sps:$4 sm:$0xff]   ;;  %v15651_v15 = vld [vmem:[%s16576_s30 + $0x380] ss:$8 sps:$4 sm:$0xff]  }
 0x6ce   : > { %9988 = vmatprep.subr.bf16.mxu0 %v15581_v0  ;;  %10072 = vmatprep.subr.bf16.mxu1 %v15584_v9  ;;  %v15654_v0 = vld [vmem:[%s16576_s30 + $0x3c0] ss:$8 sps:$4 sm:$0xff]  }
 0x6cf   : > { %v13031_v9 = vld [vmem:[%s20606_s6 + $0x78] sm:$0xff] }
 0x6d0   : > { %v8984_v8 = vpack.c.bf16 %v13031_v9, %v13031_v9  ;;  %v15734_v9 = vld [vmem:[%s16576_s30 + $0x5f4] ss:$8 sps:$4 sm:$0xff]  }
 0x6d1   : > { %9989 = vmatpush1.bf16.msra.mxu0 %v15579_v45  ;;  %10073 = vmatpush1.bf16.msra.mxu1 %v15582_v42  ;;  %v13032_v45 = vld [vmem:[%s20606_s6 + $0x80] sm:$0xff] }
 0x6d2   : > { %10150 = vmatprep.subr.bf16.mxu0 %v15587_v50  ;;  %10234 = vmatprep.subr.bf16.mxu1 %v15590_v22  ;;  %v15659_v42 = vld [vmem:[%s16576_s30 + $0x434] ss:$8 sps:$4 sm:$0xff]   ;;  %v8985_v50 = vpack.c.bf16 %v13032_v45, %v13032_v45  ;;  %v15657_v22 = vld [vmem:[%s16576_s30 + $0x430] ss:$8 sps:$4 sm:$0xff]  }
 0x6d4   : > { %13129 = vmatmul.mubr.msk.bf16.vlgmr.msra.gmra.mxu0 %vm9298_vm1, %v8978_v2  ;;  %13138 = vmatmul.mubr.msk.bf16.vlgmr.msra.gmra.mxu1 %vm9298_vm1, %v8979_v35  ;;  %v15660_v2 = vld [vmem:[%s16576_s30 + $0x470] ss:$8 sps:$4 sm:$0xff]   ;;  %v15665_v35 = vld [vmem:[%s16576_s30 + $0x424] ss:$8 sps:$4 sm:$0xff]  }
 0x6d5   : > { %10151 = vmatpush1.bf16.msra.mxu0 %v15585_v31  ;;  %10235 = vmatpush1.bf16.msra.mxu1 %v15588_v5  ;;  %v15668_v31 = vld [vmem:[%s16576_s30 + $0x464] ss:$8 sps:$4 sm:$0xff]   ;;  %v15663_v5 = vld [vmem:[%s16576_s30 + $0x420] ss:$8 sps:$4 sm:$0xff]  }
 0x6d6   : > { %10152 = vmatprep.subr.bf16.mxu0 %v15593_v34  ;;  %10236 = vmatprep.subr.bf16.mxu1 %v15596_v57  ;;  %v15666_v34 = vld [vmem:[%s16576_s30 + $0x460] ss:$8 sps:$4 sm:$0xff]   ;;  %v15671_v57 = vld [vmem:[%s16576_s30 + $0x414] ss:$8 sps:$4 sm:$0xff]  }
 0x6d7   : > { %10174 = vmatprep.mubr.bf16.mxu0 %v15906_v59  ;;  %10258 = vmatprep.mubr.bf16.mxu1 %v15906_v59 }
 0x6d9   : > { %10153 = vmatpush1.bf16.msra.mxu0 %v15591_v27  ;;  %10237 = vmatpush1.bf16.msra.mxu1 %v15594_v37  ;;  %v15674_v27 = vld [vmem:[%s16576_s30 + $0x454] ss:$8 sps:$4 sm:$0xff]   ;;  %v15669_v37 = vld [vmem:[%s16576_s30 + $0x410] ss:$8 sps:$4 sm:$0xff]  }
 0x6da   : > { %10154 = vmatprep.subr.bf16.mxu0 %v15599_v51  ;;  %10238 = vmatprep.subr.bf16.mxu1 %v15602_v10  ;;  %v15672_v51 = vld [vmem:[%s16576_s30 + $0x450] ss:$8 sps:$4 sm:$0xff]   ;;  %v15677_v10 = vld [vmem:[%s16576_s30 + $0x404] ss:$8 sps:$4 sm:$0xff]  }
 0x6dd   : > { %10155 = vmatpush1.bf16.msra.mxu0 %v15597_v36  ;;  %10239 = vmatpush1.bf16.msra.mxu1 %v15600_v3  ;;  %v15680_v36 = vld [vmem:[%s16576_s30 + $0x444] ss:$8 sps:$4 sm:$0xff]   ;;  %v15675_v3 = vld [vmem:[%s16576_s30 + $0x400] ss:$8 sps:$4 sm:$0xff]  }
 0x6de   : > { %10156 = vmatprep.subr.bf16.mxu0 %v15605_v14  ;;  %10240 = vmatprep.subr.bf16.mxu1 %v15608_v26  ;;  %v15678_v14 = vld [vmem:[%s16576_s30 + $0x440] ss:$8 sps:$4 sm:$0xff]   ;;  %v13033_v26 = vld [vmem:[%s20606_s6 + $0x88] sm:$0xff] }
 0x6df   : > { %v8986_v30 = vpack.c.bf16 %v13033_v26, %v13033_v26  ;;  %v15758_v26 = vld [vmem:[%s16576_s30 + $0x674] ss:$8 sps:$4 sm:$0xff]  }
 0x6e1   : > { %10157 = vmatpush1.bf16.msra.mxu0 %v15603_v41  ;;  %10241 = vmatpush1.bf16.msra.mxu1 %v15606_v18  ;;  %v13034_v41 = vld [vmem:[%s20606_s6 + $0x90] sm:$0xff]  ;;  %v15683_v18 = vld [vmem:[%s16576_s30 + $0x4b4] ss:$8 sps:$4 sm:$0xff]  }
 0x6e2   : > { %10318 = vmatprep.subr.bf16.mxu0 %v15611_v13  ;;  %10402 = vmatprep.subr.bf16.mxu1 %v15614_v48  ;;  %v8987_v13 = vpack.c.bf16 %v13034_v41, %v13034_v41  ;;  %v15681_v48 = vld [vmem:[%s16576_s30 + $0x4b0] ss:$8 sps:$4 sm:$0xff]  }
 0x6e4   : > { %13147 = vmatmul.mubr.msk.bf16.vlgmr.msra.gmra.mxu0 %vm9298_vm1, %v8980_v62  ;;  %13156 = vmatmul.mubr.msk.bf16.vlgmr.msra.gmra.mxu1 %vm9298_vm1, %v8981_v16  ;;  %v15684_v62 = vld [vmem:[%s16576_s30 + $0x4f0] ss:$8 sps:$4 sm:$0xff]   ;;  %v15689_v16 = vld [vmem:[%s16576_s30 + $0x4a4] ss:$8 sps:$4 sm:$0xff]  }
 0x6e5   : > { %10319 = vmatpush1.bf16.msra.mxu0 %v15609_v58  ;;  %10403 = vmatpush1.bf16.msra.mxu1 %v15612_v60  ;;  %v15692_v58 = vld [vmem:[%s16576_s30 + $0x4e4] ss:$8 sps:$4 sm:$0xff]   ;;  %v15687_v60 = vld [vmem:[%s16576_s30 + $0x4a0] ss:$8 sps:$4 sm:$0xff]  }
 0x6e6   : > { %10320 = vmatprep.subr.bf16.mxu0 %v15617_v40  ;;  %10404 = vmatprep.subr.bf16.mxu1 %v15620_v12  ;;  %v15690_v40 = vld [vmem:[%s16576_s30 + $0x4e0] ss:$8 sps:$4 sm:$0xff]   ;;  %v15695_v12 = vld [vmem:[%s16576_s30 + $0x494] ss:$8 sps:$4 sm:$0xff]  }
 0x6e7   : > { %10342 = vmatprep.mubr.bf16.mxu0 %v15906_v59  ;;  %10426 = vmatprep.mubr.bf16.mxu1 %v15906_v59 }
 0x6e9   : > { %10321 = vmatpush1.bf16.msra.mxu0 %v15615_v46  ;;  %10405 = vmatpush1.bf16.msra.mxu1 %v15618_v53  ;;  %v15698_v46 = vld [vmem:[%s16576_s30 + $0x4d4] ss:$8 sps:$4 sm:$0xff]   ;;  %v15693_v53 = vld [vmem:[%s16576_s30 + $0x490] ss:$8 sps:$4 sm:$0xff]  }
 0x6ea   : > { %10322 = vmatprep.subr.bf16.mxu0 %v15623_v19  ;;  %10406 = vmatprep.subr.bf16.mxu1 %v15626_v6  ;;  %v15696_v19 = vld [vmem:[%s16576_s30 + $0x4d0] ss:$8 sps:$4 sm:$0xff]   ;;  %v15701_v6 = vld [vmem:[%s16576_s30 + $0x484] ss:$8 sps:$4 sm:$0xff]  }
 0x6ed   : > { %10323 = vmatpush1.bf16.msra.mxu0 %v15621_v32  ;;  %10407 = vmatpush1.bf16.msra.mxu1 %v15624_v7  ;;  %v15704_v32 = vld [vmem:[%s16576_s30 + $0x4c4] ss:$8 sps:$4 sm:$0xff]   ;;  %v15699_v7 = vld [vmem:[%s16576_s30 + $0x480] ss:$8 sps:$4 sm:$0xff]  }
 0x6ee   : > { %10324 = vmatprep.subr.bf16.mxu0 %v15629_v39  ;;  %10408 = vmatprep.subr.bf16.mxu1 %v15632_v20  ;;  %v15702_v39 = vld [vmem:[%s16576_s30 + $0x4c0] ss:$8 sps:$4 sm:$0xff]  }
 0x6ef   : > { %v13035_v20 = vld [vmem:[%s20606_s6 + $0x98] sm:$0xff] }
 0x6f0   : > { %v8988_v52 = vpack.c.bf16 %v13035_v20, %v13035_v20  ;;  %v15782_v20 = vld [vmem:[%s16576_s30 + $0x6f4] ss:$8 sps:$4 sm:$0xff]  }
 0x6f1   : > { %10325 = vmatpush1.bf16.msra.mxu0 %v15627_v33  ;;  %10409 = vmatpush1.bf16.msra.mxu1 %v15630_v47  ;;  %v13036_v33 = vld [vmem:[%s20606_s6 + $0xa0] sm:$0xff] }
 0x6f2   : > { %10486 = vmatprep.subr.bf16.mxu0 %v15635_v56  ;;  %10570 = vmatprep.subr.bf16.mxu1 %v15638_v28  ;;  %v15707_v47 = vld [vmem:[%s16576_s30 + $0x534] ss:$8 sps:$4 sm:$0xff]   ;;  %v8989_v56 = vpack.c.bf16 %v13036_v33, %v13036_v33  ;;  %v15705_v28 = vld [vmem:[%s16576_s30 + $0x530] ss:$8 sps:$4 sm:$0xff]  }
 0x6f4   : > { %13165 = vmatmul.mubr.msk.bf16.vlgmr.msra.gmra.mxu0 %vm9298_vm1, %v8982_v55  ;;  %13174 = vmatmul.mubr.msk.bf16.vlgmr.msra.gmra.mxu1 %vm9298_vm1, %v8983_v63  ;;  %v15708_v55 = vld [vmem:[%s16576_s30 + $0x570] ss:$8 sps:$4 sm:$0xff]   ;;  %v15713_v63 = vld [vmem:[%s16576_s30 + $0x524] ss:$8 sps:$4 sm:$0xff]  }
 0x6f5   : > { %10487 = vmatpush1.bf16.msra.mxu0 %v15633_v25  ;;  %10571 = vmatpush1.bf16.msra.mxu1 %v15636_v43  ;;  %v15716_v25 = vld [vmem:[%s16576_s30 + $0x564] ss:$8 sps:$4 sm:$0xff]   ;;  %v15711_v43 = vld [vmem:[%s16576_s30 + $0x520] ss:$8 sps:$4 sm:$0xff]  }
 0x6f6   : > { %10488 = vmatprep.subr.bf16.mxu0 %v15641_v24  ;;  %10572 = vmatprep.subr.bf16.mxu1 %v15644_v17  ;;  %v15714_v24 = vld [vmem:[%s16576_s30 + $0x560] ss:$8 sps:$4 sm:$0xff]   ;;  %v15719_v17 = vld [vmem:[%s16576_s30 + $0x514] ss:$8 sps:$4 sm:$0xff]  }
 0x6f7   : > { %10510 = vmatprep.mubr.bf16.mxu0 %v15906_v59  ;;  %10594 = vmatprep.mubr.bf16.mxu1 %v15906_v59 }
 0x6f9   : > { %10489 = vmatpush1.bf16.msra.mxu0 %v15639_v38  ;;  %10573 = vmatpush1.bf16.msra.mxu1 %v15642_v23  ;;  %v15722_v38 = vld [vmem:[%s16576_s30 + $0x554] ss:$8 sps:$4 sm:$0xff]   ;;  %v15717_v23 = vld [vmem:[%s16576_s30 + $0x510] ss:$8 sps:$4 sm:$0xff]  }
 0x6fa   : > { %10490 = vmatprep.subr.bf16.mxu0 %v15647_v54  ;;  %10574 = vmatprep.subr.bf16.mxu1 %v15650_v1  ;;  %v15720_v54 = vld [vmem:[%s16576_s30 + $0x550] ss:$8 sps:$4 sm:$0xff]   ;;  %v15725_v1 = vld [vmem:[%s16576_s30 + $0x504] ss:$8 sps:$4 sm:$0xff]  }
 0x6fd   : > { %10491 = vmatpush1.bf16.msra.mxu0 %v15645_v29  ;;  %10575 = vmatpush1.bf16.msra.mxu1 %v15648_v4  ;;  %v15728_v29 = vld [vmem:[%s16576_s30 + $0x544] ss:$8 sps:$4 sm:$0xff]   ;;  %v15723_v4 = vld [vmem:[%s16576_s30 + $0x500] ss:$8 sps:$4 sm:$0xff]  }
 0x6fe   : > { %10492 = vmatprep.subr.bf16.mxu0 %v15653_v21  ;;  %10576 = vmatprep.subr.bf16.mxu1 %v15656_v11  ;;  %v15726_v21 = vld [vmem:[%s16576_s30 + $0x540] ss:$8 sps:$4 sm:$0xff]   ;;  %v13037_v11 = vld [vmem:[%s20606_s6 + $0xa8] sm:$0xff] }
 0x6ff   : > { %v8990_v45 = vpack.c.bf16 %v13037_v11, %v13037_v11  ;;  %v15792_v11 = vld [vmem:[%s16576_s30 + $0x6d0] ss:$8 sps:$4 sm:$0xff]  }
 0x701   : > { %10493 = vmatpush1.bf16.msra.mxu0 %v15651_v15  ;;  %10577 = vmatpush1.bf16.msra.mxu1 %v15654_v0  ;;  %v13038_v15 = vld [vmem:[%s20606_s6 + $0xb0] sm:$0xff]  ;;  %v15731_v0 = vld [vmem:[%s16576_s30 + $0x5b4] ss:$8 sps:$4 sm:$0xff]  }
 0x702   : > { %10654 = vmatprep.subr.bf16.mxu0 %v15659_v42  ;;  %10738 = vmatprep.subr.bf16.mxu1 %v15662_v61  ;;  %v8991_v42 = vpack.c.bf16 %v13038_v15, %v13038_v15  ;;  %v15729_v61 = vld [vmem:[%s16576_s30 + $0x5b0] ss:$8 sps:$4 sm:$0xff]  }
 0x704   : > { %13183 = vmatmul.mubr.msk.bf16.vlgmr.msra.gmra.mxu0 %vm9298_vm1, %v8984_v8  ;;  %13192 = vmatmul.mubr.msk.bf16.vlgmr.msra.gmra.mxu1 %vm9298_vm1, %v8985_v50  ;;  %v15732_v8 = vld [vmem:[%s16576_s30 + $0x5f0] ss:$8 sps:$4 sm:$0xff]   ;;  %v15737_v50 = vld [vmem:[%s16576_s30 + $0x5a4] ss:$8 sps:$4 sm:$0xff]  }
 0x705   : > { %10655 = vmatpush1.bf16.msra.mxu0 %v15657_v22  ;;  %10739 = vmatpush1.bf16.msra.mxu1 %v15660_v2  ;;  %v15740_v22 = vld [vmem:[%s16576_s30 + $0x5e4] ss:$8 sps:$4 sm:$0xff]   ;;  %v15735_v2 = vld [vmem:[%s16576_s30 + $0x5a0] ss:$8 sps:$4 sm:$0xff]  }
 0x706   : > { %10656 = vmatprep.subr.bf16.mxu0 %v15665_v35  ;;  %10740 = vmatprep.subr.bf16.mxu1 %v15668_v31  ;;  %v15738_v35 = vld [vmem:[%s16576_s30 + $0x5e0] ss:$8 sps:$4 sm:$0xff]   ;;  %v15743_v31 = vld [vmem:[%s16576_s30 + $0x594] ss:$8 sps:$4 sm:$0xff]  }
 0x707   : > { %10678 = vmatprep.mubr.bf16.mxu0 %v15906_v59  ;;  %10762 = vmatprep.mubr.bf16.mxu1 %v15906_v59 }
 0x709   : > { %10657 = vmatpush1.bf16.msra.mxu0 %v15663_v5  ;;  %10741 = vmatpush1.bf16.msra.mxu1 %v15666_v34  ;;  %v15746_v5 = vld [vmem:[%s16576_s30 + $0x5d4] ss:$8 sps:$4 sm:$0xff]   ;;  %v15741_v34 = vld [vmem:[%s16576_s30 + $0x590] ss:$8 sps:$4 sm:$0xff]  }
 0x70a   : > { %10658 = vmatprep.subr.bf16.mxu0 %v15671_v57  ;;  %10742 = vmatprep.subr.bf16.mxu1 %v15674_v27  ;;  %v15744_v57 = vld [vmem:[%s16576_s30 + $0x5d0] ss:$8 sps:$4 sm:$0xff]   ;;  %v15749_v27 = vld [vmem:[%s16576_s30 + $0x584] ss:$8 sps:$4 sm:$0xff]  }
 0x70d   : > { %10659 = vmatpush1.bf16.msra.mxu0 %v15669_v37  ;;  %10743 = vmatpush1.bf16.msra.mxu1 %v15672_v51  ;;  %v15752_v37 = vld [vmem:[%s16576_s30 + $0x5c4] ss:$8 sps:$4 sm:$0xff]   ;;  %v15747_v51 = vld [vmem:[%s16576_s30 + $0x580] ss:$8 sps:$4 sm:$0xff]  }
 0x70e   : > { %10660 = vmatprep.subr.bf16.mxu0 %v15677_v10  ;;  %10744 = vmatprep.subr.bf16.mxu1 %v15680_v36  ;;  %v15750_v10 = vld [vmem:[%s16576_s30 + $0x5c0] ss:$8 sps:$4 sm:$0xff]  }
 0x70f   : > { %v13039_v36 = vld [vmem:[%s20606_s6 + $0xb8] sm:$0xff] }
 0x710   : > { %v8992_v41 = vpack.c.bf16 %v13039_v36, %v13039_v36  ;;  %v15807_v36 = vld [vmem:[%s16576_s30 + $0x720] ss:$8 sps:$4 sm:$0xff]  }
 0x711   : > { %10661 = vmatpush1.bf16.msra.mxu0 %v15675_v3  ;;  %10745 = vmatpush1.bf16.msra.mxu1 %v15678_v14  ;;  %v13040_v3 = vld [vmem:[%s20606_s6 + $0xc0] sm:$0xff] }
 0x712   : > { %10822 = vmatprep.subr.bf16.mxu0 %v15683_v18  ;;  %10906 = vmatprep.subr.bf16.mxu1 %v15686_v44  ;;  %v15755_v14 = vld [vmem:[%s16576_s30 + $0x634] ss:$8 sps:$4 sm:$0xff]   ;;  %v8993_v18 = vpack.c.bf16 %v13040_v3, %v13040_v3  ;;  %v15753_v44 = vld [vmem:[%s16576_s30 + $0x630] ss:$8 sps:$4 sm:$0xff]   ;;  %v15810_v3 = vld [vmem:[%s16576_s30 + $0x760] ss:$8 sps:$4 sm:$0xff]  }
 0x714   : > { %13201 = vmatmul.mubr.msk.bf16.vlgmr.msra.gmra.mxu0 %vm9298_vm1, %v8986_v30  ;;  %13210 = vmatmul.mubr.msk.bf16.vlgmr.msra.gmra.mxu1 %vm9298_vm1, %v8987_v13  ;;  %v15756_v30 = vld [vmem:[%s16576_s30 + $0x670] ss:$8 sps:$4 sm:$0xff]   ;;  %v15761_v13 = vld [vmem:[%s16576_s30 + $0x624] ss:$8 sps:$4 sm:$0xff]  }
 0x715   : > { %10823 = vmatpush1.bf16.msra.mxu0 %v15681_v48  ;;  %10907 = vmatpush1.bf16.msra.mxu1 %v15684_v62  ;;  %v15764_v48 = vld [vmem:[%s16576_s30 + $0x664] ss:$8 sps:$4 sm:$0xff]   ;;  %v15759_v62 = vld [vmem:[%s16576_s30 + $0x620] ss:$8 sps:$4 sm:$0xff]  }
 0x716   : > { %10824 = vmatprep.subr.bf16.mxu0 %v15689_v16  ;;  %10908 = vmatprep.subr.bf16.mxu1 %v15692_v58  ;;  %v15762_v16 = vld [vmem:[%s16576_s30 + $0x660] ss:$8 sps:$4 sm:$0xff]   ;;  %v15767_v58 = vld [vmem:[%s16576_s30 + $0x614] ss:$8 sps:$4 sm:$0xff]  }
 0x717   : > { %10846 = vmatprep.mubr.bf16.mxu0 %v15906_v59  ;;  %10930 = vmatprep.mubr.bf16.mxu1 %v15906_v59 }
 0x719   : > { %10825 = vmatpush1.bf16.msra.mxu0 %v15687_v60  ;;  %10909 = vmatpush1.bf16.msra.mxu1 %v15690_v40  ;;  %v15770_v60 = vld [vmem:[%s16576_s30 + $0x654] ss:$8 sps:$4 sm:$0xff]   ;;  %v15765_v40 = vld [vmem:[%s16576_s30 + $0x610] ss:$8 sps:$4 sm:$0xff]  }
 0x71a   : > { %10826 = vmatprep.subr.bf16.mxu0 %v15695_v12  ;;  %10910 = vmatprep.subr.bf16.mxu1 %v15698_v46  ;;  %v15768_v12 = vld [vmem:[%s16576_s30 + $0x650] ss:$8 sps:$4 sm:$0xff]   ;;  %v15773_v46 = vld [vmem:[%s16576_s30 + $0x604] ss:$8 sps:$4 sm:$0xff]  }
 0x71d   : > { %10827 = vmatpush1.bf16.msra.mxu0 %v15693_v53  ;;  %10911 = vmatpush1.bf16.msra.mxu1 %v15696_v19  ;;  %v15776_v53 = vld [vmem:[%s16576_s30 + $0x644] ss:$8 sps:$4 sm:$0xff]   ;;  %v15771_v19 = vld [vmem:[%s16576_s30 + $0x600] ss:$8 sps:$4 sm:$0xff]  }
 0x71e   : > { %10828 = vmatprep.subr.bf16.mxu0 %v15701_v6  ;;  %10912 = vmatprep.subr.bf16.mxu1 %v15704_v32  ;;  %v15774_v6 = vld [vmem:[%s16576_s30 + $0x640] ss:$8 sps:$4 sm:$0xff]   ;;  %v13041_v32 = vld [vmem:[%s20606_s6 + $0xc8] sm:$0xff] }
 0x71f   : > { %v8994_v33 = vpack.c.bf16 %v13041_v32, %v13041_v32  ;;  %v13046_v32 = vld [vmem:[%s20606_s6 + $0xf0] sm:$0xff] }
 0x721   : > { %10829 = vmatpush1.bf16.msra.mxu0 %v15699_v7  ;;  %10913 = vmatpush1.bf16.msra.mxu1 %v15702_v39  ;;  %v13042_v7 = vld [vmem:[%s20606_s6 + $0xd0] sm:$0xff]  ;;  %v15779_v39 = vld [vmem:[%s16576_s30 + $0x6b4] ss:$8 sps:$4 sm:$0xff]  }
 0x722   : > { %10990 = vmatprep.subr.bf16.mxu0 %v15707_v47  ;;  %11074 = vmatprep.subr.bf16.mxu1 %v15710_v49  ;;  %v8995_v47 = vpack.c.bf16 %v13042_v7, %v13042_v7  ;;  %v15777_v49 = vld [vmem:[%s16576_s30 + $0x6b0] ss:$8 sps:$4 sm:$0xff]   ;;  %v15827_v7 = vld [vmem:[%s16576_s30 + $0x7b4] ss:$8 sps:$4 sm:$0xff]  }
 0x724   : > { %13219 = vmatmul.mubr.msk.bf16.vlgmr.msra.gmra.mxu0 %vm9298_vm1, %v8988_v52  ;;  %13228 = vmatmul.mubr.msk.bf16.vlgmr.msra.gmra.mxu1 %vm9298_vm1, %v8989_v56  ;;  %v15780_v52 = vld [vmem:[%s16576_s30 + $0x6f0] ss:$8 sps:$4 sm:$0xff]   ;;  %v15785_v56 = vld [vmem:[%s16576_s30 + $0x6a4] ss:$8 sps:$4 sm:$0xff]  }
 0x725   : > { %10991 = vmatpush1.bf16.msra.mxu0 %v15705_v28  ;;  %11075 = vmatpush1.bf16.msra.mxu1 %v15708_v55  ;;  %v15788_v28 = vld [vmem:[%s16576_s30 + $0x6e4] ss:$8 sps:$4 sm:$0xff]  }
 0x726   : > { %10992 = vmatprep.subr.bf16.mxu0 %v15713_v63  ;;  %11076 = vmatprep.subr.bf16.mxu1 %v15716_v25 }
 0x727   : > { %11014 = vmatprep.mubr.bf16.mxu0 %v15906_v59  ;;  %11098 = vmatprep.mubr.bf16.mxu1 %v15906_v59 }
 0x729   : > { %10993 = vmatpush1.bf16.msra.mxu0 %v15711_v43  ;;  %11077 = vmatpush1.bf16.msra.mxu1 %v15714_v24  ;;  %v15783_v43 = vld [vmem:[%s16576_s30 + $0x6a0] ss:$8 sps:$4 sm:$0xff]  }
 0x72a   : > { %10994 = vmatprep.subr.bf16.mxu0 %v15719_v17  ;;  %11078 = vmatprep.subr.bf16.mxu1 %v15722_v38  ;;  %v15786_v24 = vld [vmem:[%s16576_s30 + $0x6e0] ss:$8 sps:$4 sm:$0xff]  }
 0x72d   : > { %10995 = vmatpush1.bf16.msra.mxu0 %v15717_v23  ;;  %11079 = vmatpush1.bf16.msra.mxu1 %v15720_v54  ;;  %v15791_v23 = vld [vmem:[%s16576_s30 + $0x694] ss:$8 sps:$4 sm:$0xff]  }
 0x72e   : > { %10996 = vmatprep.subr.bf16.mxu0 %v15725_v1  ;;  %11080 = vmatprep.subr.bf16.mxu1 %v15728_v29  ;;  %v15794_v54 = vld [vmem:[%s16576_s30 + $0x6d4] ss:$8 sps:$4 sm:$0xff]  }
 0x731   : > { %10997 = vmatpush1.bf16.msra.mxu0 %v15723_v4  ;;  %11081 = vmatpush1.bf16.msra.mxu1 %v15726_v21  ;;  %v15789_v21 = vld [vmem:[%s16576_s30 + $0x690] ss:$8 sps:$4 sm:$0xff]  }
 0x732   : > { %11158 = vmatprep.subr.bf16.mxu0 %v15731_v0  ;;  %11242 = vmatprep.subr.bf16.mxu1 %v15734_v9  ;;  %v15797_v9 = vld [vmem:[%s16576_s30 + $0x684] ss:$8 sps:$4 sm:$0xff]  }
 0x734   : > { %13237 = vmatmul.mubr.msk.bf16.vlgmr.msra.gmra.mxu0 %vm9298_vm1, %v8990_v45  ;;  %13246 = vmatmul.mubr.msk.bf16.vlgmr.msra.gmra.mxu1 %vm9298_vm1, %v8991_v42  ;;  %v15800_v45 = vld [vmem:[%s16576_s30 + $0x6c4] ss:$8 sps:$4 sm:$0xff]   ;;  %v15795_v42 = vld [vmem:[%s16576_s30 + $0x680] ss:$8 sps:$4 sm:$0xff]  }
 0x735   : > { %11159 = vmatpush1.bf16.msra.mxu0 %v15729_v61  ;;  %11243 = vmatpush1.bf16.msra.mxu1 %v15732_v8  ;;  %v15798_v61 = vld [vmem:[%s16576_s30 + $0x6c0] ss:$8 sps:$4 sm:$0xff]  }
 0x736   : > { %11160 = vmatprep.subr.bf16.mxu0 %v15737_v50  ;;  %11244 = vmatprep.subr.bf16.mxu1 %v15740_v22  ;;  %v13043_v8 = vld [vmem:[%s20606_s6 + $0xd8] sm:$0xff]  ;;  %v13044_v50 = vld [vmem:[%s20606_s6 + $0xe0] sm:$0xff] }
 0x737   : > { %11182 = vmatprep.mubr.bf16.mxu0 %v15906_v59  ;;  %11266 = vmatprep.mubr.bf16.mxu1 %v15906_v59  ;;  %v15803_v22 = vld [vmem:[%s16576_s30 + $0x734] ss:$8 sps:$4 sm:$0xff]  }
 0x739   : > { %11161 = vmatpush1.bf16.msra.mxu0 %v15735_v2  ;;  %11245 = vmatpush1.bf16.msra.mxu1 %v15738_v35  ;;  %v15806_v2 = vld [vmem:[%s16576_s30 + $0x774] ss:$8 sps:$4 sm:$0xff]   ;;  %v8996_v35 = vpack.c.bf16 %v13043_v8, %v13043_v8  ;;  %v13047_v8 = vld [vmem:[%s20606_s6 + $0xf8] sm:$0xff] }
 0x73a   : > { %11162 = vmatprep.subr.bf16.mxu0 %v15743_v31  ;;  %11246 = vmatprep.subr.bf16.mxu1 %v15746_v5  ;;  %v8997_v31 = vpack.c.bf16 %v13044_v50, %v13044_v50  ;;  %v15801_v5 = vld [vmem:[%s16576_s30 + $0x730] ss:$8 sps:$4 sm:$0xff]  }
 0x73b   : > { %v13048_v50 = vld [vmem:[%s20606_s6 + $0x100] sm:$0xff] }
 0x73d   : > { %11163 = vmatpush1.bf16.msra.mxu0 %v15741_v34  ;;  %11247 = vmatpush1.bf16.msra.mxu1 %v15744_v57  ;;  %v15804_v34 = vld [vmem:[%s16576_s30 + $0x770] ss:$8 sps:$4 sm:$0xff]   ;;  %v15809_v57 = vld [vmem:[%s16576_s30 + $0x724] ss:$8 sps:$4 sm:$0xff]  }
 0x73e   : > { %11164 = vmatprep.subr.bf16.mxu0 %v15749_v27  ;;  %11248 = vmatprep.subr.bf16.mxu1 %v15752_v37  ;;  %v15812_v27 = vld [vmem:[%s16576_s30 + $0x764] ss:$8 sps:$4 sm:$0xff]  }
 0x741   : > { %11165 = vmatpush1.bf16.msra.mxu0 %v15747_v51  ;;  %11249 = vmatpush1.bf16.msra.mxu1 %v15750_v10 }
 0x742   : > { %11326 = vmatprep.subr.bf16.mxu0 %v15755_v14  ;;  %11410 = vmatprep.subr.bf16.mxu1 %v15758_v26 }
 0x744   : > { %13255 = vmatmul.mubr.msk.bf16.vlgmr.msra.gmra.mxu0 %vm9298_vm1, %v8992_v41  ;;  %13264 = vmatmul.mubr.msk.bf16.vlgmr.msra.gmra.mxu1 %vm9298_vm1, %v8993_v18  ;;  %v15815_v41 = vld [vmem:[%s16576_s30 + $0x714] ss:$8 sps:$4 sm:$0xff]  }
 0x745   : > { %11327 = vmatpush1.bf16.msra.mxu0 %v15753_v44  ;;  %11411 = vmatpush1.bf16.msra.mxu1 %v15756_v30  ;;  %v15818_v18 = vld [vmem:[%s16576_s30 + $0x754] ss:$8 sps:$4 sm:$0xff]  }
 0x746   : > { %11328 = vmatprep.subr.bf16.mxu0 %v15761_v13  ;;  %11412 = vmatprep.subr.bf16.mxu1 %v15764_v48 }
 0x747   : > { %11350 = vmatprep.mubr.bf16.mxu0 %v15906_v59  ;;  %11434 = vmatprep.mubr.bf16.mxu1 %v15906_v59 }
 0x749   : > { %11329 = vmatpush1.bf16.msra.mxu0 %v15759_v62  ;;  %11413 = vmatpush1.bf16.msra.mxu1 %v15762_v16  ;;  %v15813_v16 = vld [vmem:[%s16576_s30 + $0x710] ss:$8 sps:$4 sm:$0xff]  }
 0x74a   : > { %11330 = vmatprep.subr.bf16.mxu0 %v15767_v58  ;;  %11414 = vmatprep.subr.bf16.mxu1 %v15770_v60  ;;  %v15816_v58 = vld [vmem:[%s16576_s30 + $0x750] ss:$8 sps:$4 sm:$0xff]  }
 0x74d   : > { %11331 = vmatpush1.bf16.msra.mxu0 %v15765_v40  ;;  %11415 = vmatpush1.bf16.msra.mxu1 %v15768_v12  ;;  %v15821_v12 = vld [vmem:[%s16576_s30 + $0x704] ss:$8 sps:$4 sm:$0xff]  }
 0x74e   : > { %11332 = vmatprep.subr.bf16.mxu0 %v15773_v46  ;;  %11416 = vmatprep.subr.bf16.mxu1 %v15776_v53  ;;  %v15824_v46 = vld [vmem:[%s16576_s30 + $0x744] ss:$8 sps:$4 sm:$0xff]   ;;  %v15819_v53 = vld [vmem:[%s16576_s30 + $0x700] ss:$8 sps:$4 sm:$0xff]  }
 0x751   : > { %11333 = vmatpush1.bf16.msra.mxu0 %v15771_v19  ;;  %11417 = vmatpush1.bf16.msra.mxu1 %v15774_v6  ;;  %v15822_v19 = vld [vmem:[%s16576_s30 + $0x740] ss:$8 sps:$4 sm:$0xff]   ;;  %v13045_v6 = vld [vmem:[%s20606_s6 + $0xe8] sm:$0xff] }
 0x752   : > { %11494 = vmatprep.subr.bf16.mxu0 %v15779_v39  ;;  %11578 = vmatprep.subr.bf16.mxu1 %v15782_v20  ;;  %v15830_v39 = vld [vmem:[%s16576_s30 + $0x7f4] ss:$8 sps:$4 sm:$0xff]   ;;  %v8998_v20 = vpack.c.bf16 %v13045_v6, %v13045_v6 }
 0x754   : > { %v9336_v55 = vpop.f32.mrf.mxu0  ;;  %v9420_v63 = vpop.f32.mrf.mxu1  ;;  %13273 = vmatmul.mubr.msk.bf16.vlgmr.msra.gmra.mxu0 %vm9298_vm1, %v8994_v33  ;;  %13282 = vmatmul.mubr.msk.bf16.vlgmr.msra.gmra.mxu1 %vm9298_vm1, %v8995_v47  ;;  %v8999_v33 = vpack.c.bf16 %v13046_v32, %v13046_v32  ;;  %v15825_v47 = vld [vmem:[%s16576_s30 + $0x7b0] ss:$8 sps:$4 sm:$0xff]  }
 0x755   : > { %v11949_v25 = vadd.f32 %v9420_v63, %v9336_v55  ;;  %11495 = vmatpush1.bf16.msra.mxu0 %v15777_v49  ;;  %11579 = vmatpush1.bf16.msra.mxu1 %v15780_v52  ;;  %v15828_v49 = vld [vmem:[%s16576_s30 + $0x7f0] ss:$8 sps:$4 sm:$0xff]   ;;  %v15833_v52 = vld [vmem:[%s16576_s30 + $0x7a4] ss:$8 sps:$4 sm:$0xff]  }
 0x756   : > { %v9338_v17 = vpop.f32.mrf.mxu0  ;;  %v9422_v38 = vpop.f32.mrf.mxu1  ;;  %11496 = vmatprep.subr.bf16.mxu0 %v15785_v56  ;;  %11580 = vmatprep.subr.bf16.mxu1 %v15788_v28  ;;  %v15836_v56 = vld [vmem:[%s16576_s30 + $0x7e4] ss:$8 sps:$4 sm:$0xff]  }
 0x757   : > { %v11980_v1 = vadd.f32 %v9422_v38, %v9338_v17  ;;  %11518 = vmatprep.mubr.bf16.mxu0 %v15906_v59  ;;  %11602 = vmatprep.mubr.bf16.mxu1 %v15906_v59  ;;  %v15839_v38 = vld [vmem:[%s16576_s30 + $0x794] ss:$8 sps:$4 sm:$0xff]  }
 0x758   : > { %v9340_v29 = vpop.f32.mrf.mxu0  ;;  %v9424_v4 = vpop.f32.mrf.mxu1 }
 0x759   : > { %11497 = vmatpush1.bf16.msra.mxu0 %v15783_v43  ;;  %11581 = vmatpush1.bf16.msra.mxu1 %v15786_v24  ;;  %v15834_v43 = vld [vmem:[%s16576_s30 + $0x7e0] ss:$8 sps:$4 sm:$0xff]  }
 0x75a   : > { %v9341_v15 = vpop.f32.mrf.mxu0  ;;  %v9425_v0 = vpop.f32.mrf.mxu1  ;;  %11498 = vmatprep.subr.bf16.mxu0 %v15791_v23  ;;  %11582 = vmatprep.subr.bf16.mxu1 %v15794_v54  ;;  %v15842_v23 = vld [vmem:[%s16576_s30 + $0x7d4] ss:$8 sps:$4 sm:$0xff]  }
 0x75b   : > { %v15840_v15 = vld [vmem:[%s16576_s30 + $0x7d0] ss:$8 sps:$4 sm:$0xff]  }
 0x75d   : > { %11499 = vmatpush1.bf16.msra.mxu0 %v15789_v21  ;;  %11583 = vmatpush1.bf16.msra.mxu1 %v15792_v11  ;;  %v15837_v11 = vld [vmem:[%s16576_s30 + $0x790] ss:$8 sps:$4 sm:$0xff]  }
 0x75e   : > { %11500 = vmatprep.subr.bf16.mxu0 %v15797_v9  ;;  %11584 = vmatprep.subr.bf16.mxu1 %v15800_v45  ;;  %v15845_v45 = vld [vmem:[%s16576_s30 + $0x784] ss:$8 sps:$4 sm:$0xff]  }
 0x761   : > { %11501 = vmatpush1.bf16.msra.mxu0 %v15795_v42  ;;  %11585 = vmatpush1.bf16.msra.mxu1 %v15798_v61  ;;  %v15848_v42 = vld [vmem:[%s16576_s30 + $0x7c4] ss:$8 sps:$4 sm:$0xff]   ;;  %v15843_v61 = vld [vmem:[%s16576_s30 + $0x780] ss:$8 sps:$4 sm:$0xff]  }
 0x762   : > { %11662 = vmatprep.subr.bf16.mxu0 %v15803_v22  ;;  %11746 = vmatprep.subr.bf16.mxu1 %v15806_v2  ;;  %v9000_v22 = vpack.c.bf16 %v13047_v8, %v13047_v8  ;;  %v9001_v2 = vpack.c.bf16 %v13048_v50, %v13048_v50 }
 0x764   : > { %v9504_v37 = vpop.f32.mrf.mxu0  ;;  %v9588_v51 = vpop.f32.mrf.mxu1  ;;  %13291 = vmatmul.mubr.msk.bf16.vlgmr.msra.gmra.mxu0 %vm9298_vm1, %v8996_v35  ;;  %13300 = vmatmul.mubr.msk.bf16.vlgmr.msra.gmra.mxu1 %vm9298_vm1, %v8997_v31 }
 0x765   : > { %v11950_v10 = vadd.f32 %v11949_v25, %v9504_v37  ;;  %11663 = vmatpush1.bf16.msra.mxu0 %v15801_v5  ;;  %11747 = vmatpush1.bf16.msra.mxu1 %v15804_v34  ;;  %v15831_v25 = vld [vmem:[%s16576_s30 + $0x7a0] ss:$8 sps:$4 sm:$0xff]  }
 0x766   : > { %v9506_v14 = vpop.f32.mrf.mxu0  ;;  %v9590_v26 = vpop.f32.mrf.mxu1  ;;  %11664 = vmatprep.subr.bf16.mxu0 %v15809_v57  ;;  %11748 = vmatprep.subr.bf16.mxu1 %v15812_v27 }
 0x767   : > { %v11951_v44 = vadd.f32 %v11950_v10, %v9588_v51  ;;  %v11981_v30 = vadd.f32 %v11980_v1, %v9506_v14  ;;  %11686 = vmatprep.mubr.bf16.mxu0 %v15906_v59  ;;  %11770 = vmatprep.mubr.bf16.mxu1 %v15906_v59 }
 0x768   : > { %v9508_v13 = vpop.f32.mrf.mxu0  ;;  %v9592_v48 = vpop.f32.mrf.mxu1 }
 0x769   : > { %v11982_v62 = vadd.f32 %v11981_v30, %v9590_v26  ;;  %11665 = vmatpush1.bf16.msra.mxu0 %v15807_v36  ;;  %11749 = vmatpush1.bf16.msra.mxu1 %v15810_v3 }
 0x76a   : > { %v9509_v60 = vpop.f32.mrf.mxu0  ;;  %v9593_v40 = vpop.f32.mrf.mxu1  ;;  %11666 = vmatprep.subr.bf16.mxu0 %v15815_v41  ;;  %11750 = vmatprep.subr.bf16.mxu1 %v15818_v18 }
 0x76d   : > { %11667 = vmatpush1.bf16.msra.mxu0 %v15813_v16  ;;  %11751 = vmatpush1.bf16.msra.mxu1 %v15816_v58 }
 0x76e   : > { %11668 = vmatprep.subr.bf16.mxu0 %v15821_v12  ;;  %11752 = vmatprep.subr.bf16.mxu1 %v15824_v46 }
 0x771   : > { %11669 = vmatpush1.bf16.msra.mxu0 %v15819_v53  ;;  %11753 = vmatpush1.bf16.msra.mxu1 %v15822_v19 }
 0x772   : > { %11830 = vmatprep.subr.bf16.mxu0 %v15827_v7  ;;  %11914 = vmatprep.subr.bf16.mxu1 %v15830_v39 }
 0x774   : > { %v9672_v28 = vpop.f32.mrf.mxu0  ;;  %v9756_v55 = vpop.f32.mrf.mxu1  ;;  %13309 = vmatmul.mubr.msk.bf16.vlgmr.msra.gmra.mxu0 %vm9298_vm1, %v8998_v20  ;;  %13318 = vmatmul.mubr.msk.bf16.vlgmr.msra.gmra.mxu1 %vm9298_vm1, %v8999_v33 }
 0x775   : > { %v11952_v63 = vadd.f32 %v11951_v44, %v9672_v28  ;;  %11831 = vmatpush1.bf16.msra.mxu0 %v15825_v47  ;;  %11915 = vmatpush1.bf16.msra.mxu1 %v15828_v49 }
 0x776   : > { %v9674_v24 = vpop.f32.mrf.mxu0  ;;  %v9758_v17 = vpop.f32.mrf.mxu1  ;;  %11832 = vmatprep.subr.bf16.mxu0 %v15833_v52  ;;  %11916 = vmatprep.subr.bf16.mxu1 %v15836_v56 }
 0x777   : > { %v11953_v54 = vadd.f32 %v11952_v63, %v9756_v55  ;;  %v11983_v1 = vadd.f32 %v11982_v62, %v9674_v24  ;;  %11854 = vmatprep.mubr.bf16.mxu0 %v15906_v59  ;;  %11938 = vmatprep.mubr.bf16.mxu1 %v15906_v59  ;;  %v15846_v59 = vld [vmem:[%s16576_s30 + $0x7c0] ss:$8 sps:$4 sm:$0xff]  }
 0x778   : > { %v9676_v29 = vpop.f32.mrf.mxu0  ;;  %v9760_v4 = vpop.f32.mrf.mxu1 }
 0x779   : > { %v11984_v21 = vadd.f32 %v11983_v1, %v9758_v17  ;;  %11833 = vmatpush1.bf16.msra.mxu0 %v15831_v25  ;;  %11917 = vmatpush1.bf16.msra.mxu1 %v15834_v43 }
 0x77a   : > { %v9677_v0 = vpop.f32.mrf.mxu0  ;;  %v9761_v9 = vpop.f32.mrf.mxu1  ;;  %11834 = vmatprep.subr.bf16.mxu0 %v15839_v38  ;;  %11918 = vmatprep.subr.bf16.mxu1 %v15842_v23 }
 0x77d   : > { %11835 = vmatpush1.bf16.msra.mxu0 %v15837_v11  ;;  %11919 = vmatpush1.bf16.msra.mxu1 %v15840_v15 }
 0x77e   : > { %11836 = vmatprep.subr.bf16.mxu0 %v15845_v45  ;;  %11920 = vmatprep.subr.bf16.mxu1 %v15848_v42 }
 0x781   : > { %11837 = vmatpush1.bf16.msra.mxu0 %v15843_v61  ;;  %11921 = vmatpush1.bf16.msra.mxu1 %v15846_v59 }
 0x784   : > { %v9840_v35 = vpop.f32.mrf.mxu0  ;;  %v9924_v31 = vpop.f32.mrf.mxu1  ;;  %13327 = vmatmul.mubr.msk.bf16.vlgmr.msra.gmra.mxu0 %vm9298_vm1, %v9000_v22  ;;  %13336 = vmatmul.mubr.msk.bf16.vlgmr.msra.gmra.mxu1 %vm9298_vm1, %v9001_v2 }
 0x785   : > { %v11954_v5 = vadd.f32 %v11953_v54, %v9840_v35 }
 0x786   : > { %v9842_v34 = vpop.f32.mrf.mxu0  ;;  %v9926_v57 = vpop.f32.mrf.mxu1 }
 0x787   : > { %v11955_v27 = vadd.f32 %v11954_v5, %v9924_v31  ;;  %v11985_v37 = vadd.f32 %v11984_v21, %v9842_v34 }
 0x788   : > { %v9844_v51 = vpop.f32.mrf.mxu0  ;;  %v9928_v10 = vpop.f32.mrf.mxu1 }
 0x789   : > { %v11986_v36 = vadd.f32 %v11985_v37, %v9926_v57 }
 0x78a   : > { %v9845_v3 = vpop.f32.mrf.mxu0  ;;  %v9929_v14 = vpop.f32.mrf.mxu1 }
 0x794   : > { %v10008_v26 = vpop.f32.mrf.mxu0  ;;  %v10092_v41 = vpop.f32.mrf.mxu1 }
 0x795   : > { %v11956_v18 = vadd.f32 %v11955_v27, %v10008_v26 }
 0x796   : > { %v10010_v44 = vpop.f32.mrf.mxu0  ;;  %v10094_v30 = vpop.f32.mrf.mxu1 }
 0x797   : > { %v11957_v13 = vadd.f32 %v11956_v18, %v10092_v41  ;;  %v11987_v48 = vadd.f32 %v11986_v36, %v10010_v44 }
 0x798   : > { %v10012_v62 = vpop.f32.mrf.mxu0  ;;  %v10096_v16 = vpop.f32.mrf.mxu1 }
 0x799   : > { %v11988_v58 = vadd.f32 %v11987_v48, %v10094_v30 }
 0x79a   : > { %v10013_v60 = vpop.f32.mrf.mxu0  ;;  %v10097_v40 = vpop.f32.mrf.mxu1 }
 0x7a4   : > { %v10176_v12 = vpop.f32.mrf.mxu0  ;;  %v10260_v46 = vpop.f32.mrf.mxu1 }
 0x7a5   : > { %v11958_v53 = vadd.f32 %v11957_v13, %v10176_v12 }
 0x7a6   : > { %v10178_v19 = vpop.f32.mrf.mxu0  ;;  %v10262_v6 = vpop.f32.mrf.mxu1 }
 0x7a7   : > { %v11959_v32 = vadd.f32 %v11958_v53, %v10260_v46  ;;  %v11989_v7 = vadd.f32 %v11988_v58, %v10178_v19 }
 0x7a8   : > { %v10180_v39 = vpop.f32.mrf.mxu0  ;;  %v10264_v20 = vpop.f32.mrf.mxu1 }
 0x7a9   : > { %v11990_v33 = vadd.f32 %v11989_v7, %v10262_v6 }
 0x7aa   : > { %v10181_v47 = vpop.f32.mrf.mxu0  ;;  %v10265_v49 = vpop.f32.mrf.mxu1 }
 0x7b4   : > { %v10344_v52 = vpop.f32.mrf.mxu0  ;;  %v10428_v56 = vpop.f32.mrf.mxu1 }
 0x7b5   : > { %v11960_v28 = vadd.f32 %v11959_v32, %v10344_v52 }
 0x7b6   : > { %v10346_v55 = vpop.f32.mrf.mxu0  ;;  %v10430_v63 = vpop.f32.mrf.mxu1 }
 0x7b7   : > { %v11961_v25 = vadd.f32 %v11960_v28, %v10428_v56  ;;  %v11991_v43 = vadd.f32 %v11990_v33, %v10346_v55 }
 0x7b8   : > { %v10348_v24 = vpop.f32.mrf.mxu0  ;;  %v10432_v17 = vpop.f32.mrf.mxu1 }
 0x7b9   : > { %v11992_v38 = vadd.f32 %v11991_v43, %v10430_v63 }
 0x7ba   : > { %v10349_v23 = vpop.f32.mrf.mxu0  ;;  %v10433_v54 = vpop.f32.mrf.mxu1 }
 0x7c4   : > { %v10512_v1 = vpop.f32.mrf.mxu0  ;;  %v10596_v29 = vpop.f32.mrf.mxu1 }
 0x7c5   : > { %v11962_v4 = vadd.f32 %v11961_v25, %v10512_v1 }
 0x7c6   : > { %v10514_v21 = vpop.f32.mrf.mxu0  ;;  %v10598_v11 = vpop.f32.mrf.mxu1 }
 0x7c7   : > { %v11963_v15 = vadd.f32 %v11962_v4, %v10596_v29  ;;  %v11993_v0 = vadd.f32 %v11992_v38, %v10514_v21 }
 0x7c8   : > { %v10516_v9 = vpop.f32.mrf.mxu0  ;;  %v10600_v45 = vpop.f32.mrf.mxu1 }
 0x7c9   : > { %v11994_v42 = vadd.f32 %v11993_v0, %v10598_v11 }
 0x7ca   : > { %v10517_v61 = vpop.f32.mrf.mxu0  ;;  %v10601_v59 = vpop.f32.mrf.mxu1 }
 0x7d4   : > { %v10680_v8 = vpop.f32.mrf.mxu0  ;;  %v10764_v50 = vpop.f32.mrf.mxu1 }
 0x7d5   : > { %v11964_v22 = vadd.f32 %v11963_v15, %v10680_v8 }
 0x7d6   : > { %v10682_v2 = vpop.f32.mrf.mxu0  ;;  %v10766_v35 = vpop.f32.mrf.mxu1 }
 0x7d7   : > { %v11965_v31 = vadd.f32 %v11964_v22, %v10764_v50  ;;  %v11995_v5 = vadd.f32 %v11994_v42, %v10682_v2 }
 0x7d8   : > { %v10684_v34 = vpop.f32.mrf.mxu0  ;;  %v10768_v57 = vpop.f32.mrf.mxu1 }
 0x7d9   : > { %v11996_v27 = vadd.f32 %v11995_v5, %v10766_v35 }
 0x7da   : > { %v10685_v37 = vpop.f32.mrf.mxu0  ;;  %v10769_v51 = vpop.f32.mrf.mxu1 }
 0x7e4   : > { %v10848_v10 = vpop.f32.mrf.mxu0  ;;  %v10932_v36 = vpop.f32.mrf.mxu1 }
 0x7e5   : > { %v11966_v3 = vadd.f32 %v11965_v31, %v10848_v10 }
 0x7e6   : > { %v10850_v14 = vpop.f32.mrf.mxu0  ;;  %v10934_v26 = vpop.f32.mrf.mxu1 }
 0x7e7   : > { %v11967_v41 = vadd.f32 %v11966_v3, %v10932_v36  ;;  %v11997_v18 = vadd.f32 %v11996_v27, %v10850_v14 }
 0x7e8   : > { %v10852_v44 = vpop.f32.mrf.mxu0  ;;  %v10936_v30 = vpop.f32.mrf.mxu1 }
 0x7e9   : > { %v11998_v13 = vadd.f32 %v11997_v18, %v10934_v26 }
 0x7ea   : > { %v10853_v48 = vpop.f32.mrf.mxu0  ;;  %v10937_v62 = vpop.f32.mrf.mxu1 }
 0x7eb   : > { %v11947_v62 = vld [vmem:[#allocation4] sm:$0xff] }
 0x7f4   : > { %v11016_v16 = vpop.f32.mrf.mxu0  ;;  %v11100_v58 = vpop.f32.mrf.mxu1 }
 0x7f5   : > { %v11968_v1 = vadd.f32 %v11967_v41, %v11016_v16 }
 0x7f6   : > { %v11018_v60 = vpop.f32.mrf.mxu0  ;;  %v11102_v40 = vpop.f32.mrf.mxu1 }
 0x7f7   : > { %v11999_v21 = vadd.f32 %v11998_v13, %v11018_v60  ;;  %v11969_v0 = vadd.f32 %v11968_v1, %v11100_v58 }
 0x7f8   : > { %v11020_v12 = vpop.f32.mrf.mxu0  ;;  %v11104_v46 = vpop.f32.mrf.mxu1 }
 0x7f9   : > { %v12000_v9 = vadd.f32 %v11999_v21, %v11102_v40  ;;  %v11948_v12 = vld [vmem:[#allocation4 + $0x8] sm:$0xff] }
 0x7fa   : > { %v11021_v53 = vpop.f32.mrf.mxu0  ;;  %v11105_v19 = vpop.f32.mrf.mxu1 }
 0x804   : > { %v11184_v6 = vpop.f32.mrf.mxu0  ;;  %v11268_v32 = vpop.f32.mrf.mxu1 }
 0x805   : > { %v11970_v45 = vadd.f32 %v11969_v0, %v11184_v6 }
 0x806   : > { %v11186_v7 = vpop.f32.mrf.mxu0  ;;  %v11270_v39 = vpop.f32.mrf.mxu1 }
 0x807   : > { %v12001_v42 = vadd.f32 %v12000_v9, %v11186_v7  ;;  %v11971_v61 = vadd.f32 %v11970_v45, %v11268_v32 }
 0x808   : > { %v11188_v20 = vpop.f32.mrf.mxu0  ;;  %v11272_v33 = vpop.f32.mrf.mxu1 }
 0x809   : > { %v12002_v59 = vadd.f32 %v12001_v42, %v11270_v39 }
 0x80a   : > { %v11189_v47 = vpop.f32.mrf.mxu0  ;;  %v11273_v49 = vpop.f32.mrf.mxu1 }
 0x814   : > { %v11352_v52 = vpop.f32.mrf.mxu0  ;;  %v11436_v56 = vpop.f32.mrf.mxu1 }
 0x815   : > { %v11972_v8 = vadd.f32 %v11971_v61, %v11352_v52 }
 0x816   : > { %v11354_v28 = vpop.f32.mrf.mxu0  ;;  %v11438_v55 = vpop.f32.mrf.mxu1 }
 0x817   : > { %v12003_v2 = vadd.f32 %v12002_v59, %v11354_v28  ;;  %v11973_v5 = vadd.f32 %v11972_v8, %v11436_v56 }
 0x818   : > { %v11356_v63 = vpop.f32.mrf.mxu0  ;;  %v11440_v25 = vpop.f32.mrf.mxu1 }
 0x819   : > { %v12004_v27 = vadd.f32 %v12003_v2, %v11438_v55 }
 0x81a   : > { %v11357_v43 = vpop.f32.mrf.mxu0  ;;  %v11441_v24 = vpop.f32.mrf.mxu1 }
 0x824   : > { %v11520_v17 = vpop.f32.mrf.mxu0  ;;  %v11604_v38 = vpop.f32.mrf.mxu1 }
 0x825   : > { %v11974_v37 = vadd.f32 %v11973_v5, %v11520_v17 }
 0x826   : > { %v11522_v23 = vpop.f32.mrf.mxu0  ;;  %v11606_v54 = vpop.f32.mrf.mxu1 }
 0x827   : > { %v12005_v36 = vadd.f32 %v12004_v27, %v11522_v23  ;;  %v11975_v3 = vadd.f32 %v11974_v37, %v11604_v38 }
 0x828   : > { %v11524_v29 = vpop.f32.mrf.mxu0  ;;  %v11608_v4 = vpop.f32.mrf.mxu1 }
 0x829   : > { %v12006_v14 = vadd.f32 %v12005_v36, %v11606_v54 }
 0x82a   : > { %v11525_v11 = vpop.f32.mrf.mxu0  ;;  %v11609_v15 = vpop.f32.mrf.mxu1 }
 0x834   : > { %v11688_v50 = vpop.f32.mrf.mxu0  ;;  %v11772_v22 = vpop.f32.mrf.mxu1 }
 0x835   : > { %v11976_v26 = vadd.f32 %v11975_v3, %v11688_v50 }
 0x836   : > { %v11690_v35 = vpop.f32.mrf.mxu0  ;;  %v11774_v31 = vpop.f32.mrf.mxu1 }
 0x837   : > { %v12007_v41 = vadd.f32 %v12006_v14, %v11690_v35  ;;  %v11977_v18 = vadd.f32 %v11976_v26, %v11772_v22 }
 0x838   : > { %v11692_v34 = vpop.f32.mrf.mxu0  ;;  %v11776_v57 = vpop.f32.mrf.mxu1 }
 0x839   : > { %v12008_v13 = vadd.f32 %v12007_v41, %v11774_v31 }
 0x83a   : > { %v11693_v51 = vpop.f32.mrf.mxu0  ;;  %v11777_v10 = vpop.f32.mrf.mxu1 }
 0x844   : > { %v11856_v44 = vpop.f32.mrf.mxu0  ;;  %v11940_v30 = vpop.f32.mrf.mxu1 }
 0x845   : > { %v11978_v48 = vadd.f32 %v11977_v18, %v11856_v44 }
 0x846   : > { %v11858_v16 = vpop.f32.mrf.mxu0  ;;  %v11942_v58 = vpop.f32.mrf.mxu1 }
 0x847   : > { %v11979_v60 = vadd.f32 %v11978_v48, %v11940_v30  ;;  %v12009_v40 = vadd.f32 %v12008_v13, %v11858_v16 }
 0x848   : > { %v11860_v46 = vpop.f32.mrf.mxu0  ;;  %v11944_v53 = vpop.f32.mrf.mxu1 }
 0x849   : > { %v12011_v19 = vadd.f32 %v11979_v60, %v11947_v62  ;;  %v12010_v6 = vadd.f32 %v12009_v40, %v11942_v58  ;;  %12018 = sbr.rel (%p13337_p0) target bundleno = 2359 (0x937), region = 118 }
 0x84a   : > { %v11861_v32 = vpop.f32.mrf.mxu0  ;;  %v11945_v7 = vpop.f32.mrf.mxu1 }
 0x84b   : > { %12013 = vst [vmem:[#allocation4] sm:$0xff] %v12011_v19  ;;  %v12012_v39 = vadd.f32 %v12010_v6, %v11948_v12 }
 0x84d   : > { %12014 = vst [vmem:[#allocation4 + $0x8] sm:$0xff] %v12012_v39 }
 0x84e   : > { %v12068_v20 = vld [vmem:[%s16569_s25 + $0xf8] sm:$0xff]  ;;  %v12067_v47 = vld [vmem:[%s16569_s25 + $0xf0] sm:$0xff]  ;;  %v12023_v49 = vlaneseq  ;;  %v12066_v56 = vld [vmem:[%s16569_s25 + $0xe8] sm:$0xff] }
 0x84f   : > { %v12052_v33 = vld [vmem:[%s16569_s25 + $0x78] sm:$0xff]  ;;  %14126 = vmatprep.subr.mxu0 %v12068_v20  ;;  %v12051_v52 = vld [vmem:[%s16569_s25 + $0x70] sm:$0xff]  ;;  %v12050_v28 = vld [vmem:[%s16569_s25 + $0x68] sm:$0xff] }
 0x850   : > { %14127 = vmatpush3.msra.mxu0 %v12052_v33  ;;  %v12065_v55 = vld [vmem:[%s16569_s25 + $0xe0] sm:$0xff]  ;;  %v12024_v63 = vshrl.u32 %v12023_v49, 7  ;;  %v12064_v43 = vld [vmem:[%s16569_s25 + $0xd8] sm:$0xff]  ;;  %v12063_v17 = vld [vmem:[%s16569_s25 + $0xd0] sm:$0xff] }
 0x851   : > { %14128 = vmatprep.subr.mxu0 %v12067_v47  ;;  %v12049_v25 = vld [vmem:[%s16569_s25 + $0x60] sm:$0xff]  ;;  %v12048_v24 = vld [vmem:[%s16569_s25 + $0x58] sm:$0xff]  ;;  %v12047_v23 = vld [vmem:[%s16569_s25 + $0x50] sm:$0xff] }
 0x852   : > { %14129 = vmatpush3.msra.mxu0 %v12051_v52  ;;  %v12029_v38 = vsub.s32 1, %v12024_v63  ;;  %v12062_v54 = vld [vmem:[%s16569_s25 + $0xc8] sm:$0xff]  ;;  %v12021_v4 = vld [vmem:[%s21338_s16] sm:$0x3]  ;;  %v12060_v0 = vld [vmem:[%s16569_s25 + $0xb8] sm:$0xff]  ;;  %v12025_v8 = vsub.s32 0, %v12024_v63 }
 0x853   : > { %14130 = vmatprep.subr.mxu0 %v12066_v56  ;;  %v12046_v1 = vld [vmem:[%s16569_s25 + $0x48] sm:$0xff]  ;;  %v12061_v21 = vld [vmem:[%s16569_s25 + $0xc0] sm:$0xff]  ;;  %v12044_v45 = vld [vmem:[%s16569_s25 + $0x38] sm:$0xff] }
 0x854   : > { %14131 = vmatpush3.msra.mxu0 %v12050_v28  ;;  %v12020_v29 = vld [vmem:[#allocation4 + $0x8] sm:$0xff]  ;;  %v12030_v11 = vrot.slane %v12021_v4, %v12029_v38  ;;  %v12045_v15 = vld [vmem:[%s16569_s25 + $0x40] sm:$0xff]  ;;  %v12059_v42 = vld [vmem:[%s16569_s25 + $0xb0] sm:$0xff]  ;;  %v12026_v31 = vrot.slane %v12021_v4, %v12025_v8 }
 0x855   : > { %14132 = vmatprep.subr.mxu0 %v12065_v55  ;;  %v12043_v59 = vld [vmem:[%s16569_s25 + $0x30] sm:$0xff]  ;;  %v12058_v50 = vld [vmem:[%s16569_s25 + $0xa8] sm:$0xff]  ;;  %v12057_v2 = vld [vmem:[%s16569_s25 + $0xa0] sm:$0xff] }
 0x856   : > { %14133 = vmatpush3.msra.mxu0 %v12049_v25  ;;  %v12034_v9 = vadd.f32 %v12030_v11, %v12020_v29  ;;  %v12042_v22 = vld [vmem:[%s16569_s25 + $0x28] sm:$0xff]  ;;  %v12041_v35 = vld [vmem:[%s16569_s25 + $0x20] sm:$0xff]  ;;  %v12056_v5 = vld [vmem:[%s16569_s25 + $0x98] sm:$0xff] }
 0x857   : > { %14134 = vmatprep.subr.mxu0 %v12064_v43  ;;  %v12019_v34 = vld [vmem:[#allocation4] sm:$0xff]  ;;  %v12040_v57 = vld [vmem:[%s16569_s25 + $0x18] sm:$0xff]  ;;  %v12055_v27 = vld [vmem:[%s16569_s25 + $0x90] sm:$0xff] }
 0x858   : > { %14135 = vmatpush3.msra.mxu0 %v12048_v24  ;;  %v12036_v61 = vmax.f32 %v12034_v9, 0.0  ;;  %v12039_v37 = vld [vmem:[%s16569_s25 + $0x10] sm:$0xff]  ;;  %v12033_v51 = vadd.f32 %v12026_v31, %v12019_v34  ;;  %v12054_v10 = vld [vmem:[%s16569_s25 + $0x88] sm:$0xff]  ;;  %v12053_v3 = vld [vmem:[%s16569_s25 + $0x80] sm:$0xff] }
 0x859   : > { %14136 = vmatprep.subr.mxu0 %v12063_v17  ;;  %v12038_v36 = vld [vmem:[%s16569_s25 + $0x8] sm:$0xff]  ;;  %v12037_v14 = vld [vmem:[%s16569_s25] sm:$0xff] }
 0x85a   : > { %14137 = vmatpush3.msra.mxu0 %v12047_v23  ;;  %12140 = vmatprep.mubr.f32.mxu0 %v12036_v61  ;;  %v12035_v26 = vmax.f32 %v12033_v51, 0.0  ;;  %v13338_v18 = vld [vmem:[%s21339_s28] ss:$0 sm:$0xff] }
 0x85b   : > { %14138 = vmatprep.subr.mxu0 %v12062_v54 }
 0x85c   : > { %14139 = vmatpush3.msra.mxu0 %v12046_v1 }
 0x85d   : > { %14140 = vmatprep.subr.mxu0 %v12061_v21 }
 0x85e   : > { %14141 = vmatpush3.msra.mxu0 %v12045_v15 }
 0x85f   : > { %14142 = vmatprep.subr.mxu0 %v12060_v0 }
 0x860   : > { %14143 = vmatpush3.msra.mxu0 %v12044_v45 }
 0x861   : > { %14144 = vmatprep.subr.mxu0 %v12059_v42 }
 0x862   : > { %14145 = vmatpush3.msra.mxu0 %v12043_v59 }
 0x863   : > { %14146 = vmatprep.subr.mxu0 %v12058_v50 }
 0x864   : > { %14147 = vmatpush3.msra.mxu0 %v12042_v22 }
 0x865   : > { %14148 = vmatprep.subr.mxu0 %v12057_v2 }
 0x866   : > { %14149 = vmatpush3.msra.mxu0 %v12041_v35 }
 0x867   : > { %14150 = vmatprep.subr.mxu0 %v12056_v5 }
 0x868   : > { %14151 = vmatpush3.msra.mxu0 %v12040_v57 }
 0x869   : > { %14152 = vmatprep.subr.mxu0 %v12055_v27 }
 0x86a   : > { %14153 = vmatpush3.msra.mxu0 %v12039_v37 }
 0x86b   : > { %14154 = vmatprep.subr.mxu0 %v12054_v10 }
 0x86c   : > { %14155 = vmatpush3.msra.mxu0 %v12038_v36 }
 0x86d   : > { %14156 = vmatprep.subr.mxu0 %v12053_v3 }
 0x86e   : > { %14157 = vmatpush3.msra.mxu0 %v12037_v14 }
 0x86f   : > { %12141 = vmatmul.mubr.f32.vlgmr.msra.gmra.mxu0 %v12035_v26 }
 0x92f   : > { %v14158_v41 = vpop.f32.mrf.mxu0 }
 0x931   : > { %v14159_v44 = vpop.f32.mrf.mxu0 }
 0x932   : > { %v14160_v30 = vadd.f32 %v14159_v44, %v14158_v41 }
 0x934   : > { %v12143_v13 = vadd.f32 %v14160_v30, %v13338_v18 }
 0x936   : > { %12146 = vst [vmem:[%s16574_s9] sm:$0xff] %v12143_v13 }
 0x937 PF: > { %s23_s14 = sadd.s32 1, %s15903_s14   ;;  %s21340_s28 = sld [smem:[#allocation6_spill]] }
 0x938   : > { %p20_p1 = scmp.ge.s32.totalorder %s23_s14, 6   ;;  %s21341_s22 = sld [smem:[#allocation7_spill]] }
 0x939   : > { %s21342_s30 = sld [smem:[#allocation8_spill]]  ;;  %s21343_s25 = smov %s15883_s26 }
 0x93a   : > { %s21344_s26 = smov %s16028_s21  ;;  %s21345_s27 = smov %s15895_s29 }
 0x93b   :  { %22 = sbr.rel (!%p20_p1) target bundleno = 9 (0x9), region = 166 }
 0x93e   : > { %s21346_s29 = smov %s21341_s22 }

</bundles_post_ra>
